<compile_context>
chip_gen: v7x
topology: tpu7x:2x2x1
jax: 0.10.0
libtpu: 0.0.40
codegen_flags: <defaults>
</compile_context>

<pallas_src>
import functools
import math

import jax
import jax.numpy as jnp
from jax import lax
from jax.experimental import pallas as pl
from jax.experimental.pallas import tpu as pltpu

NEG_SLOPE = 0.1  # LeakyReLU negative slope used by the `conv` helper
_ROW = 16        # row-tile granularity (safe sublane multiple for bf16 blocks)


# --------------------------------------------------------------------------- #
# Pallas kernel: fused (tile_m, K) x (K, N) matmul + bias + LeakyReLU epilogue
# --------------------------------------------------------------------------- #
def _fused_conv_matmul_kernel(p_ref, w_ref, b_ref, o_ref, *, apply_lrelu):
    # p_ref : (tile_m, K_pad) bf16   im2col rows (taps fused into contraction)
    # w_ref : (K_pad, N_pad)  bf16   fused tap-major weights (VMEM resident)
    # b_ref : (1, N_pad)      f32    bias (VMEM resident)
    # o_ref : (tile_m, N_pad) f32
    acc = jnp.dot(p_ref[...], w_ref[...], preferred_element_type=jnp.float32)
    acc = acc + b_ref[...]
    if apply_lrelu:
        acc = jnp.where(acc >= 0, acc, NEG_SLOPE * acc)
    o_ref[...] = acc.astype(o_ref.dtype)


def _round_up(x, m):
    return ((x + m - 1) // m) * m


def _pick_tile_m(m_rows, k_pad):
    # Keep one bf16 patch tile <= ~4 MiB so double-buffering fits every
    # generation's scoped VMEM (16 MiB v5e default, 32 MiB v6e/v7x, 64 MiB
    # physical on v7x).
    budget = 4 * 1024 * 1024
    t = (budget // (k_pad * 2) // _ROW) * _ROW
    t = max(_ROW, min(512, t))
    return min(t, _round_up(m_rows, _ROW))


def conv2d_pallas(x, w, b, *, stride=1, dilation=1, padding=None,
                  apply_lrelu=True):
    """2-D convolution (PyTorch nn.Conv2d semantics) as ONE fused MXU matmul.

    x : (B, H, W, Cin) float32 (NHWC)
    w : (Cout, Cin, KH, KW)    (PyTorch layout)
    b : (Cout,)
    padding : int (symmetric) or ((top, bottom), (left, right))
    """
    B, H, W, Cin = x.shape
    Cout, Cin_w, KH, KW = w.shape
    assert Cin == Cin_w, (Cin, Cin_w)
    if padding is None:
        padding = ((KH - 1) // 2) * dilation  # matches the `conv` helper
    if isinstance(padding, int):
        pad_h = (padding, padding)
        pad_w = (padding, padding)
    else:
        pad_h, pad_w = padding
    Ho = (H + pad_h[0] + pad_h[1] - dilation * (KH - 1) - 1) // stride + 1
    Wo = (W + pad_w[0] + pad_w[1] - dilation * (KW - 1) - 1) // stride + 1

    # bf16 at the MXU boundary; accumulation stays fp32 inside the kernel.
    xp = jnp.pad(x, ((0, 0), pad_h, pad_w, (0, 0))).astype(jnp.bfloat16)

    # im2col with all taps fused into the contraction dim (lane-dense layout):
    # (B, Ho, Wo, KH*KW*Cin), tap order (ky, kx, cin) to match the weight reshape.
    cols = []
    for ky in range(KH):
        for kx in range(KW):
            ys = ky * dilation
            xs = kx * dilation
            cols.append(xp[:, ys: ys + (Ho - 1) * stride + 1: stride,
                              xs: xs + (Wo - 1) * stride + 1: stride, :])
    K = KH * KW * Cin
    K_pad = _round_up(K, 128)      # lane-dense contraction
    N_pad = _round_up(Cout, 128)   # lane-dense output (unmasked vst)
    if K_pad > K:
        cols.append(jnp.zeros((B, Ho, Wo, K_pad - K), jnp.bfloat16))
    patches = jnp.concatenate(cols, axis=-1).reshape(B * Ho * Wo, K_pad)

    M = B * Ho * Wo
    tile_m = _pick_tile_m(M, K_pad)
    M_pad = _round_up(M, tile_m)
    if M_pad > M:
        patches = jnp.pad(patches, ((0, M_pad - M), (0, 0)))

    # (Cout, Cin, KH, KW) -> (KH, KW, Cin, Cout) -> (K, Cout), padded to 128s.
    w_mat = jnp.transpose(w, (2, 3, 1, 0)).reshape(K, Cout)
    w_mat = jnp.pad(w_mat, ((0, K_pad - K), (0, N_pad - Cout))).astype(jnp.bfloat16)
    b_mat = jnp.pad(b.reshape(1, Cout).astype(jnp.float32),
                    ((0, 0), (0, N_pad - Cout)))

    out = pl.pallas_call(
        functools.partial(_fused_conv_matmul_kernel, apply_lrelu=apply_lrelu),
        out_shape=jax.ShapeDtypeStruct((M_pad, N_pad), jnp.float32),
        grid=(M_pad // tile_m,),
        in_specs=[
            pl.BlockSpec((tile_m, K_pad), lambda i: (i, 0)),
            pl.BlockSpec((K_pad, N_pad), lambda i: (0, 0)),  # weights resident
            pl.BlockSpec((1, N_pad), lambda i: (0, 0)),      # bias resident
        ],
        out_specs=pl.BlockSpec((tile_m, N_pad), lambda i: (i, 0)),
        compiler_params=pltpu.CompilerParams(
            dimension_semantics=("parallel",),   # shards spatial tiles on v7x
            vmem_limit_bytes=32 * 1024 * 1024),
    )(patches, w_mat, b_mat)

    return out[:M, :Cout].reshape(B, Ho, Wo, Cout)


def conv_transpose2d_pallas(x, w, b, *, stride=2, padding=1, apply_lrelu=True):
    """nn.ConvTranspose2d(k=4, s=2, p=1) + LeakyReLU via sub-pixel phase
    decomposition: 4 phase convolutions with 2x2 effective taps on the
    un-stuffed input, interleaved into the 2x-upsampled output.

    w : (Cin, Cout, KH, KW)  (PyTorch ConvTranspose2d layout)
    """
    B, H, W, Cin = x.shape
    Cin_w, Cout, KH, KW = w.shape
    assert Cin == Cin_w
    assert (stride, padding, KH, KW) == (2, 1, 4, 4)

    # correlation-form weights per tap: wc[co, ci, ky, kx] = w[ci, co, ky, kx]
    wc = jnp.transpose(w, (1, 0, 2, 3))

    # Output y = 2m + py gets contributions from ky in {1,3} (py=0) or {0,2}
    # (py=1); the corresponding input rows form a 2-row window (same along x).
    phase_rows = []
    for py in range(2):
        ky_sel = (3, 1) if py == 0 else (2, 0)
        pad_h = (1, 0) if py == 0 else (0, 1)
        row = []
        for px in range(2):
            kx_sel = (3, 1) if px == 0 else (2, 0)
            pad_w = (1, 0) if px == 0 else (0, 1)
            w_ph = wc[:, :, jnp.asarray(ky_sel)[:, None],
                            jnp.asarray(kx_sel)[None, :]]   # (Cout, Cin, 2, 2)
            row.append(conv2d_pallas(x, w_ph, b, stride=1, dilation=1,
                                     padding=(pad_h, pad_w),
                                     apply_lrelu=apply_lrelu))
        phase_rows.append(row)

    # interleave: out[:, 2m+py, 2n+px, :] = phase_rows[py][px][:, m, n, :]
    rows = [jnp.stack(r, axis=3) for r in phase_rows]   # each (B, H, W, 2, Cout)
    out6 = jnp.stack(rows, axis=2)                      # (B, H, 2, W, 2, Cout)
    return out6.reshape(B, 2 * H, 2 * W, Cout)


# --------------------------------------------------------------------------- #
# Glue ops (plain JAX, gather-free)
# --------------------------------------------------------------------------- #
def _up2_along(v, axis):
    # x2 bilinear (align_corners=False) along `axis` via edge-pad + fixed lerp:
    #   out[2m]   = 0.25*v[m-1] + 0.75*v[m]
    #   out[2m+1] = 0.75*v[m]   + 0.25*v[m+1]
    n = v.shape[axis]
    first = lax.slice_in_dim(v, 0, 1, axis=axis)
    last = lax.slice_in_dim(v, n - 1, n, axis=axis)
    prev = jnp.concatenate([first, lax.slice_in_dim(v, 0, n - 1, axis=axis)],
                           axis=axis)
    nxt = jnp.concatenate([lax.slice_in_dim(v, 1, n, axis=axis), last],
                          axis=axis)
    even = 0.25 * prev + 0.75 * v
    odd = 0.75 * v + 0.25 * nxt
    out = jnp.stack([even, odd], axis=axis + 1)
    shp = list(v.shape)
    shp[axis] = 2 * n
    return out.reshape(shp)


def bilinear_up2(x):
    """Bilinear x2 upsample, PyTorch nn.Upsample(align_corners=False) semantics."""
    return _up2_along(_up2_along(x, 1), 2)


def up_disp_bi_apply(x):
    # up_disp_bi: bilinear x2 upsample of the disparity, values scaled by 2.
    return bilinear_up2(x) * 2.0


# --------------------------------------------------------------------------- #
# Layer wrappers
# --------------------------------------------------------------------------- #
def conv_layer(p, x, *, stride=1, dilation=1, relu=True):
    return conv2d_pallas(x, p["w"], p["b"], stride=stride, dilation=dilation,
                         apply_lrelu=relu)


def resnet_block_apply(p, x, dilation=(1, 1)):
    out = conv_layer(p["c1"], x, dilation=dilation[0], relu=True)
    out = conv_layer(p["c2"], out, dilation=dilation[1], relu=True)
    return out + x


def ms_dilate_block_apply(p, x, dilation=(1, 2, 3, 4)):
    c1 = conv_layer(p["c1"], x, dilation=dilation[0])
    c2 = conv_layer(p["c2"], x, dilation=dilation[1])
    c3 = conv_layer(p["c3"], x, dilation=dilation[2])
    c4 = conv_layer(p["c4"], x, dilation=dilation[3])
    cat = jnp.concatenate([c1, c2, c3, c4], axis=-1)
    out = conv2d_pallas(cat, p["ci"]["w"], p["ci"]["b"], apply_lrelu=False)
    return out + x


def upconv_apply(p, x):
    return conv_transpose2d_pallas(x, p["w"], p["b"], stride=2, padding=1,
                                   apply_lrelu=True)


def predict_disp_apply(p, x):
    # predict_disp_bi: plain Conv2d(in, 2, 3, padding=1), no activation.
    # Cout is padded to 128 inside conv2d_pallas to keep stores lane-dense.
    return conv2d_pallas(x, p["w"], p["b"], apply_lrelu=False)


# --------------------------------------------------------------------------- #
# Parameters (deterministic synthetic init)
# --------------------------------------------------------------------------- #
def _init_conv(key, cin, cout, k):
    kw, kb = jax.random.split(key)
    w = jax.random.normal(kw, (cout, cin, k, k), jnp.float32) / math.sqrt(cin * k * k)
    b = jax.random.normal(kb, (cout,), jnp.float32) * 0.01
    return {"w": w, "b": b}


def _init_deconv(key, cin, cout, k=4):
    kw, kb = jax.random.split(key)
    w = jax.random.normal(kw, (cin, cout, k, k), jnp.float32) / math.sqrt(cin * k * k)
    b = jax.random.normal(kb, (cout,), jnp.float32) * 0.01
    return {"w": w, "b": b}


def init_params(key):
    keys = iter(jax.random.split(key, 64))

    def c(cin, cout, k=3):
        return _init_conv(next(keys), cin, cout, k)

    def rb(ch):
        return {"c1": c(ch, ch), "c2": c(ch, ch)}

    def msd(ch):
        return {"c1": c(ch, ch), "c2": c(ch, ch), "c3": c(ch, ch),
                "c4": c(ch, ch), "ci": c(4 * ch, ch)}

    def up(cin, cout):
        return _init_deconv(next(keys), cin, cout, 4)

    return {
        "conv0": c(6, 48),
        "conv1_1": c(48, 48), "conv1_2": c(48, 48),
        "conv2_1": c(48, 96), "conv2_2": c(96, 96),
        "conv3_1": c(96, 128), "conv3_2": c(128, 128),
        "conv4_1": rb(128), "conv4_2": rb(128),
        "convd_1": rb(128), "convd_2": msd(128),
        "upconvd_i": c(128, 128), "dispd": c(128, 2),
        "upconv3": c(128, 128), "upconv3_i": c(258, 128), "upconv3_f": c(128, 128),
        "disp3": c(128, 2),
        "upconv2": up(128, 96), "upconv2_i": c(194, 96), "upconv2_f": c(96, 96),
        "disp2": c(96, 2),
        "upconv1": up(96, 48), "upconv1_i": c(50, 48), "upconv1_f": c(48, 48),
        "disp1": c(48, 2),
        "upconv0": up(48, 32), "upconv0_i": c(34, 32), "upconv0_f": c(32, 32),
        "disp0": c(32, 2),
    }


# --------------------------------------------------------------------------- #
# Forward pass (mirrors DispNet_Bi.forward)
# --------------------------------------------------------------------------- #
def dispnet_bi_forward(params, x_nchw, training=False):
    # layout: external NCHW (PyTorch) <-> internal NHWC
    x = jnp.transpose(x_nchw, (0, 2, 3, 1))

    conv0 = conv_layer(params["conv0"], x)
    conv1 = conv_layer(params["conv1_2"],
                       conv_layer(params["conv1_1"], conv0, stride=2))
    conv2 = conv_layer(params["conv2_2"],
                       conv_layer(params["conv2_1"], conv1, stride=2))
    conv3 = conv_layer(params["conv3_2"],
                       conv_layer(params["conv3_1"], conv2, stride=2))
    conv4 = resnet_block_apply(params["conv4_2"],
                               resnet_block_apply(params["conv4_1"], conv3))
    convd = ms_dilate_block_apply(
        params["convd_2"],
        resnet_block_apply(params["convd_1"], conv4, dilation=(2, 1)),
        dilation=(1, 2, 3, 4))

    upconvd_i = conv_layer(params["upconvd_i"], convd)
    disp4 = predict_disp_apply(params["dispd"], upconvd_i)

    upconv3 = conv_layer(params["upconv3"], upconvd_i)
    cat3 = jnp.concatenate([conv3, upconv3, disp4], axis=-1)
    upconv3_i = conv_layer(params["upconv3_f"],
                           conv_layer(params["upconv3_i"], cat3))
    disp3 = predict_disp_apply(params["disp3"], upconv3_i) + disp4
    updisp3 = up_disp_bi_apply(disp3)

    upconv2 = upconv_apply(params["upconv2"], upconv3_i)
    H2, W2 = conv2.shape[1], conv2.shape[2]
    upconv2 = upconv2[:, :H2, :W2, :]
    updisp3 = updisp3[:, :H2, :W2, :]
    cat2 = jnp.concatenate([conv2, upconv2, updisp3], axis=-1)
    upconv2_i = conv_layer(params["upconv2_f"],
                           conv_layer(params["upconv2_i"], cat2))
    disp2 = predict_disp_apply(params["disp2"], upconv2_i) + updisp3
    updisp2 = up_disp_bi_apply(disp2)

    upconv1 = upconv_apply(params["upconv1"], upconv2_i)
    cat1 = jnp.concatenate([upconv1, updisp2], axis=-1)
    upconv1_i = conv_layer(params["upconv1_f"],
                           conv_layer(params["upconv1_i"], cat1))
    disp1 = predict_disp_apply(params["disp1"], upconv1_i) + updisp2
    updisp1 = up_disp_bi_apply(disp1)

    upconv0 = upconv_apply(params["upconv0"], upconv1_i)
    cat0 = jnp.concatenate([upconv0, updisp1], axis=-1)
    upconv0_i = conv_layer(params["upconv0_f"],
                           conv_layer(params["upconv0_i"], cat0))
    disp0 = predict_disp_apply(params["disp0"], upconv0_i) + updisp1

    to_nchw = lambda t: jnp.transpose(t, (0, 3, 1, 2))
    if training:
        return tuple(map(to_nchw, (disp0, disp1, disp2, disp3, disp4, upconv0_i)))
    return to_nchw(disp0), to_nchw(upconv0_i)


# --------------------------------------------------------------------------- #
if __name__ == "__main__":
    key = jax.random.PRNGKey(0)
    pkey, xkey = jax.random.split(key)
    params = init_params(pkey)
    # x: stereo pair concatenated along channels -> 6 input channels, NCHW.
    x = jax.random.normal(xkey, (2, 6, 16, 16), jnp.float32)

    fwd = jax.jit(functools.partial(dispnet_bi_forward, training=False))
    disp0, upconv0_i = fwd(params, x)
    jax.block_until_ready((disp0, upconv0_i))

    assert disp0.shape == (2, 2, 16, 16), disp0.shape
    assert upconv0_i.shape == (2, 32, 16, 16), upconv0_i.shape
    assert jnp.all(jnp.isfinite(disp0)) and jnp.all(jnp.isfinite(upconv0_i))
    print("KERNEL_OK")
</pallas_src>

<mosaic_0001>
module attributes {stable_mosaic.version = 11 : i64} {
  func.func @_fused_conv_matmul_kernel(%arg0: i32, %arg1: memref<512x128xbf16, #tpu.memory_space<vmem>>, %arg2: memref<128x128xbf16, #tpu.memory_space<vmem>>, %arg3: memref<1x128xf32, #tpu.memory_space<vmem>>, %arg4: memref<512x128xf32, #tpu.memory_space<vmem>>) attributes {dimension_semantics = [#tpu.dimension_semantics<parallel>], iteration_bounds = array<i64: 1>, scalar_prefetch = 0 : i64, scratch_operands = 0 : i64, tpu.core_type = #tpu.core_type<tc>, window_params = [{transform_indices = @transform_0, window_bounds = array<i64: 512, 128>}, {pipeline_mode = #tpu.pipeline_mode<synchronous>, transform_indices = @transform_1, window_bounds = array<i64: 128, 128>}, {pipeline_mode = #tpu.pipeline_mode<synchronous>, transform_indices = @transform_2, window_bounds = array<i64: 1, 128>}, {transform_indices = @transform_3, window_bounds = array<i64: 512, 128>}]} {
    %c0 = arith.constant 0 : index
    %c0_0 = arith.constant 0 : index
    %0 = vector.load %arg1[%c0, %c0_0] : memref<512x128xbf16, #tpu.memory_space<vmem>>, vector<512x128xbf16>
    %c0_1 = arith.constant 0 : index
    %c0_2 = arith.constant 0 : index
    %1 = vector.load %arg2[%c0_1, %c0_2] : memref<128x128xbf16, #tpu.memory_space<vmem>>, vector<128x128xbf16>
    %cst = arith.constant dense<0.000000e+00> : vector<512x128xf32>
    %2 = tpu.matmul %0, %1, %cst {dimension_numbers = #tpu.dot_dimension_numbers<[1], [0], [0], [1], [0, 0, 1, 1], [], []>} : vector<512x128xbf16>, vector<128x128xbf16>, vector<512x128xf32> -> vector<512x128xf32>
    %c0_3 = arith.constant 0 : index
    %c0_4 = arith.constant 0 : index
    %3 = vector.load %arg3[%c0_3, %c0_4] : memref<1x128xf32, #tpu.memory_space<vmem>>, vector<1x128xf32>
    %4 = vector.broadcast %3 : vector<1x128xf32> to vector<512x128xf32>
    %5 = arith.addf %2, %4 : vector<512x128xf32>
    %cst_5 = arith.constant 0.000000e+00 : f32
    %6 = vector.broadcast %cst_5 : f32 to vector<512x128xf32>
    %7 = arith.cmpf oge, %5, %6 : vector<512x128xf32>
    %cst_6 = arith.constant 1.000000e-01 : f32
    %8 = vector.broadcast %cst_6 : f32 to vector<512x128xf32>
    %9 = arith.mulf %8, %5 : vector<512x128xf32>
    %10 = arith.select %7, %5, %9 : vector<512x128xi1>, vector<512x128xf32>
    %c0_7 = arith.constant 0 : index
    %c0_8 = arith.constant 0 : index
    %11 = vector.load %arg4[%c0_7, %c0_8] : memref<512x128xf32, #tpu.memory_space<vmem>>, vector<512x128xf32>
    tpu.vector_store %arg4[%c0_7, %c0_8], %10 {strides = array<i32>} : memref<512x128xf32, #tpu.memory_space<vmem>>, vector<512x128xf32>,
    return
  }
  func.func @transform_0(%arg0: i32) -> (i32, i32) {
    %c0_i32 = arith.constant 0 : i32
    %c0_i32_0 = arith.constant 0 : i32
    return %arg0, %c0_i32 : i32, i32
  }
  func.func @transform_1(%arg0: i32) -> (i32, i32) {
    %c0_i32 = arith.constant 0 : i32
    %c0_i32_0 = arith.constant 0 : i32
    %c0_i32_1 = arith.constant 0 : i32
    return %c0_i32, %c0_i32_0 : i32, i32
  }
  func.func @transform_2(%arg0: i32) -> (i32, i32) {
    %c0_i32 = arith.constant 0 : i32
    %c0_i32_0 = arith.constant 0 : i32
    %c0_i32_1 = arith.constant 0 : i32
    return %c0_i32, %c0_i32_0 : i32, i32
  }
  func.func @transform_3(%arg0: i32) -> (i32, i32) {
    %c0_i32 = arith.constant 0 : i32
    %c0_i32_0 = arith.constant 0 : i32
    return %arg0, %c0_i32 : i32, i32
  }
}

module attributes {stable_mosaic.version = 11 : i64} {
  func.func @_fused_conv_matmul_kernel(%arg0: i32, %arg1: memref<128x512xbf16, #tpu.memory_space<vmem>>, %arg2: memref<512x128xbf16, #tpu.memory_space<vmem>>, %arg3: memref<1x128xf32, #tpu.memory_space<vmem>>, %arg4: memref<128x128xf32, #tpu.memory_space<vmem>>) attributes {dimension_semantics = [#tpu.dimension_semantics<parallel>], iteration_bounds = array<i64: 1>, scalar_prefetch = 0 : i64, scratch_operands = 0 : i64, tpu.core_type = #tpu.core_type<tc>, window_params = [{transform_indices = @transform_0, window_bounds = array<i64: 128, 512>}, {pipeline_mode = #tpu.pipeline_mode<synchronous>, transform_indices = @transform_1, window_bounds = array<i64: 512, 128>}, {pipeline_mode = #tpu.pipeline_mode<synchronous>, transform_indices = @transform_2, window_bounds = array<i64: 1, 128>}, {transform_indices = @transform_3, window_bounds = array<i64: 128, 128>}]} {
    %c0 = arith.constant 0 : index
    %c0_0 = arith.constant 0 : index
    %0 = vector.load %arg1[%c0, %c0_0] : memref<128x512xbf16, #tpu.memory_space<vmem>>, vector<128x512xbf16>
    %c0_1 = arith.constant 0 : index
    %c0_2 = arith.constant 0 : index
    %1 = vector.load %arg2[%c0_1, %c0_2] : memref<512x128xbf16, #tpu.memory_space<vmem>>, vector<512x128xbf16>
    %cst = arith.constant dense<0.000000e+00> : vector<128x128xf32>
    %2 = tpu.matmul %0, %1, %cst {dimension_numbers = #tpu.dot_dimension_numbers<[1], [0], [0], [1], [0, 0, 1, 1], [], []>} : vector<128x512xbf16>, vector<512x128xbf16>, vector<128x128xf32> -> vector<128x128xf32>
    %c0_3 = arith.constant 0 : index
    %c0_4 = arith.constant 0 : index
    %3 = vector.load %arg3[%c0_3, %c0_4] : memref<1x128xf32, #tpu.memory_space<vmem>>, vector<1x128xf32>
    %4 = vector.broadcast %3 : vector<1x128xf32> to vector<128x128xf32>
    %5 = arith.addf %2, %4 : vector<128x128xf32>
    %cst_5 = arith.constant 0.000000e+00 : f32
    %6 = vector.broadcast %cst_5 : f32 to vector<128x128xf32>
    %7 = arith.cmpf oge, %5, %6 : vector<128x128xf32>
    %cst_6 = arith.constant 1.000000e-01 : f32
    %8 = vector.broadcast %cst_6 : f32 to vector<128x128xf32>
    %9 = arith.mulf %8, %5 : vector<128x128xf32>
    %10 = arith.select %7, %5, %9 : vector<128x128xi1>, vector<128x128xf32>
    %c0_7 = arith.constant 0 : index
    %c0_8 = arith.constant 0 : index
    %11 = vector.load %arg4[%c0_7, %c0_8] : memref<128x128xf32, #tpu.memory_space<vmem>>, vector<128x128xf32>
    tpu.vector_store %arg4[%c0_7, %c0_8], %10 {strides = array<i32>} : memref<128x128xf32, #tpu.memory_space<vmem>>, vector<128x128xf32>,
    return
  }
  func.func @transform_0(%arg0: i32) -> (i32, i32) {
    %c0_i32 = arith.constant 0 : i32
    %c0_i32_0 = arith.constant 0 : i32
    return %arg0, %c0_i32 : i32, i32
  }
  func.func @transform_1(%arg0: i32) -> (i32, i32) {
    %c0_i32 = arith.constant 0 : i32
    %c0_i32_0 = arith.constant 0 : i32
    %c0_i32_1 = arith.constant 0 : i32
    return %c0_i32, %c0_i32_0 : i32, i32
  }
  func.func @transform_2(%arg0: i32) -> (i32, i32) {
    %c0_i32 = arith.constant 0 : i32
    %c0_i32_0 = arith.constant 0 : i32
    %c0_i32_1 = arith.constant 0 : i32
    return %c0_i32, %c0_i32_0 : i32, i32
  }
  func.func @transform_3(%arg0: i32) -> (i32, i32) {
    %c0_i32 = arith.constant 0 : i32
    %c0_i32_0 = arith.constant 0 : i32
    return %arg0, %c0_i32 : i32, i32
  }
}

module attributes {stable_mosaic.version = 11 : i64} {
  func.func @_fused_conv_matmul_kernel(%arg0: i32, %arg1: memref<32x512xbf16, #tpu.memory_space<vmem>>, %arg2: memref<512x128xbf16, #tpu.memory_space<vmem>>, %arg3: memref<1x128xf32, #tpu.memory_space<vmem>>, %arg4: memref<32x128xf32, #tpu.memory_space<vmem>>) attributes {dimension_semantics = [#tpu.dimension_semantics<parallel>], iteration_bounds = array<i64: 1>, scalar_prefetch = 0 : i64, scratch_operands = 0 : i64, tpu.core_type = #tpu.core_type<tc>, window_params = [{transform_indices = @transform_0, window_bounds = array<i64: 32, 512>}, {pipeline_mode = #tpu.pipeline_mode<synchronous>, transform_indices = @transform_1, window_bounds = array<i64: 512, 128>}, {pipeline_mode = #tpu.pipeline_mode<synchronous>, transform_indices = @transform_2, window_bounds = array<i64: 1, 128>}, {transform_indices = @transform_3, window_bounds = array<i64: 32, 128>}]} {
    %c0 = arith.constant 0 : index
    %c0_0 = arith.constant 0 : index
    %0 = vector.load %arg1[%c0, %c0_0] : memref<32x512xbf16, #tpu.memory_space<vmem>>, vector<32x512xbf16>
    %c0_1 = arith.constant 0 : index
    %c0_2 = arith.constant 0 : index
    %1 = vector.load %arg2[%c0_1, %c0_2] : memref<512x128xbf16, #tpu.memory_space<vmem>>, vector<512x128xbf16>
    %cst = arith.constant dense<0.000000e+00> : vector<32x128xf32>
    %2 = tpu.matmul %0, %1, %cst {dimension_numbers = #tpu.dot_dimension_numbers<[1], [0], [0], [1], [0, 0, 1, 1], [], []>} : vector<32x512xbf16>, vector<512x128xbf16>, vector<32x128xf32> -> vector<32x128xf32>
    %c0_3 = arith.constant 0 : index
    %c0_4 = arith.constant 0 : index
    %3 = vector.load %arg3[%c0_3, %c0_4] : memref<1x128xf32, #tpu.memory_space<vmem>>, vector<1x128xf32>
    %4 = vector.broadcast %3 : vector<1x128xf32> to vector<32x128xf32>
    %5 = arith.addf %2, %4 : vector<32x128xf32>
    %cst_5 = arith.constant 0.000000e+00 : f32
    %6 = vector.broadcast %cst_5 : f32 to vector<32x128xf32>
    %7 = arith.cmpf oge, %5, %6 : vector<32x128xf32>
    %cst_6 = arith.constant 1.000000e-01 : f32
    %8 = vector.broadcast %cst_6 : f32 to vector<32x128xf32>
    %9 = arith.mulf %8, %5 : vector<32x128xf32>
    %10 = arith.select %7, %5, %9 : vector<32x128xi1>, vector<32x128xf32>
    %c0_7 = arith.constant 0 : index
    %c0_8 = arith.constant 0 : index
    %11 = vector.load %arg4[%c0_7, %c0_8] : memref<32x128xf32, #tpu.memory_space<vmem>>, vector<32x128xf32>
    tpu.vector_store %arg4[%c0_7, %c0_8], %10 {strides = array<i32>} : memref<32x128xf32, #tpu.memory_space<vmem>>, vector<32x128xf32>,
    return
  }
  func.func @transform_0(%arg0: i32) -> (i32, i32) {
    %c0_i32 = arith.constant 0 : i32
    %c0_i32_0 = arith.constant 0 : i32
    return %arg0, %c0_i32 : i32, i32
  }
  func.func @transform_1(%arg0: i32) -> (i32, i32) {
    %c0_i32 = arith.constant 0 : i32
    %c0_i32_0 = arith.constant 0 : i32
    %c0_i32_1 = arith.constant 0 : i32
    return %c0_i32, %c0_i32_0 : i32, i32
  }
  func.func @transform_2(%arg0: i32) -> (i32, i32) {
    %c0_i32 = arith.constant 0 : i32
    %c0_i32_0 = arith.constant 0 : i32
    %c0_i32_1 = arith.constant 0 : i32
    return %c0_i32, %c0_i32_0 : i32, i32
  }
  func.func @transform_3(%arg0: i32) -> (i32, i32) {
    %c0_i32 = arith.constant 0 : i32
    %c0_i32_0 = arith.constant 0 : i32
    return %arg0, %c0_i32 : i32, i32
  }
}

module attributes {stable_mosaic.version = 11 : i64} {
  func.func @_fused_conv_matmul_kernel(%arg0: i32, %arg1: memref<32x896xbf16, #tpu.memory_space<vmem>>, %arg2: memref<896x128xbf16, #tpu.memory_space<vmem>>, %arg3: memref<1x128xf32, #tpu.memory_space<vmem>>, %arg4: memref<32x128xf32, #tpu.memory_space<vmem>>) attributes {dimension_semantics = [#tpu.dimension_semantics<parallel>], iteration_bounds = array<i64: 1>, scalar_prefetch = 0 : i64, scratch_operands = 0 : i64, tpu.core_type = #tpu.core_type<tc>, window_params = [{transform_indices = @transform_0, window_bounds = array<i64: 32, 896>}, {pipeline_mode = #tpu.pipeline_mode<synchronous>, transform_indices = @transform_1, window_bounds = array<i64: 896, 128>}, {pipeline_mode = #tpu.pipeline_mode<synchronous>, transform_indices = @transform_2, window_bounds = array<i64: 1, 128>}, {transform_indices = @transform_3, window_bounds = array<i64: 32, 128>}]} {
    %c0 = arith.constant 0 : index
    %c0_0 = arith.constant 0 : index
    %0 = vector.load %arg1[%c0, %c0_0] : memref<32x896xbf16, #tpu.memory_space<vmem>>, vector<32x896xbf16>
    %c0_1 = arith.constant 0 : index
    %c0_2 = arith.constant 0 : index
    %1 = vector.load %arg2[%c0_1, %c0_2] : memref<896x128xbf16, #tpu.memory_space<vmem>>, vector<896x128xbf16>
    %cst = arith.constant dense<0.000000e+00> : vector<32x128xf32>
    %2 = tpu.matmul %0, %1, %cst {dimension_numbers = #tpu.dot_dimension_numbers<[1], [0], [0], [1], [0, 0, 1, 1], [], []>} : vector<32x896xbf16>, vector<896x128xbf16>, vector<32x128xf32> -> vector<32x128xf32>
    %c0_3 = arith.constant 0 : index
    %c0_4 = arith.constant 0 : index
    %3 = vector.load %arg3[%c0_3, %c0_4] : memref<1x128xf32, #tpu.memory_space<vmem>>, vector<1x128xf32>
    %4 = vector.broadcast %3 : vector<1x128xf32> to vector<32x128xf32>
    %5 = arith.addf %2, %4 : vector<32x128xf32>
    %cst_5 = arith.constant 0.000000e+00 : f32
    %6 = vector.broadcast %cst_5 : f32 to vector<32x128xf32>
    %7 = arith.cmpf oge, %5, %6 : vector<32x128xf32>
    %cst_6 = arith.constant 1.000000e-01 : f32
    %8 = vector.broadcast %cst_6 : f32 to vector<32x128xf32>
    %9 = arith.mulf %8, %5 : vector<32x128xf32>
    %10 = arith.select %7, %5, %9 : vector<32x128xi1>, vector<32x128xf32>
    %c0_7 = arith.constant 0 : index
    %c0_8 = arith.constant 0 : index
    %11 = vector.load %arg4[%c0_7, %c0_8] : memref<32x128xf32, #tpu.memory_space<vmem>>, vector<32x128xf32>
    tpu.vector_store %arg4[%c0_7, %c0_8], %10 {strides = array<i32>} : memref<32x128xf32, #tpu.memory_space<vmem>>, vector<32x128xf32>,
    return
  }
  func.func @transform_0(%arg0: i32) -> (i32, i32) {
    %c0_i32 = arith.constant 0 : i32
    %c0_i32_0 = arith.constant 0 : i32
    return %arg0, %c0_i32 : i32, i32
  }
  func.func @transform_1(%arg0: i32) -> (i32, i32) {
    %c0_i32 = arith.constant 0 : i32
    %c0_i32_0 = arith.constant 0 : i32
    %c0_i32_1 = arith.constant 0 : i32
    return %c0_i32, %c0_i32_0 : i32, i32
  }
  func.func @transform_2(%arg0: i32) -> (i32, i32) {
    %c0_i32 = arith.constant 0 : i32
    %c0_i32_0 = arith.constant 0 : i32
    %c0_i32_1 = arith.constant 0 : i32
    return %c0_i32, %c0_i32_0 : i32, i32
  }
  func.func @transform_3(%arg0: i32) -> (i32, i32) {
    %c0_i32 = arith.constant 0 : i32
    %c0_i32_0 = arith.constant 0 : i32
    return %arg0, %c0_i32 : i32, i32
  }
}

module attributes {stable_mosaic.version = 11 : i64} {
  func.func @_fused_conv_matmul_kernel(%arg0: i32, %arg1: memref<16x896xbf16, #tpu.memory_space<vmem>>, %arg2: memref<896x128xbf16, #tpu.memory_space<vmem>>, %arg3: memref<1x128xf32, #tpu.memory_space<vmem>>, %arg4: memref<16x128xf32, #tpu.memory_space<vmem>>) attributes {dimension_semantics = [#tpu.dimension_semantics<parallel>], iteration_bounds = array<i64: 1>, scalar_prefetch = 0 : i64, scratch_operands = 0 : i64, tpu.core_type = #tpu.core_type<tc>, window_params = [{transform_indices = @transform_0, window_bounds = array<i64: 16, 896>}, {pipeline_mode = #tpu.pipeline_mode<synchronous>, transform_indices = @transform_1, window_bounds = array<i64: 896, 128>}, {pipeline_mode = #tpu.pipeline_mode<synchronous>, transform_indices = @transform_2, window_bounds = array<i64: 1, 128>}, {transform_indices = @transform_3, window_bounds = array<i64: 16, 128>}]} {
    %c0 = arith.constant 0 : index
    %c0_0 = arith.constant 0 : index
    %0 = vector.load %arg1[%c0, %c0_0] : memref<16x896xbf16, #tpu.memory_space<vmem>>, vector<16x896xbf16>
    %c0_1 = arith.constant 0 : index
    %c0_2 = arith.constant 0 : index
    %1 = vector.load %arg2[%c0_1, %c0_2] : memref<896x128xbf16, #tpu.memory_space<vmem>>, vector<896x128xbf16>
    %cst = arith.constant dense<0.000000e+00> : vector<16x128xf32>
    %2 = tpu.matmul %0, %1, %cst {dimension_numbers = #tpu.dot_dimension_numbers<[1], [0], [0], [1], [0, 0, 1, 1], [], []>} : vector<16x896xbf16>, vector<896x128xbf16>, vector<16x128xf32> -> vector<16x128xf32>
    %c0_3 = arith.constant 0 : index
    %c0_4 = arith.constant 0 : index
    %3 = vector.load %arg3[%c0_3, %c0_4] : memref<1x128xf32, #tpu.memory_space<vmem>>, vector<1x128xf32>
    %4 = vector.broadcast %3 : vector<1x128xf32> to vector<16x128xf32>
    %5 = arith.addf %2, %4 : vector<16x128xf32>
    %cst_5 = arith.constant 0.000000e+00 : f32
    %6 = vector.broadcast %cst_5 : f32 to vector<16x128xf32>
    %7 = arith.cmpf oge, %5, %6 : vector<16x128xf32>
    %cst_6 = arith.constant 1.000000e-01 : f32
    %8 = vector.broadcast %cst_6 : f32 to vector<16x128xf32>
    %9 = arith.mulf %8, %5 : vector<16x128xf32>
    %10 = arith.select %7, %5, %9 : vector<16x128xi1>, vector<16x128xf32>
    %c0_7 = arith.constant 0 : index
    %c0_8 = arith.constant 0 : index
    %11 = vector.load %arg4[%c0_7, %c0_8] : memref<16x128xf32, #tpu.memory_space<vmem>>, vector<16x128xf32>
    tpu.vector_store %arg4[%c0_7, %c0_8], %10 {strides = array<i32>} : memref<16x128xf32, #tpu.memory_space<vmem>>, vector<16x128xf32>,
    return
  }
  func.func @transform_0(%arg0: i32) -> (i32, i32) {
    %c0_i32 = arith.constant 0 : i32
    %c0_i32_0 = arith.constant 0 : i32
    return %arg0, %c0_i32 : i32, i32
  }
  func.func @transform_1(%arg0: i32) -> (i32, i32) {
    %c0_i32 = arith.constant 0 : i32
    %c0_i32_0 = arith.constant 0 : i32
    %c0_i32_1 = arith.constant 0 : i32
    return %c0_i32, %c0_i32_0 : i32, i32
  }
  func.func @transform_2(%arg0: i32) -> (i32, i32) {
    %c0_i32 = arith.constant 0 : i32
    %c0_i32_0 = arith.constant 0 : i32
    %c0_i32_1 = arith.constant 0 : i32
    return %c0_i32, %c0_i32_0 : i32, i32
  }
  func.func @transform_3(%arg0: i32) -> (i32, i32) {
    %c0_i32 = arith.constant 0 : i32
    %c0_i32_0 = arith.constant 0 : i32
    return %arg0, %c0_i32 : i32, i32
  }
}

module attributes {stable_mosaic.version = 11 : i64} {
  func.func @_fused_conv_matmul_kernel(%arg0: i32, %arg1: memref<16x1152xbf16, #tpu.memory_space<vmem>>, %arg2: memref<1152x128xbf16, #tpu.memory_space<vmem>>, %arg3: memref<1x128xf32, #tpu.memory_space<vmem>>, %arg4: memref<16x128xf32, #tpu.memory_space<vmem>>) attributes {dimension_semantics = [#tpu.dimension_semantics<parallel>], iteration_bounds = array<i64: 1>, scalar_prefetch = 0 : i64, scratch_operands = 0 : i64, tpu.core_type = #tpu.core_type<tc>, window_params = [{transform_indices = @transform_0, window_bounds = array<i64: 16, 1152>}, {pipeline_mode = #tpu.pipeline_mode<synchronous>, transform_indices = @transform_1, window_bounds = array<i64: 1152, 128>}, {pipeline_mode = #tpu.pipeline_mode<synchronous>, transform_indices = @transform_2, window_bounds = array<i64: 1, 128>}, {transform_indices = @transform_3, window_bounds = array<i64: 16, 128>}]} {
    %c0 = arith.constant 0 : index
    %c0_0 = arith.constant 0 : index
    %0 = vector.load %arg1[%c0, %c0_0] : memref<16x1152xbf16, #tpu.memory_space<vmem>>, vector<16x1152xbf16>
    %c0_1 = arith.constant 0 : index
    %c0_2 = arith.constant 0 : index
    %1 = vector.load %arg2[%c0_1, %c0_2] : memref<1152x128xbf16, #tpu.memory_space<vmem>>, vector<1152x128xbf16>
    %cst = arith.constant dense<0.000000e+00> : vector<16x128xf32>
    %2 = tpu.matmul %0, %1, %cst {dimension_numbers = #tpu.dot_dimension_numbers<[1], [0], [0], [1], [0, 0, 1, 1], [], []>} : vector<16x1152xbf16>, vector<1152x128xbf16>, vector<16x128xf32> -> vector<16x128xf32>
    %c0_3 = arith.constant 0 : index
    %c0_4 = arith.constant 0 : index
    %3 = vector.load %arg3[%c0_3, %c0_4] : memref<1x128xf32, #tpu.memory_space<vmem>>, vector<1x128xf32>
    %4 = vector.broadcast %3 : vector<1x128xf32> to vector<16x128xf32>
    %5 = arith.addf %2, %4 : vector<16x128xf32>
    %cst_5 = arith.constant 0.000000e+00 : f32
    %6 = vector.broadcast %cst_5 : f32 to vector<16x128xf32>
    %7 = arith.cmpf oge, %5, %6 : vector<16x128xf32>
    %cst_6 = arith.constant 1.000000e-01 : f32
    %8 = vector.broadcast %cst_6 : f32 to vector<16x128xf32>
    %9 = arith.mulf %8, %5 : vector<16x128xf32>
    %10 = arith.select %7, %5, %9 : vector<16x128xi1>, vector<16x128xf32>
    %c0_7 = arith.constant 0 : index
    %c0_8 = arith.constant 0 : index
    %11 = vector.load %arg4[%c0_7, %c0_8] : memref<16x128xf32, #tpu.memory_space<vmem>>, vector<16x128xf32>
    tpu.vector_store %arg4[%c0_7, %c0_8], %10 {strides = array<i32>} : memref<16x128xf32, #tpu.memory_space<vmem>>, vector<16x128xf32>,
    return
  }
  func.func @transform_0(%arg0: i32) -> (i32, i32) {
    %c0_i32 = arith.constant 0 : i32
    %c0_i32_0 = arith.constant 0 : i32
    return %arg0, %c0_i32 : i32, i32
  }
  func.func @transform_1(%arg0: i32) -> (i32, i32) {
    %c0_i32 = arith.constant 0 : i32
    %c0_i32_0 = arith.constant 0 : i32
    %c0_i32_1 = arith.constant 0 : i32
    return %c0_i32, %c0_i32_0 : i32, i32
  }
  func.func @transform_2(%arg0: i32) -> (i32, i32) {
    %c0_i32 = arith.constant 0 : i32
    %c0_i32_0 = arith.constant 0 : i32
    %c0_i32_1 = arith.constant 0 : i32
    return %c0_i32, %c0_i32_0 : i32, i32
  }
  func.func @transform_3(%arg0: i32) -> (i32, i32) {
    %c0_i32 = arith.constant 0 : i32
    %c0_i32_0 = arith.constant 0 : i32
    return %arg0, %c0_i32 : i32, i32
  }
}

module attributes {stable_mosaic.version = 11 : i64} {
  func.func @_fused_conv_matmul_kernel(%arg0: i32, %arg1: memref<16x4608xbf16, #tpu.memory_space<vmem>>, %arg2: memref<4608x128xbf16, #tpu.memory_space<vmem>>, %arg3: memref<1x128xf32, #tpu.memory_space<vmem>>, %arg4: memref<16x128xf32, #tpu.memory_space<vmem>>) attributes {dimension_semantics = [#tpu.dimension_semantics<parallel>], iteration_bounds = array<i64: 1>, scalar_prefetch = 0 : i64, scratch_operands = 0 : i64, tpu.core_type = #tpu.core_type<tc>, window_params = [{transform_indices = @transform_0, window_bounds = array<i64: 16, 4608>}, {pipeline_mode = #tpu.pipeline_mode<synchronous>, transform_indices = @transform_1, window_bounds = array<i64: 4608, 128>}, {pipeline_mode = #tpu.pipeline_mode<synchronous>, transform_indices = @transform_2, window_bounds = array<i64: 1, 128>}, {transform_indices = @transform_3, window_bounds = array<i64: 16, 128>}]} {
    %c0 = arith.constant 0 : index
    %c0_0 = arith.constant 0 : index
    %0 = vector.load %arg1[%c0, %c0_0] : memref<16x4608xbf16, #tpu.memory_space<vmem>>, vector<16x4608xbf16>
    %c0_1 = arith.constant 0 : index
    %c0_2 = arith.constant 0 : index
    %1 = vector.load %arg2[%c0_1, %c0_2] : memref<4608x128xbf16, #tpu.memory_space<vmem>>, vector<4608x128xbf16>
    %cst = arith.constant dense<0.000000e+00> : vector<16x128xf32>
    %2 = tpu.matmul %0, %1, %cst {dimension_numbers = #tpu.dot_dimension_numbers<[1], [0], [0], [1], [0, 0, 1, 1], [], []>} : vector<16x4608xbf16>, vector<4608x128xbf16>, vector<16x128xf32> -> vector<16x128xf32>
    %c0_3 = arith.constant 0 : index
    %c0_4 = arith.constant 0 : index
    %3 = vector.load %arg3[%c0_3, %c0_4] : memref<1x128xf32, #tpu.memory_space<vmem>>, vector<1x128xf32>
    %4 = vector.broadcast %3 : vector<1x128xf32> to vector<16x128xf32>
    %5 = arith.addf %2, %4 : vector<16x128xf32>
    %c0_5 = arith.constant 0 : index
    %c0_6 = arith.constant 0 : index
    %6 = vector.load %arg4[%c0_5, %c0_6] : memref<16x128xf32, #tpu.memory_space<vmem>>, vector<16x128xf32>
    tpu.vector_store %arg4[%c0_5, %c0_6], %5 {strides = array<i32>} : memref<16x128xf32, #tpu.memory_space<vmem>>, vector<16x128xf32>,
    return
  }
  func.func @transform_0(%arg0: i32) -> (i32, i32) {
    %c0_i32 = arith.constant 0 : i32
    %c0_i32_0 = arith.constant 0 : i32
    return %arg0, %c0_i32 : i32, i32
  }
  func.func @transform_1(%arg0: i32) -> (i32, i32) {
    %c0_i32 = arith.constant 0 : i32
    %c0_i32_0 = arith.constant 0 : i32
    %c0_i32_1 = arith.constant 0 : i32
    return %c0_i32, %c0_i32_0 : i32, i32
  }
  func.func @transform_2(%arg0: i32) -> (i32, i32) {
    %c0_i32 = arith.constant 0 : i32
    %c0_i32_0 = arith.constant 0 : i32
    %c0_i32_1 = arith.constant 0 : i32
    return %c0_i32, %c0_i32_0 : i32, i32
  }
  func.func @transform_3(%arg0: i32) -> (i32, i32) {
    %c0_i32 = arith.constant 0 : i32
    %c0_i32_0 = arith.constant 0 : i32
    return %arg0, %c0_i32 : i32, i32
  }
}

module attributes {stable_mosaic.version = 11 : i64} {
  func.func @_fused_conv_matmul_kernel(%arg0: i32, %arg1: memref<16x1152xbf16, #tpu.memory_space<vmem>>, %arg2: memref<1152x128xbf16, #tpu.memory_space<vmem>>, %arg3: memref<1x128xf32, #tpu.memory_space<vmem>>, %arg4: memref<16x128xf32, #tpu.memory_space<vmem>>) attributes {dimension_semantics = [#tpu.dimension_semantics<parallel>], iteration_bounds = array<i64: 1>, scalar_prefetch = 0 : i64, scratch_operands = 0 : i64, tpu.core_type = #tpu.core_type<tc>, window_params = [{transform_indices = @transform_0, window_bounds = array<i64: 16, 1152>}, {pipeline_mode = #tpu.pipeline_mode<synchronous>, transform_indices = @transform_1, window_bounds = array<i64: 1152, 128>}, {pipeline_mode = #tpu.pipeline_mode<synchronous>, transform_indices = @transform_2, window_bounds = array<i64: 1, 128>}, {transform_indices = @transform_3, window_bounds = array<i64: 16, 128>}]} {
    %c0 = arith.constant 0 : index
    %c0_0 = arith.constant 0 : index
    %0 = vector.load %arg1[%c0, %c0_0] : memref<16x1152xbf16, #tpu.memory_space<vmem>>, vector<16x1152xbf16>
    %c0_1 = arith.constant 0 : index
    %c0_2 = arith.constant 0 : index
    %1 = vector.load %arg2[%c0_1, %c0_2] : memref<1152x128xbf16, #tpu.memory_space<vmem>>, vector<1152x128xbf16>
    %cst = arith.constant dense<0.000000e+00> : vector<16x128xf32>
    %2 = tpu.matmul %0, %1, %cst {dimension_numbers = #tpu.dot_dimension_numbers<[1], [0], [0], [1], [0, 0, 1, 1], [], []>} : vector<16x1152xbf16>, vector<1152x128xbf16>, vector<16x128xf32> -> vector<16x128xf32>
    %c0_3 = arith.constant 0 : index
    %c0_4 = arith.constant 0 : index
    %3 = vector.load %arg3[%c0_3, %c0_4] : memref<1x128xf32, #tpu.memory_space<vmem>>, vector<1x128xf32>
    %4 = vector.broadcast %3 : vector<1x128xf32> to vector<16x128xf32>
    %5 = arith.addf %2, %4 : vector<16x128xf32>
    %c0_5 = arith.constant 0 : index
    %c0_6 = arith.constant 0 : index
    %6 = vector.load %arg4[%c0_5, %c0_6] : memref<16x128xf32, #tpu.memory_space<vmem>>, vector<16x128xf32>
    tpu.vector_store %arg4[%c0_5, %c0_6], %5 {strides = array<i32>} : memref<16x128xf32, #tpu.memory_space<vmem>>, vector<16x128xf32>,
    return
  }
  func.func @transform_0(%arg0: i32) -> (i32, i32) {
    %c0_i32 = arith.constant 0 : i32
    %c0_i32_0 = arith.constant 0 : i32
    return %arg0, %c0_i32 : i32, i32
  }
  func.func @transform_1(%arg0: i32) -> (i32, i32) {
    %c0_i32 = arith.constant 0 : i32
    %c0_i32_0 = arith.constant 0 : i32
    %c0_i32_1 = arith.constant 0 : i32
    return %c0_i32, %c0_i32_0 : i32, i32
  }
  func.func @transform_2(%arg0: i32) -> (i32, i32) {
    %c0_i32 = arith.constant 0 : i32
    %c0_i32_0 = arith.constant 0 : i32
    %c0_i32_1 = arith.constant 0 : i32
    return %c0_i32, %c0_i32_0 : i32, i32
  }
  func.func @transform_3(%arg0: i32) -> (i32, i32) {
    %c0_i32 = arith.constant 0 : i32
    %c0_i32_0 = arith.constant 0 : i32
    return %arg0, %c0_i32 : i32, i32
  }
}

module attributes {stable_mosaic.version = 11 : i64} {
  func.func @_fused_conv_matmul_kernel(%arg0: i32, %arg1: memref<16x2432xbf16, #tpu.memory_space<vmem>>, %arg2: memref<2432x128xbf16, #tpu.memory_space<vmem>>, %arg3: memref<1x128xf32, #tpu.memory_space<vmem>>, %arg4: memref<16x128xf32, #tpu.memory_space<vmem>>) attributes {dimension_semantics = [#tpu.dimension_semantics<parallel>], iteration_bounds = array<i64: 1>, scalar_prefetch = 0 : i64, scratch_operands = 0 : i64, tpu.core_type = #tpu.core_type<tc>, window_params = [{transform_indices = @transform_0, window_bounds = array<i64: 16, 2432>}, {pipeline_mode = #tpu.pipeline_mode<synchronous>, transform_indices = @transform_1, window_bounds = array<i64: 2432, 128>}, {pipeline_mode = #tpu.pipeline_mode<synchronous>, transform_indices = @transform_2, window_bounds = array<i64: 1, 128>}, {transform_indices = @transform_3, window_bounds = array<i64: 16, 128>}]} {
    %c0 = arith.constant 0 : index
    %c0_0 = arith.constant 0 : index
    %0 = vector.load %arg1[%c0, %c0_0] : memref<16x2432xbf16, #tpu.memory_space<vmem>>, vector<16x2432xbf16>
    %c0_1 = arith.constant 0 : index
    %c0_2 = arith.constant 0 : index
    %1 = vector.load %arg2[%c0_1, %c0_2] : memref<2432x128xbf16, #tpu.memory_space<vmem>>, vector<2432x128xbf16>
    %cst = arith.constant dense<0.000000e+00> : vector<16x128xf32>
    %2 = tpu.matmul %0, %1, %cst {dimension_numbers = #tpu.dot_dimension_numbers<[1], [0], [0], [1], [0, 0, 1, 1], [], []>} : vector<16x2432xbf16>, vector<2432x128xbf16>, vector<16x128xf32> -> vector<16x128xf32>
    %c0_3 = arith.constant 0 : index
    %c0_4 = arith.constant 0 : index
    %3 = vector.load %arg3[%c0_3, %c0_4] : memref<1x128xf32, #tpu.memory_space<vmem>>, vector<1x128xf32>
    %4 = vector.broadcast %3 : vector<1x128xf32> to vector<16x128xf32>
    %5 = arith.addf %2, %4 : vector<16x128xf32>
    %cst_5 = arith.constant 0.000000e+00 : f32
    %6 = vector.broadcast %cst_5 : f32 to vector<16x128xf32>
    %7 = arith.cmpf oge, %5, %6 : vector<16x128xf32>
    %cst_6 = arith.constant 1.000000e-01 : f32
    %8 = vector.broadcast %cst_6 : f32 to vector<16x128xf32>
    %9 = arith.mulf %8, %5 : vector<16x128xf32>
    %10 = arith.select %7, %5, %9 : vector<16x128xi1>, vector<16x128xf32>
    %c0_7 = arith.constant 0 : index
    %c0_8 = arith.constant 0 : index
    %11 = vector.load %arg4[%c0_7, %c0_8] : memref<16x128xf32, #tpu.memory_space<vmem>>, vector<16x128xf32>
    tpu.vector_store %arg4[%c0_7, %c0_8], %10 {strides = array<i32>} : memref<16x128xf32, #tpu.memory_space<vmem>>, vector<16x128xf32>,
    return
  }
  func.func @transform_0(%arg0: i32) -> (i32, i32) {
    %c0_i32 = arith.constant 0 : i32
    %c0_i32_0 = arith.constant 0 : i32
    return %arg0, %c0_i32 : i32, i32
  }
  func.func @transform_1(%arg0: i32) -> (i32, i32) {
    %c0_i32 = arith.constant 0 : i32
    %c0_i32_0 = arith.constant 0 : i32
    %c0_i32_1 = arith.constant 0 : i32
    return %c0_i32, %c0_i32_0 : i32, i32
  }
  func.func @transform_2(%arg0: i32) -> (i32, i32) {
    %c0_i32 = arith.constant 0 : i32
    %c0_i32_0 = arith.constant 0 : i32
    %c0_i32_1 = arith.constant 0 : i32
    return %c0_i32, %c0_i32_0 : i32, i32
  }
  func.func @transform_3(%arg0: i32) -> (i32, i32) {
    %c0_i32 = arith.constant 0 : i32
    %c0_i32_0 = arith.constant 0 : i32
    return %arg0, %c0_i32 : i32, i32
  }
}

module attributes {stable_mosaic.version = 11 : i64} {
  func.func @_fused_conv_matmul_kernel(%arg0: i32, %arg1: memref<16x512xbf16, #tpu.memory_space<vmem>>, %arg2: memref<512x128xbf16, #tpu.memory_space<vmem>>, %arg3: memref<1x128xf32, #tpu.memory_space<vmem>>, %arg4: memref<16x128xf32, #tpu.memory_space<vmem>>) attributes {dimension_semantics = [#tpu.dimension_semantics<parallel>], iteration_bounds = array<i64: 1>, scalar_prefetch = 0 : i64, scratch_operands = 0 : i64, tpu.core_type = #tpu.core_type<tc>, window_params = [{transform_indices = @transform_0, window_bounds = array<i64: 16, 512>}, {pipeline_mode = #tpu.pipeline_mode<synchronous>, transform_indices = @transform_1, window_bounds = array<i64: 512, 128>}, {pipeline_mode = #tpu.pipeline_mode<synchronous>, transform_indices = @transform_2, window_bounds = array<i64: 1, 128>}, {transform_indices = @transform_3, window_bounds = array<i64: 16, 128>}]} {
    %c0 = arith.constant 0 : index
    %c0_0 = arith.constant 0 : index
    %0 = vector.load %arg1[%c0, %c0_0] : memref<16x512xbf16, #tpu.memory_space<vmem>>, vector<16x512xbf16>
    %c0_1 = arith.constant 0 : index
    %c0_2 = arith.constant 0 : index
    %1 = vector.load %arg2[%c0_1, %c0_2] : memref<512x128xbf16, #tpu.memory_space<vmem>>, vector<512x128xbf16>
    %cst = arith.constant dense<0.000000e+00> : vector<16x128xf32>
    %2 = tpu.matmul %0, %1, %cst {dimension_numbers = #tpu.dot_dimension_numbers<[1], [0], [0], [1], [0, 0, 1, 1], [], []>} : vector<16x512xbf16>, vector<512x128xbf16>, vector<16x128xf32> -> vector<16x128xf32>
    %c0_3 = arith.constant 0 : index
    %c0_4 = arith.constant 0 : index
    %3 = vector.load %arg3[%c0_3, %c0_4] : memref<1x128xf32, #tpu.memory_space<vmem>>, vector<1x128xf32>
    %4 = vector.broadcast %3 : vector<1x128xf32> to vector<16x128xf32>
    %5 = arith.addf %2, %4 : vector<16x128xf32>
    %cst_5 = arith.constant 0.000000e+00 : f32
    %6 = vector.broadcast %cst_5 : f32 to vector<16x128xf32>
    %7 = arith.cmpf oge, %5, %6 : vector<16x128xf32>
    %cst_6 = arith.constant 1.000000e-01 : f32
    %8 = vector.broadcast %cst_6 : f32 to vector<16x128xf32>
    %9 = arith.mulf %8, %5 : vector<16x128xf32>
    %10 = arith.select %7, %5, %9 : vector<16x128xi1>, vector<16x128xf32>
    %c0_7 = arith.constant 0 : index
    %c0_8 = arith.constant 0 : index
    %11 = vector.load %arg4[%c0_7, %c0_8] : memref<16x128xf32, #tpu.memory_space<vmem>>, vector<16x128xf32>
    tpu.vector_store %arg4[%c0_7, %c0_8], %10 {strides = array<i32>} : memref<16x128xf32, #tpu.memory_space<vmem>>, vector<16x128xf32>,
    return
  }
  func.func @transform_0(%arg0: i32) -> (i32, i32) {
    %c0_i32 = arith.constant 0 : i32
    %c0_i32_0 = arith.constant 0 : i32
    return %arg0, %c0_i32 : i32, i32
  }
  func.func @transform_1(%arg0: i32) -> (i32, i32) {
    %c0_i32 = arith.constant 0 : i32
    %c0_i32_0 = arith.constant 0 : i32
    %c0_i32_1 = arith.constant 0 : i32
    return %c0_i32, %c0_i32_0 : i32, i32
  }
  func.func @transform_2(%arg0: i32) -> (i32, i32) {
    %c0_i32 = arith.constant 0 : i32
    %c0_i32_0 = arith.constant 0 : i32
    %c0_i32_1 = arith.constant 0 : i32
    return %c0_i32, %c0_i32_0 : i32, i32
  }
  func.func @transform_3(%arg0: i32) -> (i32, i32) {
    %c0_i32 = arith.constant 0 : i32
    %c0_i32_0 = arith.constant 0 : i32
    return %arg0, %c0_i32 : i32, i32
  }
}

module attributes {stable_mosaic.version = 11 : i64} {
  func.func @_fused_conv_matmul_kernel(%arg0: i32, %arg1: memref<32x1792xbf16, #tpu.memory_space<vmem>>, %arg2: memref<1792x128xbf16, #tpu.memory_space<vmem>>, %arg3: memref<1x128xf32, #tpu.memory_space<vmem>>, %arg4: memref<32x128xf32, #tpu.memory_space<vmem>>) attributes {dimension_semantics = [#tpu.dimension_semantics<parallel>], iteration_bounds = array<i64: 1>, scalar_prefetch = 0 : i64, scratch_operands = 0 : i64, tpu.core_type = #tpu.core_type<tc>, window_params = [{transform_indices = @transform_0, window_bounds = array<i64: 32, 1792>}, {pipeline_mode = #tpu.pipeline_mode<synchronous>, transform_indices = @transform_1, window_bounds = array<i64: 1792, 128>}, {pipeline_mode = #tpu.pipeline_mode<synchronous>, transform_indices = @transform_2, window_bounds = array<i64: 1, 128>}, {transform_indices = @transform_3, window_bounds = array<i64: 32, 128>}]} {
    %c0 = arith.constant 0 : index
    %c0_0 = arith.constant 0 : index
    %0 = vector.load %arg1[%c0, %c0_0] : memref<32x1792xbf16, #tpu.memory_space<vmem>>, vector<32x1792xbf16>
    %c0_1 = arith.constant 0 : index
    %c0_2 = arith.constant 0 : index
    %1 = vector.load %arg2[%c0_1, %c0_2] : memref<1792x128xbf16, #tpu.memory_space<vmem>>, vector<1792x128xbf16>
    %cst = arith.constant dense<0.000000e+00> : vector<32x128xf32>
    %2 = tpu.matmul %0, %1, %cst {dimension_numbers = #tpu.dot_dimension_numbers<[1], [0], [0], [1], [0, 0, 1, 1], [], []>} : vector<32x1792xbf16>, vector<1792x128xbf16>, vector<32x128xf32> -> vector<32x128xf32>
    %c0_3 = arith.constant 0 : index
    %c0_4 = arith.constant 0 : index
    %3 = vector.load %arg3[%c0_3, %c0_4] : memref<1x128xf32, #tpu.memory_space<vmem>>, vector<1x128xf32>
    %4 = vector.broadcast %3 : vector<1x128xf32> to vector<32x128xf32>
    %5 = arith.addf %2, %4 : vector<32x128xf32>
    %cst_5 = arith.constant 0.000000e+00 : f32
    %6 = vector.broadcast %cst_5 : f32 to vector<32x128xf32>
    %7 = arith.cmpf oge, %5, %6 : vector<32x128xf32>
    %cst_6 = arith.constant 1.000000e-01 : f32
    %8 = vector.broadcast %cst_6 : f32 to vector<32x128xf32>
    %9 = arith.mulf %8, %5 : vector<32x128xf32>
    %10 = arith.select %7, %5, %9 : vector<32x128xi1>, vector<32x128xf32>
    %c0_7 = arith.constant 0 : index
    %c0_8 = arith.constant 0 : index
    %11 = vector.load %arg4[%c0_7, %c0_8] : memref<32x128xf32, #tpu.memory_space<vmem>>, vector<32x128xf32>
    tpu.vector_store %arg4[%c0_7, %c0_8], %10 {strides = array<i32>} : memref<32x128xf32, #tpu.memory_space<vmem>>, vector<32x128xf32>,
    return
  }
  func.func @transform_0(%arg0: i32) -> (i32, i32) {
    %c0_i32 = arith.constant 0 : i32
    %c0_i32_0 = arith.constant 0 : i32
    return %arg0, %c0_i32 : i32, i32
  }
  func.func @transform_1(%arg0: i32) -> (i32, i32) {
    %c0_i32 = arith.constant 0 : i32
    %c0_i32_0 = arith.constant 0 : i32
    %c0_i32_1 = arith.constant 0 : i32
    return %c0_i32, %c0_i32_0 : i32, i32
  }
  func.func @transform_2(%arg0: i32) -> (i32, i32) {
    %c0_i32 = arith.constant 0 : i32
    %c0_i32_0 = arith.constant 0 : i32
    %c0_i32_1 = arith.constant 0 : i32
    return %c0_i32, %c0_i32_0 : i32, i32
  }
  func.func @transform_3(%arg0: i32) -> (i32, i32) {
    %c0_i32 = arith.constant 0 : i32
    %c0_i32_0 = arith.constant 0 : i32
    return %arg0, %c0_i32 : i32, i32
  }
}

module attributes {stable_mosaic.version = 11 : i64} {
  func.func @_fused_conv_matmul_kernel(%arg0: i32, %arg1: memref<32x384xbf16, #tpu.memory_space<vmem>>, %arg2: memref<384x128xbf16, #tpu.memory_space<vmem>>, %arg3: memref<1x128xf32, #tpu.memory_space<vmem>>, %arg4: memref<32x128xf32, #tpu.memory_space<vmem>>) attributes {dimension_semantics = [#tpu.dimension_semantics<parallel>], iteration_bounds = array<i64: 1>, scalar_prefetch = 0 : i64, scratch_operands = 0 : i64, tpu.core_type = #tpu.core_type<tc>, window_params = [{transform_indices = @transform_0, window_bounds = array<i64: 32, 384>}, {pipeline_mode = #tpu.pipeline_mode<synchronous>, transform_indices = @transform_1, window_bounds = array<i64: 384, 128>}, {pipeline_mode = #tpu.pipeline_mode<synchronous>, transform_indices = @transform_2, window_bounds = array<i64: 1, 128>}, {transform_indices = @transform_3, window_bounds = array<i64: 32, 128>}]} {
    %c0 = arith.constant 0 : index
    %c0_0 = arith.constant 0 : index
    %0 = vector.load %arg1[%c0, %c0_0] : memref<32x384xbf16, #tpu.memory_space<vmem>>, vector<32x384xbf16>
    %c0_1 = arith.constant 0 : index
    %c0_2 = arith.constant 0 : index
    %1 = vector.load %arg2[%c0_1, %c0_2] : memref<384x128xbf16, #tpu.memory_space<vmem>>, vector<384x128xbf16>
    %cst = arith.constant dense<0.000000e+00> : vector<32x128xf32>
    %2 = tpu.matmul %0, %1, %cst {dimension_numbers = #tpu.dot_dimension_numbers<[1], [0], [0], [1], [0, 0, 1, 1], [], []>} : vector<32x384xbf16>, vector<384x128xbf16>, vector<32x128xf32> -> vector<32x128xf32>
    %c0_3 = arith.constant 0 : index
    %c0_4 = arith.constant 0 : index
    %3 = vector.load %arg3[%c0_3, %c0_4] : memref<1x128xf32, #tpu.memory_space<vmem>>, vector<1x128xf32>
    %4 = vector.broadcast %3 : vector<1x128xf32> to vector<32x128xf32>
    %5 = arith.addf %2, %4 : vector<32x128xf32>
    %cst_5 = arith.constant 0.000000e+00 : f32
    %6 = vector.broadcast %cst_5 : f32 to vector<32x128xf32>
    %7 = arith.cmpf oge, %5, %6 : vector<32x128xf32>
    %cst_6 = arith.constant 1.000000e-01 : f32
    %8 = vector.broadcast %cst_6 : f32 to vector<32x128xf32>
    %9 = arith.mulf %8, %5 : vector<32x128xf32>
    %10 = arith.select %7, %5, %9 : vector<32x128xi1>, vector<32x128xf32>
    %c0_7 = arith.constant 0 : index
    %c0_8 = arith.constant 0 : index
    %11 = vector.load %arg4[%c0_7, %c0_8] : memref<32x128xf32, #tpu.memory_space<vmem>>, vector<32x128xf32>
    tpu.vector_store %arg4[%c0_7, %c0_8], %10 {strides = array<i32>} : memref<32x128xf32, #tpu.memory_space<vmem>>, vector<32x128xf32>,
    return
  }
  func.func @transform_0(%arg0: i32) -> (i32, i32) {
    %c0_i32 = arith.constant 0 : i32
    %c0_i32_0 = arith.constant 0 : i32
    return %arg0, %c0_i32 : i32, i32
  }
  func.func @transform_1(%arg0: i32) -> (i32, i32) {
    %c0_i32 = arith.constant 0 : i32
    %c0_i32_0 = arith.constant 0 : i32
    %c0_i32_1 = arith.constant 0 : i32
    return %c0_i32, %c0_i32_0 : i32, i32
  }
  func.func @transform_2(%arg0: i32) -> (i32, i32) {
    %c0_i32 = arith.constant 0 : i32
    %c0_i32_0 = arith.constant 0 : i32
    %c0_i32_1 = arith.constant 0 : i32
    return %c0_i32, %c0_i32_0 : i32, i32
  }
  func.func @transform_3(%arg0: i32) -> (i32, i32) {
    %c0_i32 = arith.constant 0 : i32
    %c0_i32_0 = arith.constant 0 : i32
    return %arg0, %c0_i32 : i32, i32
  }
}

module attributes {stable_mosaic.version = 11 : i64} {
  func.func @_fused_conv_matmul_kernel(%arg0: i32, %arg1: memref<32x896xbf16, #tpu.memory_space<vmem>>, %arg2: memref<896x128xbf16, #tpu.memory_space<vmem>>, %arg3: memref<1x128xf32, #tpu.memory_space<vmem>>, %arg4: memref<32x128xf32, #tpu.memory_space<vmem>>) attributes {dimension_semantics = [#tpu.dimension_semantics<parallel>], iteration_bounds = array<i64: 1>, scalar_prefetch = 0 : i64, scratch_operands = 0 : i64, tpu.core_type = #tpu.core_type<tc>, window_params = [{transform_indices = @transform_0, window_bounds = array<i64: 32, 896>}, {pipeline_mode = #tpu.pipeline_mode<synchronous>, transform_indices = @transform_1, window_bounds = array<i64: 896, 128>}, {pipeline_mode = #tpu.pipeline_mode<synchronous>, transform_indices = @transform_2, window_bounds = array<i64: 1, 128>}, {transform_indices = @transform_3, window_bounds = array<i64: 32, 128>}]} {
    %c0 = arith.constant 0 : index
    %c0_0 = arith.constant 0 : index
    %0 = vector.load %arg1[%c0, %c0_0] : memref<32x896xbf16, #tpu.memory_space<vmem>>, vector<32x896xbf16>
    %c0_1 = arith.constant 0 : index
    %c0_2 = arith.constant 0 : index
    %1 = vector.load %arg2[%c0_1, %c0_2] : memref<896x128xbf16, #tpu.memory_space<vmem>>, vector<896x128xbf16>
    %cst = arith.constant dense<0.000000e+00> : vector<32x128xf32>
    %2 = tpu.matmul %0, %1, %cst {dimension_numbers = #tpu.dot_dimension_numbers<[1], [0], [0], [1], [0, 0, 1, 1], [], []>} : vector<32x896xbf16>, vector<896x128xbf16>, vector<32x128xf32> -> vector<32x128xf32>
    %c0_3 = arith.constant 0 : index
    %c0_4 = arith.constant 0 : index
    %3 = vector.load %arg3[%c0_3, %c0_4] : memref<1x128xf32, #tpu.memory_space<vmem>>, vector<1x128xf32>
    %4 = vector.broadcast %3 : vector<1x128xf32> to vector<32x128xf32>
    %5 = arith.addf %2, %4 : vector<32x128xf32>
    %c0_5 = arith.constant 0 : index
    %c0_6 = arith.constant 0 : index
    %6 = vector.load %arg4[%c0_5, %c0_6] : memref<32x128xf32, #tpu.memory_space<vmem>>, vector<32x128xf32>
    tpu.vector_store %arg4[%c0_5, %c0_6], %5 {strides = array<i32>} : memref<32x128xf32, #tpu.memory_space<vmem>>, vector<32x128xf32>,
    return
  }
  func.func @transform_0(%arg0: i32) -> (i32, i32) {
    %c0_i32 = arith.constant 0 : i32
    %c0_i32_0 = arith.constant 0 : i32
    return %arg0, %c0_i32 : i32, i32
  }
  func.func @transform_1(%arg0: i32) -> (i32, i32) {
    %c0_i32 = arith.constant 0 : i32
    %c0_i32_0 = arith.constant 0 : i32
    %c0_i32_1 = arith.constant 0 : i32
    return %c0_i32, %c0_i32_0 : i32, i32
  }
  func.func @transform_2(%arg0: i32) -> (i32, i32) {
    %c0_i32 = arith.constant 0 : i32
    %c0_i32_0 = arith.constant 0 : i32
    %c0_i32_1 = arith.constant 0 : i32
    return %c0_i32, %c0_i32_0 : i32, i32
  }
  func.func @transform_3(%arg0: i32) -> (i32, i32) {
    %c0_i32 = arith.constant 0 : i32
    %c0_i32_0 = arith.constant 0 : i32
    return %arg0, %c0_i32 : i32, i32
  }
}

module attributes {stable_mosaic.version = 11 : i64} {
  func.func @_fused_conv_matmul_kernel(%arg0: i32, %arg1: memref<128x256xbf16, #tpu.memory_space<vmem>>, %arg2: memref<256x128xbf16, #tpu.memory_space<vmem>>, %arg3: memref<1x128xf32, #tpu.memory_space<vmem>>, %arg4: memref<128x128xf32, #tpu.memory_space<vmem>>) attributes {dimension_semantics = [#tpu.dimension_semantics<parallel>], iteration_bounds = array<i64: 1>, scalar_prefetch = 0 : i64, scratch_operands = 0 : i64, tpu.core_type = #tpu.core_type<tc>, window_params = [{transform_indices = @transform_0, window_bounds = array<i64: 128, 256>}, {pipeline_mode = #tpu.pipeline_mode<synchronous>, transform_indices = @transform_1, window_bounds = array<i64: 256, 128>}, {pipeline_mode = #tpu.pipeline_mode<synchronous>, transform_indices = @transform_2, window_bounds = array<i64: 1, 128>}, {transform_indices = @transform_3, window_bounds = array<i64: 128, 128>}]} {
    %c0 = arith.constant 0 : index
    %c0_0 = arith.constant 0 : index
    %0 = vector.load %arg1[%c0, %c0_0] : memref<128x256xbf16, #tpu.memory_space<vmem>>, vector<128x256xbf16>
    %c0_1 = arith.constant 0 : index
    %c0_2 = arith.constant 0 : index
    %1 = vector.load %arg2[%c0_1, %c0_2] : memref<256x128xbf16, #tpu.memory_space<vmem>>, vector<256x128xbf16>
    %cst = arith.constant dense<0.000000e+00> : vector<128x128xf32>
    %2 = tpu.matmul %0, %1, %cst {dimension_numbers = #tpu.dot_dimension_numbers<[1], [0], [0], [1], [0, 0, 1, 1], [], []>} : vector<128x256xbf16>, vector<256x128xbf16>, vector<128x128xf32> -> vector<128x128xf32>
    %c0_3 = arith.constant 0 : index
    %c0_4 = arith.constant 0 : index
    %3 = vector.load %arg3[%c0_3, %c0_4] : memref<1x128xf32, #tpu.memory_space<vmem>>, vector<1x128xf32>
    %4 = vector.broadcast %3 : vector<1x128xf32> to vector<128x128xf32>
    %5 = arith.addf %2, %4 : vector<128x128xf32>
    %cst_5 = arith.constant 0.000000e+00 : f32
    %6 = vector.broadcast %cst_5 : f32 to vector<128x128xf32>
    %7 = arith.cmpf oge, %5, %6 : vector<128x128xf32>
    %cst_6 = arith.constant 1.000000e-01 : f32
    %8 = vector.broadcast %cst_6 : f32 to vector<128x128xf32>
    %9 = arith.mulf %8, %5 : vector<128x128xf32>
    %10 = arith.select %7, %5, %9 : vector<128x128xi1>, vector<128x128xf32>
    %c0_7 = arith.constant 0 : index
    %c0_8 = arith.constant 0 : index
    %11 = vector.load %arg4[%c0_7, %c0_8] : memref<128x128xf32, #tpu.memory_space<vmem>>, vector<128x128xf32>
    tpu.vector_store %arg4[%c0_7, %c0_8], %10 {strides = array<i32>} : memref<128x128xf32, #tpu.memory_space<vmem>>, vector<128x128xf32>,
    return
  }
  func.func @transform_0(%arg0: i32) -> (i32, i32) {
    %c0_i32 = arith.constant 0 : i32
    %c0_i32_0 = arith.constant 0 : i32
    return %arg0, %c0_i32 : i32, i32
  }
  func.func @transform_1(%arg0: i32) -> (i32, i32) {
    %c0_i32 = arith.constant 0 : i32
    %c0_i32_0 = arith.constant 0 : i32
    %c0_i32_1 = arith.constant 0 : i32
    return %c0_i32, %c0_i32_0 : i32, i32
  }
  func.func @transform_2(%arg0: i32) -> (i32, i32) {
    %c0_i32 = arith.constant 0 : i32
    %c0_i32_0 = arith.constant 0 : i32
    %c0_i32_1 = arith.constant 0 : i32
    return %c0_i32, %c0_i32_0 : i32, i32
  }
  func.func @transform_3(%arg0: i32) -> (i32, i32) {
    %c0_i32 = arith.constant 0 : i32
    %c0_i32_0 = arith.constant 0 : i32
    return %arg0, %c0_i32 : i32, i32
  }
}

module attributes {stable_mosaic.version = 11 : i64} {
  func.func @_fused_conv_matmul_kernel(%arg0: i32, %arg1: memref<128x512xbf16, #tpu.memory_space<vmem>>, %arg2: memref<512x128xbf16, #tpu.memory_space<vmem>>, %arg3: memref<1x128xf32, #tpu.memory_space<vmem>>, %arg4: memref<128x128xf32, #tpu.memory_space<vmem>>) attributes {dimension_semantics = [#tpu.dimension_semantics<parallel>], iteration_bounds = array<i64: 1>, scalar_prefetch = 0 : i64, scratch_operands = 0 : i64, tpu.core_type = #tpu.core_type<tc>, window_params = [{transform_indices = @transform_0, window_bounds = array<i64: 128, 512>}, {pipeline_mode = #tpu.pipeline_mode<synchronous>, transform_indices = @transform_1, window_bounds = array<i64: 512, 128>}, {pipeline_mode = #tpu.pipeline_mode<synchronous>, transform_indices = @transform_2, window_bounds = array<i64: 1, 128>}, {transform_indices = @transform_3, window_bounds = array<i64: 128, 128>}]} {
    %c0 = arith.constant 0 : index
    %c0_0 = arith.constant 0 : index
    %0 = vector.load %arg1[%c0, %c0_0] : memref<128x512xbf16, #tpu.memory_space<vmem>>, vector<128x512xbf16>
    %c0_1 = arith.constant 0 : index
    %c0_2 = arith.constant 0 : index
    %1 = vector.load %arg2[%c0_1, %c0_2] : memref<512x128xbf16, #tpu.memory_space<vmem>>, vector<512x128xbf16>
    %cst = arith.constant dense<0.000000e+00> : vector<128x128xf32>
    %2 = tpu.matmul %0, %1, %cst {dimension_numbers = #tpu.dot_dimension_numbers<[1], [0], [0], [1], [0, 0, 1, 1], [], []>} : vector<128x512xbf16>, vector<512x128xbf16>, vector<128x128xf32> -> vector<128x128xf32>
    %c0_3 = arith.constant 0 : index
    %c0_4 = arith.constant 0 : index
    %3 = vector.load %arg3[%c0_3, %c0_4] : memref<1x128xf32, #tpu.memory_space<vmem>>, vector<1x128xf32>
    %4 = vector.broadcast %3 : vector<1x128xf32> to vector<128x128xf32>
    %5 = arith.addf %2, %4 : vector<128x128xf32>
    %c0_5 = arith.constant 0 : index
    %c0_6 = arith.constant 0 : index
    %6 = vector.load %arg4[%c0_5, %c0_6] : memref<128x128xf32, #tpu.memory_space<vmem>>, vector<128x128xf32>
    tpu.vector_store %arg4[%c0_5, %c0_6], %5 {strides = array<i32>} : memref<128x128xf32, #tpu.memory_space<vmem>>, vector<128x128xf32>,
    return
  }
  func.func @transform_0(%arg0: i32) -> (i32, i32) {
    %c0_i32 = arith.constant 0 : i32
    %c0_i32_0 = arith.constant 0 : i32
    return %arg0, %c0_i32 : i32, i32
  }
  func.func @transform_1(%arg0: i32) -> (i32, i32) {
    %c0_i32 = arith.constant 0 : i32
    %c0_i32_0 = arith.constant 0 : i32
    %c0_i32_1 = arith.constant 0 : i32
    return %c0_i32, %c0_i32_0 : i32, i32
  }
  func.func @transform_2(%arg0: i32) -> (i32, i32) {
    %c0_i32 = arith.constant 0 : i32
    %c0_i32_0 = arith.constant 0 : i32
    %c0_i32_1 = arith.constant 0 : i32
    return %c0_i32, %c0_i32_0 : i32, i32
  }
  func.func @transform_3(%arg0: i32) -> (i32, i32) {
    %c0_i32 = arith.constant 0 : i32
    %c0_i32_0 = arith.constant 0 : i32
    return %arg0, %c0_i32 : i32, i32
  }
}

module attributes {stable_mosaic.version = 11 : i64} {
  func.func @_fused_conv_matmul_kernel(%arg0: i32, %arg1: memref<512x384xbf16, #tpu.memory_space<vmem>>, %arg2: memref<384x128xbf16, #tpu.memory_space<vmem>>, %arg3: memref<1x128xf32, #tpu.memory_space<vmem>>, %arg4: memref<512x128xf32, #tpu.memory_space<vmem>>) attributes {dimension_semantics = [#tpu.dimension_semantics<parallel>], iteration_bounds = array<i64: 1>, scalar_prefetch = 0 : i64, scratch_operands = 0 : i64, tpu.core_type = #tpu.core_type<tc>, window_params = [{transform_indices = @transform_0, window_bounds = array<i64: 512, 384>}, {pipeline_mode = #tpu.pipeline_mode<synchronous>, transform_indices = @transform_1, window_bounds = array<i64: 384, 128>}, {pipeline_mode = #tpu.pipeline_mode<synchronous>, transform_indices = @transform_2, window_bounds = array<i64: 1, 128>}, {transform_indices = @transform_3, window_bounds = array<i64: 512, 128>}]} {
    %c0 = arith.constant 0 : index
    %c0_0 = arith.constant 0 : index
    %0 = vector.load %arg1[%c0, %c0_0] : memref<512x384xbf16, #tpu.memory_space<vmem>>, vector<512x384xbf16>
    %c0_1 = arith.constant 0 : index
    %c0_2 = arith.constant 0 : index
    %1 = vector.load %arg2[%c0_1, %c0_2] : memref<384x128xbf16, #tpu.memory_space<vmem>>, vector<384x128xbf16>
    %cst = arith.constant dense<0.000000e+00> : vector<512x128xf32>
    %2 = tpu.matmul %0, %1, %cst {dimension_numbers = #tpu.dot_dimension_numbers<[1], [0], [0], [1], [0, 0, 1, 1], [], []>} : vector<512x384xbf16>, vector<384x128xbf16>, vector<512x128xf32> -> vector<512x128xf32>
    %c0_3 = arith.constant 0 : index
    %c0_4 = arith.constant 0 : index
    %3 = vector.load %arg3[%c0_3, %c0_4] : memref<1x128xf32, #tpu.memory_space<vmem>>, vector<1x128xf32>
    %4 = vector.broadcast %3 : vector<1x128xf32> to vector<512x128xf32>
    %5 = arith.addf %2, %4 : vector<512x128xf32>
    %cst_5 = arith.constant 0.000000e+00 : f32
    %6 = vector.broadcast %cst_5 : f32 to vector<512x128xf32>
    %7 = arith.cmpf oge, %5, %6 : vector<512x128xf32>
    %cst_6 = arith.constant 1.000000e-01 : f32
    %8 = vector.broadcast %cst_6 : f32 to vector<512x128xf32>
    %9 = arith.mulf %8, %5 : vector<512x128xf32>
    %10 = arith.select %7, %5, %9 : vector<512x128xi1>, vector<512x128xf32>
    %c0_7 = arith.constant 0 : index
    %c0_8 = arith.constant 0 : index
    %11 = vector.load %arg4[%c0_7, %c0_8] : memref<512x128xf32, #tpu.memory_space<vmem>>, vector<512x128xf32>
    tpu.vector_store %arg4[%c0_7, %c0_8], %10 {strides = array<i32>} : memref<512x128xf32, #tpu.memory_space<vmem>>, vector<512x128xf32>,
    return
  }
  func.func @transform_0(%arg0: i32) -> (i32, i32) {
    %c0_i32 = arith.constant 0 : i32
    %c0_i32_0 = arith.constant 0 : i32
    return %arg0, %c0_i32 : i32, i32
  }
  func.func @transform_1(%arg0: i32) -> (i32, i32) {
    %c0_i32 = arith.constant 0 : i32
    %c0_i32_0 = arith.constant 0 : i32
    %c0_i32_1 = arith.constant 0 : i32
    return %c0_i32, %c0_i32_0 : i32, i32
  }
  func.func @transform_2(%arg0: i32) -> (i32, i32) {
    %c0_i32 = arith.constant 0 : i32
    %c0_i32_0 = arith.constant 0 : i32
    %c0_i32_1 = arith.constant 0 : i32
    return %c0_i32, %c0_i32_0 : i32, i32
  }
  func.func @transform_3(%arg0: i32) -> (i32, i32) {
    %c0_i32 = arith.constant 0 : i32
    %c0_i32_0 = arith.constant 0 : i32
    return %arg0, %c0_i32 : i32, i32
  }
}

module attributes {stable_mosaic.version = 11 : i64} {
  func.func @_fused_conv_matmul_kernel(%arg0: i32, %arg1: memref<512x384xbf16, #tpu.memory_space<vmem>>, %arg2: memref<384x128xbf16, #tpu.memory_space<vmem>>, %arg3: memref<1x128xf32, #tpu.memory_space<vmem>>, %arg4: memref<512x128xf32, #tpu.memory_space<vmem>>) attributes {dimension_semantics = [#tpu.dimension_semantics<parallel>], iteration_bounds = array<i64: 1>, scalar_prefetch = 0 : i64, scratch_operands = 0 : i64, tpu.core_type = #tpu.core_type<tc>, window_params = [{transform_indices = @transform_0, window_bounds = array<i64: 512, 384>}, {pipeline_mode = #tpu.pipeline_mode<synchronous>, transform_indices = @transform_1, window_bounds = array<i64: 384, 128>}, {pipeline_mode = #tpu.pipeline_mode<synchronous>, transform_indices = @transform_2, window_bounds = array<i64: 1, 128>}, {transform_indices = @transform_3, window_bounds = array<i64: 512, 128>}]} {
    %c0 = arith.constant 0 : index
    %c0_0 = arith.constant 0 : index
    %0 = vector.load %arg1[%c0, %c0_0] : memref<512x384xbf16, #tpu.memory_space<vmem>>, vector<512x384xbf16>
    %c0_1 = arith.constant 0 : index
    %c0_2 = arith.constant 0 : index
    %1 = vector.load %arg2[%c0_1, %c0_2] : memref<384x128xbf16, #tpu.memory_space<vmem>>, vector<384x128xbf16>
    %cst = arith.constant dense<0.000000e+00> : vector<512x128xf32>
    %2 = tpu.matmul %0, %1, %cst {dimension_numbers = #tpu.dot_dimension_numbers<[1], [0], [0], [1], [0, 0, 1, 1], [], []>} : vector<512x384xbf16>, vector<384x128xbf16>, vector<512x128xf32> -> vector<512x128xf32>
    %c0_3 = arith.constant 0 : index
    %c0_4 = arith.constant 0 : index
    %3 = vector.load %arg3[%c0_3, %c0_4] : memref<1x128xf32, #tpu.memory_space<vmem>>, vector<1x128xf32>
    %4 = vector.broadcast %3 : vector<1x128xf32> to vector<512x128xf32>
    %5 = arith.addf %2, %4 : vector<512x128xf32>
    %c0_5 = arith.constant 0 : index
    %c0_6 = arith.constant 0 : index
    %6 = vector.load %arg4[%c0_5, %c0_6] : memref<512x128xf32, #tpu.memory_space<vmem>>, vector<512x128xf32>
    tpu.vector_store %arg4[%c0_5, %c0_6], %5 {strides = array<i32>} : memref<512x128xf32, #tpu.memory_space<vmem>>, vector<512x128xf32>,
    return
  }
  func.func @transform_0(%arg0: i32) -> (i32, i32) {
    %c0_i32 = arith.constant 0 : i32
    %c0_i32_0 = arith.constant 0 : i32
    return %arg0, %c0_i32 : i32, i32
  }
  func.func @transform_1(%arg0: i32) -> (i32, i32) {
    %c0_i32 = arith.constant 0 : i32
    %c0_i32_0 = arith.constant 0 : i32
    %c0_i32_1 = arith.constant 0 : i32
    return %c0_i32, %c0_i32_0 : i32, i32
  }
  func.func @transform_2(%arg0: i32) -> (i32, i32) {
    %c0_i32 = arith.constant 0 : i32
    %c0_i32_0 = arith.constant 0 : i32
    %c0_i32_1 = arith.constant 0 : i32
    return %c0_i32, %c0_i32_0 : i32, i32
  }
  func.func @transform_3(%arg0: i32) -> (i32, i32) {
    %c0_i32 = arith.constant 0 : i32
    %c0_i32_0 = arith.constant 0 : i32
    return %arg0, %c0_i32 : i32, i32
  }
}

</mosaic_0001>

<bundles_post_ra>
// kernel: dispnet_bi_forward.45
= control target key start
LH: loop header
LB: loop body
LE: loop exit
PB: predicated region body
PF: predicated region fallthrough
CT: control target
= control target key end

     0   :  { %s1509_s1 = inlined_call_operand.vmem [shape: bf16[128,128], index: 1, kind: input, shape index: {}]   ;;  %s1510_s0 = inlined_call_operand.vmem [shape: bf16[512,128], index: 0, kind: input, shape index: {}]   ;;  %s1511_s2 = inlined_call_operand.vmem [shape: f32[1,128], index: 2, kind: input, shape index: {}]   ;;  %s1512_s3 = inlined_call_operand.vmem [shape: f32[512,128], index: 3, kind: output, shape index: {}]  }
   0x1   :  { %v1068_v0 = vld [vmem:[%s1509_s1] sm:$0xff]   ;;  %v1069_v1 = vld [vmem:[%s1509_s1 + $0x8] sm:$0xff]   ;;  %v1070_v2 = vld [vmem:[%s1509_s1 + $0x10] sm:$0xff]  }
   0x2   :  { %972 = vmatprep.subr.bf16.mxu0 %v1068_v0  ;;  %1052 = vmatprep.subr.bf16.mxu1 %v1068_v0  ;;  %v1071_v3 = vld [vmem:[%s1509_s1 + $0x18] sm:$0xff]   ;;  %v1076_v4 = vld [vmem:[%s1510_s0] sm:$0xff]   ;;  %v1073_v7 = vld [vmem:[%s1509_s1 + $0x28] sm:$0xff]  }
   0x3   :  { %973 = vmatpush3.bf16.msra.mxu0 %v1068_v0  ;;  %1060 = vmatpush3.bf16.msra.mxu1 %v1068_v0  ;;  %v1077_v5 = vld [vmem:[%s1510_s0 + $0x80] sm:$0xff]   ;;  %v1074_v8 = vld [vmem:[%s1509_s1 + $0x30] sm:$0xff]   ;;  %v1075_v9 = vld [vmem:[%s1509_s1 + $0x38] sm:$0xff]  }
   0x4   :  { %974 = vmatprep.subr.bf16.mxu0 %v1069_v1  ;;  %1053 = vmatprep.subr.bf16.mxu1 %v1069_v1  ;;  %v1072_v6 = vld [vmem:[%s1509_s1 + $0x20] sm:$0xff]   ;;  %v1078_v10 = vld [vmem:[%s1510_s0 + $0x8] sm:$0xff]   ;;  %v1080_v12 = vld [vmem:[%s1510_s0 + $0x10] sm:$0xff]  }
   0x5   :  { %988 = vmatprep.mubr.bf16.mxu0 %v1076_v4  ;;  %1020 = vmatprep.mubr.bf16.mxu1 %v1077_v5  ;;  %v1079_v11 = vld [vmem:[%s1510_s0 + $0x88] sm:$0xff]   ;;  %v1081_v13 = vld [vmem:[%s1510_s0 + $0x90] sm:$0xff]   ;;  %v1082_v14 = vld [vmem:[%s1510_s0 + $0x18] sm:$0xff]  }
   0x6   :  { %v1083_v15 = vld [vmem:[%s1510_s0 + $0x98] sm:$0xff]   ;;  %v1084_v16 = vld [vmem:[%s1510_s0 + $0x20] sm:$0xff]   ;;  %v1086_v18 = vld [vmem:[%s1510_s0 + $0x28] sm:$0xff]  }
   0x7   :  { %975 = vmatpush3.bf16.msra.mxu0 %v1069_v1  ;;  %1061 = vmatpush3.bf16.msra.mxu1 %v1069_v1  ;;  %v1085_v17 = vld [vmem:[%s1510_s0 + $0xa0] sm:$0xff]   ;;  %v1087_v19 = vld [vmem:[%s1510_s0 + $0xa8] sm:$0xff]   ;;  %v1088_v20 = vld [vmem:[%s1510_s0 + $0x30] sm:$0xff]  }
   0x8   :  { %976 = vmatprep.subr.bf16.mxu0 %v1070_v2  ;;  %1054 = vmatprep.subr.bf16.mxu1 %v1070_v2  ;;  %v1089_v21 = vld [vmem:[%s1510_s0 + $0xb0] sm:$0xff]   ;;  %v1090_v22 = vld [vmem:[%s1510_s0 + $0x38] sm:$0xff]   ;;  %v1092_v24 = vld [vmem:[%s1510_s0 + $0x40] sm:$0xff]  }
   0x9   :  { %v1091_v23 = vld [vmem:[%s1510_s0 + $0xb8] sm:$0xff]   ;;  %v1093_v25 = vld [vmem:[%s1510_s0 + $0xc0] sm:$0xff]   ;;  %v1094_v26 = vld [vmem:[%s1510_s0 + $0x48] sm:$0xff]  }
   0xa   :  { %v1095_v27 = vld [vmem:[%s1510_s0 + $0xc8] sm:$0xff]   ;;  %v1096_v28 = vld [vmem:[%s1510_s0 + $0x50] sm:$0xff]   ;;  %v1098_v30 = vld [vmem:[%s1510_s0 + $0x58] sm:$0xff]  }
   0xb   :  { %977 = vmatpush3.bf16.msra.mxu0 %v1070_v2  ;;  %1062 = vmatpush3.bf16.msra.mxu1 %v1070_v2  ;;  %v1097_v29 = vld [vmem:[%s1510_s0 + $0xd0] sm:$0xff]   ;;  %v1099_v31 = vld [vmem:[%s1510_s0 + $0xd8] sm:$0xff]   ;;  %v1100_v32 = vld [vmem:[%s1510_s0 + $0x60] sm:$0xff]  }
   0xc   :  { %978 = vmatprep.subr.bf16.mxu0 %v1071_v3  ;;  %1055 = vmatprep.subr.bf16.mxu1 %v1071_v3  ;;  %v1101_v33 = vld [vmem:[%s1510_s0 + $0xe0] sm:$0xff]   ;;  %v1102_v34 = vld [vmem:[%s1510_s0 + $0x68] sm:$0xff]   ;;  %v1104_v36 = vld [vmem:[%s1510_s0 + $0x70] sm:$0xff]  }
   0xd   :  { %v1103_v35 = vld [vmem:[%s1510_s0 + $0xe8] sm:$0xff]   ;;  %v1105_v37 = vld [vmem:[%s1510_s0 + $0xf0] sm:$0xff]   ;;  %v1106_v38 = vld [vmem:[%s1510_s0 + $0x78] sm:$0xff]  }
   0xe   :  { %v1107_v39 = vld [vmem:[%s1510_s0 + $0xf8] sm:$0xff]   ;;  %v1251_v40 = vld [vmem:[%s1511_s2] ss:$0 sm:$0xff] }
   0xf   :  { %979 = vmatpush3.bf16.msra.mxu0 %v1071_v3  ;;  %1063 = vmatpush3.bf16.msra.mxu1 %v1071_v3 }
  0x10   :  { %980 = vmatprep.subr.bf16.mxu0 %v1072_v6  ;;  %1056 = vmatprep.subr.bf16.mxu1 %v1072_v6 }
  0x13   :  { %981 = vmatpush3.bf16.msra.mxu0 %v1072_v6  ;;  %1064 = vmatpush3.bf16.msra.mxu1 %v1072_v6 }
  0x14   :  { %982 = vmatprep.subr.bf16.mxu0 %v1073_v7  ;;  %1057 = vmatprep.subr.bf16.mxu1 %v1073_v7 }
  0x17   :  { %983 = vmatpush3.bf16.msra.mxu0 %v1073_v7  ;;  %1065 = vmatpush3.bf16.msra.mxu1 %v1073_v7 }
  0x18   :  { %984 = vmatprep.subr.bf16.mxu0 %v1074_v8  ;;  %1058 = vmatprep.subr.bf16.mxu1 %v1074_v8 }
  0x1b   :  { %985 = vmatpush3.bf16.msra.mxu0 %v1074_v8  ;;  %1066 = vmatpush3.bf16.msra.mxu1 %v1074_v8 }
  0x1c   :  { %986 = vmatprep.subr.bf16.mxu0 %v1075_v9  ;;  %1059 = vmatprep.subr.bf16.mxu1 %v1075_v9 }
  0x1f   :  { %987 = vmatpush3.bf16.msra.mxu0 %v1075_v9  ;;  %1067 = vmatpush3.bf16.msra.mxu1 %v1075_v9 }
  0x22   :  { %989 = vmatmul.mubr.bf16.vlgmr.msra.gmra.mrb[0].mxu0 %v1078_v10  ;;  %1021 = vmatmul.mubr.bf16.vlgmr.msra.gmra.mrb[0].mxu1 %v1079_v11 }
  0x23   :  { %992 = vmatprep.mubr.bf16.mxu0 %v1080_v12  ;;  %1024 = vmatprep.mubr.bf16.mxu1 %v1081_v13 }
  0x2a   :  { %993 = vmatmul.mubr.bf16.gmra.mrb[4].mxu0 %v1082_v14  ;;  %1025 = vmatmul.mubr.bf16.gmra.mrb[4].mxu1 %v1083_v15 }
  0x2b   :  { %996 = vmatprep.mubr.bf16.mxu0 %v1084_v16  ;;  %1028 = vmatprep.mubr.bf16.mxu1 %v1085_v17 }
  0x32   :  { %997 = vmatmul.mubr.bf16.gmra.mrb[8].mxu0 %v1086_v18  ;;  %1029 = vmatmul.mubr.bf16.gmra.mrb[8].mxu1 %v1087_v19 }
  0x33   :  { %1000 = vmatprep.mubr.bf16.mxu0 %v1088_v20  ;;  %1032 = vmatprep.mubr.bf16.mxu1 %v1089_v21 }
  0x3a   :  { %1001 = vmatmul.mubr.bf16.gmra.mrb[12].mxu0 %v1090_v22  ;;  %1033 = vmatmul.mubr.bf16.gmra.mrb[12].mxu1 %v1091_v23 }
  0x3b   :  { %1004 = vmatprep.mubr.bf16.mxu0 %v1092_v24  ;;  %1036 = vmatprep.mubr.bf16.mxu1 %v1093_v25 }
  0x42   :  { %1005 = vmatmul.mubr.bf16.gmra.mrb[16].mxu0 %v1094_v26  ;;  %1037 = vmatmul.mubr.bf16.gmra.mrb[16].mxu1 %v1095_v27 }
  0x43   :  { %1008 = vmatprep.mubr.bf16.mxu0 %v1096_v28  ;;  %1040 = vmatprep.mubr.bf16.mxu1 %v1097_v29 }
  0x4a   :  { %1009 = vmatmul.mubr.bf16.gmra.mrb[20].mxu0 %v1098_v30  ;;  %1041 = vmatmul.mubr.bf16.gmra.mrb[20].mxu1 %v1099_v31 }
  0x4b   :  { %1012 = vmatprep.mubr.bf16.mxu0 %v1100_v32  ;;  %1044 = vmatprep.mubr.bf16.mxu1 %v1101_v33 }
  0x52   :  { %1013 = vmatmul.mubr.bf16.gmra.mrb[24].mxu0 %v1102_v34  ;;  %1045 = vmatmul.mubr.bf16.gmra.mrb[24].mxu1 %v1103_v35 }
  0x53   :  { %1016 = vmatprep.mubr.bf16.mxu0 %v1104_v36  ;;  %1048 = vmatprep.mubr.bf16.mxu1 %v1105_v37 }
  0x5a   :  { %1017 = vmatmul.mubr.bf16.gmra.mrb[28].mxu0 %v1106_v38  ;;  %1049 = vmatmul.mubr.bf16.gmra.mrb[28].mxu1 %v1107_v39 }
  0xf5   :  { %v990_v41 = vpop.f32.mrb[0].mxu0  ;;  %v1022_v42 = vpop.f32.mrb[0].mxu1 }
  0xf6   :  { %v385_v43 = vadd.f32 %v990_v41, %v1251_v40  ;;  %v513_v44 = vadd.f32 %v1022_v42, %v1251_v40  ;;  %v376_v45 = vpop.f32.mrb[1].mxu0  ;;  %v504_v46 = vpop.f32.mrb[1].mxu1 }
  0xf7   :  { %v377_v47 = vadd.f32 %v1251_v40, %v376_v45  ;;  %v505_v48 = vadd.f32 %v1251_v40, %v504_v46  ;;  %v991_v49 = vpop.f32.mrb[2].mxu0  ;;  %v1023_v50 = vpop.f32.mrb[2].mxu1 }
  0xf8   :  { %vm633_vm0 = vcmp.ge.f32.partialorder %v385_v43, 0.0  ;;  %v697_v51 = vmul.f32 0.1, %v385_v43  ;;  %vm665_vm1 = vcmp.ge.f32.partialorder %v513_v44, 0.0  ;;  %v729_v52 = vmul.f32 0.1, %v513_v44 }
  0xf9   :  { %vm631_vm2 = vcmp.ge.f32.partialorder %v377_v47, 0.0  ;;  %v695_v53 = vmul.f32 0.1, %v377_v47  ;;  %vm663_vm3 = vcmp.ge.f32.partialorder %v505_v48, 0.0  ;;  %v727_v54 = vmul.f32 0.1, %v505_v48 }
  0xfa   :  { %v761_v55 = vsel %vm633_vm0, %v385_v43, %v697_v51  ;;  %v793_v56 = vsel %vm665_vm1, %v513_v44, %v729_v52  ;;  %v388_v57 = vadd.f32 %v991_v49, %v1251_v40  ;;  %v516_v58 = vadd.f32 %v1023_v50, %v1251_v40  ;;  %v379_v59 = vpop.f32.mrb[3].mxu0  ;;  %v507_v60 = vpop.f32.mrb[3].mxu1 }
  0xfb   :  { %825 = vst [vmem:[%s1512_s3 + $0x10] sm:$0xff] %v761_v55  ;;  %857 = vst [vmem:[%s1512_s3 + $0x110] sm:$0xff] %v793_v56  ;;  %v759_v61 = vsel %vm631_vm2, %v377_v47, %v695_v53  ;;  %v791_v62 = vsel %vm663_vm3, %v505_v48, %v727_v54  ;;  %v380_v63 = vadd.f32 %v1251_v40, %v379_v59 }
  0xfc   :  { %v508_v0 = vadd.f32 %v1251_v40, %v507_v60  ;;  %823 = vst [vmem:[%s1512_s3] sm:$0xff] %v759_v61  ;;  %855 = vst [vmem:[%s1512_s3 + $0x100] sm:$0xff] %v791_v62  ;;  %vm634_vm4 = vcmp.ge.f32.partialorder %v388_v57, 0.0  ;;  %v698_v1 = vmul.f32 0.1, %v388_v57  ;;  %vm666_vm5 = vcmp.ge.f32.partialorder %v516_v58, 0.0 }
  0xfd   :  { %v730_v2 = vmul.f32 0.1, %v516_v58  ;;  %vm632_vm6 = vcmp.ge.f32.partialorder %v380_v63, 0.0  ;;  %v696_v3 = vmul.f32 0.1, %v380_v63  ;;  %v994_v7 = vpop.f32.mrb[4].mxu0 }
  0xfe   :  { %vm664_vm7 = vcmp.ge.f32.partialorder %v508_v0, 0.0  ;;  %v728_v4 = vmul.f32 0.1, %v508_v0  ;;  %v762_v5 = vsel %vm634_vm4, %v388_v57, %v698_v1  ;;  %v1026_v8 = vpop.f32.mrb[4].mxu1  ;;  %v401_v11 = vadd.f32 %v994_v7, %v1251_v40  ;;  %v392_v13 = vpop.f32.mrb[5].mxu0 }
  0xff   :  { %v794_v6 = vsel %vm666_vm5, %v516_v58, %v730_v2  ;;  %826 = vst [vmem:[%s1512_s3 + $0x18] sm:$0xff] %v762_v5  ;;  %v760_v9 = vsel %vm632_vm6, %v380_v63, %v696_v3  ;;  %v529_v12 = vadd.f32 %v1026_v8, %v1251_v40  ;;  %v520_v14 = vpop.f32.mrb[5].mxu1  ;;  %v393_v15 = vadd.f32 %v1251_v40, %v392_v13  ;;  %v995_v17 = vpop.f32.mrb[6].mxu0 }
 0x100   :  { %858 = vst [vmem:[%s1512_s3 + $0x118] sm:$0xff] %v794_v6  ;;  %v792_v10 = vsel %vm664_vm7, %v508_v0, %v728_v4  ;;  %824 = vst [vmem:[%s1512_s3 + $0x8] sm:$0xff] %v760_v9  ;;  %v521_v16 = vadd.f32 %v1251_v40, %v520_v14  ;;  %v1027_v18 = vpop.f32.mrb[6].mxu1  ;;  %vm637_vm8 = vcmp.ge.f32.partialorder %v401_v11, 0.0  ;;  %v701_v19 = vmul.f32 0.1, %v401_v11 }
 0x101   :  { %856 = vst [vmem:[%s1512_s3 + $0x108] sm:$0xff] %v792_v10  ;;  %vm669_vm9 = vcmp.ge.f32.partialorder %v529_v12, 0.0  ;;  %v733_v20 = vmul.f32 0.1, %v529_v12  ;;  %vm635_vm10 = vcmp.ge.f32.partialorder %v393_v15, 0.0  ;;  %v404_v25 = vadd.f32 %v995_v17, %v1251_v40  ;;  %v395_v27 = vpop.f32.mrb[7].mxu0 }
 0x102   :  { %v699_v21 = vmul.f32 0.1, %v393_v15  ;;  %vm667_vm11 = vcmp.ge.f32.partialorder %v521_v16, 0.0  ;;  %v731_v22 = vmul.f32 0.1, %v521_v16  ;;  %v765_v23 = vsel %vm637_vm8, %v401_v11, %v701_v19  ;;  %v523_v28 = vpop.f32.mrb[7].mxu1 }
 0x103   :  { %v797_v24 = vsel %vm669_vm9, %v529_v12, %v733_v20  ;;  %v532_v26 = vadd.f32 %v1027_v18, %v1251_v40  ;;  %829 = vst [vmem:[%s1512_s3 + $0x30] sm:$0xff] %v765_v23  ;;  %v396_v31 = vadd.f32 %v1251_v40, %v395_v27  ;;  %v524_v32 = vadd.f32 %v1251_v40, %v523_v28 }
 0x104   :  { %861 = vst [vmem:[%s1512_s3 + $0x130] sm:$0xff] %v797_v24  ;;  %v763_v29 = vsel %vm635_vm10, %v393_v15, %v699_v21  ;;  %v795_v30 = vsel %vm667_vm11, %v521_v16, %v731_v22  ;;  %vm638_vm12 = vcmp.ge.f32.partialorder %v404_v25, 0.0  ;;  %v702_v33 = vmul.f32 0.1, %v404_v25 }
 0x105   :  { %827 = vst [vmem:[%s1512_s3 + $0x20] sm:$0xff] %v763_v29  ;;  %859 = vst [vmem:[%s1512_s3 + $0x120] sm:$0xff] %v795_v30  ;;  %vm670_vm13 = vcmp.ge.f32.partialorder %v532_v26, 0.0  ;;  %v734_v34 = vmul.f32 0.1, %v532_v26  ;;  %vm636_vm14 = vcmp.ge.f32.partialorder %v396_v31, 0.0 }
 0x106   :  { %v700_v35 = vmul.f32 0.1, %v396_v31  ;;  %vm668_vm15 = vcmp.ge.f32.partialorder %v524_v32, 0.0  ;;  %v732_v36 = vmul.f32 0.1, %v524_v32  ;;  %v766_v37 = vsel %vm638_vm12, %v404_v25, %v702_v33  ;;  %v998_v39 = vpop.f32.mrb[8].mxu0 }
 0x107   :  { %v798_v38 = vsel %vm670_vm13, %v532_v26, %v734_v34  ;;  %v1030_v41 = vpop.f32.mrb[8].mxu1  ;;  %830 = vst [vmem:[%s1512_s3 + $0x38] sm:$0xff] %v766_v37  ;;  %v417_v44 = vadd.f32 %v998_v39, %v1251_v40  ;;  %v408_v46 = vpop.f32.mrb[9].mxu0 }
 0x108   :  { %862 = vst [vmem:[%s1512_s3 + $0x138] sm:$0xff] %v798_v38  ;;  %v764_v42 = vsel %vm636_vm14, %v396_v31, %v700_v35  ;;  %v796_v43 = vsel %vm668_vm15, %v524_v32, %v732_v36  ;;  %v545_v45 = vadd.f32 %v1030_v41, %v1251_v40  ;;  %v536_v47 = vpop.f32.mrb[9].mxu1  ;;  %v409_v48 = vadd.f32 %v1251_v40, %v408_v46  ;;  %v999_v50 = vpop.f32.mrb[10].mxu0 }
 0x109   :  { %828 = vst [vmem:[%s1512_s3 + $0x28] sm:$0xff] %v764_v42  ;;  %860 = vst [vmem:[%s1512_s3 + $0x128] sm:$0xff] %v796_v43  ;;  %v537_v49 = vadd.f32 %v1251_v40, %v536_v47  ;;  %v1031_v51 = vpop.f32.mrb[10].mxu1  ;;  %vm641_vm0 = vcmp.ge.f32.partialorder %v417_v44, 0.0  ;;  %v705_v52 = vmul.f32 0.1, %v417_v44  ;;  %v420_v58 = vadd.f32 %v999_v50, %v1251_v40 }
 0x10a   :  { %vm673_vm1 = vcmp.ge.f32.partialorder %v545_v45, 0.0  ;;  %v737_v53 = vmul.f32 0.1, %v545_v45  ;;  %vm639_vm2 = vcmp.ge.f32.partialorder %v409_v48, 0.0  ;;  %v703_v54 = vmul.f32 0.1, %v409_v48 }
 0x10b   :  { %vm671_vm3 = vcmp.ge.f32.partialorder %v537_v49, 0.0  ;;  %v735_v55 = vmul.f32 0.1, %v537_v49  ;;  %v769_v56 = vsel %vm641_vm0, %v417_v44, %v705_v52  ;;  %v548_v59 = vadd.f32 %v1031_v51, %v1251_v40  ;;  %v411_v60 = vpop.f32.mrb[11].mxu0  ;;  %v539_v61 = vpop.f32.mrb[11].mxu1 }
 0x10c   :  { %v801_v57 = vsel %vm673_vm1, %v545_v45, %v737_v53  ;;  %833 = vst [vmem:[%s1512_s3 + $0x50] sm:$0xff] %v769_v56  ;;  %v767_v62 = vsel %vm639_vm2, %v409_v48, %v703_v54  ;;  %v412_v0 = vadd.f32 %v1251_v40, %v411_v60  ;;  %v540_v1 = vadd.f32 %v1251_v40, %v539_v61 }
 0x10d   :  { %865 = vst [vmem:[%s1512_s3 + $0x150] sm:$0xff] %v801_v57  ;;  %v799_v63 = vsel %vm671_vm3, %v537_v49, %v735_v55  ;;  %v1002_v2 = vpop.f32.mrb[12].mxu0  ;;  %v1034_v3 = vpop.f32.mrb[12].mxu1  ;;  %831 = vst [vmem:[%s1512_s3 + $0x40] sm:$0xff] %v767_v62  ;;  %vm642_vm4 = vcmp.ge.f32.partialorder %v420_v58, 0.0  ;;  %vm674_vm5 = vcmp.ge.f32.partialorder %v548_v59, 0.0 }
 0x10e   :  { %863 = vst [vmem:[%s1512_s3 + $0x140] sm:$0xff] %v799_v63  ;;  %v706_v4 = vmul.f32 0.1, %v420_v58  ;;  %v738_v5 = vmul.f32 0.1, %v548_v59  ;;  %vm640_vm6 = vcmp.ge.f32.partialorder %v412_v0, 0.0  ;;  %v433_v10 = vadd.f32 %v1002_v2, %v1251_v40 }
 0x10f   :  { %v704_v6 = vmul.f32 0.1, %v412_v0  ;;  %vm672_vm7 = vcmp.ge.f32.partialorder %v540_v1, 0.0  ;;  %v736_v7 = vmul.f32 0.1, %v540_v1  ;;  %v561_v11 = vadd.f32 %v1034_v3, %v1251_v40  ;;  %v424_v12 = vpop.f32.mrb[13].mxu0 }
 0x110   :  { %v770_v8 = vsel %vm642_vm4, %v420_v58, %v706_v4  ;;  %v802_v9 = vsel %vm674_vm5, %v548_v59, %v738_v5  ;;  %v552_v13 = vpop.f32.mrb[13].mxu1  ;;  %v425_v16 = vadd.f32 %v1251_v40, %v424_v12  ;;  %v1003_v18 = vpop.f32.mrb[14].mxu0  ;;  %vm645_vm8 = vcmp.ge.f32.partialorder %v433_v10, 0.0 }
 0x111   :  { %834 = vst [vmem:[%s1512_s3 + $0x58] sm:$0xff] %v770_v8  ;;  %866 = vst [vmem:[%s1512_s3 + $0x158] sm:$0xff] %v802_v9  ;;  %v768_v14 = vsel %vm640_vm6, %v412_v0, %v704_v6  ;;  %v800_v15 = vsel %vm672_vm7, %v540_v1, %v736_v7  ;;  %v553_v17 = vadd.f32 %v1251_v40, %v552_v13  ;;  %v1035_v19 = vpop.f32.mrb[14].mxu1  ;;  %v709_v20 = vmul.f32 0.1, %v433_v10  ;;  %v427_v28 = vpop.f32.mrb[15].mxu0 }
 0x112   :  { %832 = vst [vmem:[%s1512_s3 + $0x48] sm:$0xff] %v768_v14  ;;  %864 = vst [vmem:[%s1512_s3 + $0x148] sm:$0xff] %v800_v15  ;;  %vm677_vm9 = vcmp.ge.f32.partialorder %v561_v11, 0.0  ;;  %v741_v21 = vmul.f32 0.1, %v561_v11  ;;  %vm643_vm10 = vcmp.ge.f32.partialorder %v425_v16, 0.0  ;;  %v436_v26 = vadd.f32 %v1003_v18, %v1251_v40 }
 0x113   :  { %v707_v22 = vmul.f32 0.1, %v425_v16  ;;  %vm675_vm11 = vcmp.ge.f32.partialorder %v553_v17, 0.0  ;;  %v739_v23 = vmul.f32 0.1, %v553_v17  ;;  %v773_v24 = vsel %vm645_vm8, %v433_v10, %v709_v20  ;;  %v555_v29 = vpop.f32.mrb[15].mxu1 }
 0x114   :  { %v805_v25 = vsel %vm677_vm9, %v561_v11, %v741_v21  ;;  %v564_v27 = vadd.f32 %v1035_v19, %v1251_v40  ;;  %837 = vst [vmem:[%s1512_s3 + $0x70] sm:$0xff] %v773_v24  ;;  %v428_v32 = vadd.f32 %v1251_v40, %v427_v28  ;;  %v556_v33 = vadd.f32 %v1251_v40, %v555_v29 }
 0x115   :  { %869 = vst [vmem:[%s1512_s3 + $0x170] sm:$0xff] %v805_v25  ;;  %v771_v30 = vsel %vm643_vm10, %v425_v16, %v707_v22  ;;  %v803_v31 = vsel %vm675_vm11, %v553_v17, %v739_v23  ;;  %v1006_v34 = vpop.f32.mrb[16].mxu0  ;;  %v1038_v35 = vpop.f32.mrb[16].mxu1  ;;  %vm646_vm12 = vcmp.ge.f32.partialorder %v436_v26, 0.0  ;;  %v710_v36 = vmul.f32 0.1, %v436_v26 }
 0x116   :  { %835 = vst [vmem:[%s1512_s3 + $0x60] sm:$0xff] %v771_v30  ;;  %867 = vst [vmem:[%s1512_s3 + $0x160] sm:$0xff] %v803_v31  ;;  %vm678_vm13 = vcmp.ge.f32.partialorder %v564_v27, 0.0  ;;  %v742_v37 = vmul.f32 0.1, %v564_v27  ;;  %vm644_vm14 = vcmp.ge.f32.partialorder %v428_v32, 0.0  ;;  %v449_v43 = vadd.f32 %v1006_v34, %v1251_v40 }
 0x117   :  { %v708_v38 = vmul.f32 0.1, %v428_v32  ;;  %vm676_vm15 = vcmp.ge.f32.partialorder %v556_v33, 0.0  ;;  %v740_v39 = vmul.f32 0.1, %v556_v33  ;;  %v774_v41 = vsel %vm646_vm12, %v436_v26, %v710_v36  ;;  %v440_v45 = vpop.f32.mrb[17].mxu0 }
 0x118   :  { %v806_v42 = vsel %vm678_vm13, %v564_v27, %v742_v37  ;;  %v577_v44 = vadd.f32 %v1038_v35, %v1251_v40  ;;  %v568_v46 = vpop.f32.mrb[17].mxu1  ;;  %838 = vst [vmem:[%s1512_s3 + $0x78] sm:$0xff] %v774_v41  ;;  %v441_v49 = vadd.f32 %v1251_v40, %v440_v45  ;;  %v1007_v51 = vpop.f32.mrb[18].mxu0  ;;  %vm649_vm0 = vcmp.ge.f32.partialorder %v449_v43, 0.0 }
 0x119   :  { %870 = vst [vmem:[%s1512_s3 + $0x178] sm:$0xff] %v806_v42  ;;  %v772_v47 = vsel %vm644_vm14, %v428_v32, %v708_v38  ;;  %v804_v48 = vsel %vm676_vm15, %v556_v33, %v740_v39  ;;  %v569_v50 = vadd.f32 %v1251_v40, %v568_v46  ;;  %v1039_v52 = vpop.f32.mrb[18].mxu1  ;;  %v713_v53 = vmul.f32 0.1, %v449_v43  ;;  %v443_v61 = vpop.f32.mrb[19].mxu0 }
 0x11a   :  { %836 = vst [vmem:[%s1512_s3 + $0x68] sm:$0xff] %v772_v47  ;;  %868 = vst [vmem:[%s1512_s3 + $0x168] sm:$0xff] %v804_v48  ;;  %vm681_vm1 = vcmp.ge.f32.partialorder %v577_v44, 0.0  ;;  %v745_v54 = vmul.f32 0.1, %v577_v44  ;;  %vm647_vm2 = vcmp.ge.f32.partialorder %v441_v49, 0.0  ;;  %v452_v59 = vadd.f32 %v1007_v51, %v1251_v40 }
 0x11b   :  { %v711_v55 = vmul.f32 0.1, %v441_v49  ;;  %vm679_vm3 = vcmp.ge.f32.partialorder %v569_v50, 0.0  ;;  %v743_v56 = vmul.f32 0.1, %v569_v50  ;;  %v777_v57 = vsel %vm649_vm0, %v449_v43, %v713_v53  ;;  %v571_v62 = vpop.f32.mrb[19].mxu1 }
 0x11c   :  { %v809_v58 = vsel %vm681_vm1, %v577_v44, %v745_v54  ;;  %v580_v60 = vadd.f32 %v1039_v52, %v1251_v40  ;;  %841 = vst [vmem:[%s1512_s3 + $0x90] sm:$0xff] %v777_v57  ;;  %v444_v1 = vadd.f32 %v1251_v40, %v443_v61  ;;  %v572_v2 = vadd.f32 %v1251_v40, %v571_v62 }
 0x11d   :  { %873 = vst [vmem:[%s1512_s3 + $0x190] sm:$0xff] %v809_v58  ;;  %v775_v63 = vsel %vm647_vm2, %v441_v49, %v711_v55  ;;  %v807_v0 = vsel %vm679_vm3, %v569_v50, %v743_v56  ;;  %v1010_v3 = vpop.f32.mrb[20].mxu0  ;;  %v1042_v4 = vpop.f32.mrb[20].mxu1  ;;  %vm650_vm4 = vcmp.ge.f32.partialorder %v452_v59, 0.0  ;;  %v714_v5 = vmul.f32 0.1, %v452_v59 }
 0x11e   :  { %839 = vst [vmem:[%s1512_s3 + $0x80] sm:$0xff] %v775_v63  ;;  %871 = vst [vmem:[%s1512_s3 + $0x180] sm:$0xff] %v807_v0  ;;  %vm682_vm5 = vcmp.ge.f32.partialorder %v580_v60, 0.0  ;;  %v746_v6 = vmul.f32 0.1, %v580_v60  ;;  %vm648_vm6 = vcmp.ge.f32.partialorder %v444_v1, 0.0  ;;  %v465_v11 = vadd.f32 %v1010_v3, %v1251_v40 }
 0x11f   :  { %v712_v7 = vmul.f32 0.1, %v444_v1  ;;  %vm680_vm7 = vcmp.ge.f32.partialorder %v572_v2, 0.0  ;;  %v744_v8 = vmul.f32 0.1, %v572_v2  ;;  %v778_v9 = vsel %vm650_vm4, %v452_v59, %v714_v5  ;;  %v456_v13 = vpop.f32.mrb[21].mxu0 }
 0x120   :  { %v810_v10 = vsel %vm682_vm5, %v580_v60, %v746_v6  ;;  %v593_v12 = vadd.f32 %v1042_v4, %v1251_v40  ;;  %v584_v14 = vpop.f32.mrb[21].mxu1  ;;  %842 = vst [vmem:[%s1512_s3 + $0x98] sm:$0xff] %v778_v9  ;;  %v457_v17 = vadd.f32 %v1251_v40, %v456_v13  ;;  %v1011_v19 = vpop.f32.mrb[22].mxu0  ;;  %vm653_vm8 = vcmp.ge.f32.partialorder %v465_v11, 0.0 }
 0x121   :  { %874 = vst [vmem:[%s1512_s3 + $0x198] sm:$0xff] %v810_v10  ;;  %v776_v15 = vsel %vm648_vm6, %v444_v1, %v712_v7  ;;  %v808_v16 = vsel %vm680_vm7, %v572_v2, %v744_v8  ;;  %v585_v18 = vadd.f32 %v1251_v40, %v584_v14  ;;  %v1043_v20 = vpop.f32.mrb[22].mxu1  ;;  %v717_v21 = vmul.f32 0.1, %v465_v11  ;;  %v459_v29 = vpop.f32.mrb[23].mxu0 }
 0x122   :  { %840 = vst [vmem:[%s1512_s3 + $0x88] sm:$0xff] %v776_v15  ;;  %872 = vst [vmem:[%s1512_s3 + $0x188] sm:$0xff] %v808_v16  ;;  %vm685_vm9 = vcmp.ge.f32.partialorder %v593_v12, 0.0  ;;  %v749_v22 = vmul.f32 0.1, %v593_v12  ;;  %vm651_vm10 = vcmp.ge.f32.partialorder %v457_v17, 0.0  ;;  %v468_v27 = vadd.f32 %v1011_v19, %v1251_v40 }
 0x123   :  { %v715_v23 = vmul.f32 0.1, %v457_v17  ;;  %vm683_vm11 = vcmp.ge.f32.partialorder %v585_v18, 0.0  ;;  %v747_v24 = vmul.f32 0.1, %v585_v18  ;;  %v781_v25 = vsel %vm653_vm8, %v465_v11, %v717_v21  ;;  %v587_v30 = vpop.f32.mrb[23].mxu1 }
 0x124   :  { %v813_v26 = vsel %vm685_vm9, %v593_v12, %v749_v22  ;;  %v596_v28 = vadd.f32 %v1043_v20, %v1251_v40  ;;  %845 = vst [vmem:[%s1512_s3 + $0xb0] sm:$0xff] %v781_v25  ;;  %v460_v33 = vadd.f32 %v1251_v40, %v459_v29  ;;  %v588_v34 = vadd.f32 %v1251_v40, %v587_v30 }
 0x125   :  { %877 = vst [vmem:[%s1512_s3 + $0x1b0] sm:$0xff] %v813_v26  ;;  %v779_v31 = vsel %vm651_vm10, %v457_v17, %v715_v23  ;;  %v811_v32 = vsel %vm683_vm11, %v585_v18, %v747_v24  ;;  %v1014_v35 = vpop.f32.mrb[24].mxu0  ;;  %v1046_v36 = vpop.f32.mrb[24].mxu1  ;;  %vm654_vm12 = vcmp.ge.f32.partialorder %v468_v27, 0.0  ;;  %v718_v37 = vmul.f32 0.1, %v468_v27 }
 0x126   :  { %843 = vst [vmem:[%s1512_s3 + $0xa0] sm:$0xff] %v779_v31  ;;  %875 = vst [vmem:[%s1512_s3 + $0x1a0] sm:$0xff] %v811_v32  ;;  %vm686_vm13 = vcmp.ge.f32.partialorder %v596_v28, 0.0  ;;  %v750_v38 = vmul.f32 0.1, %v596_v28  ;;  %vm652_vm14 = vcmp.ge.f32.partialorder %v460_v33, 0.0  ;;  %v481_v44 = vadd.f32 %v1014_v35, %v1251_v40 }
 0x127   :  { %v716_v39 = vmul.f32 0.1, %v460_v33  ;;  %vm684_vm15 = vcmp.ge.f32.partialorder %v588_v34, 0.0  ;;  %v748_v41 = vmul.f32 0.1, %v588_v34  ;;  %v782_v42 = vsel %vm654_vm12, %v468_v27, %v718_v37  ;;  %v472_v46 = vpop.f32.mrb[25].mxu0 }
 0x128   :  { %v814_v43 = vsel %vm686_vm13, %v596_v28, %v750_v38  ;;  %v609_v45 = vadd.f32 %v1046_v36, %v1251_v40  ;;  %v600_v47 = vpop.f32.mrb[25].mxu1  ;;  %846 = vst [vmem:[%s1512_s3 + $0xb8] sm:$0xff] %v782_v42  ;;  %v473_v50 = vadd.f32 %v1251_v40, %v472_v46  ;;  %v1015_v52 = vpop.f32.mrb[26].mxu0  ;;  %vm657_vm0 = vcmp.ge.f32.partialorder %v481_v44, 0.0 }
 0x129   :  { %878 = vst [vmem:[%s1512_s3 + $0x1b8] sm:$0xff] %v814_v43  ;;  %v780_v48 = vsel %vm652_vm14, %v460_v33, %v716_v39  ;;  %v812_v49 = vsel %vm684_vm15, %v588_v34, %v748_v41  ;;  %v601_v51 = vadd.f32 %v1251_v40, %v600_v47  ;;  %v1047_v53 = vpop.f32.mrb[26].mxu1  ;;  %v721_v54 = vmul.f32 0.1, %v481_v44  ;;  %v475_v62 = vpop.f32.mrb[27].mxu0 }
 0x12a   :  { %844 = vst [vmem:[%s1512_s3 + $0xa8] sm:$0xff] %v780_v48  ;;  %876 = vst [vmem:[%s1512_s3 + $0x1a8] sm:$0xff] %v812_v49  ;;  %vm689_vm1 = vcmp.ge.f32.partialorder %v609_v45, 0.0  ;;  %v753_v55 = vmul.f32 0.1, %v609_v45  ;;  %vm655_vm2 = vcmp.ge.f32.partialorder %v473_v50, 0.0  ;;  %v484_v60 = vadd.f32 %v1015_v52, %v1251_v40 }
 0x12b   :  { %v719_v56 = vmul.f32 0.1, %v473_v50  ;;  %vm687_vm3 = vcmp.ge.f32.partialorder %v601_v51, 0.0  ;;  %v751_v57 = vmul.f32 0.1, %v601_v51  ;;  %v785_v58 = vsel %vm657_vm0, %v481_v44, %v721_v54  ;;  %v603_v63 = vpop.f32.mrb[27].mxu1 }
 0x12c   :  { %v817_v59 = vsel %vm689_vm1, %v609_v45, %v753_v55  ;;  %v612_v61 = vadd.f32 %v1047_v53, %v1251_v40  ;;  %849 = vst [vmem:[%s1512_s3 + $0xd0] sm:$0xff] %v785_v58  ;;  %v476_v2 = vadd.f32 %v1251_v40, %v475_v62  ;;  %v604_v3 = vadd.f32 %v1251_v40, %v603_v63 }
 0x12d   :  { %881 = vst [vmem:[%s1512_s3 + $0x1d0] sm:$0xff] %v817_v59  ;;  %v783_v0 = vsel %vm655_vm2, %v473_v50, %v719_v56  ;;  %v815_v1 = vsel %vm687_vm3, %v601_v51, %v751_v57  ;;  %v1018_v4 = vpop.f32.mrb[28].mxu0  ;;  %v1050_v5 = vpop.f32.mrb[28].mxu1  ;;  %vm658_vm4 = vcmp.ge.f32.partialorder %v484_v60, 0.0  ;;  %v722_v6 = vmul.f32 0.1, %v484_v60 }
 0x12e   :  { %847 = vst [vmem:[%s1512_s3 + $0xc0] sm:$0xff] %v783_v0  ;;  %879 = vst [vmem:[%s1512_s3 + $0x1c0] sm:$0xff] %v815_v1  ;;  %vm690_vm5 = vcmp.ge.f32.partialorder %v612_v61, 0.0  ;;  %v754_v7 = vmul.f32 0.1, %v612_v61  ;;  %vm656_vm6 = vcmp.ge.f32.partialorder %v476_v2, 0.0  ;;  %v497_v12 = vadd.f32 %v1018_v4, %v1251_v40 }
 0x12f   :  { %v720_v8 = vmul.f32 0.1, %v476_v2  ;;  %vm688_vm7 = vcmp.ge.f32.partialorder %v604_v3, 0.0  ;;  %v752_v9 = vmul.f32 0.1, %v604_v3  ;;  %v786_v10 = vsel %vm658_vm4, %v484_v60, %v722_v6  ;;  %v488_v14 = vpop.f32.mrb[29].mxu0 }
 0x130   :  { %v818_v11 = vsel %vm690_vm5, %v612_v61, %v754_v7  ;;  %v625_v13 = vadd.f32 %v1050_v5, %v1251_v40  ;;  %v616_v15 = vpop.f32.mrb[29].mxu1  ;;  %850 = vst [vmem:[%s1512_s3 + $0xd8] sm:$0xff] %v786_v10  ;;  %v489_v18 = vadd.f32 %v1251_v40, %v488_v14  ;;  %v1019_v20 = vpop.f32.mrb[30].mxu0  ;;  %vm661_vm8 = vcmp.ge.f32.partialorder %v497_v12, 0.0 }
 0x131   :  { %882 = vst [vmem:[%s1512_s3 + $0x1d8] sm:$0xff] %v818_v11  ;;  %v784_v16 = vsel %vm656_vm6, %v476_v2, %v720_v8  ;;  %v816_v17 = vsel %vm688_vm7, %v604_v3, %v752_v9  ;;  %v617_v19 = vadd.f32 %v1251_v40, %v616_v15  ;;  %v1051_v21 = vpop.f32.mrb[30].mxu1  ;;  %v725_v22 = vmul.f32 0.1, %v497_v12  ;;  %v491_v30 = vpop.f32.mrb[31].mxu0 }
 0x132   :  { %848 = vst [vmem:[%s1512_s3 + $0xc8] sm:$0xff] %v784_v16  ;;  %880 = vst [vmem:[%s1512_s3 + $0x1c8] sm:$0xff] %v816_v17  ;;  %vm693_vm9 = vcmp.ge.f32.partialorder %v625_v13, 0.0  ;;  %v757_v23 = vmul.f32 0.1, %v625_v13  ;;  %vm659_vm10 = vcmp.ge.f32.partialorder %v489_v18, 0.0  ;;  %v500_v28 = vadd.f32 %v1019_v20, %v1251_v40 }
 0x133   :  { %v723_v24 = vmul.f32 0.1, %v489_v18  ;;  %vm691_vm11 = vcmp.ge.f32.partialorder %v617_v19, 0.0  ;;  %v755_v25 = vmul.f32 0.1, %v617_v19  ;;  %v789_v26 = vsel %vm661_vm8, %v497_v12, %v725_v22  ;;  %v619_v31 = vpop.f32.mrb[31].mxu1 }
 0x134   :  { %v821_v27 = vsel %vm693_vm9, %v625_v13, %v757_v23  ;;  %v628_v29 = vadd.f32 %v1051_v21, %v1251_v40  ;;  %853 = vst [vmem:[%s1512_s3 + $0xf0] sm:$0xff] %v789_v26  ;;  %v492_v34 = vadd.f32 %v1251_v40, %v491_v30  ;;  %v620_v35 = vadd.f32 %v1251_v40, %v619_v31 }
 0x135   :  { %885 = vst [vmem:[%s1512_s3 + $0x1f0] sm:$0xff] %v821_v27  ;;  %v787_v32 = vsel %vm659_vm10, %v489_v18, %v723_v24  ;;  %v819_v33 = vsel %vm691_vm11, %v617_v19, %v755_v25  ;;  %vm662_vm12 = vcmp.ge.f32.partialorder %v500_v28, 0.0  ;;  %v726_v36 = vmul.f32 0.1, %v500_v28 }
 0x136   :  { %851 = vst [vmem:[%s1512_s3 + $0xe0] sm:$0xff] %v787_v32  ;;  %883 = vst [vmem:[%s1512_s3 + $0x1e0] sm:$0xff] %v819_v33  ;;  %vm694_vm13 = vcmp.ge.f32.partialorder %v628_v29, 0.0  ;;  %v758_v37 = vmul.f32 0.1, %v628_v29  ;;  %vm660_vm14 = vcmp.ge.f32.partialorder %v492_v34, 0.0 }
 0x137   :  { %v724_v38 = vmul.f32 0.1, %v492_v34  ;;  %vm692_vm15 = vcmp.ge.f32.partialorder %v620_v35, 0.0  ;;  %v756_v39 = vmul.f32 0.1, %v620_v35  ;;  %v790_v41 = vsel %vm662_vm12, %v500_v28, %v726_v36 }
 0x138   :  { %v822_v42 = vsel %vm694_vm13, %v628_v29, %v758_v37  ;;  %854 = vst [vmem:[%s1512_s3 + $0xf8] sm:$0xff] %v790_v41 }
 0x139   :  { %886 = vst [vmem:[%s1512_s3 + $0x1f8] sm:$0xff] %v822_v42  ;;  %v788_v40 = vsel %vm660_vm14, %v492_v34, %v724_v38  ;;  %v820_v43 = vsel %vm692_vm15, %v620_v35, %v756_v39 }
 0x13a   :  { %852 = vst [vmem:[%s1512_s3 + $0xe8] sm:$0xff] %v788_v40  ;;  %884 = vst [vmem:[%s1512_s3 + $0x1e8] sm:$0xff] %v820_v43 }

// kernel: dispnet_bi_forward.46
= control target key start
LH: loop header
LB: loop body
LE: loop exit
PB: predicated region body
PF: predicated region fallthrough
CT: control target
= control target key end

     0   :  { %s1286_s1 = inlined_call_operand.vmem [shape: bf16[512,128], index: 1, kind: input, shape index: {}]   ;;  %s1287_s0 = inlined_call_operand.vmem [shape: bf16[128,512], index: 0, kind: input, shape index: {}]   ;;  %s1288_s2 = inlined_call_operand.vmem [shape: f32[1,128], index: 2, kind: input, shape index: {}]   ;;  %s1289_s3 = inlined_call_operand.vmem [shape: f32[128,128], index: 3, kind: output, shape index: {}]  }
   0x1   :  { %v925_v0 = vld [vmem:[%s1286_s1 + $0x40] sm:$0xff]   ;;  %v929_v4 = vld [vmem:[%s1286_s1 + $0x48] sm:$0xff]   ;;  %v933_v8 = vld [vmem:[%s1286_s1 + $0x50] sm:$0xff]  }
   0x2   :  { %v926_v1 = vld [vmem:[%s1286_s1 + $0xc0] sm:$0xff]   ;;  %797 = vmatprep.subr.bf16.mxu0 %v925_v0  ;;  %v930_v5 = vld [vmem:[%s1286_s1 + $0xc8] sm:$0xff]   ;;  %v934_v9 = vld [vmem:[%s1286_s1 + $0xd0] sm:$0xff]  }
   0x3   :  { %v927_v2 = vld [vmem:[%s1286_s1] sm:$0xff]   ;;  %861 = vmatprep.subr.bf16.mxu1 %v926_v1  ;;  %v931_v6 = vld [vmem:[%s1286_s1 + $0x8] sm:$0xff]   ;;  %v935_v10 = vld [vmem:[%s1286_s1 + $0x10] sm:$0xff]  }
   0x4   :  { %v928_v3 = vld [vmem:[%s1286_s1 + $0x80] sm:$0xff]   ;;  %798 = vmatpush3.bf16.msra.mxu0 %v927_v2  ;;  %v932_v7 = vld [vmem:[%s1286_s1 + $0x88] sm:$0xff]   ;;  %v936_v11 = vld [vmem:[%s1286_s1 + $0x90] sm:$0xff]  }
   0x5   :  { %862 = vmatpush3.bf16.msra.mxu1 %v928_v3  ;;  %799 = vmatprep.subr.bf16.mxu0 %v929_v4  ;;  %v937_v12 = vld [vmem:[%s1286_s1 + $0x58] sm:$0xff]   ;;  %v941_v16 = vld [vmem:[%s1286_s1 + $0x60] sm:$0xff]   ;;  %v945_v20 = vld [vmem:[%s1286_s1 + $0x68] sm:$0xff]  }
   0x6   :  { %863 = vmatprep.subr.bf16.mxu1 %v930_v5  ;;  %v938_v13 = vld [vmem:[%s1286_s1 + $0xd8] sm:$0xff]   ;;  %v942_v17 = vld [vmem:[%s1286_s1 + $0xe0] sm:$0xff]   ;;  %v946_v21 = vld [vmem:[%s1286_s1 + $0xe8] sm:$0xff]  }
   0x7   :  { %v939_v14 = vld [vmem:[%s1286_s1 + $0x18] sm:$0xff]   ;;  %v943_v18 = vld [vmem:[%s1286_s1 + $0x20] sm:$0xff]   ;;  %v947_v22 = vld [vmem:[%s1286_s1 + $0x28] sm:$0xff]  }
   0x8   :  { %800 = vmatpush3.bf16.msra.mxu0 %v931_v6  ;;  %v940_v15 = vld [vmem:[%s1286_s1 + $0x98] sm:$0xff]   ;;  %v944_v19 = vld [vmem:[%s1286_s1 + $0xa0] sm:$0xff]   ;;  %v948_v23 = vld [vmem:[%s1286_s1 + $0xa8] sm:$0xff]  }
   0x9   :  { %864 = vmatpush3.bf16.msra.mxu1 %v932_v7  ;;  %801 = vmatprep.subr.bf16.mxu0 %v933_v8  ;;  %v949_v24 = vld [vmem:[%s1286_s1 + $0x70] sm:$0xff]   ;;  %v953_v28 = vld [vmem:[%s1286_s1 + $0x78] sm:$0xff]   ;;  %v1220_v2 = vld [vmem:[%s1288_s2] ss:$0 sm:$0xff] }
   0xa   :  { %865 = vmatprep.subr.bf16.mxu1 %v934_v9  ;;  %v950_v25 = vld [vmem:[%s1286_s1 + $0xf0] sm:$0xff]   ;;  %v954_v29 = vld [vmem:[%s1286_s1 + $0xf8] sm:$0xff]  }
   0xb   :  { %v951_v26 = vld [vmem:[%s1286_s1 + $0x30] sm:$0xff]   ;;  %v955_v30 = vld [vmem:[%s1286_s1 + $0x38] sm:$0xff]  }
   0xc   :  { %802 = vmatpush3.bf16.msra.mxu0 %v935_v10  ;;  %v952_v27 = vld [vmem:[%s1286_s1 + $0xb0] sm:$0xff]   ;;  %v956_v31 = vld [vmem:[%s1286_s1 + $0xb8] sm:$0xff]  }
   0xd   :  { %866 = vmatpush3.bf16.msra.mxu1 %v936_v11  ;;  %803 = vmatprep.subr.bf16.mxu0 %v937_v12  ;;  %v957_v32 = vld [vmem:[%s1287_s0] ss:$16 sps:$4 sm:$0xff]   ;;  %v959_v33 = vld [vmem:[%s1287_s0 + $0x4] ss:$16 sps:$4 sm:$0xff]   ;;  %v960_v34 = vld [vmem:[%s1287_s0 + $0x8] ss:$16 sps:$4 sm:$0xff]  }
   0xe   :  { %867 = vmatprep.subr.bf16.mxu1 %v938_v13  ;;  %v962_v35 = vld [vmem:[%s1287_s0 + $0xc] ss:$16 sps:$4 sm:$0xff]   ;;  %502 = vmatprep.mubr.bf16.mxu0 %v959_v33  ;;  %v963_v36 = vld [vmem:[%s1287_s0 + $0x24] ss:$16 sps:$4 sm:$0xff]   ;;  %v967_v38 = vld [vmem:[%s1287_s0 + $0x20] ss:$16 sps:$4 sm:$0xff]  }
   0xf   :  { %599 = vmatprep.mubr.bf16.mxu1 %v962_v35  ;;  %v965_v37 = vld [vmem:[%s1287_s0 + $0x2c] ss:$16 sps:$4 sm:$0xff]   ;;  %v968_v39 = vld [vmem:[%s1287_s0 + $0x28] ss:$16 sps:$4 sm:$0xff]   ;;  %v969_v40 = vld [vmem:[%s1287_s0 + $0x44] ss:$16 sps:$4 sm:$0xff]  }
  0x10   :  { %804 = vmatpush3.bf16.msra.mxu0 %v939_v14  ;;  %v971_v41 = vld [vmem:[%s1287_s0 + $0x4c] ss:$16 sps:$4 sm:$0xff]   ;;  %v973_v42 = vld [vmem:[%s1287_s0 + $0x40] ss:$16 sps:$4 sm:$0xff]   ;;  %v974_v43 = vld [vmem:[%s1287_s0 + $0x48] ss:$16 sps:$4 sm:$0xff]  }
  0x11   :  { %868 = vmatpush3.bf16.msra.mxu1 %v940_v15  ;;  %805 = vmatprep.subr.bf16.mxu0 %v941_v16  ;;  %v975_v44 = vld [vmem:[%s1287_s0 + $0x64] ss:$16 sps:$4 sm:$0xff]   ;;  %v977_v45 = vld [vmem:[%s1287_s0 + $0x6c] ss:$16 sps:$4 sm:$0xff]   ;;  %v979_v46 = vld [vmem:[%s1287_s0 + $0x60] ss:$16 sps:$4 sm:$0xff]  }
  0x12   :  { %869 = vmatprep.subr.bf16.mxu1 %v942_v17  ;;  %v980_v47 = vld [vmem:[%s1287_s0 + $0x68] ss:$16 sps:$4 sm:$0xff]   ;;  %v981_v48 = vld [vmem:[%s1287_s0 + $0x84] ss:$16 sps:$4 sm:$0xff]   ;;  %v983_v49 = vld [vmem:[%s1287_s0 + $0x8c] ss:$16 sps:$4 sm:$0xff]  }
  0x13   :  { %v985_v50 = vld [vmem:[%s1287_s0 + $0x80] ss:$16 sps:$4 sm:$0xff]   ;;  %v986_v51 = vld [vmem:[%s1287_s0 + $0x88] ss:$16 sps:$4 sm:$0xff]   ;;  %v987_v52 = vld [vmem:[%s1287_s0 + $0xa4] ss:$16 sps:$4 sm:$0xff]  }
  0x14   :  { %806 = vmatpush3.bf16.msra.mxu0 %v943_v18  ;;  %v989_v53 = vld [vmem:[%s1287_s0 + $0xac] ss:$16 sps:$4 sm:$0xff]   ;;  %v991_v54 = vld [vmem:[%s1287_s0 + $0xa0] ss:$16 sps:$4 sm:$0xff]   ;;  %v992_v55 = vld [vmem:[%s1287_s0 + $0xa8] ss:$16 sps:$4 sm:$0xff]  }
  0x15   :  { %870 = vmatpush3.bf16.msra.mxu1 %v944_v19  ;;  %807 = vmatprep.subr.bf16.mxu0 %v945_v20  ;;  %v993_v56 = vld [vmem:[%s1287_s0 + $0xc4] ss:$16 sps:$4 sm:$0xff]   ;;  %v995_v57 = vld [vmem:[%s1287_s0 + $0xcc] ss:$16 sps:$4 sm:$0xff]   ;;  %v997_v58 = vld [vmem:[%s1287_s0 + $0xc0] ss:$16 sps:$4 sm:$0xff]  }
  0x16   :  { %871 = vmatprep.subr.bf16.mxu1 %v946_v21  ;;  %v998_v59 = vld [vmem:[%s1287_s0 + $0xc8] ss:$16 sps:$4 sm:$0xff]   ;;  %v999_v60 = vld [vmem:[%s1287_s0 + $0xe4] ss:$16 sps:$4 sm:$0xff]   ;;  %v1001_v61 = vld [vmem:[%s1287_s0 + $0xec] ss:$16 sps:$4 sm:$0xff]  }
  0x17   :  { %v1003_v62 = vld [vmem:[%s1287_s0 + $0xe0] ss:$16 sps:$4 sm:$0xff]   ;;  %v1004_v63 = vld [vmem:[%s1287_s0 + $0xe8] ss:$16 sps:$4 sm:$0xff]  }
  0x18   :  { %808 = vmatpush3.bf16.msra.mxu0 %v947_v22 }
  0x19   :  { %872 = vmatpush3.bf16.msra.mxu1 %v948_v23  ;;  %809 = vmatprep.subr.bf16.mxu0 %v949_v24 }
  0x1a   :  { %873 = vmatprep.subr.bf16.mxu1 %v950_v25 }
  0x1c   :  { %810 = vmatpush3.bf16.msra.mxu0 %v951_v26 }
  0x1d   :  { %874 = vmatpush3.bf16.msra.mxu1 %v952_v27  ;;  %811 = vmatprep.subr.bf16.mxu0 %v953_v28 }
  0x1e   :  { %875 = vmatprep.subr.bf16.mxu1 %v954_v29 }
  0x20   :  { %812 = vmatpush3.bf16.msra.mxu0 %v955_v30 }
  0x21   :  { %876 = vmatpush3.bf16.msra.mxu1 %v956_v31 }
  0x23   :  { %503 = vmatmul.mubr.bf16.vlgmr.msra.gmra.mrb[0].mxu0 %v957_v32 }
  0x24   :  { %600 = vmatmul.mubr.bf16.vlgmr.msra.gmra.mrb[0].mxu1 %v960_v34  ;;  %510 = vmatprep.mubr.bf16.mxu0 %v963_v36 }
  0x25   :  { %607 = vmatprep.mubr.bf16.mxu1 %v965_v37 }
  0x2b   :  { %511 = vmatmul.mubr.bf16.gmra.mrb[4].mxu0 %v967_v38 }
  0x2c   :  { %608 = vmatmul.mubr.bf16.gmra.mrb[4].mxu1 %v968_v39  ;;  %518 = vmatprep.mubr.bf16.mxu0 %v969_v40 }
  0x2d   :  { %615 = vmatprep.mubr.bf16.mxu1 %v971_v41 }
  0x33   :  { %519 = vmatmul.mubr.bf16.gmra.mrb[8].mxu0 %v973_v42 }
  0x34   :  { %616 = vmatmul.mubr.bf16.gmra.mrb[8].mxu1 %v974_v43  ;;  %526 = vmatprep.mubr.bf16.mxu0 %v975_v44 }
  0x35   :  { %623 = vmatprep.mubr.bf16.mxu1 %v977_v45 }
  0x3b   :  { %527 = vmatmul.mubr.bf16.gmra.mrb[12].mxu0 %v979_v46 }
  0x3c   :  { %624 = vmatmul.mubr.bf16.gmra.mrb[12].mxu1 %v980_v47  ;;  %534 = vmatprep.mubr.bf16.mxu0 %v981_v48 }
  0x3d   :  { %631 = vmatprep.mubr.bf16.mxu1 %v983_v49 }
  0x43   :  { %535 = vmatmul.mubr.bf16.gmra.mrb[16].mxu0 %v985_v50 }
  0x44   :  { %632 = vmatmul.mubr.bf16.gmra.mrb[16].mxu1 %v986_v51  ;;  %542 = vmatprep.mubr.bf16.mxu0 %v987_v52 }
  0x45   :  { %639 = vmatprep.mubr.bf16.mxu1 %v989_v53 }
  0x4b   :  { %543 = vmatmul.mubr.bf16.gmra.mrb[20].mxu0 %v991_v54 }
  0x4c   :  { %640 = vmatmul.mubr.bf16.gmra.mrb[20].mxu1 %v992_v55  ;;  %550 = vmatprep.mubr.bf16.mxu0 %v993_v56 }
  0x4d   :  { %647 = vmatprep.mubr.bf16.mxu1 %v995_v57 }
  0x53   :  { %551 = vmatmul.mubr.bf16.gmra.mrb[24].mxu0 %v997_v58 }
  0x54   :  { %648 = vmatmul.mubr.bf16.gmra.mrb[24].mxu1 %v998_v59  ;;  %558 = vmatprep.mubr.bf16.mxu0 %v999_v60 }
  0x55   :  { %655 = vmatprep.mubr.bf16.mxu1 %v1001_v61 }
  0x5b   :  { %559 = vmatmul.mubr.bf16.gmra.mrb[28].mxu0 %v1003_v62 }
  0x5c   :  { %656 = vmatmul.mubr.bf16.gmra.mrb[28].mxu1 %v1004_v63 }
  0xf6   :  { %v813_v0 = vpop.f32.mrb[0].mxu0 }
  0xf7   :  { %v877_v1 = vpop.f32.mrb[0].mxu1  ;;  %v814_v3 = vpop.f32.mrb[1].mxu0 }
  0xf8   :  { %v815_v4 = vadd.f32 %v814_v3, %v813_v0  ;;  %v878_v5 = vpop.f32.mrb[1].mxu1  ;;  %v816_v6 = vpop.f32.mrb[2].mxu0 }
  0xf9   :  { %v879_v7 = vadd.f32 %v878_v5, %v877_v1  ;;  %v880_v8 = vpop.f32.mrb[2].mxu1  ;;  %v817_v9 = vpop.f32.mrb[3].mxu0 }
  0xfa   :  { %v505_v10 = vadd.f32 %v815_v4, %v1220_v2  ;;  %v818_v11 = vadd.f32 %v817_v9, %v816_v6  ;;  %v881_v12 = vpop.f32.mrb[3].mxu1 }
  0xfb   :  { %v882_v13 = vadd.f32 %v881_v12, %v880_v8 }
  0xfc   :  { %v602_v14 = vadd.f32 %v879_v7, %v505_v10  ;;  %v508_v15 = vadd.f32 %v818_v11, %v1220_v2 }
  0xfe   :  { %vm664_vm0 = vcmp.ge.f32.partialorder %v602_v14, 0.0  ;;  %v680_v16 = vmul.f32 0.1, %v602_v14  ;;  %v605_v17 = vadd.f32 %v882_v13, %v508_v15  ;;  %v819_v18 = vpop.f32.mrb[4].mxu0 }
  0xff   :  { %v883_v19 = vpop.f32.mrb[4].mxu1  ;;  %v820_v20 = vpop.f32.mrb[5].mxu0 }
 0x100   :  { %v696_v21 = vsel %vm664_vm0, %v602_v14, %v680_v16  ;;  %vm665_vm1 = vcmp.ge.f32.partialorder %v605_v17, 0.0  ;;  %v681_v22 = vmul.f32 0.1, %v605_v17  ;;  %v821_v23 = vadd.f32 %v820_v20, %v819_v18  ;;  %v884_v24 = vpop.f32.mrb[5].mxu1  ;;  %v822_v25 = vpop.f32.mrb[6].mxu0 }
 0x101   :  { %712 = vst [vmem:[%s1289_s3] sm:$0xff] %v696_v21  ;;  %v885_v26 = vadd.f32 %v884_v24, %v883_v19  ;;  %v886_v27 = vpop.f32.mrb[6].mxu1  ;;  %v823_v28 = vpop.f32.mrb[7].mxu0 }
 0x102   :  { %v697_v29 = vsel %vm665_vm1, %v605_v17, %v681_v22  ;;  %v513_v30 = vadd.f32 %v821_v23, %v1220_v2  ;;  %v824_v31 = vadd.f32 %v823_v28, %v822_v25  ;;  %v887_v32 = vpop.f32.mrb[7].mxu1 }
 0x103   :  { %713 = vst [vmem:[%s1289_s3 + $0x8] sm:$0xff] %v697_v29  ;;  %v888_v33 = vadd.f32 %v887_v32, %v886_v27 }
 0x104   :  { %v610_v34 = vadd.f32 %v885_v26, %v513_v30  ;;  %v516_v35 = vadd.f32 %v824_v31, %v1220_v2 }
 0x106   :  { %vm666_vm2 = vcmp.ge.f32.partialorder %v610_v34, 0.0  ;;  %v682_v36 = vmul.f32 0.1, %v610_v34  ;;  %v613_v37 = vadd.f32 %v888_v33, %v516_v35  ;;  %v825_v38 = vpop.f32.mrb[8].mxu0 }
 0x107   :  { %v889_v39 = vpop.f32.mrb[8].mxu1  ;;  %v826_v40 = vpop.f32.mrb[9].mxu0 }
 0x108   :  { %v698_v41 = vsel %vm666_vm2, %v610_v34, %v682_v36  ;;  %vm667_vm3 = vcmp.ge.f32.partialorder %v613_v37, 0.0  ;;  %v683_v42 = vmul.f32 0.1, %v613_v37  ;;  %v827_v43 = vadd.f32 %v826_v40, %v825_v38  ;;  %v890_v44 = vpop.f32.mrb[9].mxu1  ;;  %v828_v45 = vpop.f32.mrb[10].mxu0 }
 0x109   :  { %714 = vst [vmem:[%s1289_s3 + $0x10] sm:$0xff] %v698_v41  ;;  %v891_v46 = vadd.f32 %v890_v44, %v889_v39  ;;  %v892_v47 = vpop.f32.mrb[10].mxu1  ;;  %v829_v48 = vpop.f32.mrb[11].mxu0 }
 0x10a   :  { %v699_v49 = vsel %vm667_vm3, %v613_v37, %v683_v42  ;;  %v521_v50 = vadd.f32 %v827_v43, %v1220_v2  ;;  %v830_v51 = vadd.f32 %v829_v48, %v828_v45  ;;  %v893_v52 = vpop.f32.mrb[11].mxu1 }
 0x10b   :  { %715 = vst [vmem:[%s1289_s3 + $0x18] sm:$0xff] %v699_v49  ;;  %v894_v53 = vadd.f32 %v893_v52, %v892_v47 }
 0x10c   :  { %v618_v54 = vadd.f32 %v891_v46, %v521_v50  ;;  %v524_v55 = vadd.f32 %v830_v51, %v1220_v2 }
 0x10e   :  { %vm668_vm4 = vcmp.ge.f32.partialorder %v618_v54, 0.0  ;;  %v684_v56 = vmul.f32 0.1, %v618_v54  ;;  %v621_v57 = vadd.f32 %v894_v53, %v524_v55  ;;  %v831_v58 = vpop.f32.mrb[12].mxu0 }
 0x10f   :  { %v895_v59 = vpop.f32.mrb[12].mxu1  ;;  %v832_v60 = vpop.f32.mrb[13].mxu0 }
 0x110   :  { %v700_v61 = vsel %vm668_vm4, %v618_v54, %v684_v56  ;;  %vm669_vm5 = vcmp.ge.f32.partialorder %v621_v57, 0.0  ;;  %v685_v62 = vmul.f32 0.1, %v621_v57  ;;  %v833_v63 = vadd.f32 %v832_v60, %v831_v58  ;;  %v896_v0 = vpop.f32.mrb[13].mxu1  ;;  %v834_v1 = vpop.f32.mrb[14].mxu0 }
 0x111   :  { %716 = vst [vmem:[%s1289_s3 + $0x20] sm:$0xff] %v700_v61  ;;  %v897_v3 = vadd.f32 %v896_v0, %v895_v59  ;;  %v898_v4 = vpop.f32.mrb[14].mxu1  ;;  %v835_v5 = vpop.f32.mrb[15].mxu0 }
 0x112   :  { %v701_v6 = vsel %vm669_vm5, %v621_v57, %v685_v62  ;;  %v529_v7 = vadd.f32 %v833_v63, %v1220_v2  ;;  %v836_v8 = vadd.f32 %v835_v5, %v834_v1  ;;  %v899_v9 = vpop.f32.mrb[15].mxu1 }
 0x113   :  { %717 = vst [vmem:[%s1289_s3 + $0x28] sm:$0xff] %v701_v6  ;;  %v900_v10 = vadd.f32 %v899_v9, %v898_v4 }
 0x114   :  { %v626_v11 = vadd.f32 %v897_v3, %v529_v7  ;;  %v532_v12 = vadd.f32 %v836_v8, %v1220_v2 }
 0x116   :  { %vm670_vm6 = vcmp.ge.f32.partialorder %v626_v11, 0.0  ;;  %v686_v13 = vmul.f32 0.1, %v626_v11  ;;  %v629_v14 = vadd.f32 %v900_v10, %v532_v12  ;;  %v837_v15 = vpop.f32.mrb[16].mxu0 }
 0x117   :  { %v901_v16 = vpop.f32.mrb[16].mxu1  ;;  %v838_v17 = vpop.f32.mrb[17].mxu0 }
 0x118   :  { %v702_v18 = vsel %vm670_vm6, %v626_v11, %v686_v13  ;;  %vm671_vm7 = vcmp.ge.f32.partialorder %v629_v14, 0.0  ;;  %v687_v19 = vmul.f32 0.1, %v629_v14  ;;  %v839_v20 = vadd.f32 %v838_v17, %v837_v15  ;;  %v902_v21 = vpop.f32.mrb[17].mxu1  ;;  %v840_v22 = vpop.f32.mrb[18].mxu0 }
 0x119   :  { %718 = vst [vmem:[%s1289_s3 + $0x30] sm:$0xff] %v702_v18  ;;  %v903_v23 = vadd.f32 %v902_v21, %v901_v16  ;;  %v904_v24 = vpop.f32.mrb[18].mxu1  ;;  %v841_v25 = vpop.f32.mrb[19].mxu0 }
 0x11a   :  { %v703_v26 = vsel %vm671_vm7, %v629_v14, %v687_v19  ;;  %v537_v27 = vadd.f32 %v839_v20, %v1220_v2  ;;  %v842_v28 = vadd.f32 %v841_v25, %v840_v22  ;;  %v905_v29 = vpop.f32.mrb[19].mxu1 }
 0x11b   :  { %719 = vst [vmem:[%s1289_s3 + $0x38] sm:$0xff] %v703_v26  ;;  %v906_v30 = vadd.f32 %v905_v29, %v904_v24 }
 0x11c   :  { %v634_v31 = vadd.f32 %v903_v23, %v537_v27  ;;  %v540_v32 = vadd.f32 %v842_v28, %v1220_v2 }
 0x11e   :  { %vm672_vm8 = vcmp.ge.f32.partialorder %v634_v31, 0.0  ;;  %v688_v33 = vmul.f32 0.1, %v634_v31  ;;  %v637_v34 = vadd.f32 %v906_v30, %v540_v32  ;;  %v843_v35 = vpop.f32.mrb[20].mxu0 }
 0x11f   :  { %v907_v36 = vpop.f32.mrb[20].mxu1  ;;  %v844_v37 = vpop.f32.mrb[21].mxu0 }
 0x120   :  { %v704_v38 = vsel %vm672_vm8, %v634_v31, %v688_v33  ;;  %vm673_vm9 = vcmp.ge.f32.partialorder %v637_v34, 0.0  ;;  %v689_v39 = vmul.f32 0.1, %v637_v34  ;;  %v845_v40 = vadd.f32 %v844_v37, %v843_v35  ;;  %v908_v41 = vpop.f32.mrb[21].mxu1  ;;  %v846_v42 = vpop.f32.mrb[22].mxu0 }
 0x121   :  { %720 = vst [vmem:[%s1289_s3 + $0x40] sm:$0xff] %v704_v38  ;;  %v909_v43 = vadd.f32 %v908_v41, %v907_v36  ;;  %v910_v44 = vpop.f32.mrb[22].mxu1  ;;  %v847_v45 = vpop.f32.mrb[23].mxu0 }
 0x122   :  { %v705_v46 = vsel %vm673_vm9, %v637_v34, %v689_v39  ;;  %v545_v47 = vadd.f32 %v845_v40, %v1220_v2  ;;  %v848_v48 = vadd.f32 %v847_v45, %v846_v42  ;;  %v911_v49 = vpop.f32.mrb[23].mxu1 }
 0x123   :  { %721 = vst [vmem:[%s1289_s3 + $0x48] sm:$0xff] %v705_v46  ;;  %v912_v50 = vadd.f32 %v911_v49, %v910_v44 }
 0x124   :  { %v642_v51 = vadd.f32 %v909_v43, %v545_v47  ;;  %v548_v52 = vadd.f32 %v848_v48, %v1220_v2 }
 0x126   :  { %vm674_vm10 = vcmp.ge.f32.partialorder %v642_v51, 0.0  ;;  %v690_v53 = vmul.f32 0.1, %v642_v51  ;;  %v645_v54 = vadd.f32 %v912_v50, %v548_v52  ;;  %v849_v55 = vpop.f32.mrb[24].mxu0 }
 0x127   :  { %v913_v56 = vpop.f32.mrb[24].mxu1  ;;  %v850_v57 = vpop.f32.mrb[25].mxu0 }
 0x128   :  { %v706_v58 = vsel %vm674_vm10, %v642_v51, %v690_v53  ;;  %vm675_vm11 = vcmp.ge.f32.partialorder %v645_v54, 0.0  ;;  %v691_v59 = vmul.f32 0.1, %v645_v54  ;;  %v851_v60 = vadd.f32 %v850_v57, %v849_v55  ;;  %v914_v61 = vpop.f32.mrb[25].mxu1  ;;  %v852_v62 = vpop.f32.mrb[26].mxu0 }
 0x129   :  { %722 = vst [vmem:[%s1289_s3 + $0x50] sm:$0xff] %v706_v58  ;;  %v915_v63 = vadd.f32 %v914_v61, %v913_v56  ;;  %v916_v0 = vpop.f32.mrb[26].mxu1  ;;  %v853_v1 = vpop.f32.mrb[27].mxu0 }
 0x12a   :  { %v707_v3 = vsel %vm675_vm11, %v645_v54, %v691_v59  ;;  %v553_v4 = vadd.f32 %v851_v60, %v1220_v2  ;;  %v854_v5 = vadd.f32 %v853_v1, %v852_v62  ;;  %v917_v6 = vpop.f32.mrb[27].mxu1 }
 0x12b   :  { %723 = vst [vmem:[%s1289_s3 + $0x58] sm:$0xff] %v707_v3  ;;  %v918_v7 = vadd.f32 %v917_v6, %v916_v0 }
 0x12c   :  { %v650_v8 = vadd.f32 %v915_v63, %v553_v4  ;;  %v556_v9 = vadd.f32 %v854_v5, %v1220_v2 }
 0x12e   :  { %vm676_vm12 = vcmp.ge.f32.partialorder %v650_v8, 0.0  ;;  %v692_v10 = vmul.f32 0.1, %v650_v8  ;;  %v653_v11 = vadd.f32 %v918_v7, %v556_v9  ;;  %v855_v12 = vpop.f32.mrb[28].mxu0 }
 0x12f   :  { %v919_v13 = vpop.f32.mrb[28].mxu1  ;;  %v856_v14 = vpop.f32.mrb[29].mxu0 }
 0x130   :  { %v708_v15 = vsel %vm676_vm12, %v650_v8, %v692_v10  ;;  %vm677_vm13 = vcmp.ge.f32.partialorder %v653_v11, 0.0  ;;  %v693_v16 = vmul.f32 0.1, %v653_v11  ;;  %v857_v17 = vadd.f32 %v856_v14, %v855_v12  ;;  %v920_v18 = vpop.f32.mrb[29].mxu1  ;;  %v858_v19 = vpop.f32.mrb[30].mxu0 }
 0x131   :  { %724 = vst [vmem:[%s1289_s3 + $0x60] sm:$0xff] %v708_v15  ;;  %v921_v20 = vadd.f32 %v920_v18, %v919_v13  ;;  %v922_v21 = vpop.f32.mrb[30].mxu1  ;;  %v859_v22 = vpop.f32.mrb[31].mxu0 }
 0x132   :  { %v709_v23 = vsel %vm677_vm13, %v653_v11, %v693_v16  ;;  %v561_v24 = vadd.f32 %v857_v17, %v1220_v2  ;;  %v860_v25 = vadd.f32 %v859_v22, %v858_v19  ;;  %v923_v26 = vpop.f32.mrb[31].mxu1 }
 0x133   :  { %725 = vst [vmem:[%s1289_s3 + $0x68] sm:$0xff] %v709_v23  ;;  %v924_v27 = vadd.f32 %v923_v26, %v922_v21 }
 0x134   :  { %v658_v28 = vadd.f32 %v921_v20, %v561_v24  ;;  %v564_v29 = vadd.f32 %v860_v25, %v1220_v2 }
 0x136   :  { %vm678_vm14 = vcmp.ge.f32.partialorder %v658_v28, 0.0  ;;  %v694_v30 = vmul.f32 0.1, %v658_v28  ;;  %v661_v31 = vadd.f32 %v924_v27, %v564_v29 }
 0x138   :  { %v710_v32 = vsel %vm678_vm14, %v658_v28, %v694_v30  ;;  %vm679_vm15 = vcmp.ge.f32.partialorder %v661_v31, 0.0  ;;  %v695_v33 = vmul.f32 0.1, %v661_v31 }
 0x139   :  { %726 = vst [vmem:[%s1289_s3 + $0x70] sm:$0xff] %v710_v32 }
 0x13a   :  { %v711_v34 = vsel %vm679_vm15, %v661_v31, %v695_v33 }
 0x13b   :  { %727 = vst [vmem:[%s1289_s3 + $0x78] sm:$0xff] %v711_v34 }

// kernel: dispnet_bi_forward.48
= control target key start
LH: loop header
LB: loop body
LE: loop exit
PB: predicated region body
PF: predicated region fallthrough
CT: control target
= control target key end

     0   :  { %s740_s1 = inlined_call_operand.vmem [shape: bf16[512,128], index: 1, kind: input, shape index: {}]   ;;  %s741_s0 = inlined_call_operand.vmem [shape: bf16[32,512], index: 0, kind: input, shape index: {}]   ;;  %s742_s2 = inlined_call_operand.vmem [shape: f32[1,128], index: 2, kind: input, shape index: {}]   ;;  %s743_s3 = inlined_call_operand.vmem [shape: f32[32,128], index: 3, kind: output, shape index: {}]  }
   0x1   :  { %v541_v0 = vld [vmem:[%s740_s1 + $0x40] sm:$0xff]   ;;  %v545_v4 = vld [vmem:[%s740_s1 + $0x48] sm:$0xff]   ;;  %v549_v8 = vld [vmem:[%s740_s1 + $0x50] sm:$0xff]  }
   0x2   :  { %v542_v1 = vld [vmem:[%s740_s1 + $0xc0] sm:$0xff]   ;;  %485 = vmatprep.subr.bf16.mxu0 %v541_v0  ;;  %v546_v5 = vld [vmem:[%s740_s1 + $0xc8] sm:$0xff]   ;;  %v550_v9 = vld [vmem:[%s740_s1 + $0xd0] sm:$0xff]  }
   0x3   :  { %v543_v2 = vld [vmem:[%s740_s1] sm:$0xff]   ;;  %513 = vmatprep.subr.bf16.mxu1 %v542_v1  ;;  %v547_v6 = vld [vmem:[%s740_s1 + $0x8] sm:$0xff]   ;;  %v551_v10 = vld [vmem:[%s740_s1 + $0x10] sm:$0xff]  }
   0x4   :  { %v544_v3 = vld [vmem:[%s740_s1 + $0x80] sm:$0xff]   ;;  %486 = vmatpush3.bf16.msra.mxu0 %v543_v2  ;;  %v548_v7 = vld [vmem:[%s740_s1 + $0x88] sm:$0xff]   ;;  %v552_v11 = vld [vmem:[%s740_s1 + $0x90] sm:$0xff]  }
   0x5   :  { %514 = vmatpush3.bf16.msra.mxu1 %v544_v3  ;;  %487 = vmatprep.subr.bf16.mxu0 %v545_v4  ;;  %v553_v12 = vld [vmem:[%s740_s1 + $0x58] sm:$0xff]   ;;  %v557_v16 = vld [vmem:[%s740_s1 + $0x60] sm:$0xff]   ;;  %v561_v20 = vld [vmem:[%s740_s1 + $0x68] sm:$0xff]  }
   0x6   :  { %515 = vmatprep.subr.bf16.mxu1 %v546_v5  ;;  %v554_v13 = vld [vmem:[%s740_s1 + $0xd8] sm:$0xff]   ;;  %v558_v17 = vld [vmem:[%s740_s1 + $0xe0] sm:$0xff]   ;;  %v562_v21 = vld [vmem:[%s740_s1 + $0xe8] sm:$0xff]  }
   0x7   :  { %v555_v14 = vld [vmem:[%s740_s1 + $0x18] sm:$0xff]   ;;  %v559_v18 = vld [vmem:[%s740_s1 + $0x20] sm:$0xff]   ;;  %v563_v22 = vld [vmem:[%s740_s1 + $0x28] sm:$0xff]  }
   0x8   :  { %488 = vmatpush3.bf16.msra.mxu0 %v547_v6  ;;  %v556_v15 = vld [vmem:[%s740_s1 + $0x98] sm:$0xff]   ;;  %v560_v19 = vld [vmem:[%s740_s1 + $0xa0] sm:$0xff]   ;;  %v564_v23 = vld [vmem:[%s740_s1 + $0xa8] sm:$0xff]  }
   0x9   :  { %516 = vmatpush3.bf16.msra.mxu1 %v548_v7  ;;  %489 = vmatprep.subr.bf16.mxu0 %v549_v8  ;;  %v565_v24 = vld [vmem:[%s740_s1 + $0x70] sm:$0xff]   ;;  %v569_v28 = vld [vmem:[%s740_s1 + $0x78] sm:$0xff]   ;;  %v444_v42 = vld [vmem:[%s742_s2] ss:$0 sm:$0xff] }
   0xa   :  { %517 = vmatprep.subr.bf16.mxu1 %v550_v9  ;;  %v566_v25 = vld [vmem:[%s740_s1 + $0xf0] sm:$0xff]   ;;  %v570_v29 = vld [vmem:[%s740_s1 + $0xf8] sm:$0xff]  }
   0xb   :  { %v567_v26 = vld [vmem:[%s740_s1 + $0x30] sm:$0xff]   ;;  %v571_v30 = vld [vmem:[%s740_s1 + $0x38] sm:$0xff]  }
   0xc   :  { %490 = vmatpush3.bf16.msra.mxu0 %v551_v10  ;;  %v568_v27 = vld [vmem:[%s740_s1 + $0xb0] sm:$0xff]   ;;  %v572_v31 = vld [vmem:[%s740_s1 + $0xb8] sm:$0xff]  }
   0xd   :  { %518 = vmatpush3.bf16.msra.mxu1 %v552_v11  ;;  %491 = vmatprep.subr.bf16.mxu0 %v553_v12  ;;  %v573_v32 = vld [vmem:[%s741_s0] ss:$16 sps:$4 sm:$0xff]   ;;  %v575_v33 = vld [vmem:[%s741_s0 + $0x4] ss:$16 sps:$4 sm:$0xff]   ;;  %v576_v34 = vld [vmem:[%s741_s0 + $0x8] ss:$16 sps:$4 sm:$0xff]  }
   0xe   :  { %519 = vmatprep.subr.bf16.mxu1 %v554_v13  ;;  %v578_v35 = vld [vmem:[%s741_s0 + $0xc] ss:$16 sps:$4 sm:$0xff]   ;;  %358 = vmatprep.mubr.bf16.mxu0 %v575_v33  ;;  %v579_v36 = vld [vmem:[%s741_s0 + $0x24] ss:$16 sps:$4 sm:$0xff]   ;;  %v583_v38 = vld [vmem:[%s741_s0 + $0x20] ss:$16 sps:$4 sm:$0xff]  }
   0xf   :  { %407 = vmatprep.mubr.bf16.mxu1 %v578_v35  ;;  %v581_v37 = vld [vmem:[%s741_s0 + $0x2c] ss:$16 sps:$4 sm:$0xff]   ;;  %v584_v39 = vld [vmem:[%s741_s0 + $0x28] ss:$16 sps:$4 sm:$0xff]  }
  0x10   :  { %492 = vmatpush3.bf16.msra.mxu0 %v555_v14 }
  0x11   :  { %520 = vmatpush3.bf16.msra.mxu1 %v556_v15  ;;  %493 = vmatprep.subr.bf16.mxu0 %v557_v16 }
  0x12   :  { %521 = vmatprep.subr.bf16.mxu1 %v558_v17 }
  0x14   :  { %494 = vmatpush3.bf16.msra.mxu0 %v559_v18 }
  0x15   :  { %522 = vmatpush3.bf16.msra.mxu1 %v560_v19  ;;  %495 = vmatprep.subr.bf16.mxu0 %v561_v20 }
  0x16   :  { %523 = vmatprep.subr.bf16.mxu1 %v562_v21 }
  0x18   :  { %496 = vmatpush3.bf16.msra.mxu0 %v563_v22 }
  0x19   :  { %524 = vmatpush3.bf16.msra.mxu1 %v564_v23  ;;  %497 = vmatprep.subr.bf16.mxu0 %v565_v24 }
  0x1a   :  { %525 = vmatprep.subr.bf16.mxu1 %v566_v25 }
  0x1c   :  { %498 = vmatpush3.bf16.msra.mxu0 %v567_v26 }
  0x1d   :  { %526 = vmatpush3.bf16.msra.mxu1 %v568_v27  ;;  %499 = vmatprep.subr.bf16.mxu0 %v569_v28 }
  0x1e   :  { %527 = vmatprep.subr.bf16.mxu1 %v570_v29 }
  0x20   :  { %500 = vmatpush3.bf16.msra.mxu0 %v571_v30 }
  0x21   :  { %528 = vmatpush3.bf16.msra.mxu1 %v572_v31 }
  0x23   :  { %359 = vmatmul.mubr.bf16.vlgmr.msra.gmra.mrb[0].mxu0 %v573_v32 }
  0x24   :  { %408 = vmatmul.mubr.bf16.vlgmr.msra.gmra.mrb[0].mxu1 %v576_v34  ;;  %366 = vmatprep.mubr.bf16.mxu0 %v579_v36 }
  0x25   :  { %415 = vmatprep.mubr.bf16.mxu1 %v581_v37 }
  0x2b   :  { %367 = vmatmul.mubr.bf16.gmra.mrb[4].mxu0 %v583_v38 }
  0x2c   :  { %416 = vmatmul.mubr.bf16.gmra.mrb[4].mxu1 %v584_v39 }
  0xf6   :  { %v501_v40 = vpop.f32.mrb[0].mxu0 }
  0xf7   :  { %v529_v41 = vpop.f32.mrb[0].mxu1  ;;  %v502_v43 = vpop.f32.mrb[1].mxu0 }
  0xf8   :  { %v503_v44 = vadd.f32 %v502_v43, %v501_v40  ;;  %v530_v45 = vpop.f32.mrb[1].mxu1  ;;  %v504_v46 = vpop.f32.mrb[2].mxu0 }
  0xf9   :  { %v531_v47 = vadd.f32 %v530_v45, %v529_v41  ;;  %v532_v48 = vpop.f32.mrb[2].mxu1  ;;  %v505_v49 = vpop.f32.mrb[3].mxu0 }
  0xfa   :  { %v361_v50 = vadd.f32 %v503_v44, %v444_v42  ;;  %v506_v51 = vadd.f32 %v505_v49, %v504_v46  ;;  %v533_v52 = vpop.f32.mrb[3].mxu1 }
  0xfb   :  { %v534_v53 = vadd.f32 %v533_v52, %v532_v48 }
  0xfc   :  { %v410_v54 = vadd.f32 %v531_v47, %v361_v50  ;;  %v364_v55 = vadd.f32 %v506_v51, %v444_v42 }
  0xfe   :  { %vm424_vm0 = vcmp.ge.f32.partialorder %v410_v54, 0.0  ;;  %v428_v56 = vmul.f32 0.1, %v410_v54  ;;  %v413_v57 = vadd.f32 %v534_v53, %v364_v55  ;;  %v507_v58 = vpop.f32.mrb[4].mxu0 }
  0xff   :  { %v535_v59 = vpop.f32.mrb[4].mxu1  ;;  %v508_v60 = vpop.f32.mrb[5].mxu0 }
 0x100   :  { %v432_v61 = vsel %vm424_vm0, %v410_v54, %v428_v56  ;;  %vm425_vm1 = vcmp.ge.f32.partialorder %v413_v57, 0.0  ;;  %v429_v62 = vmul.f32 0.1, %v413_v57  ;;  %v509_v63 = vadd.f32 %v508_v60, %v507_v58  ;;  %v536_v0 = vpop.f32.mrb[5].mxu1  ;;  %v510_v1 = vpop.f32.mrb[6].mxu0 }
 0x101   :  { %436 = vst [vmem:[%s743_s3] sm:$0xff] %v432_v61  ;;  %v537_v2 = vadd.f32 %v536_v0, %v535_v59  ;;  %v538_v3 = vpop.f32.mrb[6].mxu1  ;;  %v511_v4 = vpop.f32.mrb[7].mxu0 }
 0x102   :  { %v433_v5 = vsel %vm425_vm1, %v413_v57, %v429_v62  ;;  %v369_v6 = vadd.f32 %v509_v63, %v444_v42  ;;  %v512_v7 = vadd.f32 %v511_v4, %v510_v1  ;;  %v539_v8 = vpop.f32.mrb[7].mxu1 }
 0x103   :  { %437 = vst [vmem:[%s743_s3 + $0x8] sm:$0xff] %v433_v5  ;;  %v540_v9 = vadd.f32 %v539_v8, %v538_v3 }
 0x104   :  { %v418_v10 = vadd.f32 %v537_v2, %v369_v6  ;;  %v372_v11 = vadd.f32 %v512_v7, %v444_v42 }
 0x106   :  { %vm426_vm2 = vcmp.ge.f32.partialorder %v418_v10, 0.0  ;;  %v430_v12 = vmul.f32 0.1, %v418_v10  ;;  %v421_v13 = vadd.f32 %v540_v9, %v372_v11 }
 0x108   :  { %v434_v14 = vsel %vm426_vm2, %v418_v10, %v430_v12  ;;  %vm427_vm3 = vcmp.ge.f32.partialorder %v421_v13, 0.0  ;;  %v431_v15 = vmul.f32 0.1, %v421_v13 }
 0x109   :  { %438 = vst [vmem:[%s743_s3 + $0x10] sm:$0xff] %v434_v14 }
 0x10a   :  { %v435_v16 = vsel %vm427_vm3, %v421_v13, %v431_v15 }
 0x10b   :  { %439 = vst [vmem:[%s743_s3 + $0x18] sm:$0xff] %v435_v16 }

// kernel: dispnet_bi_forward.49
= control target key start
LH: loop header
LB: loop body
LE: loop exit
PB: predicated region body
PF: predicated region fallthrough
CT: control target
= control target key end

     0   :  { %s1280_s1 = inlined_call_operand.vmem [shape: bf16[896,128], index: 1, kind: input, shape index: {}]   ;;  %s1281_s0 = inlined_call_operand.vmem [shape: bf16[32,896], index: 0, kind: input, shape index: {}]   ;;  %s1282_s2 = inlined_call_operand.vmem [shape: f32[1,128], index: 2, kind: input, shape index: {}]   ;;  %s1283_s3 = inlined_call_operand.vmem [shape: f32[32,128], index: 3, kind: output, shape index: {}]  }
   0x1   :  { %v959_v0 = vld [vmem:[%s1280_s1 + $0x40] sm:$0xff]   ;;  %v963_v4 = vld [vmem:[%s1280_s1 + $0x48] sm:$0xff]   ;;  %v967_v8 = vld [vmem:[%s1280_s1 + $0x50] sm:$0xff]  }
   0x2   :  { %v960_v1 = vld [vmem:[%s1280_s1] sm:$0xff]   ;;  %845 = vmatprep.subr.bf16.mxu0 %v959_v0  ;;  %v964_v5 = vld [vmem:[%s1280_s1 + $0x8] sm:$0xff]   ;;  %v968_v9 = vld [vmem:[%s1280_s1 + $0x10] sm:$0xff]  }
   0x3   :  { %v961_v2 = vld [vmem:[%s1280_s1 + $0xc0] sm:$0xff]   ;;  %846 = vmatpush3.bf16.msra.mxu0 %v960_v1  ;;  %v965_v6 = vld [vmem:[%s1280_s1 + $0xc8] sm:$0xff]   ;;  %v969_v10 = vld [vmem:[%s1280_s1 + $0xd0] sm:$0xff]  }
   0x4   :  { %v962_v3 = vld [vmem:[%s1280_s1 + $0x80] sm:$0xff]   ;;  %873 = vmatprep.subr.bf16.mxu1 %v961_v2  ;;  %847 = vmatprep.subr.bf16.mxu0 %v963_v4  ;;  %v966_v7 = vld [vmem:[%s1280_s1 + $0x88] sm:$0xff]   ;;  %v970_v11 = vld [vmem:[%s1280_s1 + $0x90] sm:$0xff]  }
   0x5   :  { %874 = vmatpush3.bf16.msra.mxu1 %v962_v3  ;;  %v971_v12 = vld [vmem:[%s1280_s1 + $0x58] sm:$0xff]   ;;  %v975_v16 = vld [vmem:[%s1280_s1 + $0x60] sm:$0xff]   ;;  %v979_v20 = vld [vmem:[%s1280_s1 + $0x68] sm:$0xff]  }
   0x6   :  { %875 = vmatprep.subr.bf16.mxu1 %v965_v6  ;;  %v972_v13 = vld [vmem:[%s1280_s1 + $0x18] sm:$0xff]   ;;  %v976_v17 = vld [vmem:[%s1280_s1 + $0x20] sm:$0xff]   ;;  %v980_v21 = vld [vmem:[%s1280_s1 + $0x28] sm:$0xff]  }
   0x7   :  { %848 = vmatpush3.bf16.msra.mxu0 %v964_v5  ;;  %v973_v14 = vld [vmem:[%s1280_s1 + $0xd8] sm:$0xff]   ;;  %v977_v18 = vld [vmem:[%s1280_s1 + $0xe0] sm:$0xff]   ;;  %v981_v22 = vld [vmem:[%s1280_s1 + $0xe8] sm:$0xff]  }
   0x8   :  { %849 = vmatprep.subr.bf16.mxu0 %v967_v8  ;;  %v974_v15 = vld [vmem:[%s1280_s1 + $0x98] sm:$0xff]   ;;  %v978_v19 = vld [vmem:[%s1280_s1 + $0xa0] sm:$0xff]   ;;  %v982_v23 = vld [vmem:[%s1280_s1 + $0xa8] sm:$0xff]  }
   0x9   :  { %876 = vmatpush3.bf16.msra.mxu1 %v966_v7  ;;  %v983_v24 = vld [vmem:[%s1280_s1 + $0x70] sm:$0xff]   ;;  %v987_v28 = vld [vmem:[%s1280_s1 + $0x78] sm:$0xff]   ;;  %v992_v32 = vld [vmem:[%s1281_s0 + $0x4] ss:$28 sps:$4 sm:$0xff]  }
   0xa   :  { %877 = vmatprep.subr.bf16.mxu1 %v969_v10  ;;  %v984_v25 = vld [vmem:[%s1280_s1 + $0x30] sm:$0xff]   ;;  %v988_v29 = vld [vmem:[%s1280_s1 + $0x38] sm:$0xff]   ;;  %590 = vmatprep.mubr.bf16.mxu0 %v992_v32  ;;  %v994_v34 = vld [vmem:[%s1280_s1 + $0x140] sm:$0xff]  }
   0xb   :  { %850 = vmatpush3.bf16.msra.mxu0 %v968_v9  ;;  %v985_v26 = vld [vmem:[%s1280_s1 + $0xf0] sm:$0xff]   ;;  %v989_v30 = vld [vmem:[%s1280_s1 + $0xf8] sm:$0xff]   ;;  %v995_v35 = vld [vmem:[%s1281_s0 + $0x8] ss:$28 sps:$4 sm:$0xff]  }
   0xc   :  { %851 = vmatprep.subr.bf16.mxu0 %v971_v12  ;;  %v986_v27 = vld [vmem:[%s1280_s1 + $0xb0] sm:$0xff]   ;;  %v990_v31 = vld [vmem:[%s1281_s0] ss:$28 sps:$4 sm:$0xff]   ;;  %v997_v36 = vld [vmem:[%s1281_s0 + $0xc] ss:$28 sps:$4 sm:$0xff]  }
   0xd   :  { %878 = vmatpush3.bf16.msra.mxu1 %v970_v11  ;;  %v993_v33 = vld [vmem:[%s1280_s1 + $0xb8] sm:$0xff]   ;;  %v998_v37 = vld [vmem:[%s1280_s1 + $0x100] sm:$0xff]   ;;  %639 = vmatprep.mubr.bf16.mxu1 %v997_v36  ;;  %v999_v38 = vld [vmem:[%s1280_s1 + $0x148] sm:$0xff]  }
   0xe   :  { %879 = vmatprep.subr.bf16.mxu1 %v973_v14  ;;  %v1000_v39 = vld [vmem:[%s1280_s1 + $0x180] sm:$0xff]   ;;  %v1001_v40 = vld [vmem:[%s1280_s1 + $0x108] sm:$0xff]   ;;  %v1002_v41 = vld [vmem:[%s1280_s1 + $0x150] sm:$0xff]  }
   0xf   :  { %852 = vmatpush3.bf16.msra.mxu0 %v972_v13  ;;  %v1003_v42 = vld [vmem:[%s1280_s1 + $0x188] sm:$0xff]   ;;  %v1004_v43 = vld [vmem:[%s1280_s1 + $0x110] sm:$0xff]   ;;  %v1005_v44 = vld [vmem:[%s1280_s1 + $0x158] sm:$0xff]  }
  0x10   :  { %853 = vmatprep.subr.bf16.mxu0 %v975_v16  ;;  %v1006_v45 = vld [vmem:[%s1280_s1 + $0x190] sm:$0xff]   ;;  %v1007_v46 = vld [vmem:[%s1280_s1 + $0x118] sm:$0xff]   ;;  %v1008_v47 = vld [vmem:[%s1280_s1 + $0x160] sm:$0xff]  }
  0x11   :  { %880 = vmatpush3.bf16.msra.mxu1 %v974_v15  ;;  %v1009_v48 = vld [vmem:[%s1280_s1 + $0x198] sm:$0xff]   ;;  %v1010_v49 = vld [vmem:[%s1280_s1 + $0x120] sm:$0xff]   ;;  %v1013_v51 = vld [vmem:[%s1280_s1 + $0x168] sm:$0xff]  }
  0x12   :  { %881 = vmatprep.subr.bf16.mxu1 %v977_v18  ;;  %v1011_v50 = vld [vmem:[%s1281_s0 + $0x3c] ss:$28 sps:$4 sm:$0xff]   ;;  %v1014_v52 = vld [vmem:[%s1280_s1 + $0x1a0] sm:$0xff]   ;;  %v1016_v54 = vld [vmem:[%s1280_s1 + $0x128] sm:$0xff]  }
  0x13   :  { %854 = vmatpush3.bf16.msra.mxu0 %v976_v17  ;;  %v1015_v53 = vld [vmem:[%s1281_s0 + $0x38] ss:$28 sps:$4 sm:$0xff]   ;;  %v1017_v55 = vld [vmem:[%s1281_s0 + $0x44] ss:$28 sps:$4 sm:$0xff]   ;;  %v1021_v58 = vld [vmem:[%s1280_s1 + $0x1a8] sm:$0xff]  }
  0x14   :  { %855 = vmatprep.subr.bf16.mxu0 %v979_v20  ;;  %v1019_v56 = vld [vmem:[%s1281_s0 + $0x40] ss:$28 sps:$4 sm:$0xff]   ;;  %v1020_v57 = vld [vmem:[%s1280_s1 + $0x170] sm:$0xff]   ;;  %v1032_v3 = vld [vmem:[%s1281_s0 + $0x4c] ss:$28 sps:$4 sm:$0xff]  }
  0x15   :  { %882 = vmatpush3.bf16.msra.mxu1 %v978_v19  ;;  %v1022_v59 = vld [vmem:[%s1280_s1 + $0x130] sm:$0xff]   ;;  %v1023_v60 = vld [vmem:[%s1280_s1 + $0x178] sm:$0xff]   ;;  %v1034_v5 = vld [vmem:[%s1281_s0 + $0x48] ss:$28 sps:$4 sm:$0xff]  }
  0x16   :  { %883 = vmatprep.subr.bf16.mxu1 %v981_v22  ;;  %v1024_v61 = vld [vmem:[%s1280_s1 + $0x1b0] sm:$0xff]   ;;  %v1025_v62 = vld [vmem:[%s1280_s1 + $0x138] sm:$0xff]   ;;  %v774_v7 = vld [vmem:[%s1282_s2] ss:$0 sm:$0xff] }
  0x17   :  { %856 = vmatpush3.bf16.msra.mxu0 %v980_v21  ;;  %v1028_v63 = vld [vmem:[%s1281_s0 + $0x14] ss:$28 sps:$4 sm:$0xff]   ;;  %v1029_v0 = vld [vmem:[%s1280_s1 + $0x1b8] sm:$0xff]  }
  0x18   :  { %857 = vmatprep.subr.bf16.mxu0 %v983_v24  ;;  %v1030_v1 = vld [vmem:[%s1281_s0 + $0x18] ss:$28 sps:$4 sm:$0xff]   ;;  %v1026_v2 = vld [vmem:[%s1281_s0 + $0x10] ss:$28 sps:$4 sm:$0xff]  }
  0x19   :  { %884 = vmatpush3.bf16.msra.mxu1 %v982_v23  ;;  %v1031_v4 = vld [vmem:[%s1281_s0 + $0x50] ss:$28 sps:$4 sm:$0xff]  }
  0x1a   :  { %885 = vmatprep.subr.bf16.mxu1 %v985_v26 }
  0x1b   :  { %858 = vmatpush3.bf16.msra.mxu0 %v984_v25 }
  0x1c   :  { %859 = vmatprep.subr.bf16.mxu0 %v987_v28 }
  0x1d   :  { %886 = vmatpush3.bf16.msra.mxu1 %v986_v27 }
  0x1e   :  { %887 = vmatprep.subr.bf16.mxu1 %v989_v30 }
  0x1f   :  { %860 = vmatpush3.bf16.msra.mxu0 %v988_v29 }
  0x20   :  { %901 = vmatprep.subr.bf16.mxu0 %v994_v34 }
  0x21   :  { %888 = vmatpush3.bf16.msra.mxu1 %v993_v33 }
  0x22   :  { %591 = vmatmul.mubr.bf16.vlgmr.msra.gmra.mrb[0].mxu0 %v990_v31  ;;  %939 = vmatprep.subr.bf16.mxu1 %v1000_v39 }
  0x23   :  { %902 = vmatpush3.bf16.msra.mxu0 %v998_v37  ;;  %598 = vmatprep.mubr.bf16.mxu0 %v1011_v50 }
  0x24   :  { %640 = vmatmul.mubr.bf16.vlgmr.msra.gmra.mrb[0].mxu1 %v995_v35  ;;  %903 = vmatprep.subr.bf16.mxu0 %v999_v38 }
  0x25   :  { %940 = vmatpush3.bf16.msra.mxu1 %v1000_v39  ;;  %647 = vmatprep.mubr.bf16.mxu1 %v1017_v55 }
  0x26   :  { %941 = vmatprep.subr.bf16.mxu1 %v1003_v42 }
  0x27   :  { %904 = vmatpush3.bf16.msra.mxu0 %v1001_v40 }
  0x28   :  { %905 = vmatprep.subr.bf16.mxu0 %v1002_v41 }
  0x29   :  { %942 = vmatpush3.bf16.msra.mxu1 %v1003_v42 }
  0x2a   :  { %943 = vmatprep.subr.bf16.mxu1 %v1006_v45  ;;  %599 = vmatmul.mubr.bf16.gmra.mrb[4].mxu0 %v1015_v53 }
  0x2b   :  { %906 = vmatpush3.bf16.msra.mxu0 %v1004_v43  ;;  %688 = vmatprep.mubr.bf16.mxu0 %v1028_v63 }
  0x2c   :  { %907 = vmatprep.subr.bf16.mxu0 %v1005_v44  ;;  %648 = vmatmul.mubr.bf16.gmra.mrb[4].mxu1 %v1019_v56 }
  0x2d   :  { %944 = vmatpush3.bf16.msra.mxu1 %v1006_v45  ;;  %955 = vmatprep.mubr.bf16.mxu1 %v1030_v1 }
  0x2e   :  { %945 = vmatprep.subr.bf16.mxu1 %v1009_v48 }
  0x2f   :  { %908 = vmatpush3.bf16.msra.mxu0 %v1007_v46 }
  0x30   :  { %909 = vmatprep.subr.bf16.mxu0 %v1008_v47 }
  0x31   :  { %946 = vmatpush3.bf16.msra.mxu1 %v1009_v48 }
  0x32   :  { %947 = vmatprep.subr.bf16.mxu1 %v1014_v52 }
  0x33   :  { %910 = vmatpush3.bf16.msra.mxu0 %v1010_v49 }
  0x34   :  { %911 = vmatprep.subr.bf16.mxu0 %v1013_v51 }
  0x35   :  { %948 = vmatpush3.bf16.msra.mxu1 %v1014_v52 }
  0x36   :  { %949 = vmatprep.subr.bf16.mxu1 %v1021_v58 }
  0x37   :  { %912 = vmatpush3.bf16.msra.mxu0 %v1016_v54 }
  0x38   :  { %913 = vmatprep.subr.bf16.mxu0 %v1020_v57 }
  0x39   :  { %950 = vmatpush3.bf16.msra.mxu1 %v1021_v58 }
  0x3a   :  { %951 = vmatprep.subr.bf16.mxu1 %v1024_v61 }
  0x3b   :  { %914 = vmatpush3.bf16.msra.mxu0 %v1022_v59 }
  0x3c   :  { %915 = vmatprep.subr.bf16.mxu0 %v1023_v60 }
  0x3d   :  { %952 = vmatpush3.bf16.msra.mxu1 %v1024_v61 }
  0x3e   :  { %953 = vmatprep.subr.bf16.mxu1 %v1029_v0 }
  0x3f   :  { %916 = vmatpush3.bf16.msra.mxu0 %v1025_v62 }
  0x41   :  { %954 = vmatpush3.bf16.msra.mxu1 %v1029_v0 }
  0x42   :  { %689 = vmatmul.mubr.bf16.vlgmr.msra.gmra.mrb[8].mxu0 %v1026_v2 }
  0x43   :  { %696 = vmatprep.mubr.bf16.mxu0 %v1032_v3 }
  0x44   :  { %956 = vmatmul.mubr.bf16.vlgmr.msra.gmra.mrb[8].mxu1 %v1031_v4 }
  0x4a   :  { %697 = vmatmul.mubr.bf16.gmra.mrb[12].mxu0 %v1034_v5 }
  0xf5   :  { %v861_v6 = vpop.f32.mrb[0].mxu0 }
  0xf6   :  { %v862_v8 = vpop.f32.mrb[1].mxu0 }
  0xf7   :  { %v863_v9 = vadd.f32 %v862_v8, %v861_v6  ;;  %v864_v10 = vpop.f32.mrb[2].mxu0  ;;  %v889_v11 = vpop.f32.mrb[0].mxu1 }
  0xf8   :  { %v865_v12 = vpop.f32.mrb[3].mxu0  ;;  %v890_v15 = vpop.f32.mrb[1].mxu1 }
  0xf9   :  { %v593_v13 = vadd.f32 %v863_v9, %v774_v7  ;;  %v866_v14 = vadd.f32 %v865_v12, %v864_v10  ;;  %v891_v16 = vadd.f32 %v890_v15, %v889_v11  ;;  %v892_v17 = vpop.f32.mrb[2].mxu1 }
  0xfa   :  { %v893_v19 = vpop.f32.mrb[3].mxu1 }
  0xfb   :  { %v596_v18 = vadd.f32 %v866_v14, %v774_v7  ;;  %v642_v20 = vadd.f32 %v891_v16, %v593_v13  ;;  %v894_v21 = vadd.f32 %v893_v19, %v892_v17 }
  0xfd   :  { %v645_v22 = vadd.f32 %v894_v21, %v596_v18  ;;  %v867_v23 = vpop.f32.mrb[4].mxu0 }
  0xfe   :  { %v868_v24 = vpop.f32.mrb[5].mxu0 }
  0xff   :  { %v869_v25 = vadd.f32 %v868_v24, %v867_v23  ;;  %v870_v26 = vpop.f32.mrb[6].mxu0  ;;  %v895_v27 = vpop.f32.mrb[4].mxu1 }
 0x100   :  { %v871_v28 = vpop.f32.mrb[7].mxu0  ;;  %v896_v31 = vpop.f32.mrb[5].mxu1 }
 0x101   :  { %v601_v29 = vadd.f32 %v869_v25, %v774_v7  ;;  %v872_v30 = vadd.f32 %v871_v28, %v870_v26  ;;  %v897_v32 = vadd.f32 %v896_v31, %v895_v27  ;;  %v898_v33 = vpop.f32.mrb[6].mxu1 }
 0x102   :  { %v899_v35 = vpop.f32.mrb[7].mxu1 }
 0x103   :  { %v604_v34 = vadd.f32 %v872_v30, %v774_v7  ;;  %v650_v36 = vadd.f32 %v897_v32, %v601_v29  ;;  %v900_v37 = vadd.f32 %v899_v35, %v898_v33 }
 0x105   :  { %v653_v38 = vadd.f32 %v900_v37, %v604_v34 }
 0x115   :  { %v917_v39 = vpop.f32.mrb[8].mxu0 }
 0x116   :  { %v918_v40 = vpop.f32.mrb[9].mxu0 }
 0x117   :  { %v919_v41 = vadd.f32 %v918_v40, %v917_v39  ;;  %v920_v42 = vpop.f32.mrb[10].mxu0  ;;  %v957_v44 = vpop.f32.mrb[8].mxu1 }
 0x118   :  { %v921_v43 = vpop.f32.mrb[11].mxu0  ;;  %v739_v47 = vpop.f32.mrb[9].mxu1 }
 0x119   :  { %v922_v45 = vadd.f32 %v921_v43, %v920_v42  ;;  %v691_v46 = vadd.f32 %v919_v41, %v642_v20  ;;  %v958_v48 = vpop.f32.mrb[10].mxu1 }
 0x11a   :  { %v742_v51 = vpop.f32.mrb[11].mxu1 }
 0x11b   :  { %v740_v49 = vadd.f32 %v739_v47, %v691_v46  ;;  %v694_v50 = vadd.f32 %v922_v45, %v645_v22 }
 0x11d   :  { %vm754_vm0 = vcmp.ge.f32.partialorder %v740_v49, 0.0  ;;  %v758_v52 = vmul.f32 0.1, %v740_v49  ;;  %v743_v53 = vadd.f32 %v742_v51, %v694_v50  ;;  %v923_v54 = vpop.f32.mrb[12].mxu0 }
 0x11e   :  { %v924_v55 = vpop.f32.mrb[13].mxu0 }
 0x11f   :  { %v762_v56 = vsel %vm754_vm0, %v740_v49, %v758_v52  ;;  %vm755_vm1 = vcmp.ge.f32.partialorder %v743_v53, 0.0  ;;  %v759_v57 = vmul.f32 0.1, %v743_v53  ;;  %v925_v58 = vadd.f32 %v924_v55, %v923_v54  ;;  %v926_v59 = vpop.f32.mrb[14].mxu0 }
 0x120   :  { %766 = vst [vmem:[%s1283_s3] sm:$0xff] %v762_v56  ;;  %v927_v60 = vpop.f32.mrb[15].mxu0 }
 0x121   :  { %v763_v61 = vsel %vm755_vm1, %v743_v53, %v759_v57  ;;  %v699_v62 = vadd.f32 %v925_v58, %v650_v36  ;;  %v928_v63 = vadd.f32 %v927_v60, %v926_v59 }
 0x122   :  { %767 = vst [vmem:[%s1283_s3 + $0x8] sm:$0xff] %v763_v61 }
 0x123   :  { %v748_v0 = vadd.f32 %v957_v44, %v699_v62  ;;  %v702_v1 = vadd.f32 %v928_v63, %v653_v38 }
 0x125   :  { %vm756_vm2 = vcmp.ge.f32.partialorder %v748_v0, 0.0  ;;  %v760_v2 = vmul.f32 0.1, %v748_v0  ;;  %v751_v3 = vadd.f32 %v958_v48, %v702_v1 }
 0x127   :  { %v764_v4 = vsel %vm756_vm2, %v748_v0, %v760_v2  ;;  %vm757_vm3 = vcmp.ge.f32.partialorder %v751_v3, 0.0  ;;  %v761_v5 = vmul.f32 0.1, %v751_v3 }
 0x128   :  { %768 = vst [vmem:[%s1283_s3 + $0x10] sm:$0xff] %v764_v4 }
 0x129   :  { %v765_v6 = vsel %vm757_vm3, %v751_v3, %v761_v5 }
 0x12a   :  { %769 = vst [vmem:[%s1283_s3 + $0x18] sm:$0xff] %v765_v6 }

// kernel: dispnet_bi_forward.51
= control target key start
LH: loop header
LB: loop body
LE: loop exit
PB: predicated region body
PF: predicated region fallthrough
CT: control target
= control target key end

     0   :  { %vm1158_vm0 = vmmov 0   ;;  %s1431_s1 = inlined_call_operand.vmem [shape: bf16[1152,128], index: 1, kind: input, shape index: {}]   ;;  %s1432_s0 = inlined_call_operand.vmem [shape: bf16[16,1152], index: 0, kind: input, shape index: {}]   ;;  %s1433_s2 = inlined_call_operand.vmem [shape: f32[1,128], index: 2, kind: input, shape index: {}]   ;;  %s1434_s3 = inlined_call_operand.vmem [shape: f32[16,128], index: 3, kind: output, shape index: {}]  }
   0x1   :  { %v1072_v0 = vld [vmem:[%s1431_s1 + $0x40] sm:$0xff]   ;;  %v1076_v4 = vld [vmem:[%s1431_s1 + $0x48] sm:$0xff]   ;;  %v1080_v8 = vld [vmem:[%s1431_s1 + $0x50] sm:$0xff]  }
   0x2   :  { %v1073_v1 = vld [vmem:[%s1431_s1] sm:$0xff]   ;;  %953 = vmatprep.subr.bf16.mxu0 %v1072_v0  ;;  %v1077_v5 = vld [vmem:[%s1431_s1 + $0x8] sm:$0xff]   ;;  %v1081_v9 = vld [vmem:[%s1431_s1 + $0x10] sm:$0xff]  }
   0x3   :  { %v1074_v2 = vld [vmem:[%s1431_s1 + $0xc0] sm:$0xff]   ;;  %954 = vmatpush3.bf16.msra.mxu0 %v1073_v1  ;;  %v1078_v6 = vld [vmem:[%s1431_s1 + $0xc8] sm:$0xff]   ;;  %v1082_v10 = vld [vmem:[%s1431_s1 + $0xd0] sm:$0xff]  }
   0x4   :  { %v1075_v3 = vld [vmem:[%s1431_s1 + $0x80] sm:$0xff]   ;;  %975 = vmatprep.subr.bf16.mxu1 %v1074_v2  ;;  %955 = vmatprep.subr.bf16.mxu0 %v1076_v4  ;;  %v1079_v7 = vld [vmem:[%s1431_s1 + $0x88] sm:$0xff]   ;;  %v1083_v11 = vld [vmem:[%s1431_s1 + $0x90] sm:$0xff]  }
   0x5   :  { %976 = vmatpush3.bf16.msra.mxu1 %v1075_v3  ;;  %v1084_v12 = vld [vmem:[%s1431_s1 + $0x58] sm:$0xff]   ;;  %v1088_v16 = vld [vmem:[%s1431_s1 + $0x60] sm:$0xff]   ;;  %v1092_v20 = vld [vmem:[%s1431_s1 + $0x68] sm:$0xff]  }
   0x6   :  { %977 = vmatprep.subr.bf16.mxu1 %v1078_v6  ;;  %v1085_v13 = vld [vmem:[%s1431_s1 + $0x18] sm:$0xff]   ;;  %v1089_v17 = vld [vmem:[%s1431_s1 + $0x20] sm:$0xff]   ;;  %v1093_v21 = vld [vmem:[%s1431_s1 + $0x28] sm:$0xff]   ;;  %v1157_v6 = vmov 0.0  }
   0x7   :  { %956 = vmatpush3.bf16.msra.mxu0 %v1077_v5  ;;  %v1086_v14 = vld [vmem:[%s1431_s1 + $0xd8] sm:$0xff]   ;;  %v1090_v18 = vld [vmem:[%s1431_s1 + $0xe0] sm:$0xff]   ;;  %v1094_v22 = vld [vmem:[%s1431_s1 + $0xe8] sm:$0xff]  }
   0x8   :  { %957 = vmatprep.subr.bf16.mxu0 %v1080_v8  ;;  %v1087_v15 = vld [vmem:[%s1431_s1 + $0x98] sm:$0xff]   ;;  %v1091_v19 = vld [vmem:[%s1431_s1 + $0xa0] sm:$0xff]   ;;  %v1095_v23 = vld [vmem:[%s1431_s1 + $0xa8] sm:$0xff]  }
   0x9   :  { %978 = vmatpush3.bf16.msra.mxu1 %v1079_v7  ;;  %v1096_v24 = vld [vmem:[%s1431_s1 + $0x70] sm:$0xff]   ;;  %v1100_v28 = vld [vmem:[%s1431_s1 + $0x78] sm:$0xff]   ;;  %v1103_v31 = vld [vmem:[%s1432_s0] ss:$36 sps:$4 sm:$0xff]  }
   0xa   :  { %979 = vmatprep.subr.bf16.mxu1 %v1082_v10  ;;  %v1097_v25 = vld [vmem:[%s1431_s1 + $0x30] sm:$0xff]   ;;  %v1101_v29 = vld [vmem:[%s1431_s1 + $0x38] sm:$0xff]   ;;  %v1105_v32 = vld [vmem:[%s1432_s0 + $0x4] ss:$36 sps:$4 sm:$0xff]  }
   0xb   :  { %958 = vmatpush3.bf16.msra.mxu0 %v1081_v9  ;;  %v1098_v26 = vld [vmem:[%s1431_s1 + $0xf0] sm:$0xff]   ;;  %v1102_v30 = vld [vmem:[%s1431_s1 + $0xf8] sm:$0xff]   ;;  %686 = vmatprep.mubr.bf16.mxu0 %v1105_v32  ;;  %v1107_v34 = vld [vmem:[%s1431_s1 + $0x140] sm:$0xff]  }
   0xc   :  { %959 = vmatprep.subr.bf16.mxu0 %v1084_v12  ;;  %v1099_v27 = vld [vmem:[%s1431_s1 + $0xb0] sm:$0xff]   ;;  %v1106_v33 = vld [vmem:[%s1431_s1 + $0xb8] sm:$0xff]   ;;  %v1108_v35 = vld [vmem:[%s1432_s0 + $0x8] ss:$36 sps:$4 sm:$0xff]  }
   0xd   :  { %980 = vmatpush3.bf16.msra.mxu1 %v1083_v11  ;;  %v1110_v36 = vld [vmem:[%s1432_s0 + $0xc] ss:$36 sps:$4 sm:$0xff]   ;;  %v1111_v37 = vld [vmem:[%s1431_s1 + $0x100] sm:$0xff]   ;;  %v1122_v48 = vld [vmem:[%s1431_s1 + $0x158] sm:$0xff]  }
   0xe   :  { %981 = vmatprep.subr.bf16.mxu1 %v1086_v14  ;;  %727 = vmatprep.mubr.bf16.mxu1 %v1110_v36  ;;  %v1112_v38 = vld [vmem:[%s1431_s1 + $0x1c0] sm:$0xff]   ;;  %v1114_v40 = vld [vmem:[%s1431_s1 + $0x148] sm:$0xff]   ;;  %v1118_v44 = vld [vmem:[%s1431_s1 + $0x150] sm:$0xff]  }
   0xf   :  { %960 = vmatpush3.bf16.msra.mxu0 %v1085_v13  ;;  %v1113_v39 = vld [vmem:[%s1431_s1 + $0x180] sm:$0xff]   ;;  %v1115_v41 = vld [vmem:[%s1431_s1 + $0x108] sm:$0xff]   ;;  %v1119_v45 = vld [vmem:[%s1431_s1 + $0x110] sm:$0xff]  }
  0x10   :  { %961 = vmatprep.subr.bf16.mxu0 %v1088_v16  ;;  %v1116_v42 = vld [vmem:[%s1431_s1 + $0x1c8] sm:$0xff]   ;;  %v1120_v46 = vld [vmem:[%s1431_s1 + $0x1d0] sm:$0xff]   ;;  %v1123_v49 = vld [vmem:[%s1431_s1 + $0x118] sm:$0xff]  }
  0x11   :  { %982 = vmatpush3.bf16.msra.mxu1 %v1087_v15  ;;  %v1117_v43 = vld [vmem:[%s1431_s1 + $0x188] sm:$0xff]   ;;  %v1121_v47 = vld [vmem:[%s1431_s1 + $0x190] sm:$0xff]   ;;  %v1124_v50 = vld [vmem:[%s1431_s1 + $0x1d8] sm:$0xff]  }
  0x12   :  { %983 = vmatprep.subr.bf16.mxu1 %v1090_v18  ;;  %v1125_v51 = vld [vmem:[%s1431_s1 + $0x198] sm:$0xff]   ;;  %v1126_v52 = vld [vmem:[%s1431_s1 + $0x160] sm:$0xff]   ;;  %v1130_v56 = vld [vmem:[%s1431_s1 + $0x168] sm:$0xff]  }
  0x13   :  { %962 = vmatpush3.bf16.msra.mxu0 %v1089_v17  ;;  %v1127_v53 = vld [vmem:[%s1431_s1 + $0x120] sm:$0xff]   ;;  %v1131_v57 = vld [vmem:[%s1431_s1 + $0x128] sm:$0xff]   ;;  %v1134_v60 = vld [vmem:[%s1431_s1 + $0x170] sm:$0xff]  }
  0x14   :  { %963 = vmatprep.subr.bf16.mxu0 %v1092_v20  ;;  %v1128_v54 = vld [vmem:[%s1431_s1 + $0x1e0] sm:$0xff]   ;;  %v1132_v58 = vld [vmem:[%s1431_s1 + $0x1e8] sm:$0xff]   ;;  %v1135_v61 = vld [vmem:[%s1431_s1 + $0x130] sm:$0xff]  }
  0x15   :  { %984 = vmatpush3.bf16.msra.mxu1 %v1091_v19  ;;  %v1129_v55 = vld [vmem:[%s1431_s1 + $0x1a0] sm:$0xff]   ;;  %v1133_v59 = vld [vmem:[%s1431_s1 + $0x1a8] sm:$0xff]   ;;  %v1136_v62 = vld [vmem:[%s1431_s1 + $0x1f0] sm:$0xff]  }
  0x16   :  { %985 = vmatprep.subr.bf16.mxu1 %v1094_v22  ;;  %v1137_v63 = vld [vmem:[%s1431_s1 + $0x1b0] sm:$0xff]   ;;  %v1138_v0 = vld [vmem:[%s1431_s1 + $0x178] sm:$0xff]   ;;  %v1148_v9 = vld [vmem:[%s1431_s1 + $0x200] sm:$0xff]  }
  0x17   :  { %964 = vmatpush3.bf16.msra.mxu0 %v1093_v21  ;;  %v1139_v1 = vld [vmem:[%s1431_s1 + $0x138] sm:$0xff]   ;;  %v1141_v3 = vld [vmem:[%s1432_s0 + $0x10] ss:$36 sps:$4 sm:$0xff]   ;;  %v1149_v10 = vld [vmem:[%s1431_s1 + $0x208] sm:$0xff]  }
  0x18   :  { %965 = vmatprep.subr.bf16.mxu0 %v1096_v24  ;;  %v1140_v2 = vld [vmem:[%s1431_s1 + $0x1f8] sm:$0xff]   ;;  %v1150_v11 = vld [vmem:[%s1431_s1 + $0x210] sm:$0xff]   ;;  %v1152_v13 = vld [vmem:[%s1431_s1 + $0x220] sm:$0xff]  }
  0x19   :  { %986 = vmatpush3.bf16.msra.mxu1 %v1095_v23  ;;  %v1143_v4 = vld [vmem:[%s1432_s0 + $0x14] ss:$36 sps:$4 sm:$0xff]   ;;  %v1147_v8 = vld [vmem:[%s1432_s0 + $0x1c] ss:$36 sps:$4 sm:$0xff]   ;;  %v1153_v14 = vld [vmem:[%s1431_s1 + $0x228] sm:$0xff]  }
  0x1a   :  { %987 = vmatprep.subr.bf16.mxu1 %v1098_v26  ;;  %v1144_v5 = vld [vmem:[%s1431_s1 + $0x1b8] sm:$0xff]   ;;  %v1154_v15 = vld [vmem:[%s1431_s1 + $0x230] sm:$0xff]   ;;  %v1156_v17 = vld [vmem:[%s1432_s0 + $0x20] ss:$36 sps:$4 sm:$0xff]  }
  0x1b   :  { %966 = vmatpush3.bf16.msra.mxu0 %v1097_v25  ;;  %v1145_v7 = vld [vmem:[%s1432_s0 + $0x18] ss:$36 sps:$4 sm:$0xff]   ;;  %v871_v19 = vld [vmem:[%s1433_s2] ss:$0 sm:$0xff] }
  0x1c   :  { %967 = vmatprep.subr.bf16.mxu0 %v1100_v28  ;;  %v1151_v12 = vld [vmem:[%s1431_s1 + $0x218] sm:$0xff]  }
  0x1d   :  { %988 = vmatpush3.bf16.msra.mxu1 %v1099_v27  ;;  %v1155_v16 = vld [vmem:[%s1431_s1 + $0x238] sm:$0xff]  }
  0x1e   :  { %989 = vmatprep.subr.bf16.mxu1 %v1102_v30 }
  0x1f   :  { %968 = vmatpush3.bf16.msra.mxu0 %v1101_v29 }
  0x20   :  { %997 = vmatprep.subr.bf16.mxu0 %v1107_v34 }
  0x21   :  { %990 = vmatpush3.bf16.msra.mxu1 %v1106_v33 }
  0x22   :  { %687 = vmatmul.mubr.bf16.vlgmr.msra.gmra.mrb[0].mxu0 %v1103_v31  ;;  %1019 = vmatprep.subr.bf16.mxu1 %v1112_v38 }
  0x23   :  { %998 = vmatpush3.bf16.msra.mxu0 %v1111_v37  ;;  %768 = vmatprep.mubr.bf16.mxu0 %v1143_v4 }
  0x24   :  { %728 = vmatmul.mubr.bf16.vlgmr.msra.gmra.mrb[0].mxu1 %v1108_v35  ;;  %999 = vmatprep.subr.bf16.mxu0 %v1114_v40 }
  0x25   :  { %1020 = vmatpush3.bf16.msra.mxu1 %v1113_v39  ;;  %809 = vmatprep.mubr.bf16.mxu1 %v1147_v8 }
  0x26   :  { %1021 = vmatprep.subr.bf16.mxu1 %v1116_v42 }
  0x27   :  { %1000 = vmatpush3.bf16.msra.mxu0 %v1115_v41 }
  0x28   :  { %1001 = vmatprep.subr.bf16.mxu0 %v1118_v44 }
  0x29   :  { %1022 = vmatpush3.bf16.msra.mxu1 %v1117_v43 }
  0x2a   :  { %1023 = vmatprep.subr.bf16.mxu1 %v1120_v46 }
  0x2b   :  { %1002 = vmatpush3.bf16.msra.mxu0 %v1119_v45 }
  0x2c   :  { %1003 = vmatprep.subr.bf16.mxu0 %v1122_v48 }
  0x2d   :  { %1024 = vmatpush3.bf16.msra.mxu1 %v1121_v47 }
  0x2e   :  { %1025 = vmatprep.subr.bf16.mxu1 %v1124_v50 }
  0x2f   :  { %1004 = vmatpush3.bf16.msra.mxu0 %v1123_v49 }
  0x30   :  { %1005 = vmatprep.subr.bf16.mxu0 %v1126_v52 }
  0x31   :  { %1026 = vmatpush3.bf16.msra.mxu1 %v1125_v51 }
  0x32   :  { %1027 = vmatprep.subr.bf16.mxu1 %v1128_v54 }
  0x33   :  { %1006 = vmatpush3.bf16.msra.mxu0 %v1127_v53 }
  0x34   :  { %1007 = vmatprep.subr.bf16.mxu0 %v1130_v56 }
  0x35   :  { %1028 = vmatpush3.bf16.msra.mxu1 %v1129_v55 }
  0x36   :  { %1029 = vmatprep.subr.bf16.mxu1 %v1132_v58 }
  0x37   :  { %1008 = vmatpush3.bf16.msra.mxu0 %v1131_v57 }
  0x38   :  { %1009 = vmatprep.subr.bf16.mxu0 %v1134_v60 }
  0x39   :  { %1030 = vmatpush3.bf16.msra.mxu1 %v1133_v59 }
  0x3a   :  { %1031 = vmatprep.subr.bf16.mxu1 %v1136_v62 }
  0x3b   :  { %1010 = vmatpush3.bf16.msra.mxu0 %v1135_v61 }
  0x3c   :  { %1011 = vmatprep.subr.bf16.mxu0 %v1138_v0 }
  0x3d   :  { %1032 = vmatpush3.bf16.msra.mxu1 %v1137_v63 }
  0x3e   :  { %1033 = vmatprep.subr.bf16.mxu1 %v1140_v2 }
  0x3f   :  { %1012 = vmatpush3.bf16.msra.mxu0 %v1139_v1 }
  0x40   :  { %1050 = vmatprep.subr.bf16.mxu0 %v1157_v6 }
  0x41   :  { %1034 = vmatpush3.bf16.msra.mxu1 %v1144_v5 }
  0x42   :  { %769 = vmatmul.mubr.bf16.vlgmr.msra.gmra.mrb[4].mxu0 %v1141_v3 }
  0x43   :  { %1066 = vmatprep.mubr.msk.bf16.mxu0 %vm1158_vm0, %v1157_v6  ;;  %1051 = vmatpush3.bf16.msra.mxu0 %v1148_v9 }
  0x44   :  { %810 = vmatmul.mubr.bf16.vlgmr.msra.gmra.mrb[4].mxu1 %v1145_v7  ;;  %1052 = vmatprep.subr.bf16.mxu0 %v1157_v6 }
  0x47   :  { %1053 = vmatpush3.bf16.msra.mxu0 %v1149_v10 }
  0x48   :  { %1054 = vmatprep.subr.bf16.mxu0 %v1157_v6 }
  0x4b   :  { %1055 = vmatpush3.bf16.msra.mxu0 %v1150_v11 }
  0x4c   :  { %1056 = vmatprep.subr.bf16.mxu0 %v1157_v6 }
  0x4f   :  { %1057 = vmatpush3.bf16.msra.mxu0 %v1151_v12 }
  0x50   :  { %1058 = vmatprep.subr.bf16.mxu0 %v1157_v6 }
  0x53   :  { %1059 = vmatpush3.bf16.msra.mxu0 %v1152_v13 }
  0x54   :  { %1060 = vmatprep.subr.bf16.mxu0 %v1157_v6 }
  0x57   :  { %1061 = vmatpush3.bf16.msra.mxu0 %v1153_v14 }
  0x58   :  { %1062 = vmatprep.subr.bf16.mxu0 %v1157_v6 }
  0x5b   :  { %1063 = vmatpush3.bf16.msra.mxu0 %v1154_v15 }
  0x5c   :  { %1064 = vmatprep.subr.bf16.mxu0 %v1157_v6 }
  0x5f   :  { %1065 = vmatpush3.bf16.msra.mxu0 %v1155_v16 }
  0x62   :  { %1067 = vmatmul.mubr.bf16.vlgmr.msra.gmra.mrb[8].mxu0 %v1156_v17 }
  0xf5   :  { %v969_v18 = vpop.f32.mrb[0].mxu0 }
  0xf6   :  { %v970_v20 = vpop.f32.mrb[1].mxu0 }
  0xf7   :  { %v971_v21 = vadd.f32 %v970_v20, %v969_v18  ;;  %v972_v22 = vpop.f32.mrb[2].mxu0  ;;  %v991_v23 = vpop.f32.mrb[0].mxu1 }
  0xf8   :  { %v973_v24 = vpop.f32.mrb[3].mxu0  ;;  %v992_v27 = vpop.f32.mrb[1].mxu1 }
  0xf9   :  { %v689_v25 = vadd.f32 %v971_v21, %v871_v19  ;;  %v974_v26 = vadd.f32 %v973_v24, %v972_v22  ;;  %v993_v28 = vadd.f32 %v992_v27, %v991_v23  ;;  %v994_v29 = vpop.f32.mrb[2].mxu1 }
  0xfa   :  { %v995_v31 = vpop.f32.mrb[3].mxu1 }
  0xfb   :  { %v692_v30 = vadd.f32 %v974_v26, %v871_v19  ;;  %v730_v32 = vadd.f32 %v993_v28, %v689_v25  ;;  %v996_v33 = vadd.f32 %v995_v31, %v994_v29 }
  0xfd   :  { %v733_v34 = vadd.f32 %v996_v33, %v692_v30 }
 0x115   :  { %v1013_v35 = vpop.f32.mrb[4].mxu0 }
 0x116   :  { %v1014_v36 = vpop.f32.mrb[5].mxu0 }
 0x117   :  { %v1015_v37 = vadd.f32 %v1014_v36, %v1013_v35  ;;  %v1016_v38 = vpop.f32.mrb[6].mxu0  ;;  %v1035_v39 = vpop.f32.mrb[4].mxu1 }
 0x118   :  { %v1017_v40 = vpop.f32.mrb[7].mxu0  ;;  %v1036_v43 = vpop.f32.mrb[5].mxu1 }
 0x119   :  { %v771_v41 = vadd.f32 %v1015_v37, %v730_v32  ;;  %v1018_v42 = vadd.f32 %v1017_v40, %v1016_v38  ;;  %v1037_v44 = vadd.f32 %v1036_v43, %v1035_v39  ;;  %v1038_v45 = vpop.f32.mrb[6].mxu1 }
 0x11a   :  { %v1039_v47 = vpop.f32.mrb[7].mxu1 }
 0x11b   :  { %v774_v46 = vadd.f32 %v1018_v42, %v733_v34  ;;  %v1040_v48 = vadd.f32 %v1039_v47, %v1038_v45  ;;  %v812_v49 = vadd.f32 %v1037_v44, %v771_v41 }
 0x11d   :  { %v815_v50 = vadd.f32 %v1040_v48, %v774_v46 }
 0x135   :  { %v852_v51 = vpop.f32.mrb[8].mxu0 }
 0x136   :  { %v853_v52 = vadd.f32 %v852_v51, %v812_v49  ;;  %v1068_v53 = vpop.f32.mrb[9].mxu0 }
 0x137   :  { %v855_v54 = vpop.f32.mrb[10].mxu0 }
 0x138   :  { %vm859_vm1 = vcmp.ge.f32.partialorder %v853_v52, 0.0  ;;  %v861_v55 = vmul.f32 0.1, %v853_v52  ;;  %v856_v56 = vadd.f32 %v855_v54, %v815_v50  ;;  %v1069_v57 = vpop.f32.mrb[11].mxu0 }
 0x13a   :  { %v863_v58 = vsel %vm859_vm1, %v853_v52, %v861_v55  ;;  %vm860_vm2 = vcmp.ge.f32.partialorder %v856_v56, 0.0  ;;  %v862_v59 = vmul.f32 0.1, %v856_v56 }
 0x13b   :  { %865 = vst [vmem:[%s1434_s3] sm:$0xff] %v863_v58 }
 0x13c   :  { %v864_v60 = vsel %vm860_vm2, %v856_v56, %v862_v59 }
 0x13d   :  { %866 = vst [vmem:[%s1434_s3 + $0x8] sm:$0xff] %v864_v60 }

// kernel: dispnet_bi_forward.50
= control target key start
LH: loop header
LB: loop body
LE: loop exit
PB: predicated region body
PF: predicated region fallthrough
CT: control target
= control target key end

     0   :  { %v917_v38 = vmov 0.0   ;;  %vm918_vm0 = vmmov 0   ;;  %s1137_s1 = inlined_call_operand.vmem [shape: bf16[896,128], index: 1, kind: input, shape index: {}]   ;;  %s1138_s0 = inlined_call_operand.vmem [shape: bf16[16,896], index: 0, kind: input, shape index: {}]   ;;  %s1139_s2 = inlined_call_operand.vmem [shape: f32[1,128], index: 2, kind: input, shape index: {}]   ;;  %s1140_s3 = inlined_call_operand.vmem [shape: f32[16,128], index: 3, kind: output, shape index: {}]  }
   0x1   :  { %v851_v0 = vld [vmem:[%s1137_s1 + $0x40] sm:$0xff]   ;;  %v855_v4 = vld [vmem:[%s1137_s1 + $0x48] sm:$0xff]   ;;  %v859_v8 = vld [vmem:[%s1137_s1 + $0x50] sm:$0xff]  }
   0x2   :  { %v852_v1 = vld [vmem:[%s1137_s1] sm:$0xff]   ;;  %754 = vmatprep.subr.bf16.mxu0 %v851_v0  ;;  %v856_v5 = vld [vmem:[%s1137_s1 + $0x8] sm:$0xff]   ;;  %v860_v9 = vld [vmem:[%s1137_s1 + $0x10] sm:$0xff]  }
   0x3   :  { %v853_v2 = vld [vmem:[%s1137_s1 + $0xc0] sm:$0xff]   ;;  %755 = vmatpush3.bf16.msra.mxu0 %v852_v1  ;;  %v857_v6 = vld [vmem:[%s1137_s1 + $0xc8] sm:$0xff]   ;;  %v861_v10 = vld [vmem:[%s1137_s1 + $0xd0] sm:$0xff]  }
   0x4   :  { %v854_v3 = vld [vmem:[%s1137_s1 + $0x80] sm:$0xff]   ;;  %776 = vmatprep.subr.bf16.mxu1 %v853_v2  ;;  %756 = vmatprep.subr.bf16.mxu0 %v855_v4  ;;  %v858_v7 = vld [vmem:[%s1137_s1 + $0x88] sm:$0xff]   ;;  %v862_v11 = vld [vmem:[%s1137_s1 + $0x90] sm:$0xff]  }
   0x5   :  { %777 = vmatpush3.bf16.msra.mxu1 %v854_v3  ;;  %v863_v12 = vld [vmem:[%s1137_s1 + $0x58] sm:$0xff]   ;;  %v867_v16 = vld [vmem:[%s1137_s1 + $0x60] sm:$0xff]   ;;  %v871_v20 = vld [vmem:[%s1137_s1 + $0x68] sm:$0xff]  }
   0x6   :  { %778 = vmatprep.subr.bf16.mxu1 %v857_v6  ;;  %v864_v13 = vld [vmem:[%s1137_s1 + $0x18] sm:$0xff]   ;;  %v868_v17 = vld [vmem:[%s1137_s1 + $0x20] sm:$0xff]   ;;  %v872_v21 = vld [vmem:[%s1137_s1 + $0x28] sm:$0xff]  }
   0x7   :  { %757 = vmatpush3.bf16.msra.mxu0 %v856_v5  ;;  %v865_v14 = vld [vmem:[%s1137_s1 + $0xd8] sm:$0xff]   ;;  %v869_v18 = vld [vmem:[%s1137_s1 + $0xe0] sm:$0xff]   ;;  %v873_v22 = vld [vmem:[%s1137_s1 + $0xe8] sm:$0xff]  }
   0x8   :  { %758 = vmatprep.subr.bf16.mxu0 %v859_v8  ;;  %v866_v15 = vld [vmem:[%s1137_s1 + $0x98] sm:$0xff]   ;;  %v870_v19 = vld [vmem:[%s1137_s1 + $0xa0] sm:$0xff]   ;;  %v874_v23 = vld [vmem:[%s1137_s1 + $0xa8] sm:$0xff]  }
   0x9   :  { %779 = vmatpush3.bf16.msra.mxu1 %v858_v7  ;;  %v875_v24 = vld [vmem:[%s1137_s1 + $0x70] sm:$0xff]   ;;  %v879_v28 = vld [vmem:[%s1137_s1 + $0x78] sm:$0xff]   ;;  %v884_v32 = vld [vmem:[%s1138_s0 + $0x4] ss:$28 sps:$4 sm:$0xff]  }
   0xa   :  { %780 = vmatprep.subr.bf16.mxu1 %v861_v10  ;;  %v876_v25 = vld [vmem:[%s1137_s1 + $0x30] sm:$0xff]   ;;  %v880_v29 = vld [vmem:[%s1137_s1 + $0x38] sm:$0xff]   ;;  %546 = vmatprep.mubr.bf16.mxu0 %v884_v32  ;;  %v886_v34 = vld [vmem:[%s1137_s1 + $0x140] sm:$0xff]  }
   0xb   :  { %759 = vmatpush3.bf16.msra.mxu0 %v860_v9  ;;  %v877_v26 = vld [vmem:[%s1137_s1 + $0xf0] sm:$0xff]   ;;  %v881_v30 = vld [vmem:[%s1137_s1 + $0xf8] sm:$0xff]   ;;  %v887_v35 = vld [vmem:[%s1138_s0 + $0x8] ss:$28 sps:$4 sm:$0xff]  }
   0xc   :  { %760 = vmatprep.subr.bf16.mxu0 %v863_v12  ;;  %v878_v27 = vld [vmem:[%s1137_s1 + $0xb0] sm:$0xff]   ;;  %v882_v31 = vld [vmem:[%s1138_s0] ss:$28 sps:$4 sm:$0xff]   ;;  %v889_v36 = vld [vmem:[%s1138_s0 + $0xc] ss:$28 sps:$4 sm:$0xff]  }
   0xd   :  { %781 = vmatpush3.bf16.msra.mxu1 %v862_v11  ;;  %v885_v33 = vld [vmem:[%s1137_s1 + $0xb8] sm:$0xff]   ;;  %v890_v37 = vld [vmem:[%s1137_s1 + $0x100] sm:$0xff]   ;;  %587 = vmatprep.mubr.bf16.mxu1 %v889_v36  ;;  %v892_v40 = vld [vmem:[%s1137_s1 + $0x148] sm:$0xff]  }
   0xe   :  { %782 = vmatprep.subr.bf16.mxu1 %v865_v14  ;;  %v891_v39 = vld [vmem:[%s1137_s1 + $0x180] sm:$0xff]   ;;  %v893_v41 = vld [vmem:[%s1137_s1 + $0x108] sm:$0xff]   ;;  %v895_v43 = vld [vmem:[%s1137_s1 + $0x150] sm:$0xff]  }
   0xf   :  { %761 = vmatpush3.bf16.msra.mxu0 %v864_v13  ;;  %v894_v42 = vld [vmem:[%s1137_s1 + $0x188] sm:$0xff]   ;;  %v896_v44 = vld [vmem:[%s1137_s1 + $0x110] sm:$0xff]   ;;  %v898_v46 = vld [vmem:[%s1137_s1 + $0x158] sm:$0xff]  }
  0x10   :  { %762 = vmatprep.subr.bf16.mxu0 %v867_v16  ;;  %v897_v45 = vld [vmem:[%s1137_s1 + $0x190] sm:$0xff]   ;;  %v899_v47 = vld [vmem:[%s1137_s1 + $0x118] sm:$0xff]   ;;  %v901_v49 = vld [vmem:[%s1137_s1 + $0x160] sm:$0xff]  }
  0x11   :  { %783 = vmatpush3.bf16.msra.mxu1 %v866_v15  ;;  %v900_v48 = vld [vmem:[%s1137_s1 + $0x198] sm:$0xff]   ;;  %v902_v50 = vld [vmem:[%s1137_s1 + $0x120] sm:$0xff]   ;;  %v904_v52 = vld [vmem:[%s1137_s1 + $0x168] sm:$0xff]  }
  0x12   :  { %784 = vmatprep.subr.bf16.mxu1 %v869_v18  ;;  %v903_v51 = vld [vmem:[%s1137_s1 + $0x1a0] sm:$0xff]   ;;  %v905_v53 = vld [vmem:[%s1137_s1 + $0x128] sm:$0xff]   ;;  %v907_v55 = vld [vmem:[%s1137_s1 + $0x170] sm:$0xff]  }
  0x13   :  { %763 = vmatpush3.bf16.msra.mxu0 %v868_v17  ;;  %v906_v54 = vld [vmem:[%s1137_s1 + $0x1a8] sm:$0xff]   ;;  %v908_v56 = vld [vmem:[%s1137_s1 + $0x130] sm:$0xff]   ;;  %v910_v59 = vld [vmem:[%s1137_s1 + $0x178] sm:$0xff]  }
  0x14   :  { %764 = vmatprep.subr.bf16.mxu0 %v871_v20  ;;  %v909_v57 = vld [vmem:[%s1137_s1 + $0x1b0] sm:$0xff]   ;;  %v911_v60 = vld [vmem:[%s1137_s1 + $0x138] sm:$0xff]   ;;  %v690_v1 = vld [vmem:[%s1139_s2] ss:$0 sm:$0xff] }
  0x15   :  { %785 = vmatpush3.bf16.msra.mxu1 %v870_v19  ;;  %v914_v58 = vld [vmem:[%s1138_s0 + $0x14] ss:$28 sps:$4 sm:$0xff]   ;;  %v915_v61 = vld [vmem:[%s1137_s1 + $0x1b8] sm:$0xff]  }
  0x16   :  { %786 = vmatprep.subr.bf16.mxu1 %v873_v22  ;;  %v912_v62 = vld [vmem:[%s1138_s0 + $0x10] ss:$28 sps:$4 sm:$0xff]   ;;  %v916_v63 = vld [vmem:[%s1138_s0 + $0x18] ss:$28 sps:$4 sm:$0xff]  }
  0x17   :  { %765 = vmatpush3.bf16.msra.mxu0 %v872_v21 }
  0x18   :  { %766 = vmatprep.subr.bf16.mxu0 %v875_v24 }
  0x19   :  { %787 = vmatpush3.bf16.msra.mxu1 %v874_v23 }
  0x1a   :  { %788 = vmatprep.subr.bf16.mxu1 %v877_v26 }
  0x1b   :  { %767 = vmatpush3.bf16.msra.mxu0 %v876_v25 }
  0x1c   :  { %768 = vmatprep.subr.bf16.mxu0 %v879_v28 }
  0x1d   :  { %789 = vmatpush3.bf16.msra.mxu1 %v878_v27 }
  0x1e   :  { %790 = vmatprep.subr.bf16.mxu1 %v881_v30 }
  0x1f   :  { %769 = vmatpush3.bf16.msra.mxu0 %v880_v29 }
  0x20   :  { %798 = vmatprep.subr.bf16.mxu0 %v886_v34 }
  0x21   :  { %791 = vmatpush3.bf16.msra.mxu1 %v885_v33 }
  0x22   :  { %547 = vmatmul.mubr.bf16.vlgmr.msra.gmra.mrb[0].mxu0 %v882_v31  ;;  %829 = vmatprep.subr.bf16.mxu1 %v917_v38 }
  0x23   :  { %799 = vmatpush3.bf16.msra.mxu0 %v890_v37  ;;  %628 = vmatprep.mubr.bf16.mxu0 %v914_v58 }
  0x24   :  { %588 = vmatmul.mubr.bf16.vlgmr.msra.gmra.mrb[0].mxu1 %v887_v35  ;;  %800 = vmatprep.subr.bf16.mxu0 %v892_v40 }
  0x25   :  { %830 = vmatpush3.bf16.msra.mxu1 %v891_v39  ;;  %845 = vmatprep.mubr.msk.bf16.mxu1 %vm918_vm0, %v917_v38 }
  0x26   :  { %831 = vmatprep.subr.bf16.mxu1 %v917_v38 }
  0x27   :  { %801 = vmatpush3.bf16.msra.mxu0 %v893_v41 }
  0x28   :  { %802 = vmatprep.subr.bf16.mxu0 %v895_v43 }
  0x29   :  { %832 = vmatpush3.bf16.msra.mxu1 %v894_v42 }
  0x2a   :  { %833 = vmatprep.subr.bf16.mxu1 %v917_v38 }
  0x2b   :  { %803 = vmatpush3.bf16.msra.mxu0 %v896_v44 }
  0x2c   :  { %804 = vmatprep.subr.bf16.mxu0 %v898_v46 }
  0x2d   :  { %834 = vmatpush3.bf16.msra.mxu1 %v897_v45 }
  0x2e   :  { %835 = vmatprep.subr.bf16.mxu1 %v917_v38 }
  0x2f   :  { %805 = vmatpush3.bf16.msra.mxu0 %v899_v47 }
  0x30   :  { %806 = vmatprep.subr.bf16.mxu0 %v901_v49 }
  0x31   :  { %836 = vmatpush3.bf16.msra.mxu1 %v900_v48 }
  0x32   :  { %837 = vmatprep.subr.bf16.mxu1 %v917_v38 }
  0x33   :  { %807 = vmatpush3.bf16.msra.mxu0 %v902_v50 }
  0x34   :  { %808 = vmatprep.subr.bf16.mxu0 %v904_v52 }
  0x35   :  { %838 = vmatpush3.bf16.msra.mxu1 %v903_v51 }
  0x36   :  { %839 = vmatprep.subr.bf16.mxu1 %v917_v38 }
  0x37   :  { %809 = vmatpush3.bf16.msra.mxu0 %v905_v53 }
  0x38   :  { %810 = vmatprep.subr.bf16.mxu0 %v907_v55 }
  0x39   :  { %840 = vmatpush3.bf16.msra.mxu1 %v906_v54 }
  0x3a   :  { %841 = vmatprep.subr.bf16.mxu1 %v917_v38 }
  0x3b   :  { %811 = vmatpush3.bf16.msra.mxu0 %v908_v56 }
  0x3c   :  { %812 = vmatprep.subr.bf16.mxu0 %v910_v59 }
  0x3d   :  { %842 = vmatpush3.bf16.msra.mxu1 %v909_v57 }
  0x3e   :  { %843 = vmatprep.subr.bf16.mxu1 %v917_v38 }
  0x3f   :  { %813 = vmatpush3.bf16.msra.mxu0 %v911_v60 }
  0x41   :  { %844 = vmatpush3.bf16.msra.mxu1 %v915_v61 }
  0x42   :  { %629 = vmatmul.mubr.bf16.vlgmr.msra.gmra.mrb[4].mxu0 %v912_v62 }
  0x44   :  { %846 = vmatmul.mubr.bf16.vlgmr.msra.gmra.mrb[4].mxu1 %v916_v63 }
  0xf5   :  { %v770_v0 = vpop.f32.mrb[0].mxu0 }
  0xf6   :  { %v771_v2 = vpop.f32.mrb[1].mxu0 }
  0xf7   :  { %v772_v3 = vadd.f32 %v771_v2, %v770_v0  ;;  %v773_v4 = vpop.f32.mrb[2].mxu0  ;;  %v792_v5 = vpop.f32.mrb[0].mxu1 }
  0xf8   :  { %v774_v6 = vpop.f32.mrb[3].mxu0  ;;  %v793_v9 = vpop.f32.mrb[1].mxu1 }
  0xf9   :  { %v549_v7 = vadd.f32 %v772_v3, %v690_v1  ;;  %v775_v8 = vadd.f32 %v774_v6, %v773_v4  ;;  %v794_v10 = vadd.f32 %v793_v9, %v792_v5  ;;  %v795_v11 = vpop.f32.mrb[2].mxu1 }
  0xfa   :  { %v796_v13 = vpop.f32.mrb[3].mxu1 }
  0xfb   :  { %v552_v12 = vadd.f32 %v775_v8, %v690_v1  ;;  %v590_v14 = vadd.f32 %v794_v10, %v549_v7  ;;  %v797_v15 = vadd.f32 %v796_v13, %v795_v11 }
  0xfd   :  { %v593_v16 = vadd.f32 %v797_v15, %v552_v12 }
 0x115   :  { %v814_v17 = vpop.f32.mrb[4].mxu0 }
 0x116   :  { %v815_v18 = vpop.f32.mrb[5].mxu0 }
 0x117   :  { %v671_v19 = vpop.f32.mrb[4].mxu1  ;;  %v816_v20 = vadd.f32 %v815_v18, %v814_v17  ;;  %v817_v21 = vpop.f32.mrb[6].mxu0 }
 0x118   :  { %v847_v22 = vpop.f32.mrb[5].mxu1  ;;  %v818_v23 = vpop.f32.mrb[7].mxu0 }
 0x119   :  { %v674_v24 = vpop.f32.mrb[6].mxu1  ;;  %v631_v25 = vadd.f32 %v816_v20, %v590_v14  ;;  %v819_v26 = vadd.f32 %v818_v23, %v817_v21 }
 0x11a   :  { %v848_v27 = vpop.f32.mrb[7].mxu1 }
 0x11b   :  { %v672_v28 = vadd.f32 %v671_v19, %v631_v25  ;;  %v634_v29 = vadd.f32 %v819_v26, %v593_v16 }
 0x11d   :  { %vm678_vm1 = vcmp.ge.f32.partialorder %v672_v28, 0.0  ;;  %v680_v30 = vmul.f32 0.1, %v672_v28  ;;  %v675_v31 = vadd.f32 %v674_v24, %v634_v29 }
 0x11f   :  { %v682_v32 = vsel %vm678_vm1, %v672_v28, %v680_v30  ;;  %vm679_vm2 = vcmp.ge.f32.partialorder %v675_v31, 0.0  ;;  %v681_v33 = vmul.f32 0.1, %v675_v31 }
 0x120   :  { %684 = vst [vmem:[%s1140_s3] sm:$0xff] %v682_v32 }
 0x121   :  { %v683_v34 = vsel %vm679_vm2, %v675_v31, %v681_v33 }
 0x122   :  { %685 = vst [vmem:[%s1140_s3 + $0x8] sm:$0xff] %v683_v34 }

// kernel: dispnet_bi_forward.64
= control target key start
LH: loop header
LB: loop body
LE: loop exit
PB: predicated region body
PF: predicated region fallthrough
CT: control target
= control target key end

     0   :  { %vm1152_vm0 = vmmov 0   ;;  %s1425_s1 = inlined_call_operand.vmem [shape: bf16[1152,128], index: 1, kind: input, shape index: {}]   ;;  %s1426_s0 = inlined_call_operand.vmem [shape: bf16[16,1152], index: 0, kind: input, shape index: {}]   ;;  %s1427_s2 = inlined_call_operand.vmem [shape: f32[1,128], index: 2, kind: input, shape index: {}]   ;;  %s1428_s3 = inlined_call_operand.vmem [shape: f32[16,128], index: 3, kind: output, shape index: {}]  }
   0x1   :  { %v1066_v0 = vld [vmem:[%s1425_s1 + $0x40] sm:$0xff]   ;;  %v1070_v4 = vld [vmem:[%s1425_s1 + $0x48] sm:$0xff]   ;;  %v1074_v8 = vld [vmem:[%s1425_s1 + $0x50] sm:$0xff]  }
   0x2   :  { %v1067_v1 = vld [vmem:[%s1425_s1] sm:$0xff]   ;;  %947 = vmatprep.subr.bf16.mxu0 %v1066_v0  ;;  %v1071_v5 = vld [vmem:[%s1425_s1 + $0x8] sm:$0xff]   ;;  %v1075_v9 = vld [vmem:[%s1425_s1 + $0x10] sm:$0xff]  }
   0x3   :  { %v1068_v2 = vld [vmem:[%s1425_s1 + $0xc0] sm:$0xff]   ;;  %948 = vmatpush3.bf16.msra.mxu0 %v1067_v1  ;;  %v1072_v6 = vld [vmem:[%s1425_s1 + $0xc8] sm:$0xff]   ;;  %v1076_v10 = vld [vmem:[%s1425_s1 + $0xd0] sm:$0xff]  }
   0x4   :  { %v1069_v3 = vld [vmem:[%s1425_s1 + $0x80] sm:$0xff]   ;;  %969 = vmatprep.subr.bf16.mxu1 %v1068_v2  ;;  %949 = vmatprep.subr.bf16.mxu0 %v1070_v4  ;;  %v1073_v7 = vld [vmem:[%s1425_s1 + $0x88] sm:$0xff]   ;;  %v1077_v11 = vld [vmem:[%s1425_s1 + $0x90] sm:$0xff]  }
   0x5   :  { %970 = vmatpush3.bf16.msra.mxu1 %v1069_v3  ;;  %v1078_v12 = vld [vmem:[%s1425_s1 + $0x58] sm:$0xff]   ;;  %v1082_v16 = vld [vmem:[%s1425_s1 + $0x60] sm:$0xff]   ;;  %v1086_v20 = vld [vmem:[%s1425_s1 + $0x68] sm:$0xff]  }
   0x6   :  { %971 = vmatprep.subr.bf16.mxu1 %v1072_v6  ;;  %v1079_v13 = vld [vmem:[%s1425_s1 + $0x18] sm:$0xff]   ;;  %v1083_v17 = vld [vmem:[%s1425_s1 + $0x20] sm:$0xff]   ;;  %v1087_v21 = vld [vmem:[%s1425_s1 + $0x28] sm:$0xff]   ;;  %v1151_v6 = vmov 0.0  }
   0x7   :  { %950 = vmatpush3.bf16.msra.mxu0 %v1071_v5  ;;  %v1080_v14 = vld [vmem:[%s1425_s1 + $0xd8] sm:$0xff]   ;;  %v1084_v18 = vld [vmem:[%s1425_s1 + $0xe0] sm:$0xff]   ;;  %v1088_v22 = vld [vmem:[%s1425_s1 + $0xe8] sm:$0xff]  }
   0x8   :  { %951 = vmatprep.subr.bf16.mxu0 %v1074_v8  ;;  %v1081_v15 = vld [vmem:[%s1425_s1 + $0x98] sm:$0xff]   ;;  %v1085_v19 = vld [vmem:[%s1425_s1 + $0xa0] sm:$0xff]   ;;  %v1089_v23 = vld [vmem:[%s1425_s1 + $0xa8] sm:$0xff]  }
   0x9   :  { %972 = vmatpush3.bf16.msra.mxu1 %v1073_v7  ;;  %v1090_v24 = vld [vmem:[%s1425_s1 + $0x70] sm:$0xff]   ;;  %v1094_v28 = vld [vmem:[%s1425_s1 + $0x78] sm:$0xff]   ;;  %v1097_v31 = vld [vmem:[%s1426_s0] ss:$36 sps:$4 sm:$0xff]  }
   0xa   :  { %973 = vmatprep.subr.bf16.mxu1 %v1076_v10  ;;  %v1091_v25 = vld [vmem:[%s1425_s1 + $0x30] sm:$0xff]   ;;  %v1095_v29 = vld [vmem:[%s1425_s1 + $0x38] sm:$0xff]   ;;  %v1099_v32 = vld [vmem:[%s1426_s0 + $0x4] ss:$36 sps:$4 sm:$0xff]  }
   0xb   :  { %952 = vmatpush3.bf16.msra.mxu0 %v1075_v9  ;;  %v1092_v26 = vld [vmem:[%s1425_s1 + $0xf0] sm:$0xff]   ;;  %v1096_v30 = vld [vmem:[%s1425_s1 + $0xf8] sm:$0xff]   ;;  %686 = vmatprep.mubr.bf16.mxu0 %v1099_v32  ;;  %v1101_v34 = vld [vmem:[%s1425_s1 + $0x140] sm:$0xff]  }
   0xc   :  { %953 = vmatprep.subr.bf16.mxu0 %v1078_v12  ;;  %v1093_v27 = vld [vmem:[%s1425_s1 + $0xb0] sm:$0xff]   ;;  %v1100_v33 = vld [vmem:[%s1425_s1 + $0xb8] sm:$0xff]   ;;  %v1102_v35 = vld [vmem:[%s1426_s0 + $0x8] ss:$36 sps:$4 sm:$0xff]  }
   0xd   :  { %974 = vmatpush3.bf16.msra.mxu1 %v1077_v11  ;;  %v1104_v36 = vld [vmem:[%s1426_s0 + $0xc] ss:$36 sps:$4 sm:$0xff]   ;;  %v1105_v37 = vld [vmem:[%s1425_s1 + $0x100] sm:$0xff]   ;;  %v1116_v48 = vld [vmem:[%s1425_s1 + $0x158] sm:$0xff]  }
   0xe   :  { %975 = vmatprep.subr.bf16.mxu1 %v1080_v14  ;;  %727 = vmatprep.mubr.bf16.mxu1 %v1104_v36  ;;  %v1106_v38 = vld [vmem:[%s1425_s1 + $0x1c0] sm:$0xff]   ;;  %v1108_v40 = vld [vmem:[%s1425_s1 + $0x148] sm:$0xff]   ;;  %v1112_v44 = vld [vmem:[%s1425_s1 + $0x150] sm:$0xff]  }
   0xf   :  { %954 = vmatpush3.bf16.msra.mxu0 %v1079_v13  ;;  %v1107_v39 = vld [vmem:[%s1425_s1 + $0x180] sm:$0xff]   ;;  %v1109_v41 = vld [vmem:[%s1425_s1 + $0x108] sm:$0xff]   ;;  %v1113_v45 = vld [vmem:[%s1425_s1 + $0x110] sm:$0xff]  }
  0x10   :  { %955 = vmatprep.subr.bf16.mxu0 %v1082_v16  ;;  %v1110_v42 = vld [vmem:[%s1425_s1 + $0x1c8] sm:$0xff]   ;;  %v1114_v46 = vld [vmem:[%s1425_s1 + $0x1d0] sm:$0xff]   ;;  %v1117_v49 = vld [vmem:[%s1425_s1 + $0x118] sm:$0xff]  }
  0x11   :  { %976 = vmatpush3.bf16.msra.mxu1 %v1081_v15  ;;  %v1111_v43 = vld [vmem:[%s1425_s1 + $0x188] sm:$0xff]   ;;  %v1115_v47 = vld [vmem:[%s1425_s1 + $0x190] sm:$0xff]   ;;  %v1118_v50 = vld [vmem:[%s1425_s1 + $0x1d8] sm:$0xff]  }
  0x12   :  { %977 = vmatprep.subr.bf16.mxu1 %v1084_v18  ;;  %v1119_v51 = vld [vmem:[%s1425_s1 + $0x198] sm:$0xff]   ;;  %v1120_v52 = vld [vmem:[%s1425_s1 + $0x160] sm:$0xff]   ;;  %v1124_v56 = vld [vmem:[%s1425_s1 + $0x168] sm:$0xff]  }
  0x13   :  { %956 = vmatpush3.bf16.msra.mxu0 %v1083_v17  ;;  %v1121_v53 = vld [vmem:[%s1425_s1 + $0x120] sm:$0xff]   ;;  %v1125_v57 = vld [vmem:[%s1425_s1 + $0x128] sm:$0xff]   ;;  %v1128_v60 = vld [vmem:[%s1425_s1 + $0x170] sm:$0xff]  }
  0x14   :  { %957 = vmatprep.subr.bf16.mxu0 %v1086_v20  ;;  %v1122_v54 = vld [vmem:[%s1425_s1 + $0x1e0] sm:$0xff]   ;;  %v1126_v58 = vld [vmem:[%s1425_s1 + $0x1e8] sm:$0xff]   ;;  %v1129_v61 = vld [vmem:[%s1425_s1 + $0x130] sm:$0xff]  }
  0x15   :  { %978 = vmatpush3.bf16.msra.mxu1 %v1085_v19  ;;  %v1123_v55 = vld [vmem:[%s1425_s1 + $0x1a0] sm:$0xff]   ;;  %v1127_v59 = vld [vmem:[%s1425_s1 + $0x1a8] sm:$0xff]   ;;  %v1130_v62 = vld [vmem:[%s1425_s1 + $0x1f0] sm:$0xff]  }
  0x16   :  { %979 = vmatprep.subr.bf16.mxu1 %v1088_v22  ;;  %v1131_v63 = vld [vmem:[%s1425_s1 + $0x1b0] sm:$0xff]   ;;  %v1132_v0 = vld [vmem:[%s1425_s1 + $0x178] sm:$0xff]   ;;  %v1142_v9 = vld [vmem:[%s1425_s1 + $0x200] sm:$0xff]  }
  0x17   :  { %958 = vmatpush3.bf16.msra.mxu0 %v1087_v21  ;;  %v1133_v1 = vld [vmem:[%s1425_s1 + $0x138] sm:$0xff]   ;;  %v1135_v3 = vld [vmem:[%s1426_s0 + $0x10] ss:$36 sps:$4 sm:$0xff]   ;;  %v1143_v10 = vld [vmem:[%s1425_s1 + $0x208] sm:$0xff]  }
  0x18   :  { %959 = vmatprep.subr.bf16.mxu0 %v1090_v24  ;;  %v1134_v2 = vld [vmem:[%s1425_s1 + $0x1f8] sm:$0xff]   ;;  %v1144_v11 = vld [vmem:[%s1425_s1 + $0x210] sm:$0xff]   ;;  %v1146_v13 = vld [vmem:[%s1425_s1 + $0x220] sm:$0xff]  }
  0x19   :  { %980 = vmatpush3.bf16.msra.mxu1 %v1089_v23  ;;  %v1137_v4 = vld [vmem:[%s1426_s0 + $0x14] ss:$36 sps:$4 sm:$0xff]   ;;  %v1141_v8 = vld [vmem:[%s1426_s0 + $0x1c] ss:$36 sps:$4 sm:$0xff]   ;;  %v1147_v14 = vld [vmem:[%s1425_s1 + $0x228] sm:$0xff]  }
  0x1a   :  { %981 = vmatprep.subr.bf16.mxu1 %v1092_v26  ;;  %v1138_v5 = vld [vmem:[%s1425_s1 + $0x1b8] sm:$0xff]   ;;  %v1148_v15 = vld [vmem:[%s1425_s1 + $0x230] sm:$0xff]   ;;  %v1150_v17 = vld [vmem:[%s1426_s0 + $0x20] ss:$36 sps:$4 sm:$0xff]  }
  0x1b   :  { %960 = vmatpush3.bf16.msra.mxu0 %v1091_v25  ;;  %v1139_v7 = vld [vmem:[%s1426_s0 + $0x18] ss:$36 sps:$4 sm:$0xff]   ;;  %v865_v19 = vld [vmem:[%s1427_s2] ss:$0 sm:$0xff] }
  0x1c   :  { %961 = vmatprep.subr.bf16.mxu0 %v1094_v28  ;;  %v1145_v12 = vld [vmem:[%s1425_s1 + $0x218] sm:$0xff]  }
  0x1d   :  { %982 = vmatpush3.bf16.msra.mxu1 %v1093_v27  ;;  %v1149_v16 = vld [vmem:[%s1425_s1 + $0x238] sm:$0xff]  }
  0x1e   :  { %983 = vmatprep.subr.bf16.mxu1 %v1096_v30 }
  0x1f   :  { %962 = vmatpush3.bf16.msra.mxu0 %v1095_v29 }
  0x20   :  { %991 = vmatprep.subr.bf16.mxu0 %v1101_v34 }
  0x21   :  { %984 = vmatpush3.bf16.msra.mxu1 %v1100_v33 }
  0x22   :  { %687 = vmatmul.mubr.bf16.vlgmr.msra.gmra.mrb[0].mxu0 %v1097_v31  ;;  %1013 = vmatprep.subr.bf16.mxu1 %v1106_v38 }
  0x23   :  { %992 = vmatpush3.bf16.msra.mxu0 %v1105_v37  ;;  %768 = vmatprep.mubr.bf16.mxu0 %v1137_v4 }
  0x24   :  { %728 = vmatmul.mubr.bf16.vlgmr.msra.gmra.mrb[0].mxu1 %v1102_v35  ;;  %993 = vmatprep.subr.bf16.mxu0 %v1108_v40 }
  0x25   :  { %1014 = vmatpush3.bf16.msra.mxu1 %v1107_v39  ;;  %809 = vmatprep.mubr.bf16.mxu1 %v1141_v8 }
  0x26   :  { %1015 = vmatprep.subr.bf16.mxu1 %v1110_v42 }
  0x27   :  { %994 = vmatpush3.bf16.msra.mxu0 %v1109_v41 }
  0x28   :  { %995 = vmatprep.subr.bf16.mxu0 %v1112_v44 }
  0x29   :  { %1016 = vmatpush3.bf16.msra.mxu1 %v1111_v43 }
  0x2a   :  { %1017 = vmatprep.subr.bf16.mxu1 %v1114_v46 }
  0x2b   :  { %996 = vmatpush3.bf16.msra.mxu0 %v1113_v45 }
  0x2c   :  { %997 = vmatprep.subr.bf16.mxu0 %v1116_v48 }
  0x2d   :  { %1018 = vmatpush3.bf16.msra.mxu1 %v1115_v47 }
  0x2e   :  { %1019 = vmatprep.subr.bf16.mxu1 %v1118_v50 }
  0x2f   :  { %998 = vmatpush3.bf16.msra.mxu0 %v1117_v49 }
  0x30   :  { %999 = vmatprep.subr.bf16.mxu0 %v1120_v52 }
  0x31   :  { %1020 = vmatpush3.bf16.msra.mxu1 %v1119_v51 }
  0x32   :  { %1021 = vmatprep.subr.bf16.mxu1 %v1122_v54 }
  0x33   :  { %1000 = vmatpush3.bf16.msra.mxu0 %v1121_v53 }
  0x34   :  { %1001 = vmatprep.subr.bf16.mxu0 %v1124_v56 }
  0x35   :  { %1022 = vmatpush3.bf16.msra.mxu1 %v1123_v55 }
  0x36   :  { %1023 = vmatprep.subr.bf16.mxu1 %v1126_v58 }
  0x37   :  { %1002 = vmatpush3.bf16.msra.mxu0 %v1125_v57 }
  0x38   :  { %1003 = vmatprep.subr.bf16.mxu0 %v1128_v60 }
  0x39   :  { %1024 = vmatpush3.bf16.msra.mxu1 %v1127_v59 }
  0x3a   :  { %1025 = vmatprep.subr.bf16.mxu1 %v1130_v62 }
  0x3b   :  { %1004 = vmatpush3.bf16.msra.mxu0 %v1129_v61 }
  0x3c   :  { %1005 = vmatprep.subr.bf16.mxu0 %v1132_v0 }
  0x3d   :  { %1026 = vmatpush3.bf16.msra.mxu1 %v1131_v63 }
  0x3e   :  { %1027 = vmatprep.subr.bf16.mxu1 %v1134_v2 }
  0x3f   :  { %1006 = vmatpush3.bf16.msra.mxu0 %v1133_v1 }
  0x40   :  { %1044 = vmatprep.subr.bf16.mxu0 %v1151_v6 }
  0x41   :  { %1028 = vmatpush3.bf16.msra.mxu1 %v1138_v5 }
  0x42   :  { %769 = vmatmul.mubr.bf16.vlgmr.msra.gmra.mrb[4].mxu0 %v1135_v3 }
  0x43   :  { %1060 = vmatprep.mubr.msk.bf16.mxu0 %vm1152_vm0, %v1151_v6  ;;  %1045 = vmatpush3.bf16.msra.mxu0 %v1142_v9 }
  0x44   :  { %810 = vmatmul.mubr.bf16.vlgmr.msra.gmra.mrb[4].mxu1 %v1139_v7  ;;  %1046 = vmatprep.subr.bf16.mxu0 %v1151_v6 }
  0x47   :  { %1047 = vmatpush3.bf16.msra.mxu0 %v1143_v10 }
  0x48   :  { %1048 = vmatprep.subr.bf16.mxu0 %v1151_v6 }
  0x4b   :  { %1049 = vmatpush3.bf16.msra.mxu0 %v1144_v11 }
  0x4c   :  { %1050 = vmatprep.subr.bf16.mxu0 %v1151_v6 }
  0x4f   :  { %1051 = vmatpush3.bf16.msra.mxu0 %v1145_v12 }
  0x50   :  { %1052 = vmatprep.subr.bf16.mxu0 %v1151_v6 }
  0x53   :  { %1053 = vmatpush3.bf16.msra.mxu0 %v1146_v13 }
  0x54   :  { %1054 = vmatprep.subr.bf16.mxu0 %v1151_v6 }
  0x57   :  { %1055 = vmatpush3.bf16.msra.mxu0 %v1147_v14 }
  0x58   :  { %1056 = vmatprep.subr.bf16.mxu0 %v1151_v6 }
  0x5b   :  { %1057 = vmatpush3.bf16.msra.mxu0 %v1148_v15 }
  0x5c   :  { %1058 = vmatprep.subr.bf16.mxu0 %v1151_v6 }
  0x5f   :  { %1059 = vmatpush3.bf16.msra.mxu0 %v1149_v16 }
  0x62   :  { %1061 = vmatmul.mubr.bf16.vlgmr.msra.gmra.mrb[8].mxu0 %v1150_v17 }
  0xf5   :  { %v963_v18 = vpop.f32.mrb[0].mxu0 }
  0xf6   :  { %v964_v20 = vpop.f32.mrb[1].mxu0 }
  0xf7   :  { %v965_v21 = vadd.f32 %v964_v20, %v963_v18  ;;  %v966_v22 = vpop.f32.mrb[2].mxu0  ;;  %v985_v23 = vpop.f32.mrb[0].mxu1 }
  0xf8   :  { %v967_v24 = vpop.f32.mrb[3].mxu0  ;;  %v986_v27 = vpop.f32.mrb[1].mxu1 }
  0xf9   :  { %v689_v25 = vadd.f32 %v965_v21, %v865_v19  ;;  %v968_v26 = vadd.f32 %v967_v24, %v966_v22  ;;  %v987_v28 = vadd.f32 %v986_v27, %v985_v23  ;;  %v988_v29 = vpop.f32.mrb[2].mxu1 }
  0xfa   :  { %v989_v31 = vpop.f32.mrb[3].mxu1 }
  0xfb   :  { %v692_v30 = vadd.f32 %v968_v26, %v865_v19  ;;  %v730_v32 = vadd.f32 %v987_v28, %v689_v25  ;;  %v990_v33 = vadd.f32 %v989_v31, %v988_v29 }
  0xfd   :  { %v733_v34 = vadd.f32 %v990_v33, %v692_v30 }
 0x115   :  { %v1007_v35 = vpop.f32.mrb[4].mxu0 }
 0x116   :  { %v1008_v36 = vpop.f32.mrb[5].mxu0 }
 0x117   :  { %v1009_v37 = vadd.f32 %v1008_v36, %v1007_v35  ;;  %v1010_v38 = vpop.f32.mrb[6].mxu0  ;;  %v1029_v39 = vpop.f32.mrb[4].mxu1 }
 0x118   :  { %v1011_v40 = vpop.f32.mrb[7].mxu0  ;;  %v1030_v43 = vpop.f32.mrb[5].mxu1 }
 0x119   :  { %v771_v41 = vadd.f32 %v1009_v37, %v730_v32  ;;  %v1012_v42 = vadd.f32 %v1011_v40, %v1010_v38  ;;  %v1031_v44 = vadd.f32 %v1030_v43, %v1029_v39  ;;  %v1032_v45 = vpop.f32.mrb[6].mxu1 }
 0x11a   :  { %v1033_v47 = vpop.f32.mrb[7].mxu1 }
 0x11b   :  { %v774_v46 = vadd.f32 %v1012_v42, %v733_v34  ;;  %v1034_v48 = vadd.f32 %v1033_v47, %v1032_v45  ;;  %v812_v49 = vadd.f32 %v1031_v44, %v771_v41 }
 0x11d   :  { %v815_v50 = vadd.f32 %v1034_v48, %v774_v46 }
 0x135   :  { %v852_v51 = vpop.f32.mrb[8].mxu0 }
 0x136   :  { %v853_v52 = vadd.f32 %v852_v51, %v812_v49  ;;  %v1062_v53 = vpop.f32.mrb[9].mxu0 }
 0x137   :  { %v855_v54 = vpop.f32.mrb[10].mxu0 }
 0x138   :  { %859 = vst [vmem:[%s1428_s3] sm:$0xff] %v853_v52  ;;  %v856_v55 = vadd.f32 %v855_v54, %v815_v50  ;;  %v1063_v56 = vpop.f32.mrb[11].mxu0 }
 0x13a   :  { %860 = vst [vmem:[%s1428_s3 + $0x8] sm:$0xff] %v856_v55 }

// kernel: dispnet_bi_forward.62
= control target key start
LH: loop header
LB: loop body
LE: loop exit
PB: predicated region body
PF: predicated region fallthrough
CT: control target
= control target key end

     0   :  { %s5356_s1 = inlined_call_operand.vmem [shape: bf16[4608,128], index: 1, kind: input, shape index: {}]   ;;  %s5357_s0 = inlined_call_operand.vmem [shape: bf16[16,4608], index: 0, kind: input, shape index: {}]   ;;  %s5358_s2 = inlined_call_operand.vmem [shape: f32[1,128], index: 2, kind: input, shape index: {}]   ;;  %s5359_s3 = inlined_call_operand.vmem [shape: f32[16,128], index: 3, kind: output, shape index: {}]  }
   0x1   :  { %v4007_v0 = vld [vmem:[%s5356_s1 + $0x40] sm:$0xff]   ;;  %v4011_v4 = vld [vmem:[%s5356_s1 + $0x48] sm:$0xff]   ;;  %v4015_v8 = vld [vmem:[%s5356_s1 + $0x50] sm:$0xff]  }
   0x2   :  { %v4008_v1 = vld [vmem:[%s5356_s1 + $0xc0] sm:$0xff]   ;;  %3611 = vmatprep.subr.bf16.mxu0 %v4007_v0  ;;  %v4012_v5 = vld [vmem:[%s5356_s1 + $0xc8] sm:$0xff]   ;;  %v4016_v9 = vld [vmem:[%s5356_s1 + $0xd0] sm:$0xff]  }
   0x3   :  { %v4009_v2 = vld [vmem:[%s5356_s1] sm:$0xff]   ;;  %3633 = vmatprep.subr.bf16.mxu1 %v4008_v1  ;;  %v4013_v6 = vld [vmem:[%s5356_s1 + $0x8] sm:$0xff]   ;;  %v4017_v10 = vld [vmem:[%s5356_s1 + $0x10] sm:$0xff]  }
   0x4   :  { %v4010_v3 = vld [vmem:[%s5356_s1 + $0x80] sm:$0xff]   ;;  %3612 = vmatpush3.bf16.msra.mxu0 %v4009_v2  ;;  %v4014_v7 = vld [vmem:[%s5356_s1 + $0x88] sm:$0xff]   ;;  %v4018_v11 = vld [vmem:[%s5356_s1 + $0x90] sm:$0xff]  }
   0x5   :  { %3634 = vmatpush3.bf16.msra.mxu1 %v4010_v3  ;;  %3613 = vmatprep.subr.bf16.mxu0 %v4011_v4  ;;  %v4019_v12 = vld [vmem:[%s5356_s1 + $0x58] sm:$0xff]   ;;  %v4023_v16 = vld [vmem:[%s5356_s1 + $0x60] sm:$0xff]   ;;  %v4027_v20 = vld [vmem:[%s5356_s1 + $0x68] sm:$0xff]  }
   0x6   :  { %3635 = vmatprep.subr.bf16.mxu1 %v4012_v5  ;;  %v4020_v13 = vld [vmem:[%s5356_s1 + $0xd8] sm:$0xff]   ;;  %v4024_v17 = vld [vmem:[%s5356_s1 + $0xe0] sm:$0xff]   ;;  %v4028_v21 = vld [vmem:[%s5356_s1 + $0xe8] sm:$0xff]  }
   0x7   :  { %v4021_v14 = vld [vmem:[%s5356_s1 + $0x18] sm:$0xff]   ;;  %v4025_v18 = vld [vmem:[%s5356_s1 + $0x20] sm:$0xff]   ;;  %v4029_v22 = vld [vmem:[%s5356_s1 + $0x28] sm:$0xff]  }
   0x8   :  { %3614 = vmatpush3.bf16.msra.mxu0 %v4013_v6  ;;  %v4022_v15 = vld [vmem:[%s5356_s1 + $0x98] sm:$0xff]   ;;  %v4026_v19 = vld [vmem:[%s5356_s1 + $0xa0] sm:$0xff]   ;;  %v4030_v23 = vld [vmem:[%s5356_s1 + $0xa8] sm:$0xff]  }
   0x9   :  { %3636 = vmatpush3.bf16.msra.mxu1 %v4014_v7  ;;  %3615 = vmatprep.subr.bf16.mxu0 %v4015_v8  ;;  %v4031_v24 = vld [vmem:[%s5356_s1 + $0x70] sm:$0xff]   ;;  %v4035_v28 = vld [vmem:[%s5356_s1 + $0x78] sm:$0xff]   ;;  %v4045_v36 = vld [vmem:[%s5356_s1 + $0x140] sm:$0xff]  }
   0xa   :  { %3637 = vmatprep.subr.bf16.mxu1 %v4016_v9  ;;  %v4032_v25 = vld [vmem:[%s5356_s1 + $0xf0] sm:$0xff]   ;;  %v4036_v29 = vld [vmem:[%s5356_s1 + $0xf8] sm:$0xff]   ;;  %v4046_v37 = vld [vmem:[%s5356_s1 + $0x1c0] sm:$0xff]  }
   0xb   :  { %v4033_v26 = vld [vmem:[%s5356_s1 + $0x30] sm:$0xff]   ;;  %v4037_v30 = vld [vmem:[%s5356_s1 + $0x38] sm:$0xff]   ;;  %v4047_v38 = vld [vmem:[%s5356_s1 + $0x100] sm:$0xff]  }
   0xc   :  { %3616 = vmatpush3.bf16.msra.mxu0 %v4017_v10  ;;  %v4034_v27 = vld [vmem:[%s5356_s1 + $0xb0] sm:$0xff]   ;;  %v4038_v31 = vld [vmem:[%s5356_s1 + $0xb8] sm:$0xff]   ;;  %v4048_v39 = vld [vmem:[%s5356_s1 + $0x180] sm:$0xff]  }
   0xd   :  { %3638 = vmatpush3.bf16.msra.mxu1 %v4018_v11  ;;  %3617 = vmatprep.subr.bf16.mxu0 %v4019_v12  ;;  %v4039_v32 = vld [vmem:[%s5357_s0] ss:$144 sps:$4 sm:$0xff]   ;;  %v4041_v33 = vld [vmem:[%s5357_s0 + $0x4] ss:$144 sps:$4 sm:$0xff]   ;;  %v4042_v34 = vld [vmem:[%s5357_s0 + $0x8] ss:$144 sps:$4 sm:$0xff]  }
   0xe   :  { %3639 = vmatprep.subr.bf16.mxu1 %v4020_v13  ;;  %v4044_v35 = vld [vmem:[%s5357_s0 + $0xc] ss:$144 sps:$4 sm:$0xff]   ;;  %2574 = vmatprep.mubr.bf16.mxu0 %v4041_v33  ;;  %v4053_v44 = vld [vmem:[%s5356_s1 + $0x150] sm:$0xff]   ;;  %v4061_v52 = vld [vmem:[%s5356_s1 + $0x160] sm:$0xff]  }
   0xf   :  { %2615 = vmatprep.mubr.bf16.mxu1 %v4044_v35  ;;  %v4049_v40 = vld [vmem:[%s5356_s1 + $0x148] sm:$0xff]   ;;  %v4054_v45 = vld [vmem:[%s5356_s1 + $0x1d0] sm:$0xff]   ;;  %v4057_v48 = vld [vmem:[%s5356_s1 + $0x158] sm:$0xff]  }
  0x10   :  { %3618 = vmatpush3.bf16.msra.mxu0 %v4021_v14  ;;  %v4050_v41 = vld [vmem:[%s5356_s1 + $0x1c8] sm:$0xff]   ;;  %v4055_v46 = vld [vmem:[%s5356_s1 + $0x110] sm:$0xff]   ;;  %v4058_v49 = vld [vmem:[%s5356_s1 + $0x1d8] sm:$0xff]  }
  0x11   :  { %3640 = vmatpush3.bf16.msra.mxu1 %v4022_v15  ;;  %3619 = vmatprep.subr.bf16.mxu0 %v4023_v16  ;;  %v4051_v42 = vld [vmem:[%s5356_s1 + $0x108] sm:$0xff]   ;;  %v4056_v47 = vld [vmem:[%s5356_s1 + $0x190] sm:$0xff]   ;;  %v4059_v50 = vld [vmem:[%s5356_s1 + $0x118] sm:$0xff]  }
  0x12   :  { %3641 = vmatprep.subr.bf16.mxu1 %v4024_v17  ;;  %v4052_v43 = vld [vmem:[%s5356_s1 + $0x188] sm:$0xff]   ;;  %v4060_v51 = vld [vmem:[%s5356_s1 + $0x198] sm:$0xff]   ;;  %v4062_v53 = vld [vmem:[%s5356_s1 + $0x1e0] sm:$0xff]  }
  0x13   :  { %v4063_v54 = vld [vmem:[%s5356_s1 + $0x120] sm:$0xff]   ;;  %v4065_v56 = vld [vmem:[%s5356_s1 + $0x168] sm:$0xff]   ;;  %v4069_v60 = vld [vmem:[%s5356_s1 + $0x170] sm:$0xff]  }
  0x14   :  { %3620 = vmatpush3.bf16.msra.mxu0 %v4025_v18  ;;  %v4064_v55 = vld [vmem:[%s5356_s1 + $0x1a0] sm:$0xff]   ;;  %v4066_v57 = vld [vmem:[%s5356_s1 + $0x1e8] sm:$0xff]   ;;  %v4070_v61 = vld [vmem:[%s5356_s1 + $0x1f0] sm:$0xff]  }
  0x15   :  { %3642 = vmatpush3.bf16.msra.mxu1 %v4026_v19  ;;  %3621 = vmatprep.subr.bf16.mxu0 %v4027_v20  ;;  %v4067_v58 = vld [vmem:[%s5356_s1 + $0x128] sm:$0xff]   ;;  %v4071_v62 = vld [vmem:[%s5356_s1 + $0x130] sm:$0xff]   ;;  %v4073_v0 = vld [vmem:[%s5356_s1 + $0x178] sm:$0xff]  }
  0x16   :  { %3643 = vmatprep.subr.bf16.mxu1 %v4028_v21  ;;  %v4068_v59 = vld [vmem:[%s5356_s1 + $0x1a8] sm:$0xff]   ;;  %v4072_v63 = vld [vmem:[%s5356_s1 + $0x1b0] sm:$0xff]   ;;  %v4074_v1 = vld [vmem:[%s5356_s1 + $0x1f8] sm:$0xff]  }
  0x17   :  { %v4075_v2 = vld [vmem:[%s5356_s1 + $0x138] sm:$0xff]   ;;  %v4077_v4 = vld [vmem:[%s5357_s0 + $0x10] ss:$144 sps:$4 sm:$0xff]   ;;  %v4079_v5 = vld [vmem:[%s5357_s0 + $0x14] ss:$144 sps:$4 sm:$0xff]  }
  0x18   :  { %3622 = vmatpush3.bf16.msra.mxu0 %v4029_v22  ;;  %v4076_v3 = vld [vmem:[%s5356_s1 + $0x1b8] sm:$0xff]   ;;  %v4083_v8 = vld [vmem:[%s5356_s1 + $0x240] sm:$0xff]   ;;  %v4087_v12 = vld [vmem:[%s5356_s1 + $0x248] sm:$0xff]  }
  0x19   :  { %3644 = vmatpush3.bf16.msra.mxu1 %v4030_v23  ;;  %3623 = vmatprep.subr.bf16.mxu0 %v4031_v24  ;;  %v4080_v6 = vld [vmem:[%s5357_s0 + $0x18] ss:$144 sps:$4 sm:$0xff]   ;;  %v4082_v7 = vld [vmem:[%s5357_s0 + $0x1c] ss:$144 sps:$4 sm:$0xff]   ;;  %v4084_v9 = vld [vmem:[%s5356_s1 + $0x2c0] sm:$0xff]  }
  0x1a   :  { %3645 = vmatprep.subr.bf16.mxu1 %v4032_v25  ;;  %v4085_v10 = vld [vmem:[%s5356_s1 + $0x200] sm:$0xff]   ;;  %v4088_v13 = vld [vmem:[%s5356_s1 + $0x2c8] sm:$0xff]   ;;  %v4091_v16 = vld [vmem:[%s5356_s1 + $0x250] sm:$0xff]  }
  0x1b   :  { %v4086_v11 = vld [vmem:[%s5356_s1 + $0x280] sm:$0xff]   ;;  %v4089_v14 = vld [vmem:[%s5356_s1 + $0x208] sm:$0xff]   ;;  %v4092_v17 = vld [vmem:[%s5356_s1 + $0x2d0] sm:$0xff]  }
  0x1c   :  { %3624 = vmatpush3.bf16.msra.mxu0 %v4033_v26  ;;  %v4090_v15 = vld [vmem:[%s5356_s1 + $0x288] sm:$0xff]   ;;  %v4093_v18 = vld [vmem:[%s5356_s1 + $0x210] sm:$0xff]   ;;  %v4095_v20 = vld [vmem:[%s5356_s1 + $0x258] sm:$0xff]  }
  0x1d   :  { %3646 = vmatpush3.bf16.msra.mxu1 %v4034_v27  ;;  %3625 = vmatprep.subr.bf16.mxu0 %v4035_v28  ;;  %v4094_v19 = vld [vmem:[%s5356_s1 + $0x290] sm:$0xff]   ;;  %v4096_v21 = vld [vmem:[%s5356_s1 + $0x2d8] sm:$0xff]   ;;  %v4099_v24 = vld [vmem:[%s5356_s1 + $0x260] sm:$0xff]  }
  0x1e   :  { %3647 = vmatprep.subr.bf16.mxu1 %v4036_v29  ;;  %v4097_v22 = vld [vmem:[%s5356_s1 + $0x218] sm:$0xff]   ;;  %v4100_v25 = vld [vmem:[%s5356_s1 + $0x2e0] sm:$0xff]   ;;  %v4103_v28 = vld [vmem:[%s5356_s1 + $0x268] sm:$0xff]  }
  0x1f   :  { %v4098_v23 = vld [vmem:[%s5356_s1 + $0x298] sm:$0xff]   ;;  %v4101_v26 = vld [vmem:[%s5356_s1 + $0x220] sm:$0xff]   ;;  %v4104_v29 = vld [vmem:[%s5356_s1 + $0x2e8] sm:$0xff]  }
  0x20   :  { %3626 = vmatpush3.bf16.msra.mxu0 %v4037_v30  ;;  %v4102_v27 = vld [vmem:[%s5356_s1 + $0x2a0] sm:$0xff]   ;;  %v4105_v30 = vld [vmem:[%s5356_s1 + $0x228] sm:$0xff]   ;;  %v4108_v33 = vld [vmem:[%s5356_s1 + $0x2f0] sm:$0xff]  }
  0x21   :  { %3648 = vmatpush3.bf16.msra.mxu1 %v4038_v31  ;;  %3655 = vmatprep.subr.bf16.mxu0 %v4045_v36  ;;  %v4106_v31 = vld [vmem:[%s5356_s1 + $0x2a8] sm:$0xff]   ;;  %v4110_v35 = vld [vmem:[%s5356_s1 + $0x2b0] sm:$0xff]   ;;  %v4111_v36 = vld [vmem:[%s5356_s1 + $0x278] sm:$0xff]  }
  0x22   :  { %3677 = vmatprep.subr.bf16.mxu1 %v4046_v37  ;;  %v4112_v37 = vld [vmem:[%s5356_s1 + $0x2f8] sm:$0xff]  }
  0x23   :  { %2575 = vmatmul.mubr.bf16.vlgmr.msra.gmra.mrb[0].mxu0 %v4039_v32  ;;  %v4107_v32 = vld [vmem:[%s5356_s1 + $0x270] sm:$0xff]  }
  0x24   :  { %2616 = vmatmul.mubr.bf16.vlgmr.msra.gmra.mrb[0].mxu1 %v4042_v34  ;;  %3656 = vmatpush3.bf16.msra.mxu0 %v4047_v38  ;;  %v4109_v34 = vld [vmem:[%s5356_s1 + $0x230] sm:$0xff]   ;;  %v4113_v38 = vld [vmem:[%s5356_s1 + $0x238] sm:$0xff]  }
  0x25   :  { %3678 = vmatpush3.bf16.msra.mxu1 %v4048_v39  ;;  %3657 = vmatprep.subr.bf16.mxu0 %v4049_v40  ;;  %v4114_v39 = vld [vmem:[%s5356_s1 + $0x2b8] sm:$0xff]   ;;  %v4115_v40 = vld [vmem:[%s5357_s0 + $0x20] ss:$144 sps:$4 sm:$0xff]  }
  0x26   :  { %3679 = vmatprep.subr.bf16.mxu1 %v4050_v41  ;;  %2656 = vmatprep.mubr.bf16.mxu0 %v4079_v5  ;;  %v4117_v41 = vld [vmem:[%s5357_s0 + $0x24] ss:$144 sps:$4 sm:$0xff]  }
  0x27   :  { %2697 = vmatprep.mubr.bf16.mxu1 %v4082_v7  ;;  %v4146_v5 = vld [vmem:[%s5356_s1 + $0x3f0] sm:$0xff]  }
  0x28   :  { %3658 = vmatpush3.bf16.msra.mxu0 %v4051_v42  ;;  %v4118_v42 = vld [vmem:[%s5357_s0 + $0x28] ss:$144 sps:$4 sm:$0xff]   ;;  %v4148_v7 = vld [vmem:[%s5356_s1 + $0x3b0] sm:$0xff]  }
  0x29   :  { %3680 = vmatpush3.bf16.msra.mxu1 %v4052_v43  ;;  %3659 = vmatprep.subr.bf16.mxu0 %v4053_v44  ;;  %v4120_v43 = vld [vmem:[%s5357_s0 + $0x2c] ss:$144 sps:$4 sm:$0xff]   ;;  %v4121_v44 = vld [vmem:[%s5356_s1 + $0x340] sm:$0xff]  }
  0x2a   :  { %3681 = vmatprep.subr.bf16.mxu1 %v4054_v45  ;;  %v4122_v45 = vld [vmem:[%s5356_s1 + $0x3c0] sm:$0xff]  }
  0x2c   :  { %3660 = vmatpush3.bf16.msra.mxu0 %v4055_v46  ;;  %v4123_v46 = vld [vmem:[%s5356_s1 + $0x300] sm:$0xff]  }
  0x2d   :  { %3682 = vmatpush3.bf16.msra.mxu1 %v4056_v47  ;;  %3661 = vmatprep.subr.bf16.mxu0 %v4057_v48  ;;  %v4124_v47 = vld [vmem:[%s5356_s1 + $0x380] sm:$0xff]   ;;  %v4125_v48 = vld [vmem:[%s5356_s1 + $0x348] sm:$0xff]  }
  0x2e   :  { %3683 = vmatprep.subr.bf16.mxu1 %v4058_v49  ;;  %v4126_v49 = vld [vmem:[%s5356_s1 + $0x3c8] sm:$0xff]  }
  0x30   :  { %3662 = vmatpush3.bf16.msra.mxu0 %v4059_v50  ;;  %v4127_v50 = vld [vmem:[%s5356_s1 + $0x308] sm:$0xff]  }
  0x31   :  { %3684 = vmatpush3.bf16.msra.mxu1 %v4060_v51  ;;  %3663 = vmatprep.subr.bf16.mxu0 %v4061_v52  ;;  %v4128_v51 = vld [vmem:[%s5356_s1 + $0x388] sm:$0xff]   ;;  %v4129_v52 = vld [vmem:[%s5356_s1 + $0x350] sm:$0xff]  }
  0x32   :  { %3685 = vmatprep.subr.bf16.mxu1 %v4062_v53  ;;  %v4130_v53 = vld [vmem:[%s5356_s1 + $0x3d0] sm:$0xff]  }
  0x34   :  { %3664 = vmatpush3.bf16.msra.mxu0 %v4063_v54  ;;  %v4131_v54 = vld [vmem:[%s5356_s1 + $0x310] sm:$0xff]  }
  0x35   :  { %3686 = vmatpush3.bf16.msra.mxu1 %v4064_v55  ;;  %3665 = vmatprep.subr.bf16.mxu0 %v4065_v56  ;;  %v4132_v55 = vld [vmem:[%s5356_s1 + $0x390] sm:$0xff]   ;;  %v4133_v56 = vld [vmem:[%s5356_s1 + $0x358] sm:$0xff]  }
  0x36   :  { %3687 = vmatprep.subr.bf16.mxu1 %v4066_v57  ;;  %v4134_v57 = vld [vmem:[%s5356_s1 + $0x3d8] sm:$0xff]  }
  0x38   :  { %3666 = vmatpush3.bf16.msra.mxu0 %v4067_v58  ;;  %v4135_v58 = vld [vmem:[%s5356_s1 + $0x318] sm:$0xff]  }
  0x39   :  { %3688 = vmatpush3.bf16.msra.mxu1 %v4068_v59  ;;  %3667 = vmatprep.subr.bf16.mxu0 %v4069_v60  ;;  %v4136_v59 = vld [vmem:[%s5356_s1 + $0x398] sm:$0xff]   ;;  %v4137_v60 = vld [vmem:[%s5356_s1 + $0x360] sm:$0xff]  }
  0x3a   :  { %3689 = vmatprep.subr.bf16.mxu1 %v4070_v61  ;;  %v4138_v61 = vld [vmem:[%s5356_s1 + $0x3e0] sm:$0xff]  }
  0x3c   :  { %3668 = vmatpush3.bf16.msra.mxu0 %v4071_v62  ;;  %v4139_v62 = vld [vmem:[%s5356_s1 + $0x320] sm:$0xff]  }
  0x3d   :  { %3690 = vmatpush3.bf16.msra.mxu1 %v4072_v63  ;;  %3669 = vmatprep.subr.bf16.mxu0 %v4073_v0  ;;  %v4140_v63 = vld [vmem:[%s5356_s1 + $0x3a0] sm:$0xff]   ;;  %v4141_v0 = vld [vmem:[%s5356_s1 + $0x368] sm:$0xff]  }
  0x3e   :  { %3691 = vmatprep.subr.bf16.mxu1 %v4074_v1  ;;  %v4142_v1 = vld [vmem:[%s5356_s1 + $0x3e8] sm:$0xff]  }
  0x40   :  { %3670 = vmatpush3.bf16.msra.mxu0 %v4075_v2  ;;  %v4143_v2 = vld [vmem:[%s5356_s1 + $0x328] sm:$0xff]  }
  0x41   :  { %3692 = vmatpush3.bf16.msra.mxu1 %v4076_v3  ;;  %3699 = vmatprep.subr.bf16.mxu0 %v4083_v8  ;;  %v4144_v3 = vld [vmem:[%s5356_s1 + $0x3a8] sm:$0xff]   ;;  %v4149_v8 = vld [vmem:[%s5356_s1 + $0x378] sm:$0xff]  }
  0x42   :  { %3721 = vmatprep.subr.bf16.mxu1 %v4084_v9  ;;  %v4150_v9 = vld [vmem:[%s5356_s1 + $0x3f8] sm:$0xff]  }
  0x43   :  { %2657 = vmatmul.mubr.bf16.vlgmr.msra.gmra.mrb[4].mxu0 %v4077_v4  ;;  %v4145_v4 = vld [vmem:[%s5356_s1 + $0x370] sm:$0xff]  }
  0x44   :  { %2698 = vmatmul.mubr.bf16.vlgmr.msra.gmra.mrb[4].mxu1 %v4080_v6  ;;  %3700 = vmatpush3.bf16.msra.mxu0 %v4085_v10  ;;  %v4147_v6 = vld [vmem:[%s5356_s1 + $0x330] sm:$0xff]   ;;  %v4151_v10 = vld [vmem:[%s5356_s1 + $0x338] sm:$0xff]  }
  0x45   :  { %3722 = vmatpush3.bf16.msra.mxu1 %v4086_v11  ;;  %3701 = vmatprep.subr.bf16.mxu0 %v4087_v12  ;;  %v4152_v11 = vld [vmem:[%s5356_s1 + $0x3b8] sm:$0xff]   ;;  %v4153_v12 = vld [vmem:[%s5357_s0 + $0x30] ss:$144 sps:$4 sm:$0xff]  }
  0x46   :  { %3723 = vmatprep.subr.bf16.mxu1 %v4088_v13  ;;  %2738 = vmatprep.mubr.bf16.mxu0 %v4117_v41  ;;  %v4155_v13 = vld [vmem:[%s5357_s0 + $0x34] ss:$144 sps:$4 sm:$0xff]  }
  0x47   :  { %2779 = vmatprep.mubr.bf16.mxu1 %v4120_v43  ;;  %v4184_v41 = vld [vmem:[%s5356_s1 + $0x4f0] sm:$0xff]  }
  0x48   :  { %3702 = vmatpush3.bf16.msra.mxu0 %v4089_v14  ;;  %v4156_v14 = vld [vmem:[%s5357_s0 + $0x38] ss:$144 sps:$4 sm:$0xff]   ;;  %v4186_v43 = vld [vmem:[%s5356_s1 + $0x4b0] sm:$0xff]  }
  0x49   :  { %3724 = vmatpush3.bf16.msra.mxu1 %v4090_v15  ;;  %3703 = vmatprep.subr.bf16.mxu0 %v4091_v16  ;;  %v4158_v15 = vld [vmem:[%s5357_s0 + $0x3c] ss:$144 sps:$4 sm:$0xff]   ;;  %v4159_v16 = vld [vmem:[%s5356_s1 + $0x440] sm:$0xff]  }
  0x4a   :  { %3725 = vmatprep.subr.bf16.mxu1 %v4092_v17  ;;  %v4160_v17 = vld [vmem:[%s5356_s1 + $0x4c0] sm:$0xff]  }
  0x4c   :  { %3704 = vmatpush3.bf16.msra.mxu0 %v4093_v18  ;;  %v4161_v18 = vld [vmem:[%s5356_s1 + $0x400] sm:$0xff]  }
  0x4d   :  { %3726 = vmatpush3.bf16.msra.mxu1 %v4094_v19  ;;  %3705 = vmatprep.subr.bf16.mxu0 %v4095_v20  ;;  %v4162_v19 = vld [vmem:[%s5356_s1 + $0x480] sm:$0xff]   ;;  %v4163_v20 = vld [vmem:[%s5356_s1 + $0x448] sm:$0xff]  }
  0x4e   :  { %3727 = vmatprep.subr.bf16.mxu1 %v4096_v21  ;;  %v4164_v21 = vld [vmem:[%s5356_s1 + $0x4c8] sm:$0xff]  }
  0x50   :  { %3706 = vmatpush3.bf16.msra.mxu0 %v4097_v22  ;;  %v4165_v22 = vld [vmem:[%s5356_s1 + $0x408] sm:$0xff]  }
  0x51   :  { %3728 = vmatpush3.bf16.msra.mxu1 %v4098_v23  ;;  %3707 = vmatprep.subr.bf16.mxu0 %v4099_v24  ;;  %v4166_v23 = vld [vmem:[%s5356_s1 + $0x488] sm:$0xff]   ;;  %v4167_v24 = vld [vmem:[%s5356_s1 + $0x450] sm:$0xff]  }
  0x52   :  { %3729 = vmatprep.subr.bf16.mxu1 %v4100_v25  ;;  %v4168_v25 = vld [vmem:[%s5356_s1 + $0x4d0] sm:$0xff]  }
  0x54   :  { %3708 = vmatpush3.bf16.msra.mxu0 %v4101_v26  ;;  %v4169_v26 = vld [vmem:[%s5356_s1 + $0x410] sm:$0xff]  }
  0x55   :  { %3730 = vmatpush3.bf16.msra.mxu1 %v4102_v27  ;;  %3709 = vmatprep.subr.bf16.mxu0 %v4103_v28  ;;  %v4170_v27 = vld [vmem:[%s5356_s1 + $0x490] sm:$0xff]   ;;  %v4171_v28 = vld [vmem:[%s5356_s1 + $0x458] sm:$0xff]  }
  0x56   :  { %3731 = vmatprep.subr.bf16.mxu1 %v4104_v29  ;;  %v4172_v29 = vld [vmem:[%s5356_s1 + $0x4d8] sm:$0xff]  }
  0x58   :  { %3710 = vmatpush3.bf16.msra.mxu0 %v4105_v30  ;;  %v4173_v30 = vld [vmem:[%s5356_s1 + $0x418] sm:$0xff]  }
  0x59   :  { %3732 = vmatpush3.bf16.msra.mxu1 %v4106_v31  ;;  %3711 = vmatprep.subr.bf16.mxu0 %v4107_v32  ;;  %v4174_v31 = vld [vmem:[%s5356_s1 + $0x498] sm:$0xff]   ;;  %v4175_v32 = vld [vmem:[%s5356_s1 + $0x460] sm:$0xff]  }
  0x5a   :  { %3733 = vmatprep.subr.bf16.mxu1 %v4108_v33  ;;  %v4176_v33 = vld [vmem:[%s5356_s1 + $0x4e0] sm:$0xff]  }
  0x5c   :  { %3712 = vmatpush3.bf16.msra.mxu0 %v4109_v34  ;;  %v4177_v34 = vld [vmem:[%s5356_s1 + $0x420] sm:$0xff]  }
  0x5d   :  { %3734 = vmatpush3.bf16.msra.mxu1 %v4110_v35  ;;  %3713 = vmatprep.subr.bf16.mxu0 %v4111_v36  ;;  %v4178_v35 = vld [vmem:[%s5356_s1 + $0x4a0] sm:$0xff]   ;;  %v4179_v36 = vld [vmem:[%s5356_s1 + $0x468] sm:$0xff]  }
  0x5e   :  { %3735 = vmatprep.subr.bf16.mxu1 %v4112_v37  ;;  %v4180_v37 = vld [vmem:[%s5356_s1 + $0x4e8] sm:$0xff]  }
  0x60   :  { %3714 = vmatpush3.bf16.msra.mxu0 %v4113_v38  ;;  %v4181_v38 = vld [vmem:[%s5356_s1 + $0x428] sm:$0xff]  }
  0x61   :  { %3736 = vmatpush3.bf16.msra.mxu1 %v4114_v39  ;;  %3743 = vmatprep.subr.bf16.mxu0 %v4121_v44  ;;  %v4182_v39 = vld [vmem:[%s5356_s1 + $0x4a8] sm:$0xff]   ;;  %v4187_v44 = vld [vmem:[%s5356_s1 + $0x478] sm:$0xff]  }
  0x62   :  { %3765 = vmatprep.subr.bf16.mxu1 %v4122_v45  ;;  %v4188_v45 = vld [vmem:[%s5356_s1 + $0x4f8] sm:$0xff]  }
  0x63   :  { %2739 = vmatmul.mubr.bf16.vlgmr.msra.gmra.mrb[8].mxu0 %v4115_v40  ;;  %v4183_v40 = vld [vmem:[%s5356_s1 + $0x470] sm:$0xff]  }
  0x64   :  { %2780 = vmatmul.mubr.bf16.vlgmr.msra.gmra.mrb[8].mxu1 %v4118_v42  ;;  %3744 = vmatpush3.bf16.msra.mxu0 %v4123_v46  ;;  %v4185_v42 = vld [vmem:[%s5356_s1 + $0x430] sm:$0xff]   ;;  %v4189_v46 = vld [vmem:[%s5356_s1 + $0x438] sm:$0xff]  }
  0x65   :  { %3766 = vmatpush3.bf16.msra.mxu1 %v4124_v47  ;;  %3745 = vmatprep.subr.bf16.mxu0 %v4125_v48  ;;  %v4190_v47 = vld [vmem:[%s5356_s1 + $0x4b8] sm:$0xff]   ;;  %v4191_v48 = vld [vmem:[%s5357_s0 + $0x40] ss:$144 sps:$4 sm:$0xff]  }
  0x66   :  { %3767 = vmatprep.subr.bf16.mxu1 %v4126_v49  ;;  %2820 = vmatprep.mubr.bf16.mxu0 %v4155_v13  ;;  %v4193_v49 = vld [vmem:[%s5357_s0 + $0x44] ss:$144 sps:$4 sm:$0xff]  }
  0x67   :  { %2861 = vmatprep.mubr.bf16.mxu1 %v4158_v15  ;;  %v4222_v13 = vld [vmem:[%s5356_s1 + $0x5f0] sm:$0xff]  }
  0x68   :  { %3746 = vmatpush3.bf16.msra.mxu0 %v4127_v50  ;;  %v4194_v50 = vld [vmem:[%s5357_s0 + $0x48] ss:$144 sps:$4 sm:$0xff]   ;;  %v4224_v15 = vld [vmem:[%s5356_s1 + $0x5b0] sm:$0xff]  }
  0x69   :  { %3768 = vmatpush3.bf16.msra.mxu1 %v4128_v51  ;;  %3747 = vmatprep.subr.bf16.mxu0 %v4129_v52  ;;  %v4196_v51 = vld [vmem:[%s5357_s0 + $0x4c] ss:$144 sps:$4 sm:$0xff]   ;;  %v4197_v52 = vld [vmem:[%s5356_s1 + $0x540] sm:$0xff]  }
  0x6a   :  { %3769 = vmatprep.subr.bf16.mxu1 %v4130_v53  ;;  %v4198_v53 = vld [vmem:[%s5356_s1 + $0x5c0] sm:$0xff]  }
  0x6c   :  { %3748 = vmatpush3.bf16.msra.mxu0 %v4131_v54  ;;  %v4199_v54 = vld [vmem:[%s5356_s1 + $0x500] sm:$0xff]  }
  0x6d   :  { %3770 = vmatpush3.bf16.msra.mxu1 %v4132_v55  ;;  %3749 = vmatprep.subr.bf16.mxu0 %v4133_v56  ;;  %v4200_v55 = vld [vmem:[%s5356_s1 + $0x580] sm:$0xff]   ;;  %v4201_v56 = vld [vmem:[%s5356_s1 + $0x548] sm:$0xff]  }
  0x6e   :  { %3771 = vmatprep.subr.bf16.mxu1 %v4134_v57  ;;  %v4202_v57 = vld [vmem:[%s5356_s1 + $0x5c8] sm:$0xff]  }
  0x70   :  { %3750 = vmatpush3.bf16.msra.mxu0 %v4135_v58  ;;  %v4203_v58 = vld [vmem:[%s5356_s1 + $0x508] sm:$0xff]  }
  0x71   :  { %3772 = vmatpush3.bf16.msra.mxu1 %v4136_v59  ;;  %3751 = vmatprep.subr.bf16.mxu0 %v4137_v60  ;;  %v4204_v59 = vld [vmem:[%s5356_s1 + $0x588] sm:$0xff]   ;;  %v4205_v60 = vld [vmem:[%s5356_s1 + $0x550] sm:$0xff]  }
  0x72   :  { %3773 = vmatprep.subr.bf16.mxu1 %v4138_v61  ;;  %v4206_v61 = vld [vmem:[%s5356_s1 + $0x5d0] sm:$0xff]  }
  0x74   :  { %3752 = vmatpush3.bf16.msra.mxu0 %v4139_v62  ;;  %v4207_v62 = vld [vmem:[%s5356_s1 + $0x510] sm:$0xff]  }
  0x75   :  { %3774 = vmatpush3.bf16.msra.mxu1 %v4140_v63  ;;  %3753 = vmatprep.subr.bf16.mxu0 %v4141_v0  ;;  %v4208_v63 = vld [vmem:[%s5356_s1 + $0x590] sm:$0xff]   ;;  %v4209_v0 = vld [vmem:[%s5356_s1 + $0x558] sm:$0xff]  }
  0x76   :  { %3775 = vmatprep.subr.bf16.mxu1 %v4142_v1  ;;  %v4210_v1 = vld [vmem:[%s5356_s1 + $0x5d8] sm:$0xff]  }
  0x78   :  { %3754 = vmatpush3.bf16.msra.mxu0 %v4143_v2  ;;  %v4211_v2 = vld [vmem:[%s5356_s1 + $0x518] sm:$0xff]  }
  0x79   :  { %3776 = vmatpush3.bf16.msra.mxu1 %v4144_v3  ;;  %3755 = vmatprep.subr.bf16.mxu0 %v4145_v4  ;;  %v4212_v3 = vld [vmem:[%s5356_s1 + $0x598] sm:$0xff]   ;;  %v4213_v4 = vld [vmem:[%s5356_s1 + $0x560] sm:$0xff]  }
  0x7a   :  { %3777 = vmatprep.subr.bf16.mxu1 %v4146_v5  ;;  %v4214_v5 = vld [vmem:[%s5356_s1 + $0x5e0] sm:$0xff]  }
  0x7c   :  { %3756 = vmatpush3.bf16.msra.mxu0 %v4147_v6  ;;  %v4215_v6 = vld [vmem:[%s5356_s1 + $0x520] sm:$0xff]  }
  0x7d   :  { %3778 = vmatpush3.bf16.msra.mxu1 %v4148_v7  ;;  %3757 = vmatprep.subr.bf16.mxu0 %v4149_v8  ;;  %v4216_v7 = vld [vmem:[%s5356_s1 + $0x5a0] sm:$0xff]   ;;  %v4217_v8 = vld [vmem:[%s5356_s1 + $0x568] sm:$0xff]  }
  0x7e   :  { %3779 = vmatprep.subr.bf16.mxu1 %v4150_v9  ;;  %v4218_v9 = vld [vmem:[%s5356_s1 + $0x5e8] sm:$0xff]  }
  0x80   :  { %3758 = vmatpush3.bf16.msra.mxu0 %v4151_v10  ;;  %v4219_v10 = vld [vmem:[%s5356_s1 + $0x528] sm:$0xff]  }
  0x81   :  { %3780 = vmatpush3.bf16.msra.mxu1 %v4152_v11  ;;  %3787 = vmatprep.subr.bf16.mxu0 %v4159_v16  ;;  %v4220_v11 = vld [vmem:[%s5356_s1 + $0x5a8] sm:$0xff]   ;;  %v4225_v16 = vld [vmem:[%s5356_s1 + $0x578] sm:$0xff]  }
  0x82   :  { %3809 = vmatprep.subr.bf16.mxu1 %v4160_v17  ;;  %v4226_v17 = vld [vmem:[%s5356_s1 + $0x5f8] sm:$0xff]  }
  0x83   :  { %2821 = vmatmul.mubr.bf16.vlgmr.msra.gmra.mrb[12].mxu0 %v4153_v12  ;;  %v4221_v12 = vld [vmem:[%s5356_s1 + $0x570] sm:$0xff]  }
  0x84   :  { %2862 = vmatmul.mubr.bf16.vlgmr.msra.gmra.mrb[12].mxu1 %v4156_v14  ;;  %3788 = vmatpush3.bf16.msra.mxu0 %v4161_v18  ;;  %v4223_v14 = vld [vmem:[%s5356_s1 + $0x530] sm:$0xff]   ;;  %v4227_v18 = vld [vmem:[%s5356_s1 + $0x538] sm:$0xff]  }
  0x85   :  { %3810 = vmatpush3.bf16.msra.mxu1 %v4162_v19  ;;  %3789 = vmatprep.subr.bf16.mxu0 %v4163_v20  ;;  %v4228_v19 = vld [vmem:[%s5356_s1 + $0x5b8] sm:$0xff]   ;;  %v4229_v20 = vld [vmem:[%s5357_s0 + $0x50] ss:$144 sps:$4 sm:$0xff]  }
  0x86   :  { %3811 = vmatprep.subr.bf16.mxu1 %v4164_v21  ;;  %2902 = vmatprep.mubr.bf16.mxu0 %v4193_v49  ;;  %v4231_v21 = vld [vmem:[%s5357_s0 + $0x54] ss:$144 sps:$4 sm:$0xff]  }
  0x87   :  { %2943 = vmatprep.mubr.bf16.mxu1 %v4196_v51  ;;  %v4260_v49 = vld [vmem:[%s5356_s1 + $0x6f0] sm:$0xff]  }
  0x88   :  { %3790 = vmatpush3.bf16.msra.mxu0 %v4165_v22  ;;  %v4232_v22 = vld [vmem:[%s5357_s0 + $0x58] ss:$144 sps:$4 sm:$0xff]   ;;  %v4262_v51 = vld [vmem:[%s5356_s1 + $0x6b0] sm:$0xff]  }
  0x89   :  { %3812 = vmatpush3.bf16.msra.mxu1 %v4166_v23  ;;  %3791 = vmatprep.subr.bf16.mxu0 %v4167_v24  ;;  %v4234_v23 = vld [vmem:[%s5357_s0 + $0x5c] ss:$144 sps:$4 sm:$0xff]   ;;  %v4235_v24 = vld [vmem:[%s5356_s1 + $0x640] sm:$0xff]  }
  0x8a   :  { %3813 = vmatprep.subr.bf16.mxu1 %v4168_v25  ;;  %v4236_v25 = vld [vmem:[%s5356_s1 + $0x6c0] sm:$0xff]  }
  0x8c   :  { %3792 = vmatpush3.bf16.msra.mxu0 %v4169_v26  ;;  %v4237_v26 = vld [vmem:[%s5356_s1 + $0x600] sm:$0xff]  }
  0x8d   :  { %3814 = vmatpush3.bf16.msra.mxu1 %v4170_v27  ;;  %3793 = vmatprep.subr.bf16.mxu0 %v4171_v28  ;;  %v4238_v27 = vld [vmem:[%s5356_s1 + $0x680] sm:$0xff]   ;;  %v4239_v28 = vld [vmem:[%s5356_s1 + $0x648] sm:$0xff]  }
  0x8e   :  { %3815 = vmatprep.subr.bf16.mxu1 %v4172_v29  ;;  %v4240_v29 = vld [vmem:[%s5356_s1 + $0x6c8] sm:$0xff]  }
  0x90   :  { %3794 = vmatpush3.bf16.msra.mxu0 %v4173_v30  ;;  %v4241_v30 = vld [vmem:[%s5356_s1 + $0x608] sm:$0xff]  }
  0x91   :  { %3816 = vmatpush3.bf16.msra.mxu1 %v4174_v31  ;;  %3795 = vmatprep.subr.bf16.mxu0 %v4175_v32  ;;  %v4242_v31 = vld [vmem:[%s5356_s1 + $0x688] sm:$0xff]   ;;  %v4243_v32 = vld [vmem:[%s5356_s1 + $0x650] sm:$0xff]  }
  0x92   :  { %3817 = vmatprep.subr.bf16.mxu1 %v4176_v33  ;;  %v4244_v33 = vld [vmem:[%s5356_s1 + $0x6d0] sm:$0xff]  }
  0x94   :  { %3796 = vmatpush3.bf16.msra.mxu0 %v4177_v34  ;;  %v4245_v34 = vld [vmem:[%s5356_s1 + $0x610] sm:$0xff]  }
  0x95   :  { %3818 = vmatpush3.bf16.msra.mxu1 %v4178_v35  ;;  %3797 = vmatprep.subr.bf16.mxu0 %v4179_v36  ;;  %v4246_v35 = vld [vmem:[%s5356_s1 + $0x690] sm:$0xff]   ;;  %v4247_v36 = vld [vmem:[%s5356_s1 + $0x658] sm:$0xff]  }
  0x96   :  { %3819 = vmatprep.subr.bf16.mxu1 %v4180_v37  ;;  %v4248_v37 = vld [vmem:[%s5356_s1 + $0x6d8] sm:$0xff]  }
  0x98   :  { %3798 = vmatpush3.bf16.msra.mxu0 %v4181_v38  ;;  %v4249_v38 = vld [vmem:[%s5356_s1 + $0x618] sm:$0xff]  }
  0x99   :  { %3820 = vmatpush3.bf16.msra.mxu1 %v4182_v39  ;;  %3799 = vmatprep.subr.bf16.mxu0 %v4183_v40  ;;  %v4250_v39 = vld [vmem:[%s5356_s1 + $0x698] sm:$0xff]   ;;  %v4251_v40 = vld [vmem:[%s5356_s1 + $0x660] sm:$0xff]  }
  0x9a   :  { %3821 = vmatprep.subr.bf16.mxu1 %v4184_v41  ;;  %v4252_v41 = vld [vmem:[%s5356_s1 + $0x6e0] sm:$0xff]  }
  0x9c   :  { %3800 = vmatpush3.bf16.msra.mxu0 %v4185_v42  ;;  %v4253_v42 = vld [vmem:[%s5356_s1 + $0x620] sm:$0xff]  }
  0x9d   :  { %3822 = vmatpush3.bf16.msra.mxu1 %v4186_v43  ;;  %3801 = vmatprep.subr.bf16.mxu0 %v4187_v44  ;;  %v4254_v43 = vld [vmem:[%s5356_s1 + $0x6a0] sm:$0xff]   ;;  %v4255_v44 = vld [vmem:[%s5356_s1 + $0x668] sm:$0xff]  }
  0x9e   :  { %3823 = vmatprep.subr.bf16.mxu1 %v4188_v45  ;;  %v4256_v45 = vld [vmem:[%s5356_s1 + $0x6e8] sm:$0xff]  }
  0xa0   :  { %3802 = vmatpush3.bf16.msra.mxu0 %v4189_v46  ;;  %v4257_v46 = vld [vmem:[%s5356_s1 + $0x628] sm:$0xff]  }
  0xa1   :  { %3824 = vmatpush3.bf16.msra.mxu1 %v4190_v47  ;;  %3831 = vmatprep.subr.bf16.mxu0 %v4197_v52  ;;  %v4258_v47 = vld [vmem:[%s5356_s1 + $0x6a8] sm:$0xff]   ;;  %v4263_v52 = vld [vmem:[%s5356_s1 + $0x678] sm:$0xff]  }
  0xa2   :  { %3853 = vmatprep.subr.bf16.mxu1 %v4198_v53  ;;  %v4264_v53 = vld [vmem:[%s5356_s1 + $0x6f8] sm:$0xff]  }
  0xa3   :  { %2903 = vmatmul.mubr.bf16.vlgmr.msra.gmra.mrb[16].mxu0 %v4191_v48  ;;  %v4259_v48 = vld [vmem:[%s5356_s1 + $0x670] sm:$0xff]  }
  0xa4   :  { %2944 = vmatmul.mubr.bf16.vlgmr.msra.gmra.mrb[16].mxu1 %v4194_v50  ;;  %3832 = vmatpush3.bf16.msra.mxu0 %v4199_v54  ;;  %v4261_v50 = vld [vmem:[%s5356_s1 + $0x630] sm:$0xff]   ;;  %v4265_v54 = vld [vmem:[%s5356_s1 + $0x638] sm:$0xff]  }
  0xa5   :  { %3854 = vmatpush3.bf16.msra.mxu1 %v4200_v55  ;;  %3833 = vmatprep.subr.bf16.mxu0 %v4201_v56  ;;  %v4266_v55 = vld [vmem:[%s5356_s1 + $0x6b8] sm:$0xff]   ;;  %v4267_v56 = vld [vmem:[%s5357_s0 + $0x60] ss:$144 sps:$4 sm:$0xff]  }
  0xa6   :  { %3855 = vmatprep.subr.bf16.mxu1 %v4202_v57  ;;  %2984 = vmatprep.mubr.bf16.mxu0 %v4231_v21  ;;  %v4269_v57 = vld [vmem:[%s5357_s0 + $0x64] ss:$144 sps:$4 sm:$0xff]   ;;  %v4286_v21 = vld [vmem:[%s5356_s1 + $0x7d8] sm:$0xff]  }
  0xa7   :  { %3025 = vmatprep.mubr.bf16.mxu1 %v4234_v23  ;;  %v4288_v23 = vld [vmem:[%s5356_s1 + $0x798] sm:$0xff]  }
  0xa8   :  { %3834 = vmatpush3.bf16.msra.mxu0 %v4203_v58  ;;  %v4270_v58 = vld [vmem:[%s5357_s0 + $0x68] ss:$144 sps:$4 sm:$0xff]  }
  0xa9   :  { %3856 = vmatpush3.bf16.msra.mxu1 %v4204_v59  ;;  %3835 = vmatprep.subr.bf16.mxu0 %v4205_v60  ;;  %v4272_v59 = vld [vmem:[%s5357_s0 + $0x6c] ss:$144 sps:$4 sm:$0xff]   ;;  %v4273_v60 = vld [vmem:[%s5356_s1 + $0x740] sm:$0xff]  }
  0xaa   :  { %3857 = vmatprep.subr.bf16.mxu1 %v4206_v61  ;;  %v4274_v61 = vld [vmem:[%s5356_s1 + $0x7c0] sm:$0xff]  }
  0xac   :  { %3836 = vmatpush3.bf16.msra.mxu0 %v4207_v62  ;;  %v4275_v62 = vld [vmem:[%s5356_s1 + $0x700] sm:$0xff]  }
  0xad   :  { %3858 = vmatpush3.bf16.msra.mxu1 %v4208_v63  ;;  %3837 = vmatprep.subr.bf16.mxu0 %v4209_v0  ;;  %v4276_v63 = vld [vmem:[%s5356_s1 + $0x780] sm:$0xff]   ;;  %v4277_v0 = vld [vmem:[%s5356_s1 + $0x748] sm:$0xff]  }
  0xae   :  { %3859 = vmatprep.subr.bf16.mxu1 %v4210_v1 }
  0xb0   :  { %3838 = vmatpush3.bf16.msra.mxu0 %v4211_v2  ;;  %v4278_v2 = vld [vmem:[%s5356_s1 + $0x7c8] sm:$0xff]  }
  0xb1   :  { %3860 = vmatpush3.bf16.msra.mxu1 %v4212_v3  ;;  %3839 = vmatprep.subr.bf16.mxu0 %v4213_v4  ;;  %v4279_v4 = vld [vmem:[%s5356_s1 + $0x708] sm:$0xff]  }
  0xb2   :  { %3861 = vmatprep.subr.bf16.mxu1 %v4214_v5 }
  0xb4   :  { %3840 = vmatpush3.bf16.msra.mxu0 %v4215_v6  ;;  %v4280_v6 = vld [vmem:[%s5356_s1 + $0x788] sm:$0xff]  }
  0xb5   :  { %3862 = vmatpush3.bf16.msra.mxu1 %v4216_v7  ;;  %3841 = vmatprep.subr.bf16.mxu0 %v4217_v8 }
  0xb6   :  { %3863 = vmatprep.subr.bf16.mxu1 %v4218_v9  ;;  %v4281_v9 = vld [vmem:[%s5356_s1 + $0x750] sm:$0xff]  }
  0xb8   :  { %3842 = vmatpush3.bf16.msra.mxu0 %v4219_v10 }
  0xb9   :  { %3864 = vmatpush3.bf16.msra.mxu1 %v4220_v11  ;;  %3843 = vmatprep.subr.bf16.mxu0 %v4221_v12  ;;  %v4282_v12 = vld [vmem:[%s5356_s1 + $0x7d0] sm:$0xff]  }
  0xba   :  { %3865 = vmatprep.subr.bf16.mxu1 %v4222_v13 }
  0xbc   :  { %3844 = vmatpush3.bf16.msra.mxu0 %v4223_v14  ;;  %v4283_v14 = vld [vmem:[%s5356_s1 + $0x710] sm:$0xff]  }
  0xbd   :  { %3866 = vmatpush3.bf16.msra.mxu1 %v4224_v15  ;;  %3845 = vmatprep.subr.bf16.mxu0 %v4225_v16  ;;  %v4284_v16 = vld [vmem:[%s5356_s1 + $0x790] sm:$0xff]  }
  0xbe   :  { %3867 = vmatprep.subr.bf16.mxu1 %v4226_v17 }
  0xc0   :  { %3846 = vmatpush3.bf16.msra.mxu0 %v4227_v18 }
  0xc1   :  { %3868 = vmatpush3.bf16.msra.mxu1 %v4228_v19  ;;  %3875 = vmatprep.subr.bf16.mxu0 %v4235_v24  ;;  %v4285_v19 = vld [vmem:[%s5356_s1 + $0x758] sm:$0xff]   ;;  %v4289_v24 = vld [vmem:[%s5356_s1 + $0x760] sm:$0xff]  }
  0xc2   :  { %3897 = vmatprep.subr.bf16.mxu1 %v4236_v25  ;;  %v4290_v25 = vld [vmem:[%s5356_s1 + $0x7e0] sm:$0xff]  }
  0xc3   :  { %2985 = vmatmul.mubr.bf16.vlgmr.msra.gmra.mrb[20].mxu0 %v4229_v20 }
  0xc4   :  { %3026 = vmatmul.mubr.bf16.vlgmr.msra.gmra.mrb[20].mxu1 %v4232_v22  ;;  %3876 = vmatpush3.bf16.msra.mxu0 %v4237_v26  ;;  %v4287_v22 = vld [vmem:[%s5356_s1 + $0x718] sm:$0xff]   ;;  %v4291_v26 = vld [vmem:[%s5356_s1 + $0x720] sm:$0xff]  }
  0xc5   :  { %3898 = vmatpush3.bf16.msra.mxu1 %v4238_v27  ;;  %3877 = vmatprep.subr.bf16.mxu0 %v4239_v28  ;;  %v4292_v27 = vld [vmem:[%s5356_s1 + $0x7a0] sm:$0xff]  }
  0xc6   :  { %3899 = vmatprep.subr.bf16.mxu1 %v4240_v29  ;;  %3066 = vmatprep.mubr.bf16.mxu0 %v4269_v57  ;;  %v3286_v28 = vld [vmem:[%s5358_s2] ss:$0 sm:$0xff] }
  0xc7   :  { %3107 = vmatprep.mubr.bf16.mxu1 %v4272_v59  ;;  %v4317_v59 = vld [vmem:[%s5356_s1 + $0x808] sm:$0xff]  }
  0xc8   :  { %3878 = vmatpush3.bf16.msra.mxu0 %v4241_v30  ;;  %v4293_v30 = vld [vmem:[%s5356_s1 + $0x768] sm:$0xff]  }
  0xc9   :  { %3900 = vmatpush3.bf16.msra.mxu1 %v4242_v31  ;;  %3879 = vmatprep.subr.bf16.mxu0 %v4243_v32  ;;  %v4294_v32 = vld [vmem:[%s5356_s1 + $0x7e8] sm:$0xff]  }
  0xca   :  { %3901 = vmatprep.subr.bf16.mxu1 %v4244_v33 }
  0xcc   :  { %3880 = vmatpush3.bf16.msra.mxu0 %v4245_v34  ;;  %v4295_v34 = vld [vmem:[%s5356_s1 + $0x728] sm:$0xff]  }
  0xcd   :  { %3902 = vmatpush3.bf16.msra.mxu1 %v4246_v35  ;;  %3881 = vmatprep.subr.bf16.mxu0 %v4247_v36  ;;  %v4296_v36 = vld [vmem:[%s5356_s1 + $0x7a8] sm:$0xff]  }
  0xce   :  { %3903 = vmatprep.subr.bf16.mxu1 %v4248_v37  ;;  %v4297_v37 = vld [vmem:[%s5356_s1 + $0x770] sm:$0xff]  }
  0xd0   :  { %3882 = vmatpush3.bf16.msra.mxu0 %v4249_v38  ;;  %v4298_v38 = vld [vmem:[%s5356_s1 + $0x7f0] sm:$0xff]  }
  0xd1   :  { %3904 = vmatpush3.bf16.msra.mxu1 %v4250_v39  ;;  %3883 = vmatprep.subr.bf16.mxu0 %v4251_v40  ;;  %v4299_v39 = vld [vmem:[%s5356_s1 + $0x730] sm:$0xff]  }
  0xd2   :  { %3905 = vmatprep.subr.bf16.mxu1 %v4252_v41  ;;  %v4300_v40 = vld [vmem:[%s5356_s1 + $0x7b0] sm:$0xff]   ;;  %v4301_v41 = vld [vmem:[%s5356_s1 + $0x778] sm:$0xff]  }
  0xd4   :  { %3884 = vmatpush3.bf16.msra.mxu0 %v4253_v42  ;;  %v4302_v42 = vld [vmem:[%s5356_s1 + $0x7f8] sm:$0xff]  }
  0xd5   :  { %3906 = vmatpush3.bf16.msra.mxu1 %v4254_v43  ;;  %3885 = vmatprep.subr.bf16.mxu0 %v4255_v44  ;;  %v4303_v43 = vld [vmem:[%s5356_s1 + $0x738] sm:$0xff]  }
  0xd6   :  { %3907 = vmatprep.subr.bf16.mxu1 %v4256_v45  ;;  %v4304_v44 = vld [vmem:[%s5356_s1 + $0x7b8] sm:$0xff]   ;;  %v4305_v45 = vld [vmem:[%s5357_s0 + $0x70] ss:$144 sps:$4 sm:$0xff]  }
  0xd8   :  { %3886 = vmatpush3.bf16.msra.mxu0 %v4257_v46  ;;  %v4307_v46 = vld [vmem:[%s5357_s0 + $0x74] ss:$144 sps:$4 sm:$0xff]  }
  0xd9   :  { %3908 = vmatpush3.bf16.msra.mxu1 %v4258_v47  ;;  %3887 = vmatprep.subr.bf16.mxu0 %v4259_v48  ;;  %v4308_v47 = vld [vmem:[%s5357_s0 + $0x78] ss:$144 sps:$4 sm:$0xff]   ;;  %v4310_v48 = vld [vmem:[%s5357_s0 + $0x7c] ss:$144 sps:$4 sm:$0xff]  }
  0xda   :  { %3909 = vmatprep.subr.bf16.mxu1 %v4260_v49  ;;  %v4311_v49 = vld [vmem:[%s5356_s1 + $0x840] sm:$0xff]  }
  0xdc   :  { %3888 = vmatpush3.bf16.msra.mxu0 %v4261_v50  ;;  %v4312_v50 = vld [vmem:[%s5356_s1 + $0x8c0] sm:$0xff]  }
  0xdd   :  { %3910 = vmatpush3.bf16.msra.mxu1 %v4262_v51  ;;  %3889 = vmatprep.subr.bf16.mxu0 %v4263_v52  ;;  %v4313_v51 = vld [vmem:[%s5356_s1 + $0x800] sm:$0xff]  }
  0xde   :  { %3911 = vmatprep.subr.bf16.mxu1 %v4264_v53  ;;  %v4314_v52 = vld [vmem:[%s5356_s1 + $0x880] sm:$0xff]  }
  0xe0   :  { %3890 = vmatpush3.bf16.msra.mxu0 %v4265_v54  ;;  %v4315_v54 = vld [vmem:[%s5356_s1 + $0x848] sm:$0xff]  }
  0xe1   :  { %3912 = vmatpush3.bf16.msra.mxu1 %v4266_v55  ;;  %3919 = vmatprep.subr.bf16.mxu0 %v4273_v60 }
  0xe2   :  { %3941 = vmatprep.subr.bf16.mxu1 %v4274_v61  ;;  %v4318_v61 = vld [vmem:[%s5356_s1 + $0x888] sm:$0xff]  }
  0xe3   :  { %3067 = vmatmul.mubr.bf16.vlgmr.msra.gmra.mrb[24].mxu0 %v4267_v56  ;;  %v4316_v56 = vld [vmem:[%s5356_s1 + $0x8c8] sm:$0xff]  }
  0xe4   :  { %3108 = vmatmul.mubr.bf16.vlgmr.msra.gmra.mrb[24].mxu1 %v4270_v58  ;;  %3920 = vmatpush3.bf16.msra.mxu0 %v4275_v62 }
  0xe5   :  { %3942 = vmatpush3.bf16.msra.mxu1 %v4276_v63  ;;  %3921 = vmatprep.subr.bf16.mxu0 %v4277_v0 }
  0xe6   :  { %3943 = vmatprep.subr.bf16.mxu1 %v4278_v2  ;;  %3148 = vmatprep.mubr.bf16.mxu0 %v4307_v46 }
  0xe7   :  { %3189 = vmatprep.mubr.bf16.mxu1 %v4310_v48 }
  0xe8   :  { %3922 = vmatpush3.bf16.msra.mxu0 %v4279_v4 }
  0xe9   :  { %3944 = vmatpush3.bf16.msra.mxu1 %v4280_v6  ;;  %3923 = vmatprep.subr.bf16.mxu0 %v4281_v9  ;;  %v4321_v6 = vld [vmem:[%s5356_s1 + $0x810] sm:$0xff]  }
  0xea   :  { %3945 = vmatprep.subr.bf16.mxu1 %v4282_v12  ;;  %v4322_v9 = vld [vmem:[%s5356_s1 + $0x890] sm:$0xff]  }
  0xec   :  { %3924 = vmatpush3.bf16.msra.mxu0 %v4283_v14  ;;  %v4325_v14 = vld [vmem:[%s5356_s1 + $0x818] sm:$0xff]  }
  0xed   :  { %3946 = vmatpush3.bf16.msra.mxu1 %v4284_v16  ;;  %3925 = vmatprep.subr.bf16.mxu0 %v4285_v19  ;;  %v4326_v16 = vld [vmem:[%s5356_s1 + $0x898] sm:$0xff]   ;;  %v4329_v19 = vld [vmem:[%s5356_s1 + $0x820] sm:$0xff]  }
  0xee   :  { %3947 = vmatprep.subr.bf16.mxu1 %v4286_v21  ;;  %v4331_v21 = vld [vmem:[%s5356_s1 + $0x868] sm:$0xff]  }
  0xf0   :  { %3926 = vmatpush3.bf16.msra.mxu0 %v4287_v22  ;;  %v4332_v22 = vld [vmem:[%s5356_s1 + $0x8e8] sm:$0xff]  }
  0xf1   :  { %3948 = vmatpush3.bf16.msra.mxu1 %v4288_v23  ;;  %3927 = vmatprep.subr.bf16.mxu0 %v4289_v24  ;;  %v4333_v23 = vld [vmem:[%s5356_s1 + $0x828] sm:$0xff]  }
  0xf2   :  { %3949 = vmatprep.subr.bf16.mxu1 %v4290_v25  ;;  %v4334_v24 = vld [vmem:[%s5356_s1 + $0x8a8] sm:$0xff]   ;;  %v4335_v25 = vld [vmem:[%s5356_s1 + $0x870] sm:$0xff]  }
  0xf4   :  { %3928 = vmatpush3.bf16.msra.mxu0 %v4291_v26  ;;  %v4336_v26 = vld [vmem:[%s5356_s1 + $0x8f0] sm:$0xff]  }
  0xf5   :  { %3950 = vmatpush3.bf16.msra.mxu1 %v4292_v27  ;;  %3929 = vmatprep.subr.bf16.mxu0 %v4293_v30  ;;  %v4337_v27 = vld [vmem:[%s5356_s1 + $0x830] sm:$0xff]   ;;  %v4340_v30 = vld [vmem:[%s5356_s1 + $0x8f8] sm:$0xff]  }
  0xf6   :  { %v3627_v1 = vpop.f32.mrb[0].mxu0  ;;  %3951 = vmatprep.subr.bf16.mxu1 %v4294_v32  ;;  %v4342_v32 = vld [vmem:[%s5356_s1 + $0x8b8] sm:$0xff]  }
  0xf7   :  { %v3649_v3 = vpop.f32.mrb[0].mxu1  ;;  %v3628_v5 = vpop.f32.mrb[1].mxu0 }
  0xf8   :  { %v3629_v7 = vadd.f32 %v3628_v5, %v3627_v1  ;;  %v3650_v8 = vpop.f32.mrb[1].mxu1  ;;  %v3630_v11 = vpop.f32.mrb[2].mxu0  ;;  %3930 = vmatpush3.bf16.msra.mxu0 %v4295_v34  ;;  %v4319_v1 = vld [vmem:[%s5356_s1 + $0x850] sm:$0xff]  }
  0xf9   :  { %v3651_v10 = vadd.f32 %v3650_v8, %v3649_v3  ;;  %v3652_v13 = vpop.f32.mrb[2].mxu1  ;;  %v3631_v15 = vpop.f32.mrb[3].mxu0  ;;  %3952 = vmatpush3.bf16.msra.mxu1 %v4296_v36  ;;  %3931 = vmatprep.subr.bf16.mxu0 %v4297_v37  ;;  %v4320_v3 = vld [vmem:[%s5356_s1 + $0x8d0] sm:$0xff]   ;;  %v4348_v36 = vld [vmem:[%s5357_s0 + $0x8c] ss:$144 sps:$4 sm:$0xff]  }
  0xfa   :  { %v3632_v17 = vadd.f32 %v3631_v15, %v3630_v11  ;;  %v3653_v18 = vpop.f32.mrb[3].mxu1  ;;  %v2577_v29 = vadd.f32 %v3629_v7, %v3286_v28  ;;  %3953 = vmatprep.subr.bf16.mxu1 %v4298_v38  ;;  %v4323_v11 = vld [vmem:[%s5356_s1 + $0x858] sm:$0xff]   ;;  %v4345_v34 = vld [vmem:[%s5357_s0 + $0x84] ss:$144 sps:$4 sm:$0xff]  }
  0xfb   :  { %v3654_v20 = vadd.f32 %v3653_v18, %v3652_v13  ;;  %v4324_v13 = vld [vmem:[%s5356_s1 + $0x8d8] sm:$0xff]   ;;  %v4328_v18 = vld [vmem:[%s5356_s1 + $0x8e0] sm:$0xff]  }
  0xfc   :  { %v2580_v31 = vadd.f32 %v3632_v17, %v3286_v28  ;;  %v2618_v33 = vadd.f32 %v3651_v10, %v2577_v29  ;;  %3932 = vmatpush3.bf16.msra.mxu0 %v4299_v39  ;;  %v4327_v17 = vld [vmem:[%s5356_s1 + $0x860] sm:$0xff]   ;;  %v4338_v28 = vld [vmem:[%s5356_s1 + $0x8b0] sm:$0xff]   ;;  %v4339_v29 = vld [vmem:[%s5356_s1 + $0x878] sm:$0xff]  }
  0xfd   :  { %3954 = vmatpush3.bf16.msra.mxu1 %v4300_v40  ;;  %3933 = vmatprep.subr.bf16.mxu0 %v4301_v41 }
  0xfe   :  { %v5197_v35 = vadd.f32 %v3654_v20, %v2580_v31  ;;  %3955 = vmatprep.subr.bf16.mxu1 %v4302_v42  ;;  %v4330_v20 = vld [vmem:[%s5356_s1 + $0x8a0] sm:$0xff]   ;;  %v4341_v31 = vld [vmem:[%s5356_s1 + $0x838] sm:$0xff]  }
 0x100   :  { %3934 = vmatpush3.bf16.msra.mxu0 %v4303_v43 }
 0x101   :  { %3956 = vmatpush3.bf16.msra.mxu1 %v4304_v44  ;;  %3963 = vmatprep.subr.bf16.mxu0 %v4311_v49 }
 0x102   :  { %3985 = vmatprep.subr.bf16.mxu1 %v4312_v50 }
 0x103   :  { %3149 = vmatmul.mubr.bf16.vlgmr.msra.gmra.mrb[28].mxu0 %v4305_v45 }
 0x104   :  { %3190 = vmatmul.mubr.bf16.vlgmr.msra.gmra.mrb[28].mxu1 %v4308_v47  ;;  %3964 = vmatpush3.bf16.msra.mxu0 %v4313_v51 }
 0x105   :  { %3986 = vmatpush3.bf16.msra.mxu1 %v4314_v52  ;;  %3965 = vmatprep.subr.bf16.mxu0 %v4315_v54 }
 0x106   :  { %3987 = vmatprep.subr.bf16.mxu1 %v4316_v56  ;;  %3230 = vmatprep.mubr.bf16.mxu0 %v4345_v34 }
 0x107   :  { %3271 = vmatprep.mubr.bf16.mxu1 %v4348_v36 }
 0x108   :  { %3966 = vmatpush3.bf16.msra.mxu0 %v4317_v59 }
 0x109   :  { %3988 = vmatpush3.bf16.msra.mxu1 %v4318_v61  ;;  %3967 = vmatprep.subr.bf16.mxu0 %v4319_v1 }
 0x10a   :  { %3989 = vmatprep.subr.bf16.mxu1 %v4320_v3 }
 0x10c   :  { %3968 = vmatpush3.bf16.msra.mxu0 %v4321_v6 }
 0x10d   :  { %3990 = vmatpush3.bf16.msra.mxu1 %v4322_v9  ;;  %3969 = vmatprep.subr.bf16.mxu0 %v4323_v11 }
 0x10e   :  { %3991 = vmatprep.subr.bf16.mxu1 %v4324_v13 }
 0x110   :  { %3970 = vmatpush3.bf16.msra.mxu0 %v4325_v14 }
 0x111   :  { %3992 = vmatpush3.bf16.msra.mxu1 %v4326_v16  ;;  %3971 = vmatprep.subr.bf16.mxu0 %v4327_v17 }
 0x112   :  { %3993 = vmatprep.subr.bf16.mxu1 %v4328_v18 }
 0x114   :  { %3972 = vmatpush3.bf16.msra.mxu0 %v4329_v19 }
 0x115   :  { %3994 = vmatpush3.bf16.msra.mxu1 %v4330_v20  ;;  %3973 = vmatprep.subr.bf16.mxu0 %v4331_v21 }
 0x116   :  { %v3671_v53 = vpop.f32.mrb[4].mxu0  ;;  %3995 = vmatprep.subr.bf16.mxu1 %v4332_v22 }
 0x117   :  { %v3672_v55 = vpop.f32.mrb[5].mxu0  ;;  %v3693_v57 = vpop.f32.mrb[4].mxu1 }
 0x118   :  { %v3673_v58 = vadd.f32 %v3672_v55, %v3671_v53  ;;  %v3694_v60 = vpop.f32.mrb[5].mxu1  ;;  %v3674_v0 = vpop.f32.mrb[6].mxu0  ;;  %3974 = vmatpush3.bf16.msra.mxu0 %v4333_v23 }
 0x119   :  { %v3695_v63 = vadd.f32 %v3694_v60, %v3693_v57  ;;  %v3696_v2 = vpop.f32.mrb[6].mxu1  ;;  %v3675_v5 = vpop.f32.mrb[7].mxu0  ;;  %3996 = vmatpush3.bf16.msra.mxu1 %v4334_v24  ;;  %3975 = vmatprep.subr.bf16.mxu0 %v4335_v25 }
 0x11a   :  { %v2659_v62 = vadd.f32 %v3673_v58, %v2618_v33  ;;  %v3676_v7 = vadd.f32 %v3675_v5, %v3674_v0  ;;  %v3697_v8 = vpop.f32.mrb[7].mxu1  ;;  %3997 = vmatprep.subr.bf16.mxu1 %v4336_v26  ;;  %v4343_v33 = vld [vmem:[%s5357_s0 + $0x80] ss:$144 sps:$4 sm:$0xff]  }
 0x11b   :  { %v3698_v10 = vadd.f32 %v3697_v8, %v3696_v2 }
 0x11c   :  { %v5268_v4 = vadd.f32 %v3695_v63, %v2659_v62  ;;  %v2662_v12 = vadd.f32 %v3676_v7, %v5197_v35  ;;  %3976 = vmatpush3.bf16.msra.mxu0 %v4337_v27  ;;  %v4346_v35 = vld [vmem:[%s5357_s0 + $0x88] ss:$144 sps:$4 sm:$0xff]  }
 0x11d   :  { %3998 = vmatpush3.bf16.msra.mxu1 %v4338_v28  ;;  %3977 = vmatprep.subr.bf16.mxu0 %v4339_v29 }
 0x11e   :  { %v2703_v15 = vadd.f32 %v3698_v10, %v2662_v12  ;;  %3999 = vmatprep.subr.bf16.mxu1 %v4340_v30 }
 0x120   :  { %3978 = vmatpush3.bf16.msra.mxu0 %v4341_v31 }
 0x121   :  { %4000 = vmatpush3.bf16.msra.mxu1 %v4342_v32 }
 0x123   :  { %3231 = vmatmul.mubr.bf16.vlgmr.msra.gmra.mrb[32].mxu0 %v4343_v33 }
 0x124   :  { %3272 = vmatmul.mubr.bf16.vlgmr.msra.gmra.mrb[32].mxu1 %v4346_v35 }
 0x136   :  { %v3715_v37 = vpop.f32.mrb[8].mxu0 }
 0x137   :  { %v3737_v38 = vpop.f32.mrb[8].mxu1  ;;  %v3716_v39 = vpop.f32.mrb[9].mxu0 }
 0x138   :  { %v3717_v40 = vadd.f32 %v3716_v39, %v3715_v37  ;;  %v3738_v41 = vpop.f32.mrb[9].mxu1  ;;  %v3718_v42 = vpop.f32.mrb[10].mxu0 }
 0x139   :  { %v3739_v43 = vadd.f32 %v3738_v41, %v3737_v38  ;;  %v3740_v44 = vpop.f32.mrb[10].mxu1  ;;  %v3719_v45 = vpop.f32.mrb[11].mxu0 }
 0x13a   :  { %v2741_v46 = vadd.f32 %v3717_v40, %v5268_v4  ;;  %v3720_v47 = vadd.f32 %v3719_v45, %v3718_v42  ;;  %v3741_v48 = vpop.f32.mrb[11].mxu1 }
 0x13b   :  { %v3742_v49 = vadd.f32 %v3741_v48, %v3740_v44 }
 0x13c   :  { %v2782_v50 = vadd.f32 %v3739_v43, %v2741_v46  ;;  %v2744_v51 = vadd.f32 %v3720_v47, %v2703_v15 }
 0x13e   :  { %v2785_v52 = vadd.f32 %v3742_v49, %v2744_v51 }
 0x156   :  { %v3759_v53 = vpop.f32.mrb[12].mxu0 }
 0x157   :  { %v3781_v54 = vpop.f32.mrb[12].mxu1  ;;  %v3760_v55 = vpop.f32.mrb[13].mxu0 }
 0x158   :  { %v3761_v56 = vadd.f32 %v3760_v55, %v3759_v53  ;;  %v3782_v57 = vpop.f32.mrb[13].mxu1  ;;  %v3762_v58 = vpop.f32.mrb[14].mxu0 }
 0x159   :  { %v3783_v59 = vadd.f32 %v3782_v57, %v3781_v54  ;;  %v3784_v60 = vpop.f32.mrb[14].mxu1  ;;  %v3763_v61 = vpop.f32.mrb[15].mxu0 }
 0x15a   :  { %v2823_v62 = vadd.f32 %v3761_v56, %v2782_v50  ;;  %v3764_v63 = vadd.f32 %v3763_v61, %v3762_v58  ;;  %v3785_v0 = vpop.f32.mrb[15].mxu1 }
 0x15b   :  { %v3786_v1 = vadd.f32 %v3785_v0, %v3784_v60 }
 0x15c   :  { %v2864_v2 = vadd.f32 %v3783_v59, %v2823_v62  ;;  %v2826_v3 = vadd.f32 %v3764_v63, %v2785_v52 }
 0x15e   :  { %v2867_v4 = vadd.f32 %v3786_v1, %v2826_v3 }
 0x176   :  { %v3803_v5 = vpop.f32.mrb[16].mxu0 }
 0x177   :  { %v3804_v6 = vpop.f32.mrb[17].mxu0  ;;  %v3825_v7 = vpop.f32.mrb[16].mxu1 }
 0x178   :  { %v3805_v8 = vadd.f32 %v3804_v6, %v3803_v5  ;;  %v3806_v9 = vpop.f32.mrb[18].mxu0  ;;  %v3826_v10 = vpop.f32.mrb[17].mxu1 }
 0x179   :  { %v3807_v11 = vpop.f32.mrb[19].mxu0  ;;  %v3827_v13 = vadd.f32 %v3826_v10, %v3825_v7  ;;  %v3828_v14 = vpop.f32.mrb[18].mxu1 }
 0x17a   :  { %v2905_v12 = vadd.f32 %v3805_v8, %v2864_v2  ;;  %v3808_v15 = vadd.f32 %v3807_v11, %v3806_v9  ;;  %v3829_v16 = vpop.f32.mrb[19].mxu1 }
 0x17b   :  { %v3830_v19 = vadd.f32 %v3829_v16, %v3828_v14 }
 0x17c   :  { %v2946_v17 = vadd.f32 %v3827_v13, %v2905_v12  ;;  %v2908_v18 = vadd.f32 %v3808_v15, %v2867_v4 }
 0x17e   :  { %v2949_v20 = vadd.f32 %v3830_v19, %v2908_v18 }
 0x196   :  { %v3847_v21 = vpop.f32.mrb[20].mxu0 }
 0x197   :  { %v3869_v22 = vpop.f32.mrb[20].mxu1  ;;  %v3848_v23 = vpop.f32.mrb[21].mxu0 }
 0x198   :  { %v3849_v24 = vadd.f32 %v3848_v23, %v3847_v21  ;;  %v3870_v25 = vpop.f32.mrb[21].mxu1  ;;  %v3850_v26 = vpop.f32.mrb[22].mxu0 }
 0x199   :  { %v3871_v27 = vadd.f32 %v3870_v25, %v3869_v22  ;;  %v3872_v28 = vpop.f32.mrb[22].mxu1  ;;  %v3851_v29 = vpop.f32.mrb[23].mxu0 }
 0x19a   :  { %v2987_v30 = vadd.f32 %v3849_v24, %v2946_v17  ;;  %v3852_v31 = vadd.f32 %v3851_v29, %v3850_v26  ;;  %v3873_v32 = vpop.f32.mrb[23].mxu1 }
 0x19b   :  { %v3874_v33 = vadd.f32 %v3873_v32, %v3872_v28 }
 0x19c   :  { %v3028_v34 = vadd.f32 %v3871_v27, %v2987_v30  ;;  %v2990_v35 = vadd.f32 %v3852_v31, %v2949_v20 }
 0x19e   :  { %v3031_v36 = vadd.f32 %v3874_v33, %v2990_v35 }
 0x1b6   :  { %v3891_v37 = vpop.f32.mrb[24].mxu0 }
 0x1b7   :  { %v3913_v38 = vpop.f32.mrb[24].mxu1  ;;  %v3892_v39 = vpop.f32.mrb[25].mxu0 }
 0x1b8   :  { %v3893_v40 = vadd.f32 %v3892_v39, %v3891_v37  ;;  %v3914_v41 = vpop.f32.mrb[25].mxu1  ;;  %v3894_v42 = vpop.f32.mrb[26].mxu0 }
 0x1b9   :  { %v3915_v43 = vadd.f32 %v3914_v41, %v3913_v38  ;;  %v3916_v44 = vpop.f32.mrb[26].mxu1  ;;  %v3895_v45 = vpop.f32.mrb[27].mxu0 }
 0x1ba   :  { %v3069_v46 = vadd.f32 %v3893_v40, %v3028_v34  ;;  %v3896_v47 = vadd.f32 %v3895_v45, %v3894_v42  ;;  %v3917_v48 = vpop.f32.mrb[27].mxu1 }
 0x1bb   :  { %v3918_v49 = vadd.f32 %v3917_v48, %v3916_v44 }
 0x1bc   :  { %v3110_v50 = vadd.f32 %v3915_v43, %v3069_v46  ;;  %v3072_v51 = vadd.f32 %v3896_v47, %v3031_v36 }
 0x1be   :  { %v3113_v52 = vadd.f32 %v3918_v49, %v3072_v51 }
 0x1d6   :  { %v3935_v53 = vpop.f32.mrb[28].mxu0 }
 0x1d7   :  { %v3957_v54 = vpop.f32.mrb[28].mxu1  ;;  %v3936_v55 = vpop.f32.mrb[29].mxu0 }
 0x1d8   :  { %v3937_v56 = vadd.f32 %v3936_v55, %v3935_v53  ;;  %v3958_v57 = vpop.f32.mrb[29].mxu1  ;;  %v3938_v58 = vpop.f32.mrb[30].mxu0 }
 0x1d9   :  { %v3959_v59 = vadd.f32 %v3958_v57, %v3957_v54  ;;  %v3960_v60 = vpop.f32.mrb[30].mxu1  ;;  %v3939_v61 = vpop.f32.mrb[31].mxu0 }
 0x1da   :  { %v3151_v62 = vadd.f32 %v3937_v56, %v3110_v50  ;;  %v3940_v63 = vadd.f32 %v3939_v61, %v3938_v58  ;;  %v3961_v0 = vpop.f32.mrb[31].mxu1 }
 0x1db   :  { %v3962_v1 = vadd.f32 %v3961_v0, %v3960_v60 }
 0x1dc   :  { %v3192_v2 = vadd.f32 %v3959_v59, %v3151_v62  ;;  %v3154_v3 = vadd.f32 %v3940_v63, %v3113_v52 }
 0x1de   :  { %v3195_v4 = vadd.f32 %v3962_v1, %v3154_v3 }
 0x1f6   :  { %v3979_v5 = vpop.f32.mrb[32].mxu0 }
 0x1f7   :  { %v3980_v6 = vpop.f32.mrb[33].mxu0  ;;  %v4001_v7 = vpop.f32.mrb[32].mxu1 }
 0x1f8   :  { %v3981_v8 = vadd.f32 %v3980_v6, %v3979_v5  ;;  %v3982_v9 = vpop.f32.mrb[34].mxu0  ;;  %v4002_v10 = vpop.f32.mrb[33].mxu1 }
 0x1f9   :  { %v3983_v11 = vpop.f32.mrb[35].mxu0  ;;  %v4003_v13 = vadd.f32 %v4002_v10, %v4001_v7  ;;  %v4004_v14 = vpop.f32.mrb[34].mxu1 }
 0x1fa   :  { %v3233_v12 = vadd.f32 %v3981_v8, %v3192_v2  ;;  %v3984_v15 = vadd.f32 %v3983_v11, %v3982_v9  ;;  %v4005_v16 = vpop.f32.mrb[35].mxu1 }
 0x1fb   :  { %v4006_v19 = vadd.f32 %v4005_v16, %v4004_v14 }
 0x1fc   :  { %v3274_v17 = vadd.f32 %v4003_v13, %v3233_v12  ;;  %v3236_v18 = vadd.f32 %v3984_v15, %v3195_v4 }
 0x1fe   :  { %3280 = vst [vmem:[%s5359_s3] sm:$0xff] %v3274_v17  ;;  %v3277_v20 = vadd.f32 %v4006_v19, %v3236_v18 }
 0x200   :  { %3281 = vst [vmem:[%s5359_s3 + $0x8] sm:$0xff] %v3277_v20 }

// kernel: dispnet_bi_forward.66
= control target key start
LH: loop header
LB: loop body
LE: loop exit
PB: predicated region body
PF: predicated region fallthrough
CT: control target
= control target key end

     0   :  { %vm2358_vm0 = vmmov 0   ;;  %s2901_s1 = inlined_call_operand.vmem [shape: bf16[2432,128], index: 1, kind: input, shape index: {}]   ;;  %s2902_s0 = inlined_call_operand.vmem [shape: bf16[16,2432], index: 0, kind: input, shape index: {}]   ;;  %s2903_s2 = inlined_call_operand.vmem [shape: f32[1,128], index: 2, kind: input, shape index: {}]   ;;  %s2904_s3 = inlined_call_operand.vmem [shape: f32[16,128], index: 3, kind: output, shape index: {}]  }
   0x1   :  { %v2177_v0 = vld [vmem:[%s2901_s1 + $0x40] sm:$0xff]   ;;  %v2181_v4 = vld [vmem:[%s2901_s1 + $0x48] sm:$0xff]   ;;  %v2185_v8 = vld [vmem:[%s2901_s1 + $0x50] sm:$0xff]  }
   0x2   :  { %v2178_v1 = vld [vmem:[%s2901_s1] sm:$0xff]   ;;  %1948 = vmatprep.subr.bf16.mxu0 %v2177_v0  ;;  %v2182_v5 = vld [vmem:[%s2901_s1 + $0x8] sm:$0xff]   ;;  %v2186_v9 = vld [vmem:[%s2901_s1 + $0x10] sm:$0xff]  }
   0x3   :  { %v2179_v2 = vld [vmem:[%s2901_s1 + $0xc0] sm:$0xff]   ;;  %1949 = vmatpush3.bf16.msra.mxu0 %v2178_v1  ;;  %v2183_v6 = vld [vmem:[%s2901_s1 + $0xc8] sm:$0xff]   ;;  %v2187_v10 = vld [vmem:[%s2901_s1 + $0xd0] sm:$0xff]  }
   0x4   :  { %v2180_v3 = vld [vmem:[%s2901_s1 + $0x80] sm:$0xff]   ;;  %1970 = vmatprep.subr.bf16.mxu1 %v2179_v2  ;;  %1950 = vmatprep.subr.bf16.mxu0 %v2181_v4  ;;  %v2184_v7 = vld [vmem:[%s2901_s1 + $0x88] sm:$0xff]   ;;  %v2188_v11 = vld [vmem:[%s2901_s1 + $0x90] sm:$0xff]  }
   0x5   :  { %1971 = vmatpush3.bf16.msra.mxu1 %v2180_v3  ;;  %v2189_v12 = vld [vmem:[%s2901_s1 + $0x58] sm:$0xff]   ;;  %v2193_v16 = vld [vmem:[%s2901_s1 + $0x60] sm:$0xff]   ;;  %v2197_v20 = vld [vmem:[%s2901_s1 + $0x68] sm:$0xff]  }
   0x6   :  { %1972 = vmatprep.subr.bf16.mxu1 %v2183_v6  ;;  %v2190_v13 = vld [vmem:[%s2901_s1 + $0x18] sm:$0xff]   ;;  %v2194_v17 = vld [vmem:[%s2901_s1 + $0x20] sm:$0xff]   ;;  %v2198_v21 = vld [vmem:[%s2901_s1 + $0x28] sm:$0xff]  }
   0x7   :  { %1951 = vmatpush3.bf16.msra.mxu0 %v2182_v5  ;;  %v2191_v14 = vld [vmem:[%s2901_s1 + $0xd8] sm:$0xff]   ;;  %v2195_v18 = vld [vmem:[%s2901_s1 + $0xe0] sm:$0xff]   ;;  %v2199_v22 = vld [vmem:[%s2901_s1 + $0xe8] sm:$0xff]  }
   0x8   :  { %1952 = vmatprep.subr.bf16.mxu0 %v2185_v8  ;;  %v2192_v15 = vld [vmem:[%s2901_s1 + $0x98] sm:$0xff]   ;;  %v2196_v19 = vld [vmem:[%s2901_s1 + $0xa0] sm:$0xff]   ;;  %v2200_v23 = vld [vmem:[%s2901_s1 + $0xa8] sm:$0xff]  }
   0x9   :  { %1973 = vmatpush3.bf16.msra.mxu1 %v2184_v7  ;;  %v2201_v24 = vld [vmem:[%s2901_s1 + $0x70] sm:$0xff]   ;;  %v2205_v28 = vld [vmem:[%s2901_s1 + $0x78] sm:$0xff]   ;;  %v2208_v31 = vld [vmem:[%s2902_s0] ss:$76 sps:$4 sm:$0xff]  }
   0xa   :  { %1974 = vmatprep.subr.bf16.mxu1 %v2187_v10  ;;  %v2202_v25 = vld [vmem:[%s2901_s1 + $0x30] sm:$0xff]   ;;  %v2206_v29 = vld [vmem:[%s2901_s1 + $0x38] sm:$0xff]   ;;  %v2212_v34 = vld [vmem:[%s2901_s1 + $0x140] sm:$0xff]  }
   0xb   :  { %1953 = vmatpush3.bf16.msra.mxu0 %v2186_v9  ;;  %v2203_v26 = vld [vmem:[%s2901_s1 + $0xf0] sm:$0xff]   ;;  %v2207_v30 = vld [vmem:[%s2901_s1 + $0xf8] sm:$0xff]   ;;  %v2216_v37 = vld [vmem:[%s2901_s1 + $0x100] sm:$0xff]  }
   0xc   :  { %1954 = vmatprep.subr.bf16.mxu0 %v2189_v12  ;;  %v2204_v27 = vld [vmem:[%s2901_s1 + $0xb0] sm:$0xff]   ;;  %v2211_v33 = vld [vmem:[%s2901_s1 + $0xb8] sm:$0xff]   ;;  %v2217_v38 = vld [vmem:[%s2901_s1 + $0x1c0] sm:$0xff]  }
   0xd   :  { %1975 = vmatpush3.bf16.msra.mxu1 %v2188_v11  ;;  %v2210_v32 = vld [vmem:[%s2902_s0 + $0x4] ss:$76 sps:$4 sm:$0xff]   ;;  %v2213_v35 = vld [vmem:[%s2902_s0 + $0x8] ss:$76 sps:$4 sm:$0xff]   ;;  %v2215_v36 = vld [vmem:[%s2902_s0 + $0xc] ss:$76 sps:$4 sm:$0xff]  }
   0xe   :  { %1976 = vmatprep.subr.bf16.mxu1 %v2191_v14  ;;  %1386 = vmatprep.mubr.bf16.mxu0 %v2210_v32  ;;  %v2218_v39 = vld [vmem:[%s2901_s1 + $0x180] sm:$0xff]   ;;  %v2219_v40 = vld [vmem:[%s2901_s1 + $0x148] sm:$0xff]   ;;  %v2223_v44 = vld [vmem:[%s2901_s1 + $0x150] sm:$0xff]  }
   0xf   :  { %1955 = vmatpush3.bf16.msra.mxu0 %v2190_v13  ;;  %1427 = vmatprep.mubr.bf16.mxu1 %v2215_v36  ;;  %v2220_v41 = vld [vmem:[%s2901_s1 + $0x108] sm:$0xff]   ;;  %v2224_v45 = vld [vmem:[%s2901_s1 + $0x110] sm:$0xff]   ;;  %v2227_v48 = vld [vmem:[%s2901_s1 + $0x158] sm:$0xff]  }
  0x10   :  { %1956 = vmatprep.subr.bf16.mxu0 %v2193_v16  ;;  %v2221_v42 = vld [vmem:[%s2901_s1 + $0x1c8] sm:$0xff]   ;;  %v2225_v46 = vld [vmem:[%s2901_s1 + $0x1d0] sm:$0xff]   ;;  %v2228_v49 = vld [vmem:[%s2901_s1 + $0x118] sm:$0xff]  }
  0x11   :  { %1977 = vmatpush3.bf16.msra.mxu1 %v2192_v15  ;;  %v2222_v43 = vld [vmem:[%s2901_s1 + $0x188] sm:$0xff]   ;;  %v2226_v47 = vld [vmem:[%s2901_s1 + $0x190] sm:$0xff]   ;;  %v2229_v50 = vld [vmem:[%s2901_s1 + $0x1d8] sm:$0xff]  }
  0x12   :  { %1978 = vmatprep.subr.bf16.mxu1 %v2195_v18  ;;  %v2230_v51 = vld [vmem:[%s2901_s1 + $0x198] sm:$0xff]   ;;  %v2231_v52 = vld [vmem:[%s2901_s1 + $0x160] sm:$0xff]   ;;  %v2235_v56 = vld [vmem:[%s2901_s1 + $0x168] sm:$0xff]  }
  0x13   :  { %1957 = vmatpush3.bf16.msra.mxu0 %v2194_v17  ;;  %v2232_v53 = vld [vmem:[%s2901_s1 + $0x120] sm:$0xff]   ;;  %v2236_v57 = vld [vmem:[%s2901_s1 + $0x128] sm:$0xff]   ;;  %v2239_v60 = vld [vmem:[%s2901_s1 + $0x170] sm:$0xff]  }
  0x14   :  { %1958 = vmatprep.subr.bf16.mxu0 %v2197_v20  ;;  %v2233_v54 = vld [vmem:[%s2901_s1 + $0x1e0] sm:$0xff]   ;;  %v2237_v58 = vld [vmem:[%s2901_s1 + $0x1e8] sm:$0xff]   ;;  %v2240_v61 = vld [vmem:[%s2901_s1 + $0x130] sm:$0xff]  }
  0x15   :  { %1979 = vmatpush3.bf16.msra.mxu1 %v2196_v19  ;;  %v2234_v55 = vld [vmem:[%s2901_s1 + $0x1a0] sm:$0xff]   ;;  %v2238_v59 = vld [vmem:[%s2901_s1 + $0x1a8] sm:$0xff]   ;;  %v2241_v62 = vld [vmem:[%s2901_s1 + $0x1f0] sm:$0xff]  }
  0x16   :  { %1980 = vmatprep.subr.bf16.mxu1 %v2199_v22  ;;  %v2242_v63 = vld [vmem:[%s2901_s1 + $0x1b0] sm:$0xff]   ;;  %v2243_v0 = vld [vmem:[%s2901_s1 + $0x178] sm:$0xff]   ;;  %v2250_v6 = vld [vmem:[%s2901_s1 + $0x240] sm:$0xff]  }
  0x17   :  { %1959 = vmatpush3.bf16.msra.mxu0 %v2198_v21  ;;  %v2244_v1 = vld [vmem:[%s2901_s1 + $0x138] sm:$0xff]   ;;  %v2248_v4 = vld [vmem:[%s2902_s0 + $0x14] ss:$76 sps:$4 sm:$0xff]   ;;  %v2257_v12 = vld [vmem:[%s2901_s1 + $0x248] sm:$0xff]  }
  0x18   :  { %1960 = vmatprep.subr.bf16.mxu0 %v2201_v24  ;;  %v2245_v2 = vld [vmem:[%s2901_s1 + $0x1f8] sm:$0xff]   ;;  %v2254_v9 = vld [vmem:[%s2901_s1 + $0x200] sm:$0xff]   ;;  %v2258_v13 = vld [vmem:[%s2901_s1 + $0x208] sm:$0xff]  }
  0x19   :  { %1981 = vmatpush3.bf16.msra.mxu1 %v2200_v23  ;;  %v2246_v3 = vld [vmem:[%s2902_s0 + $0x10] ss:$76 sps:$4 sm:$0xff]   ;;  %v2251_v7 = vld [vmem:[%s2902_s0 + $0x18] ss:$76 sps:$4 sm:$0xff]   ;;  %v2259_v14 = vld [vmem:[%s2901_s1 + $0x2c8] sm:$0xff]  }
  0x1a   :  { %1982 = vmatprep.subr.bf16.mxu1 %v2203_v26  ;;  %v2249_v5 = vld [vmem:[%s2901_s1 + $0x1b8] sm:$0xff]   ;;  %v2255_v10 = vld [vmem:[%s2901_s1 + $0x2c0] sm:$0xff]   ;;  %v2260_v15 = vld [vmem:[%s2901_s1 + $0x288] sm:$0xff]  }
  0x1b   :  { %1961 = vmatpush3.bf16.msra.mxu0 %v2202_v25  ;;  %v2253_v8 = vld [vmem:[%s2902_s0 + $0x1c] ss:$76 sps:$4 sm:$0xff]   ;;  %v2256_v11 = vld [vmem:[%s2901_s1 + $0x280] sm:$0xff]   ;;  %v2261_v16 = vld [vmem:[%s2901_s1 + $0x250] sm:$0xff]  }
  0x1c   :  { %1962 = vmatprep.subr.bf16.mxu0 %v2205_v28  ;;  %v2262_v17 = vld [vmem:[%s2901_s1 + $0x210] sm:$0xff]   ;;  %v2265_v20 = vld [vmem:[%s2901_s1 + $0x258] sm:$0xff]   ;;  %v2269_v24 = vld [vmem:[%s2901_s1 + $0x260] sm:$0xff]  }
  0x1d   :  { %1983 = vmatpush3.bf16.msra.mxu1 %v2204_v27  ;;  %v2263_v18 = vld [vmem:[%s2901_s1 + $0x2d0] sm:$0xff]   ;;  %v2266_v21 = vld [vmem:[%s2901_s1 + $0x218] sm:$0xff]   ;;  %v2270_v25 = vld [vmem:[%s2901_s1 + $0x220] sm:$0xff]  }
  0x1e   :  { %1984 = vmatprep.subr.bf16.mxu1 %v2207_v30  ;;  %v2264_v19 = vld [vmem:[%s2901_s1 + $0x290] sm:$0xff]   ;;  %v2267_v22 = vld [vmem:[%s2901_s1 + $0x2d8] sm:$0xff]   ;;  %v2271_v26 = vld [vmem:[%s2901_s1 + $0x2e0] sm:$0xff]  }
  0x1f   :  { %1963 = vmatpush3.bf16.msra.mxu0 %v2206_v29  ;;  %v2268_v23 = vld [vmem:[%s2901_s1 + $0x298] sm:$0xff]   ;;  %v2272_v27 = vld [vmem:[%s2901_s1 + $0x2a0] sm:$0xff]   ;;  %v2273_v28 = vld [vmem:[%s2901_s1 + $0x268] sm:$0xff]  }
  0x20   :  { %1992 = vmatprep.subr.bf16.mxu0 %v2212_v34  ;;  %v2274_v29 = vld [vmem:[%s2901_s1 + $0x228] sm:$0xff]   ;;  %v2277_v32 = vld [vmem:[%s2901_s1 + $0x270] sm:$0xff]   ;;  %v2281_v36 = vld [vmem:[%s2901_s1 + $0x278] sm:$0xff]  }
  0x21   :  { %1985 = vmatpush3.bf16.msra.mxu1 %v2211_v33  ;;  %v2275_v30 = vld [vmem:[%s2901_s1 + $0x2e8] sm:$0xff]   ;;  %v2278_v33 = vld [vmem:[%s2901_s1 + $0x230] sm:$0xff]  }
  0x22   :  { %1387 = vmatmul.mubr.bf16.vlgmr.msra.gmra.mrb[0].mxu0 %v2208_v31  ;;  %2014 = vmatprep.subr.bf16.mxu1 %v2217_v38  ;;  %v2276_v31 = vld [vmem:[%s2901_s1 + $0x2a8] sm:$0xff]   ;;  %v2279_v34 = vld [vmem:[%s2901_s1 + $0x2f0] sm:$0xff]   ;;  %v2283_v38 = vld [vmem:[%s2901_s1 + $0x2f8] sm:$0xff]  }
  0x23   :  { %1993 = vmatpush3.bf16.msra.mxu0 %v2216_v37  ;;  %1468 = vmatprep.mubr.bf16.mxu0 %v2248_v4  ;;  %v2282_v37 = vld [vmem:[%s2901_s1 + $0x238] sm:$0xff]   ;;  %v2315_v4 = vld [vmem:[%s2901_s1 + $0x370] sm:$0xff]  }
  0x24   :  { %1428 = vmatmul.mubr.bf16.vlgmr.msra.gmra.mrb[0].mxu1 %v2213_v35  ;;  %1994 = vmatprep.subr.bf16.mxu0 %v2219_v40  ;;  %v2280_v35 = vld [vmem:[%s2901_s1 + $0x2b0] sm:$0xff]  }
  0x25   :  { %2015 = vmatpush3.bf16.msra.mxu1 %v2218_v39  ;;  %1509 = vmatprep.mubr.bf16.mxu1 %v2253_v8  ;;  %v2284_v39 = vld [vmem:[%s2902_s0 + $0x20] ss:$76 sps:$4 sm:$0xff]   ;;  %v2286_v40 = vld [vmem:[%s2902_s0 + $0x24] ss:$76 sps:$4 sm:$0xff]   ;;  %v2319_v8 = vld [vmem:[%s2901_s1 + $0x378] sm:$0xff]  }
  0x26   :  { %2016 = vmatprep.subr.bf16.mxu1 %v2221_v42  ;;  %v2288_v42 = vld [vmem:[%s2901_s1 + $0x340] sm:$0xff]  }
  0x27   :  { %1995 = vmatpush3.bf16.msra.mxu0 %v2220_v41  ;;  %v2287_v41 = vld [vmem:[%s2901_s1 + $0x2b8] sm:$0xff]  }
  0x28   :  { %1996 = vmatprep.subr.bf16.mxu0 %v2223_v44  ;;  %v2291_v44 = vld [vmem:[%s2902_s0 + $0x2c] ss:$76 sps:$4 sm:$0xff]  }
  0x29   :  { %2017 = vmatpush3.bf16.msra.mxu1 %v2222_v43  ;;  %v2289_v43 = vld [vmem:[%s2902_s0 + $0x28] ss:$76 sps:$4 sm:$0xff]  }
  0x2a   :  { %2018 = vmatprep.subr.bf16.mxu1 %v2225_v46  ;;  %v2293_v46 = vld [vmem:[%s2901_s1 + $0x3c0] sm:$0xff]  }
  0x2b   :  { %1997 = vmatpush3.bf16.msra.mxu0 %v2224_v45  ;;  %v2292_v45 = vld [vmem:[%s2901_s1 + $0x300] sm:$0xff]  }
  0x2c   :  { %1998 = vmatprep.subr.bf16.mxu0 %v2227_v48  ;;  %v2295_v48 = vld [vmem:[%s2901_s1 + $0x348] sm:$0xff]  }
  0x2d   :  { %2019 = vmatpush3.bf16.msra.mxu1 %v2226_v47  ;;  %v2294_v47 = vld [vmem:[%s2901_s1 + $0x380] sm:$0xff]  }
  0x2e   :  { %2020 = vmatprep.subr.bf16.mxu1 %v2229_v50  ;;  %v2297_v50 = vld [vmem:[%s2901_s1 + $0x3c8] sm:$0xff]  }
  0x2f   :  { %1999 = vmatpush3.bf16.msra.mxu0 %v2228_v49  ;;  %v2296_v49 = vld [vmem:[%s2901_s1 + $0x308] sm:$0xff]  }
  0x30   :  { %2000 = vmatprep.subr.bf16.mxu0 %v2231_v52  ;;  %v2299_v52 = vld [vmem:[%s2901_s1 + $0x350] sm:$0xff]  }
  0x31   :  { %2021 = vmatpush3.bf16.msra.mxu1 %v2230_v51  ;;  %v2298_v51 = vld [vmem:[%s2901_s1 + $0x388] sm:$0xff]  }
  0x32   :  { %2022 = vmatprep.subr.bf16.mxu1 %v2233_v54  ;;  %v2301_v54 = vld [vmem:[%s2901_s1 + $0x3d0] sm:$0xff]  }
  0x33   :  { %2001 = vmatpush3.bf16.msra.mxu0 %v2232_v53  ;;  %v2300_v53 = vld [vmem:[%s2901_s1 + $0x310] sm:$0xff]  }
  0x34   :  { %2002 = vmatprep.subr.bf16.mxu0 %v2235_v56  ;;  %v2303_v56 = vld [vmem:[%s2901_s1 + $0x358] sm:$0xff]  }
  0x35   :  { %2023 = vmatpush3.bf16.msra.mxu1 %v2234_v55  ;;  %v2302_v55 = vld [vmem:[%s2901_s1 + $0x390] sm:$0xff]  }
  0x36   :  { %2024 = vmatprep.subr.bf16.mxu1 %v2237_v58  ;;  %v2305_v58 = vld [vmem:[%s2901_s1 + $0x3d8] sm:$0xff]  }
  0x37   :  { %2003 = vmatpush3.bf16.msra.mxu0 %v2236_v57  ;;  %v2304_v57 = vld [vmem:[%s2901_s1 + $0x318] sm:$0xff]  }
  0x38   :  { %2004 = vmatprep.subr.bf16.mxu0 %v2239_v60  ;;  %v2307_v60 = vld [vmem:[%s2901_s1 + $0x360] sm:$0xff]  }
  0x39   :  { %2025 = vmatpush3.bf16.msra.mxu1 %v2238_v59  ;;  %v2306_v59 = vld [vmem:[%s2901_s1 + $0x398] sm:$0xff]  }
  0x3a   :  { %2026 = vmatprep.subr.bf16.mxu1 %v2241_v62  ;;  %v2309_v62 = vld [vmem:[%s2901_s1 + $0x3e0] sm:$0xff]  }
  0x3b   :  { %2005 = vmatpush3.bf16.msra.mxu0 %v2240_v61  ;;  %v2308_v61 = vld [vmem:[%s2901_s1 + $0x320] sm:$0xff]  }
  0x3c   :  { %2006 = vmatprep.subr.bf16.mxu0 %v2243_v0  ;;  %v2311_v0 = vld [vmem:[%s2901_s1 + $0x368] sm:$0xff]  }
  0x3d   :  { %2027 = vmatpush3.bf16.msra.mxu1 %v2242_v63  ;;  %v2310_v63 = vld [vmem:[%s2901_s1 + $0x3a0] sm:$0xff]  }
  0x3e   :  { %2028 = vmatprep.subr.bf16.mxu1 %v2245_v2  ;;  %v2313_v2 = vld [vmem:[%s2901_s1 + $0x3e8] sm:$0xff]  }
  0x3f   :  { %2007 = vmatpush3.bf16.msra.mxu0 %v2244_v1  ;;  %v2312_v1 = vld [vmem:[%s2901_s1 + $0x328] sm:$0xff]  }
  0x40   :  { %2036 = vmatprep.subr.bf16.mxu0 %v2250_v6  ;;  %v2317_v6 = vld [vmem:[%s2901_s1 + $0x3f0] sm:$0xff]  }
  0x41   :  { %2029 = vmatpush3.bf16.msra.mxu1 %v2249_v5  ;;  %v2316_v5 = vld [vmem:[%s2901_s1 + $0x330] sm:$0xff]  }
  0x42   :  { %1469 = vmatmul.mubr.bf16.vlgmr.msra.gmra.mrb[4].mxu0 %v2246_v3  ;;  %2058 = vmatprep.subr.bf16.mxu1 %v2255_v10  ;;  %v2314_v3 = vld [vmem:[%s2901_s1 + $0x3a8] sm:$0xff]   ;;  %v2321_v10 = vld [vmem:[%s2901_s1 + $0x3f8] sm:$0xff]  }
  0x43   :  { %2037 = vmatpush3.bf16.msra.mxu0 %v2254_v9  ;;  %1550 = vmatprep.mubr.bf16.mxu0 %v2286_v40  ;;  %v2320_v9 = vld [vmem:[%s2901_s1 + $0x338] sm:$0xff]  }
  0x44   :  { %1510 = vmatmul.mubr.bf16.vlgmr.msra.gmra.mrb[4].mxu1 %v2251_v7  ;;  %2038 = vmatprep.subr.bf16.mxu0 %v2257_v12  ;;  %v2318_v7 = vld [vmem:[%s2901_s1 + $0x3b0] sm:$0xff]   ;;  %v2351_v40 = vld [vmem:[%s2901_s1 + $0x438] sm:$0xff]  }
  0x45   :  { %2059 = vmatpush3.bf16.msra.mxu1 %v2256_v11  ;;  %1591 = vmatprep.mubr.bf16.mxu1 %v2291_v44  ;;  %v2322_v11 = vld [vmem:[%s2902_s0 + $0x30] ss:$76 sps:$4 sm:$0xff]   ;;  %v2324_v12 = vld [vmem:[%s2902_s0 + $0x34] ss:$76 sps:$4 sm:$0xff]  }
  0x46   :  { %2060 = vmatprep.subr.bf16.mxu1 %v2259_v14  ;;  %v2326_v14 = vld [vmem:[%s2901_s1 + $0x440] sm:$0xff]  }
  0x47   :  { %2039 = vmatpush3.bf16.msra.mxu0 %v2258_v13  ;;  %v2325_v13 = vld [vmem:[%s2901_s1 + $0x3b8] sm:$0xff]  }
  0x48   :  { %2040 = vmatprep.subr.bf16.mxu0 %v2261_v16  ;;  %v2329_v16 = vld [vmem:[%s2902_s0 + $0x3c] ss:$76 sps:$4 sm:$0xff]  }
  0x49   :  { %2061 = vmatpush3.bf16.msra.mxu1 %v2260_v15  ;;  %v2327_v15 = vld [vmem:[%s2902_s0 + $0x38] ss:$76 sps:$4 sm:$0xff]  }
  0x4a   :  { %2062 = vmatprep.subr.bf16.mxu1 %v2263_v18  ;;  %v2357_v18 = vmov 0.0  }
  0x4b   :  { %2041 = vmatpush3.bf16.msra.mxu0 %v2262_v17  ;;  %v2330_v17 = vld [vmem:[%s2901_s1 + $0x400] sm:$0xff]  }
  0x4c   :  { %2042 = vmatprep.subr.bf16.mxu0 %v2265_v20  ;;  %v2332_v20 = vld [vmem:[%s2901_s1 + $0x448] sm:$0xff]  }
  0x4d   :  { %2063 = vmatpush3.bf16.msra.mxu1 %v2264_v19  ;;  %v2331_v19 = vld [vmem:[%s2901_s1 + $0x480] sm:$0xff]  }
  0x4e   :  { %2064 = vmatprep.subr.bf16.mxu1 %v2267_v22  ;;  %v2334_v22 = vld [vmem:[%s2901_s1 + $0x488] sm:$0xff]  }
  0x4f   :  { %2043 = vmatpush3.bf16.msra.mxu0 %v2266_v21  ;;  %v2333_v21 = vld [vmem:[%s2901_s1 + $0x408] sm:$0xff]  }
  0x50   :  { %2044 = vmatprep.subr.bf16.mxu0 %v2269_v24  ;;  %v2336_v24 = vld [vmem:[%s2901_s1 + $0x410] sm:$0xff]  }
  0x51   :  { %2065 = vmatpush3.bf16.msra.mxu1 %v2268_v23  ;;  %v2335_v23 = vld [vmem:[%s2901_s1 + $0x450] sm:$0xff]  }
  0x52   :  { %2066 = vmatprep.subr.bf16.mxu1 %v2271_v26  ;;  %v2338_v26 = vld [vmem:[%s2901_s1 + $0x458] sm:$0xff]  }
  0x53   :  { %2045 = vmatpush3.bf16.msra.mxu0 %v2270_v25  ;;  %v2337_v25 = vld [vmem:[%s2901_s1 + $0x490] sm:$0xff]  }
  0x54   :  { %2046 = vmatprep.subr.bf16.mxu0 %v2273_v28  ;;  %v2340_v28 = vld [vmem:[%s2901_s1 + $0x498] sm:$0xff]  }
  0x55   :  { %2067 = vmatpush3.bf16.msra.mxu1 %v2272_v27  ;;  %v2339_v27 = vld [vmem:[%s2901_s1 + $0x418] sm:$0xff]  }
  0x56   :  { %2068 = vmatprep.subr.bf16.mxu1 %v2275_v30  ;;  %v2342_v30 = vld [vmem:[%s2901_s1 + $0x420] sm:$0xff]  }
  0x57   :  { %2047 = vmatpush3.bf16.msra.mxu0 %v2274_v29  ;;  %v2341_v29 = vld [vmem:[%s2901_s1 + $0x460] sm:$0xff]  }
  0x58   :  { %2048 = vmatprep.subr.bf16.mxu0 %v2277_v32  ;;  %v2344_v32 = vld [vmem:[%s2901_s1 + $0x468] sm:$0xff]  }
  0x59   :  { %2069 = vmatpush3.bf16.msra.mxu1 %v2276_v31  ;;  %v2343_v31 = vld [vmem:[%s2901_s1 + $0x4a0] sm:$0xff]  }
  0x5a   :  { %2070 = vmatprep.subr.bf16.mxu1 %v2279_v34  ;;  %v2346_v34 = vld [vmem:[%s2901_s1 + $0x4a8] sm:$0xff]  }
  0x5b   :  { %2049 = vmatpush3.bf16.msra.mxu0 %v2278_v33  ;;  %v2345_v33 = vld [vmem:[%s2901_s1 + $0x428] sm:$0xff]  }
  0x5c   :  { %2050 = vmatprep.subr.bf16.mxu0 %v2281_v36  ;;  %v2348_v36 = vld [vmem:[%s2901_s1 + $0x430] sm:$0xff]  }
  0x5d   :  { %2071 = vmatpush3.bf16.msra.mxu1 %v2280_v35  ;;  %v2347_v35 = vld [vmem:[%s2901_s1 + $0x470] sm:$0xff]  }
  0x5e   :  { %2072 = vmatprep.subr.bf16.mxu1 %v2283_v38  ;;  %v2354_v38 = vld [vmem:[%s2902_s0 + $0x44] ss:$76 sps:$4 sm:$0xff]  }
  0x5f   :  { %2051 = vmatpush3.bf16.msra.mxu0 %v2282_v37  ;;  %v2349_v37 = vld [vmem:[%s2901_s1 + $0x4b0] sm:$0xff]  }
  0x60   :  { %2080 = vmatprep.subr.bf16.mxu0 %v2288_v42  ;;  %v2352_v42 = vld [vmem:[%s2902_s0 + $0x40] ss:$76 sps:$4 sm:$0xff]  }
  0x61   :  { %2073 = vmatpush3.bf16.msra.mxu1 %v2287_v41  ;;  %v2355_v41 = vld [vmem:[%s2901_s1 + $0x4b8] sm:$0xff]  }
  0x62   :  { %1551 = vmatmul.mubr.bf16.vlgmr.msra.gmra.mrb[8].mxu0 %v2284_v39  ;;  %2102 = vmatprep.subr.bf16.mxu1 %v2293_v46  ;;  %v2350_v39 = vld [vmem:[%s2901_s1 + $0x478] sm:$0xff]  }
  0x63   :  { %2081 = vmatpush3.bf16.msra.mxu0 %v2292_v45  ;;  %1632 = vmatprep.mubr.bf16.mxu0 %v2324_v12  ;;  %v1776_v45 = vld [vmem:[%s2903_s2] ss:$0 sm:$0xff] }
  0x64   :  { %1592 = vmatmul.mubr.bf16.vlgmr.msra.gmra.mrb[8].mxu1 %v2289_v43  ;;  %2082 = vmatprep.subr.bf16.mxu0 %v2295_v48  ;;  %v2356_v43 = vld [vmem:[%s2902_s0 + $0x48] ss:$76 sps:$4 sm:$0xff]  }
  0x65   :  { %2103 = vmatpush3.bf16.msra.mxu1 %v2294_v47  ;;  %1673 = vmatprep.mubr.bf16.mxu1 %v2329_v16 }
  0x66   :  { %2104 = vmatprep.subr.bf16.mxu1 %v2297_v50 }
  0x67   :  { %2083 = vmatpush3.bf16.msra.mxu0 %v2296_v49 }
  0x68   :  { %2084 = vmatprep.subr.bf16.mxu0 %v2299_v52 }
  0x69   :  { %2105 = vmatpush3.bf16.msra.mxu1 %v2298_v51 }
  0x6a   :  { %2106 = vmatprep.subr.bf16.mxu1 %v2301_v54 }
  0x6b   :  { %2085 = vmatpush3.bf16.msra.mxu0 %v2300_v53 }
  0x6c   :  { %2086 = vmatprep.subr.bf16.mxu0 %v2303_v56 }
  0x6d   :  { %2107 = vmatpush3.bf16.msra.mxu1 %v2302_v55 }
  0x6e   :  { %2108 = vmatprep.subr.bf16.mxu1 %v2305_v58 }
  0x6f   :  { %2087 = vmatpush3.bf16.msra.mxu0 %v2304_v57 }
  0x70   :  { %2088 = vmatprep.subr.bf16.mxu0 %v2307_v60 }
  0x71   :  { %2109 = vmatpush3.bf16.msra.mxu1 %v2306_v59 }
  0x72   :  { %2110 = vmatprep.subr.bf16.mxu1 %v2309_v62 }
  0x73   :  { %2089 = vmatpush3.bf16.msra.mxu0 %v2308_v61 }
  0x74   :  { %2090 = vmatprep.subr.bf16.mxu0 %v2311_v0 }
  0x75   :  { %2111 = vmatpush3.bf16.msra.mxu1 %v2310_v63 }
  0x76   :  { %2112 = vmatprep.subr.bf16.mxu1 %v2313_v2 }
  0x77   :  { %2091 = vmatpush3.bf16.msra.mxu0 %v2312_v1 }
  0x78   :  { %2092 = vmatprep.subr.bf16.mxu0 %v2315_v4 }
  0x79   :  { %2113 = vmatpush3.bf16.msra.mxu1 %v2314_v3 }
  0x7a   :  { %2114 = vmatprep.subr.bf16.mxu1 %v2317_v6 }
  0x7b   :  { %2093 = vmatpush3.bf16.msra.mxu0 %v2316_v5 }
  0x7c   :  { %2094 = vmatprep.subr.bf16.mxu0 %v2319_v8 }
  0x7d   :  { %2115 = vmatpush3.bf16.msra.mxu1 %v2318_v7 }
  0x7e   :  { %2116 = vmatprep.subr.bf16.mxu1 %v2321_v10 }
  0x7f   :  { %2095 = vmatpush3.bf16.msra.mxu0 %v2320_v9 }
  0x80   :  { %2124 = vmatprep.subr.bf16.mxu0 %v2326_v14 }
  0x81   :  { %2117 = vmatpush3.bf16.msra.mxu1 %v2325_v13 }
  0x82   :  { %1633 = vmatmul.mubr.bf16.vlgmr.msra.gmra.mrb[12].mxu0 %v2322_v11  ;;  %2155 = vmatprep.subr.bf16.mxu1 %v2357_v18 }
  0x83   :  { %2125 = vmatpush3.bf16.msra.mxu0 %v2330_v17  ;;  %1714 = vmatprep.mubr.bf16.mxu0 %v2354_v38 }
  0x84   :  { %1674 = vmatmul.mubr.bf16.vlgmr.msra.gmra.mrb[12].mxu1 %v2327_v15  ;;  %2126 = vmatprep.subr.bf16.mxu0 %v2332_v20 }
  0x85   :  { %2156 = vmatpush3.bf16.msra.mxu1 %v2331_v19  ;;  %2171 = vmatprep.mubr.msk.bf16.mxu1 %vm2358_vm0, %v2357_v18 }
  0x86   :  { %2157 = vmatprep.subr.bf16.mxu1 %v2357_v18 }
  0x87   :  { %2127 = vmatpush3.bf16.msra.mxu0 %v2333_v21 }
  0x88   :  { %2128 = vmatprep.subr.bf16.mxu0 %v2335_v23 }
  0x89   :  { %2158 = vmatpush3.bf16.msra.mxu1 %v2334_v22 }
  0x8a   :  { %2159 = vmatprep.subr.bf16.mxu1 %v2357_v18 }
  0x8b   :  { %2129 = vmatpush3.bf16.msra.mxu0 %v2336_v24 }
  0x8c   :  { %2130 = vmatprep.subr.bf16.mxu0 %v2338_v26 }
  0x8d   :  { %2160 = vmatpush3.bf16.msra.mxu1 %v2337_v25 }
  0x8e   :  { %2161 = vmatprep.subr.bf16.mxu1 %v2357_v18 }
  0x8f   :  { %2131 = vmatpush3.bf16.msra.mxu0 %v2339_v27 }
  0x90   :  { %2132 = vmatprep.subr.bf16.mxu0 %v2341_v29 }
  0x91   :  { %2162 = vmatpush3.bf16.msra.mxu1 %v2340_v28 }
  0x92   :  { %2163 = vmatprep.subr.bf16.mxu1 %v2357_v18 }
  0x93   :  { %2133 = vmatpush3.bf16.msra.mxu0 %v2342_v30 }
  0x94   :  { %2134 = vmatprep.subr.bf16.mxu0 %v2344_v32 }
  0x95   :  { %2164 = vmatpush3.bf16.msra.mxu1 %v2343_v31 }
  0x96   :  { %2165 = vmatprep.subr.bf16.mxu1 %v2357_v18 }
  0x97   :  { %2135 = vmatpush3.bf16.msra.mxu0 %v2345_v33 }
  0x98   :  { %2136 = vmatprep.subr.bf16.mxu0 %v2347_v35 }
  0x99   :  { %2166 = vmatpush3.bf16.msra.mxu1 %v2346_v34 }
  0x9a   :  { %2167 = vmatprep.subr.bf16.mxu1 %v2357_v18 }
  0x9b   :  { %2137 = vmatpush3.bf16.msra.mxu0 %v2348_v36 }
  0x9c   :  { %2138 = vmatprep.subr.bf16.mxu0 %v2350_v39 }
  0x9d   :  { %2168 = vmatpush3.bf16.msra.mxu1 %v2349_v37 }
  0x9e   :  { %2169 = vmatprep.subr.bf16.mxu1 %v2357_v18 }
  0x9f   :  { %2139 = vmatpush3.bf16.msra.mxu0 %v2351_v40 }
  0xa1   :  { %2170 = vmatpush3.bf16.msra.mxu1 %v2355_v41 }
  0xa2   :  { %1715 = vmatmul.mubr.bf16.vlgmr.msra.gmra.mrb[16].mxu0 %v2352_v42 }
  0xa4   :  { %2172 = vmatmul.mubr.bf16.vlgmr.msra.gmra.mrb[16].mxu1 %v2356_v43 }
  0xf5   :  { %v1964_v44 = vpop.f32.mrb[0].mxu0 }
  0xf6   :  { %v1965_v46 = vpop.f32.mrb[1].mxu0 }
  0xf7   :  { %v1966_v47 = vadd.f32 %v1965_v46, %v1964_v44  ;;  %v1967_v48 = vpop.f32.mrb[2].mxu0  ;;  %v1986_v49 = vpop.f32.mrb[0].mxu1 }
  0xf8   :  { %v1968_v50 = vpop.f32.mrb[3].mxu0  ;;  %v1987_v53 = vpop.f32.mrb[1].mxu1 }
  0xf9   :  { %v1389_v51 = vadd.f32 %v1966_v47, %v1776_v45  ;;  %v1969_v52 = vadd.f32 %v1968_v50, %v1967_v48  ;;  %v1988_v54 = vadd.f32 %v1987_v53, %v1986_v49  ;;  %v1989_v55 = vpop.f32.mrb[2].mxu1 }
  0xfa   :  { %v1990_v57 = vpop.f32.mrb[3].mxu1 }
  0xfb   :  { %v1392_v56 = vadd.f32 %v1969_v52, %v1776_v45  ;;  %v1430_v58 = vadd.f32 %v1988_v54, %v1389_v51  ;;  %v1991_v59 = vadd.f32 %v1990_v57, %v1989_v55 }
  0xfd   :  { %v1433_v60 = vadd.f32 %v1991_v59, %v1392_v56 }
 0x115   :  { %v2008_v61 = vpop.f32.mrb[4].mxu0 }
 0x116   :  { %v2009_v62 = vpop.f32.mrb[5].mxu0 }
 0x117   :  { %v2010_v63 = vadd.f32 %v2009_v62, %v2008_v61  ;;  %v2011_v0 = vpop.f32.mrb[6].mxu0  ;;  %v2030_v3 = vpop.f32.mrb[4].mxu1 }
 0x118   :  { %v2012_v1 = vpop.f32.mrb[7].mxu0  ;;  %v2031_v5 = vpop.f32.mrb[5].mxu1 }
 0x119   :  { %v1471_v2 = vadd.f32 %v2010_v63, %v1430_v58  ;;  %v2013_v4 = vadd.f32 %v2012_v1, %v2011_v0  ;;  %v2032_v7 = vadd.f32 %v2031_v5, %v2030_v3  ;;  %v2033_v8 = vpop.f32.mrb[6].mxu1 }
 0x11a   :  { %v2034_v9 = vpop.f32.mrb[7].mxu1 }
 0x11b   :  { %v1474_v6 = vadd.f32 %v2013_v4, %v1433_v60  ;;  %v1512_v10 = vadd.f32 %v2032_v7, %v1471_v2  ;;  %v2035_v11 = vadd.f32 %v2034_v9, %v2033_v8 }
 0x11d   :  { %v1515_v12 = vadd.f32 %v2035_v11, %v1474_v6 }
 0x135   :  { %v2052_v13 = vpop.f32.mrb[8].mxu0 }
 0x136   :  { %v2053_v14 = vpop.f32.mrb[9].mxu0 }
 0x137   :  { %v2054_v15 = vadd.f32 %v2053_v14, %v2052_v13  ;;  %v2055_v16 = vpop.f32.mrb[10].mxu0  ;;  %v2074_v17 = vpop.f32.mrb[8].mxu1 }
 0x138   :  { %v2056_v18 = vpop.f32.mrb[11].mxu0  ;;  %v2075_v21 = vpop.f32.mrb[9].mxu1 }
 0x139   :  { %v1553_v19 = vadd.f32 %v2054_v15, %v1512_v10  ;;  %v2057_v20 = vadd.f32 %v2056_v18, %v2055_v16  ;;  %v2076_v22 = vadd.f32 %v2075_v21, %v2074_v17  ;;  %v2077_v23 = vpop.f32.mrb[10].mxu1 }
 0x13a   :  { %v2078_v25 = vpop.f32.mrb[11].mxu1 }
 0x13b   :  { %v1556_v24 = vadd.f32 %v2057_v20, %v1515_v12  ;;  %v1594_v26 = vadd.f32 %v2076_v22, %v1553_v19  ;;  %v2079_v27 = vadd.f32 %v2078_v25, %v2077_v23 }
 0x13d   :  { %v1597_v28 = vadd.f32 %v2079_v27, %v1556_v24 }
 0x155   :  { %v2096_v29 = vpop.f32.mrb[12].mxu0 }
 0x156   :  { %v2097_v30 = vpop.f32.mrb[13].mxu0 }
 0x157   :  { %v2098_v31 = vadd.f32 %v2097_v30, %v2096_v29  ;;  %v2099_v32 = vpop.f32.mrb[14].mxu0  ;;  %v2118_v33 = vpop.f32.mrb[12].mxu1 }
 0x158   :  { %v2100_v34 = vpop.f32.mrb[15].mxu0  ;;  %v2119_v37 = vpop.f32.mrb[13].mxu1 }
 0x159   :  { %v1635_v35 = vadd.f32 %v2098_v31, %v1594_v26  ;;  %v2101_v36 = vadd.f32 %v2100_v34, %v2099_v32  ;;  %v2120_v38 = vadd.f32 %v2119_v37, %v2118_v33  ;;  %v2121_v39 = vpop.f32.mrb[14].mxu1 }
 0x15a   :  { %v2122_v41 = vpop.f32.mrb[15].mxu1 }
 0x15b   :  { %v1638_v40 = vadd.f32 %v2101_v36, %v1597_v28  ;;  %v1676_v42 = vadd.f32 %v2120_v38, %v1635_v35  ;;  %v2123_v43 = vadd.f32 %v2122_v41, %v2121_v39 }
 0x15d   :  { %v1679_v44 = vadd.f32 %v2123_v43, %v1638_v40 }
 0x175   :  { %v2140_v45 = vpop.f32.mrb[16].mxu0 }
 0x176   :  { %v2141_v46 = vpop.f32.mrb[17].mxu0 }
 0x177   :  { %v1757_v47 = vpop.f32.mrb[16].mxu1  ;;  %v2142_v48 = vadd.f32 %v2141_v46, %v2140_v45  ;;  %v2143_v49 = vpop.f32.mrb[18].mxu0 }
 0x178   :  { %v2173_v50 = vpop.f32.mrb[17].mxu1  ;;  %v2144_v51 = vpop.f32.mrb[19].mxu0 }
 0x179   :  { %v1760_v52 = vpop.f32.mrb[18].mxu1  ;;  %v1717_v53 = vadd.f32 %v2142_v48, %v1676_v42  ;;  %v2145_v54 = vadd.f32 %v2144_v51, %v2143_v49 }
 0x17a   :  { %v2174_v55 = vpop.f32.mrb[19].mxu1 }
 0x17b   :  { %v1758_v56 = vadd.f32 %v1757_v47, %v1717_v53  ;;  %v1720_v57 = vadd.f32 %v2145_v54, %v1679_v44 }
 0x17d   :  { %vm1764_vm1 = vcmp.ge.f32.partialorder %v1758_v56, 0.0  ;;  %v1766_v58 = vmul.f32 0.1, %v1758_v56  ;;  %v1761_v59 = vadd.f32 %v1760_v52, %v1720_v57 }
 0x17f   :  { %v1768_v60 = vsel %vm1764_vm1, %v1758_v56, %v1766_v58  ;;  %vm1765_vm2 = vcmp.ge.f32.partialorder %v1761_v59, 0.0  ;;  %v1767_v61 = vmul.f32 0.1, %v1761_v59 }
 0x180   :  { %1770 = vst [vmem:[%s2904_s3] sm:$0xff] %v1768_v60 }
 0x181   :  { %v1769_v62 = vsel %vm1765_vm2, %v1761_v59, %v1767_v61 }
 0x182   :  { %1771 = vst [vmem:[%s2904_s3 + $0x8] sm:$0xff] %v1769_v62 }

// kernel: dispnet_bi_forward.70
= control target key start
LH: loop header
LB: loop body
LE: loop exit
PB: predicated region body
PF: predicated region fallthrough
CT: control target
= control target key end

     0   :  { %s652_s1 = inlined_call_operand.vmem [shape: bf16[512,128], index: 1, kind: input, shape index: {}]   ;;  %s653_s0 = inlined_call_operand.vmem [shape: bf16[16,512], index: 0, kind: input, shape index: {}]   ;;  %s654_s2 = inlined_call_operand.vmem [shape: f32[1,128], index: 2, kind: input, shape index: {}]   ;;  %s655_s3 = inlined_call_operand.vmem [shape: f32[16,128], index: 3, kind: output, shape index: {}]  }
   0x1   :  { %v477_v0 = vld [vmem:[%s652_s1 + $0x40] sm:$0xff]   ;;  %v481_v4 = vld [vmem:[%s652_s1 + $0x48] sm:$0xff]   ;;  %v485_v8 = vld [vmem:[%s652_s1 + $0x50] sm:$0xff]  }
   0x2   :  { %v478_v1 = vld [vmem:[%s652_s1 + $0xc0] sm:$0xff]   ;;  %433 = vmatprep.subr.bf16.mxu0 %v477_v0  ;;  %v482_v5 = vld [vmem:[%s652_s1 + $0xc8] sm:$0xff]   ;;  %v486_v9 = vld [vmem:[%s652_s1 + $0xd0] sm:$0xff]  }
   0x3   :  { %v479_v2 = vld [vmem:[%s652_s1] sm:$0xff]   ;;  %455 = vmatprep.subr.bf16.mxu1 %v478_v1  ;;  %v483_v6 = vld [vmem:[%s652_s1 + $0x8] sm:$0xff]   ;;  %v487_v10 = vld [vmem:[%s652_s1 + $0x10] sm:$0xff]  }
   0x4   :  { %v480_v3 = vld [vmem:[%s652_s1 + $0x80] sm:$0xff]   ;;  %434 = vmatpush3.bf16.msra.mxu0 %v479_v2  ;;  %v484_v7 = vld [vmem:[%s652_s1 + $0x88] sm:$0xff]   ;;  %v488_v11 = vld [vmem:[%s652_s1 + $0x90] sm:$0xff]  }
   0x5   :  { %456 = vmatpush3.bf16.msra.mxu1 %v480_v3  ;;  %435 = vmatprep.subr.bf16.mxu0 %v481_v4  ;;  %v489_v12 = vld [vmem:[%s652_s1 + $0x58] sm:$0xff]   ;;  %v493_v16 = vld [vmem:[%s652_s1 + $0x60] sm:$0xff]   ;;  %v497_v20 = vld [vmem:[%s652_s1 + $0x68] sm:$0xff]  }
   0x6   :  { %457 = vmatprep.subr.bf16.mxu1 %v482_v5  ;;  %v490_v13 = vld [vmem:[%s652_s1 + $0xd8] sm:$0xff]   ;;  %v494_v17 = vld [vmem:[%s652_s1 + $0xe0] sm:$0xff]   ;;  %v498_v21 = vld [vmem:[%s652_s1 + $0xe8] sm:$0xff]  }
   0x7   :  { %v491_v14 = vld [vmem:[%s652_s1 + $0x18] sm:$0xff]   ;;  %v495_v18 = vld [vmem:[%s652_s1 + $0x20] sm:$0xff]   ;;  %v499_v22 = vld [vmem:[%s652_s1 + $0x28] sm:$0xff]  }
   0x8   :  { %436 = vmatpush3.bf16.msra.mxu0 %v483_v6  ;;  %v492_v15 = vld [vmem:[%s652_s1 + $0x98] sm:$0xff]   ;;  %v496_v19 = vld [vmem:[%s652_s1 + $0xa0] sm:$0xff]   ;;  %v500_v23 = vld [vmem:[%s652_s1 + $0xa8] sm:$0xff]  }
   0x9   :  { %458 = vmatpush3.bf16.msra.mxu1 %v484_v7  ;;  %437 = vmatprep.subr.bf16.mxu0 %v485_v8  ;;  %v501_v24 = vld [vmem:[%s652_s1 + $0x70] sm:$0xff]   ;;  %v505_v28 = vld [vmem:[%s652_s1 + $0x78] sm:$0xff]   ;;  %v396_v38 = vld [vmem:[%s654_s2] ss:$0 sm:$0xff] }
   0xa   :  { %459 = vmatprep.subr.bf16.mxu1 %v486_v9  ;;  %v502_v25 = vld [vmem:[%s652_s1 + $0xf0] sm:$0xff]   ;;  %v506_v29 = vld [vmem:[%s652_s1 + $0xf8] sm:$0xff]  }
   0xb   :  { %v503_v26 = vld [vmem:[%s652_s1 + $0x30] sm:$0xff]   ;;  %v507_v30 = vld [vmem:[%s652_s1 + $0x38] sm:$0xff]  }
   0xc   :  { %438 = vmatpush3.bf16.msra.mxu0 %v487_v10  ;;  %v504_v27 = vld [vmem:[%s652_s1 + $0xb0] sm:$0xff]   ;;  %v508_v31 = vld [vmem:[%s652_s1 + $0xb8] sm:$0xff]  }
   0xd   :  { %460 = vmatpush3.bf16.msra.mxu1 %v488_v11  ;;  %439 = vmatprep.subr.bf16.mxu0 %v489_v12  ;;  %v509_v32 = vld [vmem:[%s653_s0] ss:$16 sps:$4 sm:$0xff]   ;;  %v511_v33 = vld [vmem:[%s653_s0 + $0x4] ss:$16 sps:$4 sm:$0xff]   ;;  %v512_v34 = vld [vmem:[%s653_s0 + $0x8] ss:$16 sps:$4 sm:$0xff]  }
   0xe   :  { %461 = vmatprep.subr.bf16.mxu1 %v490_v13  ;;  %v514_v35 = vld [vmem:[%s653_s0 + $0xc] ss:$16 sps:$4 sm:$0xff]   ;;  %334 = vmatprep.mubr.bf16.mxu0 %v511_v33 }
   0xf   :  { %375 = vmatprep.mubr.bf16.mxu1 %v514_v35 }
  0x10   :  { %440 = vmatpush3.bf16.msra.mxu0 %v491_v14 }
  0x11   :  { %462 = vmatpush3.bf16.msra.mxu1 %v492_v15  ;;  %441 = vmatprep.subr.bf16.mxu0 %v493_v16 }
  0x12   :  { %463 = vmatprep.subr.bf16.mxu1 %v494_v17 }
  0x14   :  { %442 = vmatpush3.bf16.msra.mxu0 %v495_v18 }
  0x15   :  { %464 = vmatpush3.bf16.msra.mxu1 %v496_v19  ;;  %443 = vmatprep.subr.bf16.mxu0 %v497_v20 }
  0x16   :  { %465 = vmatprep.subr.bf16.mxu1 %v498_v21 }
  0x18   :  { %444 = vmatpush3.bf16.msra.mxu0 %v499_v22 }
  0x19   :  { %466 = vmatpush3.bf16.msra.mxu1 %v500_v23  ;;  %445 = vmatprep.subr.bf16.mxu0 %v501_v24 }
  0x1a   :  { %467 = vmatprep.subr.bf16.mxu1 %v502_v25 }
  0x1c   :  { %446 = vmatpush3.bf16.msra.mxu0 %v503_v26 }
  0x1d   :  { %468 = vmatpush3.bf16.msra.mxu1 %v504_v27  ;;  %447 = vmatprep.subr.bf16.mxu0 %v505_v28 }
  0x1e   :  { %469 = vmatprep.subr.bf16.mxu1 %v506_v29 }
  0x20   :  { %448 = vmatpush3.bf16.msra.mxu0 %v507_v30 }
  0x21   :  { %470 = vmatpush3.bf16.msra.mxu1 %v508_v31 }
  0x23   :  { %335 = vmatmul.mubr.bf16.vlgmr.msra.gmra.mrb[0].mxu0 %v509_v32 }
  0x24   :  { %376 = vmatmul.mubr.bf16.vlgmr.msra.gmra.mrb[0].mxu1 %v512_v34 }
  0xf6   :  { %v449_v36 = vpop.f32.mrb[0].mxu0 }
  0xf7   :  { %v471_v37 = vpop.f32.mrb[0].mxu1  ;;  %v450_v39 = vpop.f32.mrb[1].mxu0 }
  0xf8   :  { %v451_v40 = vadd.f32 %v450_v39, %v449_v36  ;;  %v472_v41 = vpop.f32.mrb[1].mxu1  ;;  %v452_v42 = vpop.f32.mrb[2].mxu0 }
  0xf9   :  { %v473_v43 = vadd.f32 %v472_v41, %v471_v37  ;;  %v474_v44 = vpop.f32.mrb[2].mxu1  ;;  %v453_v45 = vpop.f32.mrb[3].mxu0 }
  0xfa   :  { %v337_v46 = vadd.f32 %v451_v40, %v396_v38  ;;  %v454_v47 = vadd.f32 %v453_v45, %v452_v42  ;;  %v475_v48 = vpop.f32.mrb[3].mxu1 }
  0xfb   :  { %v476_v49 = vadd.f32 %v475_v48, %v474_v44 }
  0xfc   :  { %v378_v50 = vadd.f32 %v473_v43, %v337_v46  ;;  %v340_v51 = vadd.f32 %v454_v47, %v396_v38 }
  0xfe   :  { %vm384_vm0 = vcmp.ge.f32.partialorder %v378_v50, 0.0  ;;  %v386_v52 = vmul.f32 0.1, %v378_v50  ;;  %v381_v53 = vadd.f32 %v476_v49, %v340_v51 }
 0x100   :  { %v388_v54 = vsel %vm384_vm0, %v378_v50, %v386_v52  ;;  %vm385_vm1 = vcmp.ge.f32.partialorder %v381_v53, 0.0  ;;  %v387_v55 = vmul.f32 0.1, %v381_v53 }
 0x101   :  { %390 = vst [vmem:[%s655_s3] sm:$0xff] %v388_v54 }
 0x102   :  { %v389_v56 = vsel %vm385_vm1, %v381_v53, %v387_v55 }
 0x103   :  { %391 = vst [vmem:[%s655_s3 + $0x8] sm:$0xff] %v389_v56 }

// kernel: dispnet_bi_forward.73
= control target key start
LH: loop header
LB: loop body
LE: loop exit
PB: predicated region body
PF: predicated region fallthrough
CT: control target
= control target key end

     0   :  { %s2411_s1 = inlined_call_operand.vmem [shape: bf16[1792,128], index: 1, kind: input, shape index: {}]   ;;  %s2412_s0 = inlined_call_operand.vmem [shape: bf16[32,1792], index: 0, kind: input, shape index: {}]   ;;  %s2413_s2 = inlined_call_operand.vmem [shape: f32[1,128], index: 2, kind: input, shape index: {}]   ;;  %s2414_s3 = inlined_call_operand.vmem [shape: f32[32,128], index: 3, kind: output, shape index: {}]  }
   0x1   :  { %v1802_v0 = vld [vmem:[%s2411_s1 + $0x40] sm:$0xff]   ;;  %v1806_v4 = vld [vmem:[%s2411_s1 + $0x48] sm:$0xff]   ;;  %v1810_v8 = vld [vmem:[%s2411_s1 + $0x50] sm:$0xff]  }
   0x2   :  { %v1803_v1 = vld [vmem:[%s2411_s1 + $0xc0] sm:$0xff]   ;;  %1590 = vmatprep.subr.bf16.mxu0 %v1802_v0  ;;  %v1807_v5 = vld [vmem:[%s2411_s1 + $0xc8] sm:$0xff]   ;;  %v1811_v9 = vld [vmem:[%s2411_s1 + $0xd0] sm:$0xff]  }
   0x3   :  { %v1804_v2 = vld [vmem:[%s2411_s1] sm:$0xff]   ;;  %1618 = vmatprep.subr.bf16.mxu1 %v1803_v1  ;;  %v1808_v6 = vld [vmem:[%s2411_s1 + $0x8] sm:$0xff]   ;;  %v1812_v10 = vld [vmem:[%s2411_s1 + $0x10] sm:$0xff]  }
   0x4   :  { %v1805_v3 = vld [vmem:[%s2411_s1 + $0x80] sm:$0xff]   ;;  %1591 = vmatpush3.bf16.msra.mxu0 %v1804_v2  ;;  %v1809_v7 = vld [vmem:[%s2411_s1 + $0x88] sm:$0xff]   ;;  %v1813_v11 = vld [vmem:[%s2411_s1 + $0x90] sm:$0xff]  }
   0x5   :  { %1619 = vmatpush3.bf16.msra.mxu1 %v1805_v3  ;;  %1592 = vmatprep.subr.bf16.mxu0 %v1806_v4  ;;  %v1814_v12 = vld [vmem:[%s2411_s1 + $0x58] sm:$0xff]   ;;  %v1818_v16 = vld [vmem:[%s2411_s1 + $0x60] sm:$0xff]   ;;  %v1822_v20 = vld [vmem:[%s2411_s1 + $0x68] sm:$0xff]  }
   0x6   :  { %1620 = vmatprep.subr.bf16.mxu1 %v1807_v5  ;;  %v1815_v13 = vld [vmem:[%s2411_s1 + $0xd8] sm:$0xff]   ;;  %v1819_v17 = vld [vmem:[%s2411_s1 + $0xe0] sm:$0xff]   ;;  %v1823_v21 = vld [vmem:[%s2411_s1 + $0xe8] sm:$0xff]  }
   0x7   :  { %v1816_v14 = vld [vmem:[%s2411_s1 + $0x18] sm:$0xff]   ;;  %v1820_v18 = vld [vmem:[%s2411_s1 + $0x20] sm:$0xff]   ;;  %v1824_v22 = vld [vmem:[%s2411_s1 + $0x28] sm:$0xff]  }
   0x8   :  { %1593 = vmatpush3.bf16.msra.mxu0 %v1808_v6  ;;  %v1817_v15 = vld [vmem:[%s2411_s1 + $0x98] sm:$0xff]   ;;  %v1821_v19 = vld [vmem:[%s2411_s1 + $0xa0] sm:$0xff]   ;;  %v1825_v23 = vld [vmem:[%s2411_s1 + $0xa8] sm:$0xff]  }
   0x9   :  { %1621 = vmatpush3.bf16.msra.mxu1 %v1809_v7  ;;  %1594 = vmatprep.subr.bf16.mxu0 %v1810_v8  ;;  %v1826_v24 = vld [vmem:[%s2411_s1 + $0x70] sm:$0xff]   ;;  %v1830_v28 = vld [vmem:[%s2411_s1 + $0x78] sm:$0xff]   ;;  %v1837_v34 = vld [vmem:[%s2412_s0 + $0x8] ss:$56 sps:$4 sm:$0xff]  }
   0xa   :  { %1622 = vmatprep.subr.bf16.mxu1 %v1811_v9  ;;  %v1827_v25 = vld [vmem:[%s2411_s1 + $0xf0] sm:$0xff]   ;;  %v1831_v29 = vld [vmem:[%s2411_s1 + $0xf8] sm:$0xff]   ;;  %v1839_v35 = vld [vmem:[%s2412_s0 + $0xc] ss:$56 sps:$4 sm:$0xff]  }
   0xb   :  { %v1828_v26 = vld [vmem:[%s2411_s1 + $0x30] sm:$0xff]   ;;  %v1832_v30 = vld [vmem:[%s2411_s1 + $0x38] sm:$0xff]   ;;  %v1840_v36 = vld [vmem:[%s2411_s1 + $0x140] sm:$0xff]   ;;  %1167 = vmatprep.mubr.bf16.mxu1 %v1839_v35 }
   0xc   :  { %1595 = vmatpush3.bf16.msra.mxu0 %v1812_v10  ;;  %v1829_v27 = vld [vmem:[%s2411_s1 + $0xb0] sm:$0xff]   ;;  %v1833_v31 = vld [vmem:[%s2411_s1 + $0xb8] sm:$0xff]   ;;  %v1841_v37 = vld [vmem:[%s2411_s1 + $0x1c0] sm:$0xff]  }
   0xd   :  { %1623 = vmatpush3.bf16.msra.mxu1 %v1813_v11  ;;  %1596 = vmatprep.subr.bf16.mxu0 %v1814_v12  ;;  %v1834_v32 = vld [vmem:[%s2412_s0] ss:$56 sps:$4 sm:$0xff]   ;;  %v1836_v33 = vld [vmem:[%s2412_s0 + $0x4] ss:$56 sps:$4 sm:$0xff]   ;;  %v1844_v40 = vld [vmem:[%s2411_s1 + $0x148] sm:$0xff]  }
   0xe   :  { %1624 = vmatprep.subr.bf16.mxu1 %v1815_v13  ;;  %1118 = vmatprep.mubr.bf16.mxu0 %v1836_v33  ;;  %v1842_v38 = vld [vmem:[%s2411_s1 + $0x100] sm:$0xff]   ;;  %v1845_v41 = vld [vmem:[%s2411_s1 + $0x1c8] sm:$0xff]   ;;  %v1848_v44 = vld [vmem:[%s2411_s1 + $0x150] sm:$0xff]  }
   0xf   :  { %v1843_v39 = vld [vmem:[%s2411_s1 + $0x180] sm:$0xff]   ;;  %v1846_v42 = vld [vmem:[%s2411_s1 + $0x108] sm:$0xff]   ;;  %v1849_v45 = vld [vmem:[%s2411_s1 + $0x1d0] sm:$0xff]  }
  0x10   :  { %1597 = vmatpush3.bf16.msra.mxu0 %v1816_v14  ;;  %v1847_v43 = vld [vmem:[%s2411_s1 + $0x188] sm:$0xff]   ;;  %v1850_v46 = vld [vmem:[%s2411_s1 + $0x110] sm:$0xff]   ;;  %v1852_v48 = vld [vmem:[%s2411_s1 + $0x158] sm:$0xff]  }
  0x11   :  { %1625 = vmatpush3.bf16.msra.mxu1 %v1817_v15  ;;  %1598 = vmatprep.subr.bf16.mxu0 %v1818_v16  ;;  %v1851_v47 = vld [vmem:[%s2411_s1 + $0x190] sm:$0xff]   ;;  %v1853_v49 = vld [vmem:[%s2411_s1 + $0x1d8] sm:$0xff]   ;;  %v1856_v52 = vld [vmem:[%s2411_s1 + $0x160] sm:$0xff]  }
  0x12   :  { %1626 = vmatprep.subr.bf16.mxu1 %v1819_v17  ;;  %v1854_v50 = vld [vmem:[%s2411_s1 + $0x118] sm:$0xff]   ;;  %v1857_v53 = vld [vmem:[%s2411_s1 + $0x1e0] sm:$0xff]   ;;  %v1860_v56 = vld [vmem:[%s2412_s0 + $0x74] ss:$56 sps:$4 sm:$0xff]  }
  0x13   :  { %v1855_v51 = vld [vmem:[%s2411_s1 + $0x198] sm:$0xff]   ;;  %v1858_v54 = vld [vmem:[%s2411_s1 + $0x120] sm:$0xff]   ;;  %v1862_v57 = vld [vmem:[%s2412_s0 + $0x70] ss:$56 sps:$4 sm:$0xff]  }
  0x14   :  { %1599 = vmatpush3.bf16.msra.mxu0 %v1820_v18  ;;  %v1859_v55 = vld [vmem:[%s2411_s1 + $0x1a0] sm:$0xff]   ;;  %v1863_v58 = vld [vmem:[%s2411_s1 + $0x168] sm:$0xff]   ;;  %v1865_v60 = vld [vmem:[%s2412_s0 + $0x7c] ss:$56 sps:$4 sm:$0xff]  }
  0x15   :  { %1627 = vmatpush3.bf16.msra.mxu1 %v1821_v19  ;;  %1600 = vmatprep.subr.bf16.mxu0 %v1822_v20  ;;  %v1864_v59 = vld [vmem:[%s2411_s1 + $0x1e8] sm:$0xff]   ;;  %v1869_v63 = vld [vmem:[%s2412_s0 + $0x78] ss:$56 sps:$4 sm:$0xff]   ;;  %v1883_v11 = vld [vmem:[%s2412_s0 + $0x1c] ss:$56 sps:$4 sm:$0xff]  }
  0x16   :  { %1628 = vmatprep.subr.bf16.mxu1 %v1823_v21  ;;  %v1867_v61 = vld [vmem:[%s2411_s1 + $0x128] sm:$0xff]   ;;  %v1870_v0 = vld [vmem:[%s2411_s1 + $0x170] sm:$0xff]   ;;  %v1874_v4 = vld [vmem:[%s2411_s1 + $0x178] sm:$0xff]  }
  0x17   :  { %v1868_v62 = vld [vmem:[%s2411_s1 + $0x1a8] sm:$0xff]   ;;  %v1871_v1 = vld [vmem:[%s2411_s1 + $0x1f0] sm:$0xff]   ;;  %v1875_v5 = vld [vmem:[%s2411_s1 + $0x1f8] sm:$0xff]  }
  0x18   :  { %1601 = vmatpush3.bf16.msra.mxu0 %v1824_v22  ;;  %v1872_v2 = vld [vmem:[%s2411_s1 + $0x130] sm:$0xff]   ;;  %v1876_v6 = vld [vmem:[%s2411_s1 + $0x138] sm:$0xff]   ;;  %v1884_v12 = vld [vmem:[%s2411_s1 + $0x240] sm:$0xff]  }
  0x19   :  { %1629 = vmatpush3.bf16.msra.mxu1 %v1825_v23  ;;  %1602 = vmatprep.subr.bf16.mxu0 %v1826_v24  ;;  %v1873_v3 = vld [vmem:[%s2411_s1 + $0x1b0] sm:$0xff]   ;;  %v1877_v7 = vld [vmem:[%s2411_s1 + $0x1b8] sm:$0xff]   ;;  %v1885_v13 = vld [vmem:[%s2411_s1 + $0x2c0] sm:$0xff]  }
  0x1a   :  { %1630 = vmatprep.subr.bf16.mxu1 %v1827_v25  ;;  %v1878_v8 = vld [vmem:[%s2412_s0 + $0x10] ss:$56 sps:$4 sm:$0xff]   ;;  %v1880_v9 = vld [vmem:[%s2412_s0 + $0x14] ss:$56 sps:$4 sm:$0xff]   ;;  %v1886_v14 = vld [vmem:[%s2411_s1 + $0x200] sm:$0xff]  }
  0x1b   :  { %v1881_v10 = vld [vmem:[%s2412_s0 + $0x18] ss:$56 sps:$4 sm:$0xff]   ;;  %v1887_v15 = vld [vmem:[%s2411_s1 + $0x280] sm:$0xff]   ;;  %v1888_v16 = vld [vmem:[%s2411_s1 + $0x248] sm:$0xff]  }
  0x1c   :  { %1603 = vmatpush3.bf16.msra.mxu0 %v1828_v26  ;;  %v1889_v17 = vld [vmem:[%s2411_s1 + $0x2c8] sm:$0xff]   ;;  %v1892_v20 = vld [vmem:[%s2412_s0 + $0x84] ss:$56 sps:$4 sm:$0xff]   ;;  %v1894_v21 = vld [vmem:[%s2412_s0 + $0x80] ss:$56 sps:$4 sm:$0xff]  }
  0x1d   :  { %1631 = vmatpush3.bf16.msra.mxu1 %v1829_v27  ;;  %1604 = vmatprep.subr.bf16.mxu0 %v1830_v28  ;;  %v1890_v18 = vld [vmem:[%s2411_s1 + $0x208] sm:$0xff]   ;;  %v1895_v22 = vld [vmem:[%s2411_s1 + $0x250] sm:$0xff]   ;;  %v1902_v28 = vld [vmem:[%s2411_s1 + $0x258] sm:$0xff]  }
  0x1e   :  { %1632 = vmatprep.subr.bf16.mxu1 %v1831_v29  ;;  %v1891_v19 = vld [vmem:[%s2411_s1 + $0x288] sm:$0xff]   ;;  %v1896_v23 = vld [vmem:[%s2411_s1 + $0x2d0] sm:$0xff]   ;;  %v1903_v29 = vld [vmem:[%s2411_s1 + $0x2d8] sm:$0xff]  }
  0x1f   :  { %v1897_v24 = vld [vmem:[%s2412_s0 + $0x8c] ss:$56 sps:$4 sm:$0xff]   ;;  %v1899_v25 = vld [vmem:[%s2411_s1 + $0x210] sm:$0xff]   ;;  %v1901_v27 = vld [vmem:[%s2412_s0 + $0x88] ss:$56 sps:$4 sm:$0xff]  }
  0x20   :  { %1605 = vmatpush3.bf16.msra.mxu0 %v1832_v30  ;;  %v1900_v26 = vld [vmem:[%s2411_s1 + $0x290] sm:$0xff]   ;;  %v1904_v30 = vld [vmem:[%s2411_s1 + $0x218] sm:$0xff]   ;;  %v1907_v33 = vld [vmem:[%s2411_s1 + $0x2e0] sm:$0xff]  }
  0x21   :  { %1633 = vmatpush3.bf16.msra.mxu1 %v1833_v31  ;;  %1646 = vmatprep.subr.bf16.mxu0 %v1840_v36  ;;  %v1905_v31 = vld [vmem:[%s2411_s1 + $0x298] sm:$0xff]   ;;  %v1909_v35 = vld [vmem:[%s2411_s1 + $0x2a0] sm:$0xff]   ;;  %v1910_v36 = vld [vmem:[%s2411_s1 + $0x268] sm:$0xff]  }
  0x22   :  { %1674 = vmatprep.subr.bf16.mxu1 %v1841_v37  ;;  %v1911_v37 = vld [vmem:[%s2411_s1 + $0x2e8] sm:$0xff]  }
  0x23   :  { %1119 = vmatmul.mubr.bf16.vlgmr.msra.gmra.mrb[0].mxu0 %v1834_v32  ;;  %v1906_v32 = vld [vmem:[%s2411_s1 + $0x260] sm:$0xff]  }
  0x24   :  { %1168 = vmatmul.mubr.bf16.vlgmr.msra.gmra.mrb[0].mxu1 %v1837_v34  ;;  %1647 = vmatpush3.bf16.msra.mxu0 %v1842_v38  ;;  %v1908_v34 = vld [vmem:[%s2411_s1 + $0x220] sm:$0xff]   ;;  %v1912_v38 = vld [vmem:[%s2411_s1 + $0x228] sm:$0xff]  }
  0x25   :  { %1675 = vmatpush3.bf16.msra.mxu1 %v1843_v39  ;;  %1648 = vmatprep.subr.bf16.mxu0 %v1844_v40  ;;  %v1913_v39 = vld [vmem:[%s2411_s1 + $0x2a8] sm:$0xff]   ;;  %v1914_v40 = vld [vmem:[%s2411_s1 + $0x270] sm:$0xff]  }
  0x26   :  { %1676 = vmatprep.subr.bf16.mxu1 %v1845_v41  ;;  %1126 = vmatprep.mubr.bf16.mxu0 %v1860_v56  ;;  %v1915_v41 = vld [vmem:[%s2411_s1 + $0x2f0] sm:$0xff]  }
  0x27   :  { %1175 = vmatprep.mubr.bf16.mxu1 %v1865_v60  ;;  %v1932_v56 = vld [vmem:[%s2412_s0 + $0x94] ss:$56 sps:$4 sm:$0xff]  }
  0x28   :  { %1649 = vmatpush3.bf16.msra.mxu0 %v1846_v42  ;;  %v1916_v42 = vld [vmem:[%s2411_s1 + $0x230] sm:$0xff]  }
  0x29   :  { %1677 = vmatpush3.bf16.msra.mxu1 %v1847_v43  ;;  %1650 = vmatprep.subr.bf16.mxu0 %v1848_v44  ;;  %v1917_v43 = vld [vmem:[%s2411_s1 + $0x2b0] sm:$0xff]   ;;  %v1918_v44 = vld [vmem:[%s2411_s1 + $0x278] sm:$0xff]  }
  0x2a   :  { %1678 = vmatprep.subr.bf16.mxu1 %v1849_v45  ;;  %v1919_v45 = vld [vmem:[%s2411_s1 + $0x2f8] sm:$0xff]   ;;  %v1938_v60 = vld [vmem:[%s2411_s1 + $0x310] sm:$0xff]  }
  0x2b   :  { %1127 = vmatmul.mubr.bf16.gmra.mrb[4].mxu0 %v1862_v57  ;;  %v1934_v57 = vld [vmem:[%s2412_s0 + $0x90] ss:$56 sps:$4 sm:$0xff]  }
  0x2c   :  { %1651 = vmatpush3.bf16.msra.mxu0 %v1850_v46  ;;  %1176 = vmatmul.mubr.bf16.gmra.mrb[4].mxu1 %v1869_v63  ;;  %v1920_v46 = vld [vmem:[%s2411_s1 + $0x238] sm:$0xff]  }
  0x2d   :  { %1679 = vmatpush3.bf16.msra.mxu1 %v1851_v47  ;;  %1652 = vmatprep.subr.bf16.mxu0 %v1852_v48  ;;  %v1921_v47 = vld [vmem:[%s2411_s1 + $0x2b8] sm:$0xff]  }
  0x2e   :  { %1680 = vmatprep.subr.bf16.mxu1 %v1853_v49  ;;  %1216 = vmatprep.mubr.bf16.mxu0 %v1880_v9  ;;  %v1922_v48 = vld [vmem:[%s2412_s0 + $0x20] ss:$56 sps:$4 sm:$0xff]   ;;  %v1924_v49 = vld [vmem:[%s2412_s0 + $0x24] ss:$56 sps:$4 sm:$0xff]  }
  0x2f   :  { %1265 = vmatprep.mubr.bf16.mxu1 %v1883_v11  ;;  %v1941_v63 = vld [vmem:[%s2411_s1 + $0x318] sm:$0xff]  }
  0x30   :  { %1653 = vmatpush3.bf16.msra.mxu0 %v1854_v50  ;;  %v1925_v50 = vld [vmem:[%s2412_s0 + $0x28] ss:$56 sps:$4 sm:$0xff]   ;;  %v1949_v9 = vld [vmem:[%s2411_s1 + $0x338] sm:$0xff]  }
  0x31   :  { %1681 = vmatpush3.bf16.msra.mxu1 %v1855_v51  ;;  %1654 = vmatprep.subr.bf16.mxu0 %v1856_v52  ;;  %v1927_v51 = vld [vmem:[%s2412_s0 + $0x2c] ss:$56 sps:$4 sm:$0xff]   ;;  %v1953_v11 = vld [vmem:[%s2412_s0 + $0xa0] ss:$56 sps:$4 sm:$0xff]  }
  0x32   :  { %1682 = vmatprep.subr.bf16.mxu1 %v1857_v53  ;;  %v1928_v52 = vld [vmem:[%s2411_s1 + $0x340] sm:$0xff]  }
  0x33   :  { %v1929_v53 = vld [vmem:[%s2411_s1 + $0x300] sm:$0xff]  }
  0x34   :  { %1655 = vmatpush3.bf16.msra.mxu0 %v1858_v54  ;;  %v1930_v54 = vld [vmem:[%s2411_s1 + $0x348] sm:$0xff]  }
  0x35   :  { %1683 = vmatpush3.bf16.msra.mxu1 %v1859_v55  ;;  %1656 = vmatprep.subr.bf16.mxu0 %v1863_v58  ;;  %v1931_v55 = vld [vmem:[%s2411_s1 + $0x308] sm:$0xff]   ;;  %v1935_v58 = vld [vmem:[%s2411_s1 + $0x350] sm:$0xff]  }
  0x36   :  { %1684 = vmatprep.subr.bf16.mxu1 %v1864_v59  ;;  %v1936_v59 = vld [vmem:[%s2412_s0 + $0x9c] ss:$56 sps:$4 sm:$0xff]  }
  0x38   :  { %1657 = vmatpush3.bf16.msra.mxu0 %v1867_v61  ;;  %v1939_v61 = vld [vmem:[%s2412_s0 + $0x98] ss:$56 sps:$4 sm:$0xff]  }
  0x39   :  { %1685 = vmatpush3.bf16.msra.mxu1 %v1868_v62  ;;  %1658 = vmatprep.subr.bf16.mxu0 %v1870_v0  ;;  %v1940_v62 = vld [vmem:[%s2411_s1 + $0x358] sm:$0xff]   ;;  %v1942_v0 = vld [vmem:[%s2411_s1 + $0x360] sm:$0xff]  }
  0x3a   :  { %1686 = vmatprep.subr.bf16.mxu1 %v1871_v1  ;;  %v1943_v1 = vld [vmem:[%s2411_s1 + $0x320] sm:$0xff]  }
  0x3c   :  { %1659 = vmatpush3.bf16.msra.mxu0 %v1872_v2  ;;  %v1944_v2 = vld [vmem:[%s2411_s1 + $0x368] sm:$0xff]  }
  0x3d   :  { %1687 = vmatpush3.bf16.msra.mxu1 %v1873_v3  ;;  %1660 = vmatprep.subr.bf16.mxu0 %v1874_v4  ;;  %v1945_v3 = vld [vmem:[%s2411_s1 + $0x328] sm:$0xff]  }
  0x3e   :  { %1688 = vmatprep.subr.bf16.mxu1 %v1875_v5  ;;  %v1952_v4 = vld [vmem:[%s2412_s0 + $0x34] ss:$56 sps:$4 sm:$0xff]  }
  0x3f   :  { %v1946_v5 = vld [vmem:[%s2411_s1 + $0x370] sm:$0xff]  }
  0x40   :  { %1661 = vmatpush3.bf16.msra.mxu0 %v1876_v6  ;;  %v1955_v6 = vld [vmem:[%s2412_s0 + $0xa4] ss:$56 sps:$4 sm:$0xff]  }
  0x41   :  { %1689 = vmatpush3.bf16.msra.mxu1 %v1877_v7  ;;  %1702 = vmatprep.subr.bf16.mxu0 %v1884_v12  ;;  %v1947_v7 = vld [vmem:[%s2411_s1 + $0x330] sm:$0xff]  }
  0x42   :  { %1730 = vmatprep.subr.bf16.mxu1 %v1885_v13 }
  0x43   :  { %1217 = vmatmul.mubr.bf16.vlgmr.msra.gmra.mrb[8].mxu0 %v1878_v8  ;;  %v1948_v8 = vld [vmem:[%s2411_s1 + $0x378] sm:$0xff]  }
  0x44   :  { %1266 = vmatmul.mubr.bf16.vlgmr.msra.gmra.mrb[8].mxu1 %v1881_v10  ;;  %1703 = vmatpush3.bf16.msra.mxu0 %v1886_v14  ;;  %v1950_v10 = vld [vmem:[%s2412_s0 + $0x30] ss:$56 sps:$4 sm:$0xff]   ;;  %v1449_v14 = vld [vmem:[%s2413_s2] ss:$0 sm:$0xff] }
  0x45   :  { %1731 = vmatpush3.bf16.msra.mxu1 %v1887_v15  ;;  %1704 = vmatprep.subr.bf16.mxu0 %v1888_v16 }
  0x46   :  { %1732 = vmatprep.subr.bf16.mxu1 %v1889_v17  ;;  %1224 = vmatprep.mubr.bf16.mxu0 %v1892_v20 }
  0x47   :  { %1273 = vmatprep.mubr.bf16.mxu1 %v1897_v24 }
  0x48   :  { %1705 = vmatpush3.bf16.msra.mxu0 %v1890_v18 }
  0x49   :  { %1733 = vmatpush3.bf16.msra.mxu1 %v1891_v19  ;;  %1706 = vmatprep.subr.bf16.mxu0 %v1895_v22 }
  0x4a   :  { %1734 = vmatprep.subr.bf16.mxu1 %v1896_v23 }
  0x4b   :  { %1225 = vmatmul.mubr.bf16.gmra.mrb[12].mxu0 %v1894_v21 }
  0x4c   :  { %1707 = vmatpush3.bf16.msra.mxu0 %v1899_v25  ;;  %1274 = vmatmul.mubr.bf16.gmra.mrb[12].mxu1 %v1901_v27 }
  0x4d   :  { %1735 = vmatpush3.bf16.msra.mxu1 %v1900_v26  ;;  %1708 = vmatprep.subr.bf16.mxu0 %v1902_v28 }
  0x4e   :  { %1736 = vmatprep.subr.bf16.mxu1 %v1903_v29  ;;  %1314 = vmatprep.mubr.bf16.mxu0 %v1924_v49 }
  0x4f   :  { %1363 = vmatprep.mubr.bf16.mxu1 %v1927_v51 }
  0x50   :  { %1709 = vmatpush3.bf16.msra.mxu0 %v1904_v30 }
  0x51   :  { %1737 = vmatpush3.bf16.msra.mxu1 %v1905_v31  ;;  %1710 = vmatprep.subr.bf16.mxu0 %v1906_v32 }
  0x52   :  { %1738 = vmatprep.subr.bf16.mxu1 %v1907_v33 }
  0x54   :  { %1711 = vmatpush3.bf16.msra.mxu0 %v1908_v34 }
  0x55   :  { %1739 = vmatpush3.bf16.msra.mxu1 %v1909_v35  ;;  %1712 = vmatprep.subr.bf16.mxu0 %v1910_v36 }
  0x56   :  { %1740 = vmatprep.subr.bf16.mxu1 %v1911_v37 }
  0x58   :  { %1713 = vmatpush3.bf16.msra.mxu0 %v1912_v38 }
  0x59   :  { %1741 = vmatpush3.bf16.msra.mxu1 %v1913_v39  ;;  %1714 = vmatprep.subr.bf16.mxu0 %v1914_v40 }
  0x5a   :  { %1742 = vmatprep.subr.bf16.mxu1 %v1915_v41 }
  0x5c   :  { %1715 = vmatpush3.bf16.msra.mxu0 %v1916_v42 }
  0x5d   :  { %1743 = vmatpush3.bf16.msra.mxu1 %v1917_v43  ;;  %1716 = vmatprep.subr.bf16.mxu0 %v1918_v44 }
  0x5e   :  { %1744 = vmatprep.subr.bf16.mxu1 %v1919_v45 }
  0x60   :  { %1717 = vmatpush3.bf16.msra.mxu0 %v1920_v46 }
  0x61   :  { %1745 = vmatpush3.bf16.msra.mxu1 %v1921_v47  ;;  %1758 = vmatprep.subr.bf16.mxu0 %v1928_v52 }
  0x62   :  { %1786 = vmatprep.subr.bf16.mxu1 %v1928_v52 }
  0x63   :  { %1315 = vmatmul.mubr.bf16.vlgmr.msra.gmra.mrb[16].mxu0 %v1922_v48 }
  0x64   :  { %1364 = vmatmul.mubr.bf16.vlgmr.msra.gmra.mrb[16].mxu1 %v1925_v50  ;;  %1759 = vmatpush3.bf16.msra.mxu0 %v1929_v53 }
  0x65   :  { %1794 = vmatpush3.bf16.msra.mxu1 %v1929_v53  ;;  %1760 = vmatprep.subr.bf16.mxu0 %v1930_v54 }
  0x66   :  { %1787 = vmatprep.subr.bf16.mxu1 %v1930_v54  ;;  %1322 = vmatprep.mubr.bf16.mxu0 %v1932_v56 }
  0x67   :  { %1371 = vmatprep.mubr.bf16.mxu1 %v1936_v59 }
  0x68   :  { %1761 = vmatpush3.bf16.msra.mxu0 %v1931_v55 }
  0x69   :  { %1795 = vmatpush3.bf16.msra.mxu1 %v1931_v55  ;;  %1762 = vmatprep.subr.bf16.mxu0 %v1935_v58 }
  0x6a   :  { %1788 = vmatprep.subr.bf16.mxu1 %v1935_v58 }
  0x6b   :  { %1323 = vmatmul.mubr.bf16.gmra.mrb[20].mxu0 %v1934_v57 }
  0x6c   :  { %1763 = vmatpush3.bf16.msra.mxu0 %v1938_v60  ;;  %1372 = vmatmul.mubr.bf16.gmra.mrb[20].mxu1 %v1939_v61 }
  0x6d   :  { %1796 = vmatpush3.bf16.msra.mxu1 %v1938_v60  ;;  %1764 = vmatprep.subr.bf16.mxu0 %v1940_v62 }
  0x6e   :  { %1789 = vmatprep.subr.bf16.mxu1 %v1940_v62  ;;  %1412 = vmatprep.mubr.bf16.mxu0 %v1952_v4 }
  0x6f   :  { %1420 = vmatprep.mubr.bf16.mxu1 %v1955_v6 }
  0x70   :  { %1765 = vmatpush3.bf16.msra.mxu0 %v1941_v63 }
  0x71   :  { %1797 = vmatpush3.bf16.msra.mxu1 %v1941_v63  ;;  %1766 = vmatprep.subr.bf16.mxu0 %v1942_v0 }
  0x72   :  { %1790 = vmatprep.subr.bf16.mxu1 %v1942_v0 }
  0x74   :  { %1767 = vmatpush3.bf16.msra.mxu0 %v1943_v1 }
  0x75   :  { %1798 = vmatpush3.bf16.msra.mxu1 %v1943_v1  ;;  %1768 = vmatprep.subr.bf16.mxu0 %v1944_v2 }
  0x76   :  { %1791 = vmatprep.subr.bf16.mxu1 %v1944_v2 }
  0x78   :  { %1769 = vmatpush3.bf16.msra.mxu0 %v1945_v3 }
  0x79   :  { %1799 = vmatpush3.bf16.msra.mxu1 %v1945_v3  ;;  %1770 = vmatprep.subr.bf16.mxu0 %v1946_v5 }
  0x7a   :  { %1792 = vmatprep.subr.bf16.mxu1 %v1946_v5 }
  0x7c   :  { %1771 = vmatpush3.bf16.msra.mxu0 %v1947_v7 }
  0x7d   :  { %1800 = vmatpush3.bf16.msra.mxu1 %v1947_v7  ;;  %1772 = vmatprep.subr.bf16.mxu0 %v1948_v8 }
  0x7e   :  { %1793 = vmatprep.subr.bf16.mxu1 %v1948_v8 }
  0x80   :  { %1773 = vmatpush3.bf16.msra.mxu0 %v1949_v9 }
  0x81   :  { %1801 = vmatpush3.bf16.msra.mxu1 %v1949_v9 }
  0x83   :  { %1413 = vmatmul.mubr.bf16.vlgmr.msra.gmra.mrb[24].mxu0 %v1950_v10 }
  0x84   :  { %1421 = vmatmul.mubr.bf16.vlgmr.msra.gmra.mrb[24].mxu1 %v1953_v11 }
  0xf6   :  { %v1606_v12 = vpop.f32.mrb[0].mxu0 }
  0xf7   :  { %v1634_v13 = vpop.f32.mrb[0].mxu1  ;;  %v1607_v15 = vpop.f32.mrb[1].mxu0 }
  0xf8   :  { %v1608_v16 = vadd.f32 %v1607_v15, %v1606_v12  ;;  %v1635_v17 = vpop.f32.mrb[1].mxu1  ;;  %v1609_v18 = vpop.f32.mrb[2].mxu0 }
  0xf9   :  { %v1636_v19 = vadd.f32 %v1635_v17, %v1634_v13  ;;  %v1637_v20 = vpop.f32.mrb[2].mxu1  ;;  %v1610_v21 = vpop.f32.mrb[3].mxu0 }
  0xfa   :  { %v1121_v22 = vadd.f32 %v1608_v16, %v1449_v14  ;;  %v1611_v23 = vadd.f32 %v1610_v21, %v1609_v18  ;;  %v1638_v24 = vpop.f32.mrb[3].mxu1 }
  0xfb   :  { %v1639_v25 = vadd.f32 %v1638_v24, %v1637_v20 }
  0xfc   :  { %v1170_v26 = vadd.f32 %v1636_v19, %v1121_v22  ;;  %v1124_v27 = vadd.f32 %v1611_v23, %v1449_v14 }
  0xfe   :  { %v1173_v28 = vadd.f32 %v1639_v25, %v1124_v27  ;;  %v1612_v29 = vpop.f32.mrb[4].mxu0 }
  0xff   :  { %v1613_v30 = vpop.f32.mrb[5].mxu0  ;;  %v1640_v36 = vpop.f32.mrb[4].mxu1 }
 0x100   :  { %v1614_v31 = vadd.f32 %v1613_v30, %v1612_v29  ;;  %v1615_v32 = vpop.f32.mrb[6].mxu0  ;;  %v1641_v37 = vpop.f32.mrb[5].mxu1 }
 0x101   :  { %v1616_v33 = vpop.f32.mrb[7].mxu0  ;;  %v1642_v39 = vadd.f32 %v1641_v37, %v1640_v36  ;;  %v1643_v40 = vpop.f32.mrb[6].mxu1 }
 0x102   :  { %v1617_v34 = vadd.f32 %v1616_v33, %v1615_v32  ;;  %v1129_v35 = vadd.f32 %v1614_v31, %v1449_v14  ;;  %v1644_v41 = vpop.f32.mrb[7].mxu1 }
 0x103   :  { %v1645_v43 = vadd.f32 %v1644_v41, %v1643_v40 }
 0x104   :  { %v1132_v38 = vadd.f32 %v1617_v34, %v1449_v14  ;;  %v1178_v42 = vadd.f32 %v1642_v39, %v1129_v35 }
 0x106   :  { %v1181_v44 = vadd.f32 %v1645_v43, %v1132_v38 }
 0x116   :  { %v1662_v45 = vpop.f32.mrb[8].mxu0 }
 0x117   :  { %v1690_v46 = vpop.f32.mrb[8].mxu1  ;;  %v1663_v47 = vpop.f32.mrb[9].mxu0 }
 0x118   :  { %v1664_v48 = vadd.f32 %v1663_v47, %v1662_v45  ;;  %v1691_v49 = vpop.f32.mrb[9].mxu1  ;;  %v1665_v50 = vpop.f32.mrb[10].mxu0 }
 0x119   :  { %v1692_v51 = vadd.f32 %v1691_v49, %v1690_v46  ;;  %v1693_v52 = vpop.f32.mrb[10].mxu1  ;;  %v1666_v53 = vpop.f32.mrb[11].mxu0 }
 0x11a   :  { %v1219_v54 = vadd.f32 %v1664_v48, %v1170_v26  ;;  %v1667_v55 = vadd.f32 %v1666_v53, %v1665_v50  ;;  %v1694_v56 = vpop.f32.mrb[11].mxu1 }
 0x11b   :  { %v1695_v57 = vadd.f32 %v1694_v56, %v1693_v52 }
 0x11c   :  { %v1268_v58 = vadd.f32 %v1692_v51, %v1219_v54  ;;  %v1222_v59 = vadd.f32 %v1667_v55, %v1173_v28 }
 0x11e   :  { %v1271_v60 = vadd.f32 %v1695_v57, %v1222_v59  ;;  %v1668_v61 = vpop.f32.mrb[12].mxu0 }
 0x11f   :  { %v1669_v62 = vpop.f32.mrb[13].mxu0  ;;  %v1696_v4 = vpop.f32.mrb[12].mxu1 }
 0x120   :  { %v1670_v63 = vadd.f32 %v1669_v62, %v1668_v61  ;;  %v1671_v0 = vpop.f32.mrb[14].mxu0  ;;  %v1697_v6 = vpop.f32.mrb[13].mxu1 }
 0x121   :  { %v1672_v1 = vpop.f32.mrb[15].mxu0  ;;  %v1698_v7 = vadd.f32 %v1697_v6, %v1696_v4  ;;  %v1699_v8 = vpop.f32.mrb[14].mxu1 }
 0x122   :  { %v1227_v2 = vadd.f32 %v1670_v63, %v1178_v42  ;;  %v1673_v3 = vadd.f32 %v1672_v1, %v1671_v0  ;;  %v1700_v9 = vpop.f32.mrb[15].mxu1 }
 0x123   :  { %v1701_v11 = vadd.f32 %v1700_v9, %v1699_v8 }
 0x124   :  { %v1230_v5 = vadd.f32 %v1673_v3, %v1181_v44  ;;  %v1276_v10 = vadd.f32 %v1698_v7, %v1227_v2 }
 0x126   :  { %v1279_v12 = vadd.f32 %v1701_v11, %v1230_v5 }
 0x136   :  { %v1718_v13 = vpop.f32.mrb[16].mxu0 }
 0x137   :  { %v1719_v14 = vpop.f32.mrb[17].mxu0  ;;  %v1746_v15 = vpop.f32.mrb[16].mxu1 }
 0x138   :  { %v1720_v16 = vadd.f32 %v1719_v14, %v1718_v13  ;;  %v1721_v17 = vpop.f32.mrb[18].mxu0  ;;  %v1747_v18 = vpop.f32.mrb[17].mxu1 }
 0x139   :  { %v1722_v19 = vpop.f32.mrb[19].mxu0  ;;  %v1748_v21 = vadd.f32 %v1747_v18, %v1746_v15  ;;  %v1749_v22 = vpop.f32.mrb[18].mxu1 }
 0x13a   :  { %v1317_v20 = vadd.f32 %v1720_v16, %v1268_v58  ;;  %v1723_v23 = vadd.f32 %v1722_v19, %v1721_v17  ;;  %v1750_v24 = vpop.f32.mrb[19].mxu1 }
 0x13b   :  { %v1751_v27 = vadd.f32 %v1750_v24, %v1749_v22 }
 0x13c   :  { %v1366_v25 = vadd.f32 %v1748_v21, %v1317_v20  ;;  %v1320_v26 = vadd.f32 %v1723_v23, %v1271_v60 }
 0x13e   :  { %v1369_v28 = vadd.f32 %v1751_v27, %v1320_v26  ;;  %v1724_v29 = vpop.f32.mrb[20].mxu0 }
 0x13f   :  { %v1725_v30 = vpop.f32.mrb[21].mxu0  ;;  %v1752_v33 = vpop.f32.mrb[20].mxu1 }
 0x140   :  { %v1726_v31 = vadd.f32 %v1725_v30, %v1724_v29  ;;  %v1727_v32 = vpop.f32.mrb[22].mxu0  ;;  %v1753_v37 = vpop.f32.mrb[21].mxu1 }
 0x141   :  { %v1728_v34 = vpop.f32.mrb[23].mxu0  ;;  %v1754_v38 = vadd.f32 %v1753_v37, %v1752_v33  ;;  %v1755_v39 = vpop.f32.mrb[22].mxu1 }
 0x142   :  { %v1325_v35 = vadd.f32 %v1726_v31, %v1276_v10  ;;  %v1729_v36 = vadd.f32 %v1728_v34, %v1727_v32  ;;  %v1756_v41 = vpop.f32.mrb[23].mxu1 }
 0x143   :  { %v1757_v43 = vadd.f32 %v1756_v41, %v1755_v39 }
 0x144   :  { %v1328_v40 = vadd.f32 %v1729_v36, %v1279_v12  ;;  %v1374_v42 = vadd.f32 %v1754_v38, %v1325_v35 }
 0x146   :  { %v1377_v44 = vadd.f32 %v1757_v43, %v1328_v40 }
 0x156   :  { %v1774_v45 = vpop.f32.mrb[24].mxu0 }
 0x157   :  { %v1780_v46 = vpop.f32.mrb[24].mxu1  ;;  %v1775_v47 = vpop.f32.mrb[25].mxu0 }
 0x158   :  { %v1776_v48 = vadd.f32 %v1775_v47, %v1774_v45  ;;  %v1781_v49 = vpop.f32.mrb[25].mxu1  ;;  %v1777_v50 = vpop.f32.mrb[26].mxu0 }
 0x159   :  { %v1782_v51 = vadd.f32 %v1781_v49, %v1780_v46  ;;  %v1783_v52 = vpop.f32.mrb[26].mxu1  ;;  %v1778_v53 = vpop.f32.mrb[27].mxu0 }
 0x15a   :  { %v1415_v54 = vadd.f32 %v1776_v48, %v1366_v25  ;;  %v1779_v55 = vadd.f32 %v1778_v53, %v1777_v50  ;;  %v1784_v56 = vpop.f32.mrb[27].mxu1 }
 0x15b   :  { %v1423_v57 = vadd.f32 %v1782_v51, %v1374_v42  ;;  %v1785_v58 = vadd.f32 %v1784_v56, %v1783_v52 }
 0x15c   :  { %vm1429_vm0 = vcmp.ge.f32.partialorder %v1415_v54, 0.0  ;;  %v1433_v59 = vmul.f32 0.1, %v1415_v54  ;;  %v1418_v60 = vadd.f32 %v1779_v55, %v1369_v28 }
 0x15d   :  { %vm1431_vm1 = vcmp.ge.f32.partialorder %v1423_v57, 0.0  ;;  %v1435_v61 = vmul.f32 0.1, %v1423_v57  ;;  %v1426_v62 = vadd.f32 %v1785_v58, %v1377_v44 }
 0x15e   :  { %v1437_v63 = vsel %vm1429_vm0, %v1415_v54, %v1433_v59  ;;  %vm1430_vm2 = vcmp.ge.f32.partialorder %v1418_v60, 0.0  ;;  %v1434_v0 = vmul.f32 0.1, %v1418_v60 }
 0x15f   :  { %1441 = vst [vmem:[%s2414_s3] sm:$0xff] %v1437_v63  ;;  %v1439_v1 = vsel %vm1431_vm1, %v1423_v57, %v1435_v61  ;;  %vm1432_vm3 = vcmp.ge.f32.partialorder %v1426_v62, 0.0  ;;  %v1436_v2 = vmul.f32 0.1, %v1426_v62 }
 0x160   :  { %1443 = vst [vmem:[%s2414_s3 + $0x10] sm:$0xff] %v1439_v1  ;;  %v1438_v3 = vsel %vm1430_vm2, %v1418_v60, %v1434_v0 }
 0x161   :  { %1442 = vst [vmem:[%s2414_s3 + $0x8] sm:$0xff] %v1438_v3  ;;  %v1440_v4 = vsel %vm1432_vm3, %v1426_v62, %v1436_v2 }
 0x162   :  { %1444 = vst [vmem:[%s2414_s3 + $0x18] sm:$0xff] %v1440_v4 }

// kernel: dispnet_bi_forward.76
= control target key start
LH: loop header
LB: loop body
LE: loop exit
PB: predicated region body
PF: predicated region fallthrough
CT: control target
= control target key end

     0   :  { %s618_s1 = inlined_call_operand.vmem [shape: bf16[384,128], index: 1, kind: input, shape index: {}]   ;;  %s619_s0 = inlined_call_operand.vmem [shape: bf16[32,384], index: 0, kind: input, shape index: {}]   ;;  %s620_s2 = inlined_call_operand.vmem [shape: f32[1,128], index: 2, kind: input, shape index: {}]   ;;  %s621_s3 = inlined_call_operand.vmem [shape: f32[32,128], index: 3, kind: output, shape index: {}]  }
   0x1   :  { %v461_v0 = vld [vmem:[%s618_s1 + $0x40] sm:$0xff]   ;;  %v463_v2 = vld [vmem:[%s618_s1 + $0x48] sm:$0xff]   ;;  %v466_v5 = vld [vmem:[%s618_s1 + $0x50] sm:$0xff]  }
   0x2   :  { %v462_v1 = vld [vmem:[%s618_s1] sm:$0xff]   ;;  %403 = vmatprep.subr.bf16.mxu0 %v461_v0  ;;  %v465_v4 = vld [vmem:[%s618_s1 + $0x8] sm:$0xff]   ;;  %v468_v7 = vld [vmem:[%s618_s1 + $0x10] sm:$0xff]  }
   0x3   :  { %404 = vmatpush3.bf16.msra.mxu0 %v462_v1  ;;  %v464_v3 = vld [vmem:[%s618_s1 + $0x80] sm:$0xff]   ;;  %v467_v6 = vld [vmem:[%s618_s1 + $0x88] sm:$0xff]   ;;  %v469_v8 = vld [vmem:[%s618_s1 + $0x58] sm:$0xff]  }
   0x4   :  { %405 = vmatprep.subr.bf16.mxu0 %v463_v2  ;;  %441 = vmatprep.subr.bf16.mxu1 %v464_v3  ;;  %v470_v9 = vld [vmem:[%s618_s1 + $0x90] sm:$0xff]   ;;  %v471_v10 = vld [vmem:[%s618_s1 + $0x18] sm:$0xff]   ;;  %v472_v11 = vld [vmem:[%s618_s1 + $0x60] sm:$0xff]  }
   0x5   :  { %442 = vmatpush3.bf16.msra.mxu1 %v464_v3  ;;  %v473_v12 = vld [vmem:[%s618_s1 + $0x98] sm:$0xff]   ;;  %v474_v13 = vld [vmem:[%s618_s1 + $0x20] sm:$0xff]   ;;  %v475_v15 = vld [vmem:[%s618_s1 + $0x68] sm:$0xff]  }
   0x6   :  { %443 = vmatprep.subr.bf16.mxu1 %v467_v6  ;;  %v476_v14 = vld [vmem:[%s618_s1 + $0xa0] sm:$0xff]   ;;  %v477_v16 = vld [vmem:[%s618_s1 + $0x28] sm:$0xff]   ;;  %v478_v18 = vld [vmem:[%s618_s1 + $0x70] sm:$0xff]  }
   0x7   :  { %406 = vmatpush3.bf16.msra.mxu0 %v465_v4  ;;  %v479_v17 = vld [vmem:[%s618_s1 + $0xa8] sm:$0xff]   ;;  %v480_v19 = vld [vmem:[%s618_s1 + $0x30] sm:$0xff]   ;;  %v481_v20 = vld [vmem:[%s618_s1 + $0x78] sm:$0xff]  }
   0x8   :  { %407 = vmatprep.subr.bf16.mxu0 %v466_v5  ;;  %v482_v21 = vld [vmem:[%s618_s1 + $0xb0] sm:$0xff]   ;;  %v483_v23 = vld [vmem:[%s618_s1 + $0x38] sm:$0xff]   ;;  %v484_v26 = vld [vmem:[%s619_s0] ss:$12 sps:$4 sm:$0xff]  }
   0x9   :  { %444 = vmatpush3.bf16.msra.mxu1 %v467_v6  ;;  %v486_v22 = vld [vmem:[%s619_s0 + $0x4] ss:$12 sps:$4 sm:$0xff]   ;;  %v488_v24 = vld [vmem:[%s619_s0 + $0x8] ss:$12 sps:$4 sm:$0xff]   ;;  %v487_v25 = vld [vmem:[%s618_s1 + $0xb8] sm:$0xff]  }
   0xa   :  { %445 = vmatprep.subr.bf16.mxu1 %v470_v9  ;;  %286 = vmatprep.mubr.bf16.mxu0 %v486_v22  ;;  %v490_v27 = vld [vmem:[%s619_s0 + $0x1c] ss:$12 sps:$4 sm:$0xff]   ;;  %v489_v28 = vld [vmem:[%s619_s0 + $0x20] ss:$12 sps:$4 sm:$0xff]   ;;  %v492_v29 = vld [vmem:[%s619_s0 + $0x18] ss:$12 sps:$4 sm:$0xff]  }
   0xb   :  { %408 = vmatpush3.bf16.msra.mxu0 %v468_v7  ;;  %457 = vmatprep.mubr.bf16.mxu1 %v488_v24  ;;  %v372_v32 = vld [vmem:[%s620_s2] ss:$0 sm:$0xff] }
   0xc   :  { %409 = vmatprep.subr.bf16.mxu0 %v469_v8 }
   0xd   :  { %446 = vmatpush3.bf16.msra.mxu1 %v470_v9 }
   0xe   :  { %447 = vmatprep.subr.bf16.mxu1 %v473_v12 }
   0xf   :  { %410 = vmatpush3.bf16.msra.mxu0 %v471_v10 }
  0x10   :  { %411 = vmatprep.subr.bf16.mxu0 %v472_v11 }
  0x11   :  { %448 = vmatpush3.bf16.msra.mxu1 %v473_v12 }
  0x12   :  { %449 = vmatprep.subr.bf16.mxu1 %v476_v14 }
  0x13   :  { %412 = vmatpush3.bf16.msra.mxu0 %v474_v13 }
  0x14   :  { %413 = vmatprep.subr.bf16.mxu0 %v475_v15 }
  0x15   :  { %450 = vmatpush3.bf16.msra.mxu1 %v476_v14 }
  0x16   :  { %451 = vmatprep.subr.bf16.mxu1 %v479_v17 }
  0x17   :  { %414 = vmatpush3.bf16.msra.mxu0 %v477_v16 }
  0x18   :  { %415 = vmatprep.subr.bf16.mxu0 %v478_v18 }
  0x19   :  { %452 = vmatpush3.bf16.msra.mxu1 %v479_v17 }
  0x1a   :  { %453 = vmatprep.subr.bf16.mxu1 %v482_v21 }
  0x1b   :  { %416 = vmatpush3.bf16.msra.mxu0 %v480_v19 }
  0x1c   :  { %417 = vmatprep.subr.bf16.mxu0 %v481_v20 }
  0x1d   :  { %454 = vmatpush3.bf16.msra.mxu1 %v482_v21 }
  0x1e   :  { %455 = vmatprep.subr.bf16.mxu1 %v487_v25 }
  0x1f   :  { %418 = vmatpush3.bf16.msra.mxu0 %v483_v23 }
  0x21   :  { %456 = vmatpush3.bf16.msra.mxu1 %v487_v25 }
  0x22   :  { %287 = vmatmul.mubr.bf16.vlgmr.msra.gmra.mrb[0].mxu0 %v484_v26 }
  0x23   :  { %294 = vmatprep.mubr.bf16.mxu0 %v490_v27 }
  0x24   :  { %458 = vmatmul.mubr.bf16.vlgmr.msra.gmra.mrb[0].mxu1 %v489_v28 }
  0x2a   :  { %295 = vmatmul.mubr.bf16.gmra.mrb[4].mxu0 %v492_v29 }
  0xf5   :  { %v419_v30 = vpop.f32.mrb[0].mxu0 }
  0xf6   :  { %v420_v31 = vpop.f32.mrb[1].mxu0 }
  0xf7   :  { %v421_v33 = vadd.f32 %v420_v31, %v419_v30  ;;  %v422_v34 = vpop.f32.mrb[2].mxu0  ;;  %v459_v36 = vpop.f32.mrb[0].mxu1 }
  0xf8   :  { %v423_v35 = vpop.f32.mrb[3].mxu0  ;;  %v337_v39 = vpop.f32.mrb[1].mxu1 }
  0xf9   :  { %v424_v37 = vadd.f32 %v423_v35, %v422_v34  ;;  %v289_v38 = vadd.f32 %v421_v33, %v372_v32  ;;  %v460_v40 = vpop.f32.mrb[2].mxu1 }
  0xfa   :  { %v340_v43 = vpop.f32.mrb[3].mxu1 }
  0xfb   :  { %v338_v41 = vadd.f32 %v337_v39, %v289_v38  ;;  %v292_v42 = vadd.f32 %v424_v37, %v372_v32 }
  0xfd   :  { %vm352_vm0 = vcmp.ge.f32.partialorder %v338_v41, 0.0  ;;  %v356_v44 = vmul.f32 0.1, %v338_v41  ;;  %v341_v45 = vadd.f32 %v340_v43, %v292_v42  ;;  %v425_v46 = vpop.f32.mrb[4].mxu0 }
  0xfe   :  { %v426_v47 = vpop.f32.mrb[5].mxu0 }
  0xff   :  { %v360_v48 = vsel %vm352_vm0, %v338_v41, %v356_v44  ;;  %vm353_vm1 = vcmp.ge.f32.partialorder %v341_v45, 0.0  ;;  %v357_v49 = vmul.f32 0.1, %v341_v45  ;;  %v427_v50 = vadd.f32 %v426_v47, %v425_v46  ;;  %v428_v51 = vpop.f32.mrb[6].mxu0 }
 0x100   :  { %364 = vst [vmem:[%s621_s3] sm:$0xff] %v360_v48  ;;  %v429_v52 = vpop.f32.mrb[7].mxu0 }
 0x101   :  { %v361_v53 = vsel %vm353_vm1, %v341_v45, %v357_v49  ;;  %v297_v54 = vadd.f32 %v427_v50, %v372_v32  ;;  %v430_v55 = vadd.f32 %v429_v52, %v428_v51 }
 0x102   :  { %365 = vst [vmem:[%s621_s3 + $0x8] sm:$0xff] %v361_v53 }
 0x103   :  { %v346_v56 = vadd.f32 %v459_v36, %v297_v54  ;;  %v300_v57 = vadd.f32 %v430_v55, %v372_v32 }
 0x105   :  { %vm354_vm2 = vcmp.ge.f32.partialorder %v346_v56, 0.0  ;;  %v358_v58 = vmul.f32 0.1, %v346_v56  ;;  %v349_v59 = vadd.f32 %v460_v40, %v300_v57 }
 0x107   :  { %v362_v60 = vsel %vm354_vm2, %v346_v56, %v358_v58  ;;  %vm355_vm3 = vcmp.ge.f32.partialorder %v349_v59, 0.0  ;;  %v359_v61 = vmul.f32 0.1, %v349_v59 }
 0x108   :  { %366 = vst [vmem:[%s621_s3 + $0x10] sm:$0xff] %v362_v60 }
 0x109   :  { %v363_v62 = vsel %vm355_vm3, %v349_v59, %v359_v61 }
 0x10a   :  { %367 = vst [vmem:[%s621_s3 + $0x18] sm:$0xff] %v363_v62 }

// kernel: dispnet_bi_forward.75
= control target key start
LH: loop header
LB: loop body
LE: loop exit
PB: predicated region body
PF: predicated region fallthrough
CT: control target
= control target key end

     0   :  { %s1268_s1 = inlined_call_operand.vmem [shape: bf16[896,128], index: 1, kind: input, shape index: {}]   ;;  %s1269_s0 = inlined_call_operand.vmem [shape: bf16[32,896], index: 0, kind: input, shape index: {}]   ;;  %s1270_s2 = inlined_call_operand.vmem [shape: f32[1,128], index: 2, kind: input, shape index: {}]   ;;  %s1271_s3 = inlined_call_operand.vmem [shape: f32[32,128], index: 3, kind: output, shape index: {}]  }
   0x1   :  { %v947_v0 = vld [vmem:[%s1268_s1 + $0x40] sm:$0xff]   ;;  %v951_v4 = vld [vmem:[%s1268_s1 + $0x48] sm:$0xff]   ;;  %v955_v8 = vld [vmem:[%s1268_s1 + $0x50] sm:$0xff]  }
   0x2   :  { %v948_v1 = vld [vmem:[%s1268_s1] sm:$0xff]   ;;  %833 = vmatprep.subr.bf16.mxu0 %v947_v0  ;;  %v952_v5 = vld [vmem:[%s1268_s1 + $0x8] sm:$0xff]   ;;  %v956_v9 = vld [vmem:[%s1268_s1 + $0x10] sm:$0xff]  }
   0x3   :  { %v949_v2 = vld [vmem:[%s1268_s1 + $0xc0] sm:$0xff]   ;;  %834 = vmatpush3.bf16.msra.mxu0 %v948_v1  ;;  %v953_v6 = vld [vmem:[%s1268_s1 + $0xc8] sm:$0xff]   ;;  %v957_v10 = vld [vmem:[%s1268_s1 + $0xd0] sm:$0xff]  }
   0x4   :  { %v950_v3 = vld [vmem:[%s1268_s1 + $0x80] sm:$0xff]   ;;  %861 = vmatprep.subr.bf16.mxu1 %v949_v2  ;;  %835 = vmatprep.subr.bf16.mxu0 %v951_v4  ;;  %v954_v7 = vld [vmem:[%s1268_s1 + $0x88] sm:$0xff]   ;;  %v958_v11 = vld [vmem:[%s1268_s1 + $0x90] sm:$0xff]  }
   0x5   :  { %862 = vmatpush3.bf16.msra.mxu1 %v950_v3  ;;  %v959_v12 = vld [vmem:[%s1268_s1 + $0x58] sm:$0xff]   ;;  %v963_v16 = vld [vmem:[%s1268_s1 + $0x60] sm:$0xff]   ;;  %v967_v20 = vld [vmem:[%s1268_s1 + $0x68] sm:$0xff]  }
   0x6   :  { %863 = vmatprep.subr.bf16.mxu1 %v953_v6  ;;  %v960_v13 = vld [vmem:[%s1268_s1 + $0x18] sm:$0xff]   ;;  %v964_v17 = vld [vmem:[%s1268_s1 + $0x20] sm:$0xff]   ;;  %v968_v21 = vld [vmem:[%s1268_s1 + $0x28] sm:$0xff]  }
   0x7   :  { %836 = vmatpush3.bf16.msra.mxu0 %v952_v5  ;;  %v961_v14 = vld [vmem:[%s1268_s1 + $0xd8] sm:$0xff]   ;;  %v965_v18 = vld [vmem:[%s1268_s1 + $0xe0] sm:$0xff]   ;;  %v969_v22 = vld [vmem:[%s1268_s1 + $0xe8] sm:$0xff]  }
   0x8   :  { %837 = vmatprep.subr.bf16.mxu0 %v955_v8  ;;  %v962_v15 = vld [vmem:[%s1268_s1 + $0x98] sm:$0xff]   ;;  %v966_v19 = vld [vmem:[%s1268_s1 + $0xa0] sm:$0xff]   ;;  %v970_v23 = vld [vmem:[%s1268_s1 + $0xa8] sm:$0xff]  }
   0x9   :  { %864 = vmatpush3.bf16.msra.mxu1 %v954_v7  ;;  %v971_v24 = vld [vmem:[%s1268_s1 + $0x70] sm:$0xff]   ;;  %v975_v28 = vld [vmem:[%s1268_s1 + $0x78] sm:$0xff]   ;;  %v980_v32 = vld [vmem:[%s1269_s0 + $0x4] ss:$28 sps:$4 sm:$0xff]  }
   0xa   :  { %865 = vmatprep.subr.bf16.mxu1 %v957_v10  ;;  %v972_v25 = vld [vmem:[%s1268_s1 + $0x30] sm:$0xff]   ;;  %v976_v29 = vld [vmem:[%s1268_s1 + $0x38] sm:$0xff]   ;;  %590 = vmatprep.mubr.bf16.mxu0 %v980_v32  ;;  %v982_v34 = vld [vmem:[%s1268_s1 + $0x140] sm:$0xff]  }
   0xb   :  { %838 = vmatpush3.bf16.msra.mxu0 %v956_v9  ;;  %v973_v26 = vld [vmem:[%s1268_s1 + $0xf0] sm:$0xff]   ;;  %v977_v30 = vld [vmem:[%s1268_s1 + $0xf8] sm:$0xff]   ;;  %v983_v35 = vld [vmem:[%s1269_s0 + $0x8] ss:$28 sps:$4 sm:$0xff]  }
   0xc   :  { %839 = vmatprep.subr.bf16.mxu0 %v959_v12  ;;  %v974_v27 = vld [vmem:[%s1268_s1 + $0xb0] sm:$0xff]   ;;  %v978_v31 = vld [vmem:[%s1269_s0] ss:$28 sps:$4 sm:$0xff]   ;;  %v985_v36 = vld [vmem:[%s1269_s0 + $0xc] ss:$28 sps:$4 sm:$0xff]  }
   0xd   :  { %866 = vmatpush3.bf16.msra.mxu1 %v958_v11  ;;  %v981_v33 = vld [vmem:[%s1268_s1 + $0xb8] sm:$0xff]   ;;  %v986_v37 = vld [vmem:[%s1268_s1 + $0x100] sm:$0xff]   ;;  %639 = vmatprep.mubr.bf16.mxu1 %v985_v36  ;;  %v987_v38 = vld [vmem:[%s1268_s1 + $0x148] sm:$0xff]  }
   0xe   :  { %867 = vmatprep.subr.bf16.mxu1 %v961_v14  ;;  %v988_v39 = vld [vmem:[%s1268_s1 + $0x180] sm:$0xff]   ;;  %v989_v40 = vld [vmem:[%s1268_s1 + $0x108] sm:$0xff]   ;;  %v990_v41 = vld [vmem:[%s1268_s1 + $0x150] sm:$0xff]  }
   0xf   :  { %840 = vmatpush3.bf16.msra.mxu0 %v960_v13  ;;  %v991_v42 = vld [vmem:[%s1268_s1 + $0x188] sm:$0xff]   ;;  %v992_v43 = vld [vmem:[%s1268_s1 + $0x110] sm:$0xff]   ;;  %v993_v44 = vld [vmem:[%s1268_s1 + $0x158] sm:$0xff]  }
  0x10   :  { %841 = vmatprep.subr.bf16.mxu0 %v963_v16  ;;  %v994_v45 = vld [vmem:[%s1268_s1 + $0x190] sm:$0xff]   ;;  %v995_v46 = vld [vmem:[%s1268_s1 + $0x118] sm:$0xff]   ;;  %v996_v47 = vld [vmem:[%s1268_s1 + $0x160] sm:$0xff]  }
  0x11   :  { %868 = vmatpush3.bf16.msra.mxu1 %v962_v15  ;;  %v997_v48 = vld [vmem:[%s1268_s1 + $0x198] sm:$0xff]   ;;  %v998_v49 = vld [vmem:[%s1268_s1 + $0x120] sm:$0xff]   ;;  %v1001_v51 = vld [vmem:[%s1268_s1 + $0x168] sm:$0xff]  }
  0x12   :  { %869 = vmatprep.subr.bf16.mxu1 %v965_v18  ;;  %v999_v50 = vld [vmem:[%s1269_s0 + $0x3c] ss:$28 sps:$4 sm:$0xff]   ;;  %v1002_v52 = vld [vmem:[%s1268_s1 + $0x1a0] sm:$0xff]   ;;  %v1004_v54 = vld [vmem:[%s1268_s1 + $0x128] sm:$0xff]  }
  0x13   :  { %842 = vmatpush3.bf16.msra.mxu0 %v964_v17  ;;  %v1003_v53 = vld [vmem:[%s1269_s0 + $0x38] ss:$28 sps:$4 sm:$0xff]   ;;  %v1005_v55 = vld [vmem:[%s1269_s0 + $0x44] ss:$28 sps:$4 sm:$0xff]   ;;  %v1009_v58 = vld [vmem:[%s1268_s1 + $0x1a8] sm:$0xff]  }
  0x14   :  { %843 = vmatprep.subr.bf16.mxu0 %v967_v20  ;;  %v1007_v56 = vld [vmem:[%s1269_s0 + $0x40] ss:$28 sps:$4 sm:$0xff]   ;;  %v1008_v57 = vld [vmem:[%s1268_s1 + $0x170] sm:$0xff]   ;;  %v1020_v3 = vld [vmem:[%s1269_s0 + $0x4c] ss:$28 sps:$4 sm:$0xff]  }
  0x15   :  { %870 = vmatpush3.bf16.msra.mxu1 %v966_v19  ;;  %v1010_v59 = vld [vmem:[%s1268_s1 + $0x130] sm:$0xff]   ;;  %v1011_v60 = vld [vmem:[%s1268_s1 + $0x178] sm:$0xff]   ;;  %v1022_v5 = vld [vmem:[%s1269_s0 + $0x48] ss:$28 sps:$4 sm:$0xff]  }
  0x16   :  { %871 = vmatprep.subr.bf16.mxu1 %v969_v22  ;;  %v1012_v61 = vld [vmem:[%s1268_s1 + $0x1b0] sm:$0xff]   ;;  %v1013_v62 = vld [vmem:[%s1268_s1 + $0x138] sm:$0xff]   ;;  %v762_v7 = vld [vmem:[%s1270_s2] ss:$0 sm:$0xff] }
  0x17   :  { %844 = vmatpush3.bf16.msra.mxu0 %v968_v21  ;;  %v1016_v63 = vld [vmem:[%s1269_s0 + $0x14] ss:$28 sps:$4 sm:$0xff]   ;;  %v1017_v0 = vld [vmem:[%s1268_s1 + $0x1b8] sm:$0xff]  }
  0x18   :  { %845 = vmatprep.subr.bf16.mxu0 %v971_v24  ;;  %v1018_v1 = vld [vmem:[%s1269_s0 + $0x18] ss:$28 sps:$4 sm:$0xff]   ;;  %v1014_v2 = vld [vmem:[%s1269_s0 + $0x10] ss:$28 sps:$4 sm:$0xff]  }
  0x19   :  { %872 = vmatpush3.bf16.msra.mxu1 %v970_v23  ;;  %v1019_v4 = vld [vmem:[%s1269_s0 + $0x50] ss:$28 sps:$4 sm:$0xff]  }
  0x1a   :  { %873 = vmatprep.subr.bf16.mxu1 %v973_v26 }
  0x1b   :  { %846 = vmatpush3.bf16.msra.mxu0 %v972_v25 }
  0x1c   :  { %847 = vmatprep.subr.bf16.mxu0 %v975_v28 }
  0x1d   :  { %874 = vmatpush3.bf16.msra.mxu1 %v974_v27 }
  0x1e   :  { %875 = vmatprep.subr.bf16.mxu1 %v977_v30 }
  0x1f   :  { %848 = vmatpush3.bf16.msra.mxu0 %v976_v29 }
  0x20   :  { %889 = vmatprep.subr.bf16.mxu0 %v982_v34 }
  0x21   :  { %876 = vmatpush3.bf16.msra.mxu1 %v981_v33 }
  0x22   :  { %591 = vmatmul.mubr.bf16.vlgmr.msra.gmra.mrb[0].mxu0 %v978_v31  ;;  %927 = vmatprep.subr.bf16.mxu1 %v988_v39 }
  0x23   :  { %890 = vmatpush3.bf16.msra.mxu0 %v986_v37  ;;  %598 = vmatprep.mubr.bf16.mxu0 %v999_v50 }
  0x24   :  { %640 = vmatmul.mubr.bf16.vlgmr.msra.gmra.mrb[0].mxu1 %v983_v35  ;;  %891 = vmatprep.subr.bf16.mxu0 %v987_v38 }
  0x25   :  { %928 = vmatpush3.bf16.msra.mxu1 %v988_v39  ;;  %647 = vmatprep.mubr.bf16.mxu1 %v1005_v55 }
  0x26   :  { %929 = vmatprep.subr.bf16.mxu1 %v991_v42 }
  0x27   :  { %892 = vmatpush3.bf16.msra.mxu0 %v989_v40 }
  0x28   :  { %893 = vmatprep.subr.bf16.mxu0 %v990_v41 }
  0x29   :  { %930 = vmatpush3.bf16.msra.mxu1 %v991_v42 }
  0x2a   :  { %931 = vmatprep.subr.bf16.mxu1 %v994_v45  ;;  %599 = vmatmul.mubr.bf16.gmra.mrb[4].mxu0 %v1003_v53 }
  0x2b   :  { %894 = vmatpush3.bf16.msra.mxu0 %v992_v43  ;;  %688 = vmatprep.mubr.bf16.mxu0 %v1016_v63 }
  0x2c   :  { %895 = vmatprep.subr.bf16.mxu0 %v993_v44  ;;  %648 = vmatmul.mubr.bf16.gmra.mrb[4].mxu1 %v1007_v56 }
  0x2d   :  { %932 = vmatpush3.bf16.msra.mxu1 %v994_v45  ;;  %943 = vmatprep.mubr.bf16.mxu1 %v1018_v1 }
  0x2e   :  { %933 = vmatprep.subr.bf16.mxu1 %v997_v48 }
  0x2f   :  { %896 = vmatpush3.bf16.msra.mxu0 %v995_v46 }
  0x30   :  { %897 = vmatprep.subr.bf16.mxu0 %v996_v47 }
  0x31   :  { %934 = vmatpush3.bf16.msra.mxu1 %v997_v48 }
  0x32   :  { %935 = vmatprep.subr.bf16.mxu1 %v1002_v52 }
  0x33   :  { %898 = vmatpush3.bf16.msra.mxu0 %v998_v49 }
  0x34   :  { %899 = vmatprep.subr.bf16.mxu0 %v1001_v51 }
  0x35   :  { %936 = vmatpush3.bf16.msra.mxu1 %v1002_v52 }
  0x36   :  { %937 = vmatprep.subr.bf16.mxu1 %v1009_v58 }
  0x37   :  { %900 = vmatpush3.bf16.msra.mxu0 %v1004_v54 }
  0x38   :  { %901 = vmatprep.subr.bf16.mxu0 %v1008_v57 }
  0x39   :  { %938 = vmatpush3.bf16.msra.mxu1 %v1009_v58 }
  0x3a   :  { %939 = vmatprep.subr.bf16.mxu1 %v1012_v61 }
  0x3b   :  { %902 = vmatpush3.bf16.msra.mxu0 %v1010_v59 }
  0x3c   :  { %903 = vmatprep.subr.bf16.mxu0 %v1011_v60 }
  0x3d   :  { %940 = vmatpush3.bf16.msra.mxu1 %v1012_v61 }
  0x3e   :  { %941 = vmatprep.subr.bf16.mxu1 %v1017_v0 }
  0x3f   :  { %904 = vmatpush3.bf16.msra.mxu0 %v1013_v62 }
  0x41   :  { %942 = vmatpush3.bf16.msra.mxu1 %v1017_v0 }
  0x42   :  { %689 = vmatmul.mubr.bf16.vlgmr.msra.gmra.mrb[8].mxu0 %v1014_v2 }
  0x43   :  { %696 = vmatprep.mubr.bf16.mxu0 %v1020_v3 }
  0x44   :  { %944 = vmatmul.mubr.bf16.vlgmr.msra.gmra.mrb[8].mxu1 %v1019_v4 }
  0x4a   :  { %697 = vmatmul.mubr.bf16.gmra.mrb[12].mxu0 %v1022_v5 }
  0xf5   :  { %v849_v6 = vpop.f32.mrb[0].mxu0 }
  0xf6   :  { %v850_v8 = vpop.f32.mrb[1].mxu0 }
  0xf7   :  { %v851_v9 = vadd.f32 %v850_v8, %v849_v6  ;;  %v852_v10 = vpop.f32.mrb[2].mxu0  ;;  %v877_v11 = vpop.f32.mrb[0].mxu1 }
  0xf8   :  { %v853_v12 = vpop.f32.mrb[3].mxu0  ;;  %v878_v15 = vpop.f32.mrb[1].mxu1 }
  0xf9   :  { %v593_v13 = vadd.f32 %v851_v9, %v762_v7  ;;  %v854_v14 = vadd.f32 %v853_v12, %v852_v10  ;;  %v879_v16 = vadd.f32 %v878_v15, %v877_v11  ;;  %v880_v17 = vpop.f32.mrb[2].mxu1 }
  0xfa   :  { %v881_v19 = vpop.f32.mrb[3].mxu1 }
  0xfb   :  { %v596_v18 = vadd.f32 %v854_v14, %v762_v7  ;;  %v642_v20 = vadd.f32 %v879_v16, %v593_v13  ;;  %v882_v21 = vadd.f32 %v881_v19, %v880_v17 }
  0xfd   :  { %v645_v22 = vadd.f32 %v882_v21, %v596_v18  ;;  %v855_v23 = vpop.f32.mrb[4].mxu0 }
  0xfe   :  { %v856_v24 = vpop.f32.mrb[5].mxu0 }
  0xff   :  { %v857_v25 = vadd.f32 %v856_v24, %v855_v23  ;;  %v858_v26 = vpop.f32.mrb[6].mxu0  ;;  %v883_v27 = vpop.f32.mrb[4].mxu1 }
 0x100   :  { %v859_v28 = vpop.f32.mrb[7].mxu0  ;;  %v884_v31 = vpop.f32.mrb[5].mxu1 }
 0x101   :  { %v601_v29 = vadd.f32 %v857_v25, %v762_v7  ;;  %v860_v30 = vadd.f32 %v859_v28, %v858_v26  ;;  %v885_v32 = vadd.f32 %v884_v31, %v883_v27  ;;  %v886_v33 = vpop.f32.mrb[6].mxu1 }
 0x102   :  { %v887_v35 = vpop.f32.mrb[7].mxu1 }
 0x103   :  { %v604_v34 = vadd.f32 %v860_v30, %v762_v7  ;;  %v650_v36 = vadd.f32 %v885_v32, %v601_v29  ;;  %v888_v37 = vadd.f32 %v887_v35, %v886_v33 }
 0x105   :  { %v653_v38 = vadd.f32 %v888_v37, %v604_v34 }
 0x115   :  { %v905_v39 = vpop.f32.mrb[8].mxu0 }
 0x116   :  { %v906_v40 = vpop.f32.mrb[9].mxu0 }
 0x117   :  { %v907_v41 = vadd.f32 %v906_v40, %v905_v39  ;;  %v908_v42 = vpop.f32.mrb[10].mxu0  ;;  %v945_v44 = vpop.f32.mrb[8].mxu1 }
 0x118   :  { %v909_v43 = vpop.f32.mrb[11].mxu0  ;;  %v739_v47 = vpop.f32.mrb[9].mxu1 }
 0x119   :  { %v910_v45 = vadd.f32 %v909_v43, %v908_v42  ;;  %v691_v46 = vadd.f32 %v907_v41, %v642_v20  ;;  %v946_v48 = vpop.f32.mrb[10].mxu1 }
 0x11a   :  { %v742_v51 = vpop.f32.mrb[11].mxu1 }
 0x11b   :  { %v740_v49 = vadd.f32 %v739_v47, %v691_v46  ;;  %v694_v50 = vadd.f32 %v910_v45, %v645_v22 }
 0x11d   :  { %754 = vst [vmem:[%s1271_s3] sm:$0xff] %v740_v49  ;;  %v743_v52 = vadd.f32 %v742_v51, %v694_v50  ;;  %v911_v53 = vpop.f32.mrb[12].mxu0 }
 0x11e   :  { %v912_v54 = vpop.f32.mrb[13].mxu0 }
 0x11f   :  { %755 = vst [vmem:[%s1271_s3 + $0x8] sm:$0xff] %v743_v52  ;;  %v913_v55 = vadd.f32 %v912_v54, %v911_v53  ;;  %v914_v56 = vpop.f32.mrb[14].mxu0 }
 0x120   :  { %v915_v57 = vpop.f32.mrb[15].mxu0 }
 0x121   :  { %v699_v58 = vadd.f32 %v913_v55, %v650_v36  ;;  %v916_v59 = vadd.f32 %v915_v57, %v914_v56 }
 0x123   :  { %v748_v60 = vadd.f32 %v945_v44, %v699_v58  ;;  %v702_v61 = vadd.f32 %v916_v59, %v653_v38 }
 0x125   :  { %756 = vst [vmem:[%s1271_s3 + $0x10] sm:$0xff] %v748_v60  ;;  %v751_v62 = vadd.f32 %v946_v48, %v702_v61 }
 0x127   :  { %757 = vst [vmem:[%s1271_s3 + $0x18] sm:$0xff] %v751_v62 }

// kernel: dispnet_bi_forward.83
= control target key start
LH: loop header
LB: loop body
LE: loop exit
PB: predicated region body
PF: predicated region fallthrough
CT: control target
= control target key end

     0   :  { %s749_s1 = inlined_call_operand.vmem [shape: bf16[256,128], index: 1, kind: input, shape index: {}]   ;;  %s750_s0 = inlined_call_operand.vmem [shape: bf16[128,256], index: 0, kind: input, shape index: {}]   ;;  %s751_s2 = inlined_call_operand.vmem [shape: f32[1,128], index: 2, kind: input, shape index: {}]   ;;  %s752_s3 = inlined_call_operand.vmem [shape: f32[128,128], index: 3, kind: output, shape index: {}]  }
   0x1   :  { %v524_v0 = vld [vmem:[%s749_s1 + $0x40] sm:$0xff]   ;;  %v526_v2 = vld [vmem:[%s749_s1 + $0x48] sm:$0xff]   ;;  %v528_v4 = vld [vmem:[%s749_s1 + $0x50] sm:$0xff]  }
   0x2   :  { %v525_v1 = vld [vmem:[%s749_s1] sm:$0xff]   ;;  %444 = vmatprep.subr.bf16.mxu0 %v524_v0  ;;  %508 = vmatprep.subr.bf16.mxu1 %v524_v0  ;;  %v527_v3 = vld [vmem:[%s749_s1 + $0x8] sm:$0xff]   ;;  %v529_v5 = vld [vmem:[%s749_s1 + $0x10] sm:$0xff]  }
   0x3   :  { %445 = vmatpush3.bf16.msra.mxu0 %v525_v1  ;;  %516 = vmatpush3.bf16.msra.mxu1 %v525_v1  ;;  %v530_v6 = vld [vmem:[%s749_s1 + $0x58] sm:$0xff]   ;;  %v532_v8 = vld [vmem:[%s749_s1 + $0x60] sm:$0xff]   ;;  %v534_v10 = vld [vmem:[%s749_s1 + $0x68] sm:$0xff]  }
   0x4   :  { %446 = vmatprep.subr.bf16.mxu0 %v526_v2  ;;  %509 = vmatprep.subr.bf16.mxu1 %v526_v2  ;;  %v531_v7 = vld [vmem:[%s749_s1 + $0x18] sm:$0xff]   ;;  %v533_v9 = vld [vmem:[%s749_s1 + $0x20] sm:$0xff]   ;;  %v535_v13 = vld [vmem:[%s749_s1 + $0x28] sm:$0xff]  }
   0x5   :  { %v542_v11 = vld [vmem:[%s750_s0 + $0x4] ss:$8 sps:$4 sm:$0xff]   ;;  %v536_v14 = vld [vmem:[%s749_s1 + $0x70] sm:$0xff]   ;;  %v538_v16 = vld [vmem:[%s749_s1 + $0x78] sm:$0xff]  }
   0x6   :  { %v545_v12 = vld [vmem:[%s750_s0 + $0x44] ss:$8 sps:$4 sm:$0xff]   ;;  %278 = vmatprep.mubr.bf16.mxu0 %v542_v11  ;;  %v537_v15 = vld [vmem:[%s749_s1 + $0x30] sm:$0xff]   ;;  %v539_v17 = vld [vmem:[%s749_s1 + $0x38] sm:$0xff]  }
   0x7   :  { %447 = vmatpush3.bf16.msra.mxu0 %v527_v3  ;;  %517 = vmatpush3.bf16.msra.mxu1 %v527_v3  ;;  %v540_v18 = vld [vmem:[%s750_s0] ss:$8 sps:$4 sm:$0xff]   ;;  %v546_v20 = vld [vmem:[%s750_s0 + $0x14] ss:$8 sps:$4 sm:$0xff]   ;;  %v550_v22 = vld [vmem:[%s750_s0 + $0x10] ss:$8 sps:$4 sm:$0xff]  }
   0x8   :  { %448 = vmatprep.subr.bf16.mxu0 %v528_v4  ;;  %510 = vmatprep.subr.bf16.mxu1 %v528_v4  ;;  %v543_v19 = vld [vmem:[%s750_s0 + $0x40] ss:$8 sps:$4 sm:$0xff]   ;;  %v548_v21 = vld [vmem:[%s750_s0 + $0x54] ss:$8 sps:$4 sm:$0xff]   ;;  %v551_v23 = vld [vmem:[%s750_s0 + $0x50] ss:$8 sps:$4 sm:$0xff]  }
   0x9   :  { %310 = vmatprep.mubr.bf16.mxu1 %v545_v12  ;;  %v552_v24 = vld [vmem:[%s750_s0 + $0x24] ss:$8 sps:$4 sm:$0xff]   ;;  %v556_v26 = vld [vmem:[%s750_s0 + $0x20] ss:$8 sps:$4 sm:$0xff]   ;;  %v558_v28 = vld [vmem:[%s750_s0 + $0x34] ss:$8 sps:$4 sm:$0xff]  }
   0xa   :  { %v554_v25 = vld [vmem:[%s750_s0 + $0x64] ss:$8 sps:$4 sm:$0xff]   ;;  %v557_v27 = vld [vmem:[%s750_s0 + $0x60] ss:$8 sps:$4 sm:$0xff]   ;;  %v560_v29 = vld [vmem:[%s750_s0 + $0x74] ss:$8 sps:$4 sm:$0xff]  }
   0xb   :  { %449 = vmatpush3.bf16.msra.mxu0 %v529_v5  ;;  %518 = vmatpush3.bf16.msra.mxu1 %v529_v5  ;;  %v562_v30 = vld [vmem:[%s750_s0 + $0x30] ss:$8 sps:$4 sm:$0xff]   ;;  %v683_v34 = vld [vmem:[%s751_s2] ss:$0 sm:$0xff] }
   0xc   :  { %450 = vmatprep.subr.bf16.mxu0 %v530_v6  ;;  %511 = vmatprep.subr.bf16.mxu1 %v530_v6  ;;  %v563_v31 = vld [vmem:[%s750_s0 + $0x70] ss:$8 sps:$4 sm:$0xff]  }
   0xf   :  { %451 = vmatpush3.bf16.msra.mxu0 %v531_v7  ;;  %519 = vmatpush3.bf16.msra.mxu1 %v531_v7 }
  0x10   :  { %452 = vmatprep.subr.bf16.mxu0 %v532_v8  ;;  %512 = vmatprep.subr.bf16.mxu1 %v532_v8 }
  0x13   :  { %453 = vmatpush3.bf16.msra.mxu0 %v533_v9  ;;  %520 = vmatpush3.bf16.msra.mxu1 %v533_v9 }
  0x14   :  { %454 = vmatprep.subr.bf16.mxu0 %v534_v10  ;;  %513 = vmatprep.subr.bf16.mxu1 %v534_v10 }
  0x17   :  { %455 = vmatpush3.bf16.msra.mxu0 %v535_v13  ;;  %521 = vmatpush3.bf16.msra.mxu1 %v535_v13 }
  0x18   :  { %456 = vmatprep.subr.bf16.mxu0 %v536_v14  ;;  %514 = vmatprep.subr.bf16.mxu1 %v536_v14 }
  0x1b   :  { %457 = vmatpush3.bf16.msra.mxu0 %v537_v15  ;;  %522 = vmatpush3.bf16.msra.mxu1 %v537_v15 }
  0x1c   :  { %458 = vmatprep.subr.bf16.mxu0 %v538_v16  ;;  %515 = vmatprep.subr.bf16.mxu1 %v538_v16 }
  0x1f   :  { %459 = vmatpush3.bf16.msra.mxu0 %v539_v17  ;;  %523 = vmatpush3.bf16.msra.mxu1 %v539_v17 }
  0x22   :  { %279 = vmatmul.mubr.bf16.vlgmr.msra.gmra.mrb[0].mxu0 %v540_v18  ;;  %311 = vmatmul.mubr.bf16.vlgmr.msra.gmra.mrb[0].mxu1 %v543_v19 }
  0x23   :  { %286 = vmatprep.mubr.bf16.mxu0 %v546_v20  ;;  %318 = vmatprep.mubr.bf16.mxu1 %v548_v21 }
  0x2a   :  { %287 = vmatmul.mubr.bf16.gmra.mrb[4].mxu0 %v550_v22  ;;  %319 = vmatmul.mubr.bf16.gmra.mrb[4].mxu1 %v551_v23 }
  0x2b   :  { %294 = vmatprep.mubr.bf16.mxu0 %v552_v24  ;;  %326 = vmatprep.mubr.bf16.mxu1 %v554_v25 }
  0x32   :  { %295 = vmatmul.mubr.bf16.gmra.mrb[8].mxu0 %v556_v26  ;;  %327 = vmatmul.mubr.bf16.gmra.mrb[8].mxu1 %v557_v27 }
  0x33   :  { %302 = vmatprep.mubr.bf16.mxu0 %v558_v28  ;;  %334 = vmatprep.mubr.bf16.mxu1 %v560_v29 }
  0x3a   :  { %303 = vmatmul.mubr.bf16.gmra.mrb[12].mxu0 %v562_v30  ;;  %335 = vmatmul.mubr.bf16.gmra.mrb[12].mxu1 %v563_v31 }
  0xf5   :  { %v460_v32 = vpop.f32.mrb[0].mxu0  ;;  %v484_v33 = vpop.f32.mrb[0].mxu1 }
  0xf6   :  { %v461_v35 = vpop.f32.mrb[1].mxu0  ;;  %v485_v36 = vpop.f32.mrb[1].mxu1 }
  0xf7   :  { %v462_v37 = vadd.f32 %v461_v35, %v460_v32  ;;  %v486_v38 = vadd.f32 %v485_v36, %v484_v33  ;;  %v463_v39 = vpop.f32.mrb[2].mxu0  ;;  %v487_v40 = vpop.f32.mrb[2].mxu1 }
  0xf8   :  { %v464_v41 = vpop.f32.mrb[3].mxu0  ;;  %v488_v42 = vpop.f32.mrb[3].mxu1 }
  0xf9   :  { %v281_v43 = vadd.f32 %v462_v37, %v683_v34  ;;  %v313_v44 = vadd.f32 %v486_v38, %v683_v34  ;;  %v465_v45 = vadd.f32 %v464_v41, %v463_v39  ;;  %v489_v46 = vadd.f32 %v488_v42, %v487_v40 }
  0xfb   :  { %vm343_vm0 = vcmp.ge.f32.partialorder %v281_v43, 0.0  ;;  %v359_v47 = vmul.f32 0.1, %v281_v43  ;;  %vm351_vm1 = vcmp.ge.f32.partialorder %v313_v44, 0.0  ;;  %v367_v48 = vmul.f32 0.1, %v313_v44 }
  0xfc   :  { %v284_v49 = vadd.f32 %v465_v45, %v683_v34  ;;  %v316_v50 = vadd.f32 %v489_v46, %v683_v34 }
  0xfd   :  { %v375_v51 = vsel %vm343_vm0, %v281_v43, %v359_v47  ;;  %v383_v52 = vsel %vm351_vm1, %v313_v44, %v367_v48  ;;  %v466_v53 = vpop.f32.mrb[4].mxu0  ;;  %v490_v54 = vpop.f32.mrb[4].mxu1 }
  0xfe   :  { %391 = vst [vmem:[%s752_s3] sm:$0xff] %v375_v51  ;;  %399 = vst [vmem:[%s752_s3 + $0x40] sm:$0xff] %v383_v52  ;;  %vm344_vm2 = vcmp.ge.f32.partialorder %v284_v49, 0.0  ;;  %v360_v55 = vmul.f32 0.1, %v284_v49  ;;  %vm352_vm3 = vcmp.ge.f32.partialorder %v316_v50, 0.0  ;;  %v467_v57 = vpop.f32.mrb[5].mxu0 }
  0xff   :  { %v368_v56 = vmul.f32 0.1, %v316_v50  ;;  %v491_v58 = vpop.f32.mrb[5].mxu1  ;;  %v468_v61 = vadd.f32 %v467_v57, %v466_v53  ;;  %v469_v63 = vpop.f32.mrb[6].mxu0 }
 0x100   :  { %v376_v59 = vsel %vm344_vm2, %v284_v49, %v360_v55  ;;  %v492_v62 = vadd.f32 %v491_v58, %v490_v54  ;;  %v493_v0 = vpop.f32.mrb[6].mxu1  ;;  %v470_v1 = vpop.f32.mrb[7].mxu0 }
 0x101   :  { %v384_v60 = vsel %vm352_vm3, %v316_v50, %v368_v56  ;;  %392 = vst [vmem:[%s752_s3 + $0x8] sm:$0xff] %v376_v59  ;;  %v494_v2 = vpop.f32.mrb[7].mxu1  ;;  %v289_v3 = vadd.f32 %v468_v61, %v683_v34  ;;  %v471_v5 = vadd.f32 %v470_v1, %v469_v63 }
 0x102   :  { %400 = vst [vmem:[%s752_s3 + $0x48] sm:$0xff] %v384_v60  ;;  %v321_v4 = vadd.f32 %v492_v62, %v683_v34  ;;  %v495_v6 = vadd.f32 %v494_v2, %v493_v0 }
 0x103   :  { %vm345_vm4 = vcmp.ge.f32.partialorder %v289_v3, 0.0  ;;  %v361_v7 = vmul.f32 0.1, %v289_v3  ;;  %v292_v9 = vadd.f32 %v471_v5, %v683_v34 }
 0x104   :  { %vm353_vm5 = vcmp.ge.f32.partialorder %v321_v4, 0.0  ;;  %v369_v8 = vmul.f32 0.1, %v321_v4  ;;  %v324_v10 = vadd.f32 %v495_v6, %v683_v34 }
 0x105   :  { %v472_v11 = vpop.f32.mrb[8].mxu0  ;;  %v496_v12 = vpop.f32.mrb[8].mxu1  ;;  %v377_v13 = vsel %vm345_vm4, %v289_v3, %v361_v7  ;;  %vm346_vm6 = vcmp.ge.f32.partialorder %v292_v9, 0.0  ;;  %v362_v17 = vmul.f32 0.1, %v292_v9 }
 0x106   :  { %v385_v14 = vsel %vm353_vm5, %v321_v4, %v369_v8  ;;  %v473_v15 = vpop.f32.mrb[9].mxu0  ;;  %v497_v16 = vpop.f32.mrb[9].mxu1  ;;  %393 = vst [vmem:[%s752_s3 + $0x10] sm:$0xff] %v377_v13  ;;  %vm354_vm7 = vcmp.ge.f32.partialorder %v324_v10, 0.0  ;;  %v370_v18 = vmul.f32 0.1, %v324_v10 }
 0x107   :  { %401 = vst [vmem:[%s752_s3 + $0x50] sm:$0xff] %v385_v14  ;;  %v474_v19 = vadd.f32 %v473_v15, %v472_v11  ;;  %v498_v20 = vadd.f32 %v497_v16, %v496_v12  ;;  %v475_v21 = vpop.f32.mrb[10].mxu0  ;;  %v499_v22 = vpop.f32.mrb[10].mxu1  ;;  %v378_v23 = vsel %vm346_vm6, %v292_v9, %v362_v17 }
 0x108   :  { %v386_v24 = vsel %vm354_vm7, %v324_v10, %v370_v18  ;;  %v476_v25 = vpop.f32.mrb[11].mxu0  ;;  %v500_v26 = vpop.f32.mrb[11].mxu1  ;;  %394 = vst [vmem:[%s752_s3 + $0x18] sm:$0xff] %v378_v23 }
 0x109   :  { %402 = vst [vmem:[%s752_s3 + $0x58] sm:$0xff] %v386_v24  ;;  %v297_v27 = vadd.f32 %v474_v19, %v683_v34  ;;  %v329_v28 = vadd.f32 %v498_v20, %v683_v34  ;;  %v477_v29 = vadd.f32 %v476_v25, %v475_v21  ;;  %v501_v30 = vadd.f32 %v500_v26, %v499_v22 }
 0x10b   :  { %vm347_vm8 = vcmp.ge.f32.partialorder %v297_v27, 0.0  ;;  %v363_v31 = vmul.f32 0.1, %v297_v27  ;;  %vm355_vm9 = vcmp.ge.f32.partialorder %v329_v28, 0.0  ;;  %v371_v32 = vmul.f32 0.1, %v329_v28 }
 0x10c   :  { %v300_v33 = vadd.f32 %v477_v29, %v683_v34  ;;  %v332_v35 = vadd.f32 %v501_v30, %v683_v34 }
 0x10d   :  { %v478_v36 = vpop.f32.mrb[12].mxu0  ;;  %v502_v37 = vpop.f32.mrb[12].mxu1  ;;  %v379_v38 = vsel %vm347_vm8, %v297_v27, %v363_v31  ;;  %v387_v39 = vsel %vm355_vm9, %v329_v28, %v371_v32 }
 0x10e   :  { %v479_v40 = vpop.f32.mrb[13].mxu0  ;;  %v503_v41 = vpop.f32.mrb[13].mxu1  ;;  %395 = vst [vmem:[%s752_s3 + $0x20] sm:$0xff] %v379_v38  ;;  %403 = vst [vmem:[%s752_s3 + $0x60] sm:$0xff] %v387_v39  ;;  %vm348_vm10 = vcmp.ge.f32.partialorder %v300_v33, 0.0  ;;  %vm356_vm11 = vcmp.ge.f32.partialorder %v332_v35, 0.0 }
 0x10f   :  { %v364_v42 = vmul.f32 0.1, %v300_v33  ;;  %v372_v43 = vmul.f32 0.1, %v332_v35  ;;  %v480_v44 = vadd.f32 %v479_v40, %v478_v36  ;;  %v504_v45 = vadd.f32 %v503_v41, %v502_v37  ;;  %v481_v46 = vpop.f32.mrb[14].mxu0  ;;  %v505_v47 = vpop.f32.mrb[14].mxu1 }
 0x110   :  { %v482_v50 = vpop.f32.mrb[15].mxu0  ;;  %v506_v51 = vpop.f32.mrb[15].mxu1 }
 0x111   :  { %v380_v48 = vsel %vm348_vm10, %v300_v33, %v364_v42  ;;  %v388_v49 = vsel %vm356_vm11, %v332_v35, %v372_v43  ;;  %v305_v52 = vadd.f32 %v480_v44, %v683_v34  ;;  %v337_v53 = vadd.f32 %v504_v45, %v683_v34 }
 0x112   :  { %396 = vst [vmem:[%s752_s3 + $0x28] sm:$0xff] %v380_v48  ;;  %404 = vst [vmem:[%s752_s3 + $0x68] sm:$0xff] %v388_v49  ;;  %v483_v54 = vadd.f32 %v482_v50, %v481_v46  ;;  %v507_v55 = vadd.f32 %v506_v51, %v505_v47 }
 0x113   :  { %vm349_vm12 = vcmp.ge.f32.partialorder %v305_v52, 0.0  ;;  %v365_v56 = vmul.f32 0.1, %v305_v52  ;;  %vm357_vm13 = vcmp.ge.f32.partialorder %v337_v53, 0.0  ;;  %v373_v57 = vmul.f32 0.1, %v337_v53 }
 0x114   :  { %v308_v58 = vadd.f32 %v483_v54, %v683_v34  ;;  %v340_v59 = vadd.f32 %v507_v55, %v683_v34 }
 0x115   :  { %v381_v60 = vsel %vm349_vm12, %v305_v52, %v365_v56  ;;  %v389_v61 = vsel %vm357_vm13, %v337_v53, %v373_v57 }
 0x116   :  { %397 = vst [vmem:[%s752_s3 + $0x30] sm:$0xff] %v381_v60  ;;  %405 = vst [vmem:[%s752_s3 + $0x70] sm:$0xff] %v389_v61  ;;  %vm350_vm14 = vcmp.ge.f32.partialorder %v308_v58, 0.0  ;;  %v366_v62 = vmul.f32 0.1, %v308_v58  ;;  %vm358_vm15 = vcmp.ge.f32.partialorder %v340_v59, 0.0 }
 0x117   :  { %v374_v63 = vmul.f32 0.1, %v340_v59 }
 0x118   :  { %v382_v0 = vsel %vm350_vm14, %v308_v58, %v366_v62 }
 0x119   :  { %v390_v1 = vsel %vm358_vm15, %v340_v59, %v374_v63  ;;  %398 = vst [vmem:[%s752_s3 + $0x38] sm:$0xff] %v382_v0 }
 0x11a   :  { %406 = vst [vmem:[%s752_s3 + $0x78] sm:$0xff] %v390_v1 }

// kernel: dispnet_bi_forward.82
= control target key start
LH: loop header
LB: loop body
LE: loop exit
PB: predicated region body
PF: predicated region fallthrough
CT: control target
= control target key end

     0   :  { %s1238_s1 = inlined_call_operand.vmem [shape: bf16[512,128], index: 1, kind: input, shape index: {}]   ;;  %s1239_s0 = inlined_call_operand.vmem [shape: bf16[128,512], index: 0, kind: input, shape index: {}]   ;;  %s1240_s2 = inlined_call_operand.vmem [shape: f32[1,128], index: 2, kind: input, shape index: {}]   ;;  %s1241_s3 = inlined_call_operand.vmem [shape: f32[128,128], index: 3, kind: output, shape index: {}]  }
   0x1   :  { %v877_v0 = vld [vmem:[%s1238_s1 + $0x40] sm:$0xff]   ;;  %v881_v4 = vld [vmem:[%s1238_s1 + $0x48] sm:$0xff]   ;;  %v885_v8 = vld [vmem:[%s1238_s1 + $0x50] sm:$0xff]  }
   0x2   :  { %v878_v1 = vld [vmem:[%s1238_s1 + $0xc0] sm:$0xff]   ;;  %749 = vmatprep.subr.bf16.mxu0 %v877_v0  ;;  %v882_v5 = vld [vmem:[%s1238_s1 + $0xc8] sm:$0xff]   ;;  %v886_v9 = vld [vmem:[%s1238_s1 + $0xd0] sm:$0xff]  }
   0x3   :  { %v879_v2 = vld [vmem:[%s1238_s1] sm:$0xff]   ;;  %813 = vmatprep.subr.bf16.mxu1 %v878_v1  ;;  %v883_v6 = vld [vmem:[%s1238_s1 + $0x8] sm:$0xff]   ;;  %v887_v10 = vld [vmem:[%s1238_s1 + $0x10] sm:$0xff]  }
   0x4   :  { %v880_v3 = vld [vmem:[%s1238_s1 + $0x80] sm:$0xff]   ;;  %750 = vmatpush3.bf16.msra.mxu0 %v879_v2  ;;  %v884_v7 = vld [vmem:[%s1238_s1 + $0x88] sm:$0xff]   ;;  %v888_v11 = vld [vmem:[%s1238_s1 + $0x90] sm:$0xff]  }
   0x5   :  { %814 = vmatpush3.bf16.msra.mxu1 %v880_v3  ;;  %751 = vmatprep.subr.bf16.mxu0 %v881_v4  ;;  %v889_v12 = vld [vmem:[%s1238_s1 + $0x58] sm:$0xff]   ;;  %v893_v16 = vld [vmem:[%s1238_s1 + $0x60] sm:$0xff]   ;;  %v897_v20 = vld [vmem:[%s1238_s1 + $0x68] sm:$0xff]  }
   0x6   :  { %815 = vmatprep.subr.bf16.mxu1 %v882_v5  ;;  %v890_v13 = vld [vmem:[%s1238_s1 + $0xd8] sm:$0xff]   ;;  %v894_v17 = vld [vmem:[%s1238_s1 + $0xe0] sm:$0xff]   ;;  %v898_v21 = vld [vmem:[%s1238_s1 + $0xe8] sm:$0xff]  }
   0x7   :  { %v891_v14 = vld [vmem:[%s1238_s1 + $0x18] sm:$0xff]   ;;  %v895_v18 = vld [vmem:[%s1238_s1 + $0x20] sm:$0xff]   ;;  %v899_v22 = vld [vmem:[%s1238_s1 + $0x28] sm:$0xff]  }
   0x8   :  { %752 = vmatpush3.bf16.msra.mxu0 %v883_v6  ;;  %v892_v15 = vld [vmem:[%s1238_s1 + $0x98] sm:$0xff]   ;;  %v896_v19 = vld [vmem:[%s1238_s1 + $0xa0] sm:$0xff]   ;;  %v900_v23 = vld [vmem:[%s1238_s1 + $0xa8] sm:$0xff]  }
   0x9   :  { %816 = vmatpush3.bf16.msra.mxu1 %v884_v7  ;;  %753 = vmatprep.subr.bf16.mxu0 %v885_v8  ;;  %v901_v24 = vld [vmem:[%s1238_s1 + $0x70] sm:$0xff]   ;;  %v905_v28 = vld [vmem:[%s1238_s1 + $0x78] sm:$0xff]   ;;  %v1172_v2 = vld [vmem:[%s1240_s2] ss:$0 sm:$0xff] }
   0xa   :  { %817 = vmatprep.subr.bf16.mxu1 %v886_v9  ;;  %v902_v25 = vld [vmem:[%s1238_s1 + $0xf0] sm:$0xff]   ;;  %v906_v29 = vld [vmem:[%s1238_s1 + $0xf8] sm:$0xff]  }
   0xb   :  { %v903_v26 = vld [vmem:[%s1238_s1 + $0x30] sm:$0xff]   ;;  %v907_v30 = vld [vmem:[%s1238_s1 + $0x38] sm:$0xff]  }
   0xc   :  { %754 = vmatpush3.bf16.msra.mxu0 %v887_v10  ;;  %v904_v27 = vld [vmem:[%s1238_s1 + $0xb0] sm:$0xff]   ;;  %v908_v31 = vld [vmem:[%s1238_s1 + $0xb8] sm:$0xff]  }
   0xd   :  { %818 = vmatpush3.bf16.msra.mxu1 %v888_v11  ;;  %755 = vmatprep.subr.bf16.mxu0 %v889_v12  ;;  %v909_v32 = vld [vmem:[%s1239_s0] ss:$16 sps:$4 sm:$0xff]   ;;  %v911_v33 = vld [vmem:[%s1239_s0 + $0x4] ss:$16 sps:$4 sm:$0xff]   ;;  %v912_v34 = vld [vmem:[%s1239_s0 + $0x8] ss:$16 sps:$4 sm:$0xff]  }
   0xe   :  { %819 = vmatprep.subr.bf16.mxu1 %v890_v13  ;;  %v914_v35 = vld [vmem:[%s1239_s0 + $0xc] ss:$16 sps:$4 sm:$0xff]   ;;  %502 = vmatprep.mubr.bf16.mxu0 %v911_v33  ;;  %v915_v36 = vld [vmem:[%s1239_s0 + $0x24] ss:$16 sps:$4 sm:$0xff]   ;;  %v919_v38 = vld [vmem:[%s1239_s0 + $0x20] ss:$16 sps:$4 sm:$0xff]  }
   0xf   :  { %599 = vmatprep.mubr.bf16.mxu1 %v914_v35  ;;  %v917_v37 = vld [vmem:[%s1239_s0 + $0x2c] ss:$16 sps:$4 sm:$0xff]   ;;  %v920_v39 = vld [vmem:[%s1239_s0 + $0x28] ss:$16 sps:$4 sm:$0xff]   ;;  %v921_v40 = vld [vmem:[%s1239_s0 + $0x44] ss:$16 sps:$4 sm:$0xff]  }
  0x10   :  { %756 = vmatpush3.bf16.msra.mxu0 %v891_v14  ;;  %v923_v41 = vld [vmem:[%s1239_s0 + $0x4c] ss:$16 sps:$4 sm:$0xff]   ;;  %v925_v42 = vld [vmem:[%s1239_s0 + $0x40] ss:$16 sps:$4 sm:$0xff]   ;;  %v926_v43 = vld [vmem:[%s1239_s0 + $0x48] ss:$16 sps:$4 sm:$0xff]  }
  0x11   :  { %820 = vmatpush3.bf16.msra.mxu1 %v892_v15  ;;  %757 = vmatprep.subr.bf16.mxu0 %v893_v16  ;;  %v927_v44 = vld [vmem:[%s1239_s0 + $0x64] ss:$16 sps:$4 sm:$0xff]   ;;  %v929_v45 = vld [vmem:[%s1239_s0 + $0x6c] ss:$16 sps:$4 sm:$0xff]   ;;  %v931_v46 = vld [vmem:[%s1239_s0 + $0x60] ss:$16 sps:$4 sm:$0xff]  }
  0x12   :  { %821 = vmatprep.subr.bf16.mxu1 %v894_v17  ;;  %v932_v47 = vld [vmem:[%s1239_s0 + $0x68] ss:$16 sps:$4 sm:$0xff]   ;;  %v933_v48 = vld [vmem:[%s1239_s0 + $0x84] ss:$16 sps:$4 sm:$0xff]   ;;  %v935_v49 = vld [vmem:[%s1239_s0 + $0x8c] ss:$16 sps:$4 sm:$0xff]  }
  0x13   :  { %v937_v50 = vld [vmem:[%s1239_s0 + $0x80] ss:$16 sps:$4 sm:$0xff]   ;;  %v938_v51 = vld [vmem:[%s1239_s0 + $0x88] ss:$16 sps:$4 sm:$0xff]   ;;  %v939_v52 = vld [vmem:[%s1239_s0 + $0xa4] ss:$16 sps:$4 sm:$0xff]  }
  0x14   :  { %758 = vmatpush3.bf16.msra.mxu0 %v895_v18  ;;  %v941_v53 = vld [vmem:[%s1239_s0 + $0xac] ss:$16 sps:$4 sm:$0xff]   ;;  %v943_v54 = vld [vmem:[%s1239_s0 + $0xa0] ss:$16 sps:$4 sm:$0xff]   ;;  %v944_v55 = vld [vmem:[%s1239_s0 + $0xa8] ss:$16 sps:$4 sm:$0xff]  }
  0x15   :  { %822 = vmatpush3.bf16.msra.mxu1 %v896_v19  ;;  %759 = vmatprep.subr.bf16.mxu0 %v897_v20  ;;  %v945_v56 = vld [vmem:[%s1239_s0 + $0xc4] ss:$16 sps:$4 sm:$0xff]   ;;  %v947_v57 = vld [vmem:[%s1239_s0 + $0xcc] ss:$16 sps:$4 sm:$0xff]   ;;  %v949_v58 = vld [vmem:[%s1239_s0 + $0xc0] ss:$16 sps:$4 sm:$0xff]  }
  0x16   :  { %823 = vmatprep.subr.bf16.mxu1 %v898_v21  ;;  %v950_v59 = vld [vmem:[%s1239_s0 + $0xc8] ss:$16 sps:$4 sm:$0xff]   ;;  %v951_v60 = vld [vmem:[%s1239_s0 + $0xe4] ss:$16 sps:$4 sm:$0xff]   ;;  %v953_v61 = vld [vmem:[%s1239_s0 + $0xec] ss:$16 sps:$4 sm:$0xff]  }
  0x17   :  { %v955_v62 = vld [vmem:[%s1239_s0 + $0xe0] ss:$16 sps:$4 sm:$0xff]   ;;  %v956_v63 = vld [vmem:[%s1239_s0 + $0xe8] ss:$16 sps:$4 sm:$0xff]  }
  0x18   :  { %760 = vmatpush3.bf16.msra.mxu0 %v899_v22 }
  0x19   :  { %824 = vmatpush3.bf16.msra.mxu1 %v900_v23  ;;  %761 = vmatprep.subr.bf16.mxu0 %v901_v24 }
  0x1a   :  { %825 = vmatprep.subr.bf16.mxu1 %v902_v25 }
  0x1c   :  { %762 = vmatpush3.bf16.msra.mxu0 %v903_v26 }
  0x1d   :  { %826 = vmatpush3.bf16.msra.mxu1 %v904_v27  ;;  %763 = vmatprep.subr.bf16.mxu0 %v905_v28 }
  0x1e   :  { %827 = vmatprep.subr.bf16.mxu1 %v906_v29 }
  0x20   :  { %764 = vmatpush3.bf16.msra.mxu0 %v907_v30 }
  0x21   :  { %828 = vmatpush3.bf16.msra.mxu1 %v908_v31 }
  0x23   :  { %503 = vmatmul.mubr.bf16.vlgmr.msra.gmra.mrb[0].mxu0 %v909_v32 }
  0x24   :  { %600 = vmatmul.mubr.bf16.vlgmr.msra.gmra.mrb[0].mxu1 %v912_v34  ;;  %510 = vmatprep.mubr.bf16.mxu0 %v915_v36 }
  0x25   :  { %607 = vmatprep.mubr.bf16.mxu1 %v917_v37 }
  0x2b   :  { %511 = vmatmul.mubr.bf16.gmra.mrb[4].mxu0 %v919_v38 }
  0x2c   :  { %608 = vmatmul.mubr.bf16.gmra.mrb[4].mxu1 %v920_v39  ;;  %518 = vmatprep.mubr.bf16.mxu0 %v921_v40 }
  0x2d   :  { %615 = vmatprep.mubr.bf16.mxu1 %v923_v41 }
  0x33   :  { %519 = vmatmul.mubr.bf16.gmra.mrb[8].mxu0 %v925_v42 }
  0x34   :  { %616 = vmatmul.mubr.bf16.gmra.mrb[8].mxu1 %v926_v43  ;;  %526 = vmatprep.mubr.bf16.mxu0 %v927_v44 }
  0x35   :  { %623 = vmatprep.mubr.bf16.mxu1 %v929_v45 }
  0x3b   :  { %527 = vmatmul.mubr.bf16.gmra.mrb[12].mxu0 %v931_v46 }
  0x3c   :  { %624 = vmatmul.mubr.bf16.gmra.mrb[12].mxu1 %v932_v47  ;;  %534 = vmatprep.mubr.bf16.mxu0 %v933_v48 }
  0x3d   :  { %631 = vmatprep.mubr.bf16.mxu1 %v935_v49 }
  0x43   :  { %535 = vmatmul.mubr.bf16.gmra.mrb[16].mxu0 %v937_v50 }
  0x44   :  { %632 = vmatmul.mubr.bf16.gmra.mrb[16].mxu1 %v938_v51  ;;  %542 = vmatprep.mubr.bf16.mxu0 %v939_v52 }
  0x45   :  { %639 = vmatprep.mubr.bf16.mxu1 %v941_v53 }
  0x4b   :  { %543 = vmatmul.mubr.bf16.gmra.mrb[20].mxu0 %v943_v54 }
  0x4c   :  { %640 = vmatmul.mubr.bf16.gmra.mrb[20].mxu1 %v944_v55  ;;  %550 = vmatprep.mubr.bf16.mxu0 %v945_v56 }
  0x4d   :  { %647 = vmatprep.mubr.bf16.mxu1 %v947_v57 }
  0x53   :  { %551 = vmatmul.mubr.bf16.gmra.mrb[24].mxu0 %v949_v58 }
  0x54   :  { %648 = vmatmul.mubr.bf16.gmra.mrb[24].mxu1 %v950_v59  ;;  %558 = vmatprep.mubr.bf16.mxu0 %v951_v60 }
  0x55   :  { %655 = vmatprep.mubr.bf16.mxu1 %v953_v61 }
  0x5b   :  { %559 = vmatmul.mubr.bf16.gmra.mrb[28].mxu0 %v955_v62 }
  0x5c   :  { %656 = vmatmul.mubr.bf16.gmra.mrb[28].mxu1 %v956_v63 }
  0xf6   :  { %v765_v0 = vpop.f32.mrb[0].mxu0 }
  0xf7   :  { %v829_v1 = vpop.f32.mrb[0].mxu1  ;;  %v766_v3 = vpop.f32.mrb[1].mxu0 }
  0xf8   :  { %v767_v4 = vadd.f32 %v766_v3, %v765_v0  ;;  %v830_v5 = vpop.f32.mrb[1].mxu1  ;;  %v768_v6 = vpop.f32.mrb[2].mxu0 }
  0xf9   :  { %v831_v7 = vadd.f32 %v830_v5, %v829_v1  ;;  %v832_v8 = vpop.f32.mrb[2].mxu1  ;;  %v769_v9 = vpop.f32.mrb[3].mxu0 }
  0xfa   :  { %v505_v10 = vadd.f32 %v767_v4, %v1172_v2  ;;  %v770_v11 = vadd.f32 %v769_v9, %v768_v6  ;;  %v833_v12 = vpop.f32.mrb[3].mxu1 }
  0xfb   :  { %v834_v13 = vadd.f32 %v833_v12, %v832_v8 }
  0xfc   :  { %v602_v14 = vadd.f32 %v831_v7, %v505_v10  ;;  %v508_v15 = vadd.f32 %v770_v11, %v1172_v2 }
  0xfe   :  { %664 = vst [vmem:[%s1241_s3] sm:$0xff] %v602_v14  ;;  %v605_v16 = vadd.f32 %v834_v13, %v508_v15  ;;  %v771_v17 = vpop.f32.mrb[4].mxu0 }
  0xff   :  { %v835_v18 = vpop.f32.mrb[4].mxu1  ;;  %v772_v19 = vpop.f32.mrb[5].mxu0 }
 0x100   :  { %665 = vst [vmem:[%s1241_s3 + $0x8] sm:$0xff] %v605_v16  ;;  %v773_v20 = vadd.f32 %v772_v19, %v771_v17  ;;  %v836_v21 = vpop.f32.mrb[5].mxu1  ;;  %v774_v22 = vpop.f32.mrb[6].mxu0 }
 0x101   :  { %v837_v23 = vadd.f32 %v836_v21, %v835_v18  ;;  %v838_v24 = vpop.f32.mrb[6].mxu1  ;;  %v775_v25 = vpop.f32.mrb[7].mxu0 }
 0x102   :  { %v513_v26 = vadd.f32 %v773_v20, %v1172_v2  ;;  %v776_v27 = vadd.f32 %v775_v25, %v774_v22  ;;  %v839_v28 = vpop.f32.mrb[7].mxu1 }
 0x103   :  { %v840_v29 = vadd.f32 %v839_v28, %v838_v24 }
 0x104   :  { %v610_v30 = vadd.f32 %v837_v23, %v513_v26  ;;  %v516_v31 = vadd.f32 %v776_v27, %v1172_v2 }
 0x106   :  { %666 = vst [vmem:[%s1241_s3 + $0x10] sm:$0xff] %v610_v30  ;;  %v613_v32 = vadd.f32 %v840_v29, %v516_v31  ;;  %v777_v33 = vpop.f32.mrb[8].mxu0 }
 0x107   :  { %v841_v34 = vpop.f32.mrb[8].mxu1  ;;  %v778_v35 = vpop.f32.mrb[9].mxu0 }
 0x108   :  { %667 = vst [vmem:[%s1241_s3 + $0x18] sm:$0xff] %v613_v32  ;;  %v779_v36 = vadd.f32 %v778_v35, %v777_v33  ;;  %v842_v37 = vpop.f32.mrb[9].mxu1  ;;  %v780_v38 = vpop.f32.mrb[10].mxu0 }
 0x109   :  { %v843_v39 = vadd.f32 %v842_v37, %v841_v34  ;;  %v844_v40 = vpop.f32.mrb[10].mxu1  ;;  %v781_v41 = vpop.f32.mrb[11].mxu0 }
 0x10a   :  { %v521_v42 = vadd.f32 %v779_v36, %v1172_v2  ;;  %v782_v43 = vadd.f32 %v781_v41, %v780_v38  ;;  %v845_v44 = vpop.f32.mrb[11].mxu1 }
 0x10b   :  { %v846_v45 = vadd.f32 %v845_v44, %v844_v40 }
 0x10c   :  { %v618_v46 = vadd.f32 %v843_v39, %v521_v42  ;;  %v524_v47 = vadd.f32 %v782_v43, %v1172_v2 }
 0x10e   :  { %668 = vst [vmem:[%s1241_s3 + $0x20] sm:$0xff] %v618_v46  ;;  %v621_v48 = vadd.f32 %v846_v45, %v524_v47  ;;  %v783_v49 = vpop.f32.mrb[12].mxu0 }
 0x10f   :  { %v847_v50 = vpop.f32.mrb[12].mxu1  ;;  %v784_v51 = vpop.f32.mrb[13].mxu0 }
 0x110   :  { %669 = vst [vmem:[%s1241_s3 + $0x28] sm:$0xff] %v621_v48  ;;  %v785_v52 = vadd.f32 %v784_v51, %v783_v49  ;;  %v848_v53 = vpop.f32.mrb[13].mxu1  ;;  %v786_v54 = vpop.f32.mrb[14].mxu0 }
 0x111   :  { %v849_v55 = vadd.f32 %v848_v53, %v847_v50  ;;  %v850_v56 = vpop.f32.mrb[14].mxu1  ;;  %v787_v57 = vpop.f32.mrb[15].mxu0 }
 0x112   :  { %v529_v58 = vadd.f32 %v785_v52, %v1172_v2  ;;  %v788_v59 = vadd.f32 %v787_v57, %v786_v54  ;;  %v851_v60 = vpop.f32.mrb[15].mxu1 }
 0x113   :  { %v852_v61 = vadd.f32 %v851_v60, %v850_v56 }
 0x114   :  { %v626_v62 = vadd.f32 %v849_v55, %v529_v58  ;;  %v532_v63 = vadd.f32 %v788_v59, %v1172_v2 }
 0x116   :  { %670 = vst [vmem:[%s1241_s3 + $0x30] sm:$0xff] %v626_v62  ;;  %v629_v0 = vadd.f32 %v852_v61, %v532_v63  ;;  %v789_v1 = vpop.f32.mrb[16].mxu0 }
 0x117   :  { %v853_v3 = vpop.f32.mrb[16].mxu1  ;;  %v790_v4 = vpop.f32.mrb[17].mxu0 }
 0x118   :  { %671 = vst [vmem:[%s1241_s3 + $0x38] sm:$0xff] %v629_v0  ;;  %v791_v5 = vadd.f32 %v790_v4, %v789_v1  ;;  %v854_v6 = vpop.f32.mrb[17].mxu1  ;;  %v792_v7 = vpop.f32.mrb[18].mxu0 }
 0x119   :  { %v855_v8 = vadd.f32 %v854_v6, %v853_v3  ;;  %v856_v9 = vpop.f32.mrb[18].mxu1  ;;  %v793_v10 = vpop.f32.mrb[19].mxu0 }
 0x11a   :  { %v537_v11 = vadd.f32 %v791_v5, %v1172_v2  ;;  %v794_v12 = vadd.f32 %v793_v10, %v792_v7  ;;  %v857_v13 = vpop.f32.mrb[19].mxu1 }
 0x11b   :  { %v858_v14 = vadd.f32 %v857_v13, %v856_v9 }
 0x11c   :  { %v634_v15 = vadd.f32 %v855_v8, %v537_v11  ;;  %v540_v16 = vadd.f32 %v794_v12, %v1172_v2 }
 0x11e   :  { %672 = vst [vmem:[%s1241_s3 + $0x40] sm:$0xff] %v634_v15  ;;  %v637_v17 = vadd.f32 %v858_v14, %v540_v16  ;;  %v795_v18 = vpop.f32.mrb[20].mxu0 }
 0x11f   :  { %v859_v19 = vpop.f32.mrb[20].mxu1  ;;  %v796_v20 = vpop.f32.mrb[21].mxu0 }
 0x120   :  { %673 = vst [vmem:[%s1241_s3 + $0x48] sm:$0xff] %v637_v17  ;;  %v797_v21 = vadd.f32 %v796_v20, %v795_v18  ;;  %v860_v22 = vpop.f32.mrb[21].mxu1  ;;  %v798_v23 = vpop.f32.mrb[22].mxu0 }
 0x121   :  { %v861_v24 = vadd.f32 %v860_v22, %v859_v19  ;;  %v862_v25 = vpop.f32.mrb[22].mxu1  ;;  %v799_v26 = vpop.f32.mrb[23].mxu0 }
 0x122   :  { %v545_v27 = vadd.f32 %v797_v21, %v1172_v2  ;;  %v800_v28 = vadd.f32 %v799_v26, %v798_v23  ;;  %v863_v29 = vpop.f32.mrb[23].mxu1 }
 0x123   :  { %v864_v30 = vadd.f32 %v863_v29, %v862_v25 }
 0x124   :  { %v642_v31 = vadd.f32 %v861_v24, %v545_v27  ;;  %v548_v32 = vadd.f32 %v800_v28, %v1172_v2 }
 0x126   :  { %674 = vst [vmem:[%s1241_s3 + $0x50] sm:$0xff] %v642_v31  ;;  %v645_v33 = vadd.f32 %v864_v30, %v548_v32  ;;  %v801_v34 = vpop.f32.mrb[24].mxu0 }
 0x127   :  { %v865_v35 = vpop.f32.mrb[24].mxu1  ;;  %v802_v36 = vpop.f32.mrb[25].mxu0 }
 0x128   :  { %675 = vst [vmem:[%s1241_s3 + $0x58] sm:$0xff] %v645_v33  ;;  %v803_v37 = vadd.f32 %v802_v36, %v801_v34  ;;  %v866_v38 = vpop.f32.mrb[25].mxu1  ;;  %v804_v39 = vpop.f32.mrb[26].mxu0 }
 0x129   :  { %v867_v40 = vadd.f32 %v866_v38, %v865_v35  ;;  %v868_v41 = vpop.f32.mrb[26].mxu1  ;;  %v805_v42 = vpop.f32.mrb[27].mxu0 }
 0x12a   :  { %v553_v43 = vadd.f32 %v803_v37, %v1172_v2  ;;  %v806_v44 = vadd.f32 %v805_v42, %v804_v39  ;;  %v869_v45 = vpop.f32.mrb[27].mxu1 }
 0x12b   :  { %v870_v46 = vadd.f32 %v869_v45, %v868_v41 }
 0x12c   :  { %v650_v47 = vadd.f32 %v867_v40, %v553_v43  ;;  %v556_v48 = vadd.f32 %v806_v44, %v1172_v2 }
 0x12e   :  { %676 = vst [vmem:[%s1241_s3 + $0x60] sm:$0xff] %v650_v47  ;;  %v653_v49 = vadd.f32 %v870_v46, %v556_v48  ;;  %v807_v50 = vpop.f32.mrb[28].mxu0 }
 0x12f   :  { %v871_v51 = vpop.f32.mrb[28].mxu1  ;;  %v808_v52 = vpop.f32.mrb[29].mxu0 }
 0x130   :  { %677 = vst [vmem:[%s1241_s3 + $0x68] sm:$0xff] %v653_v49  ;;  %v809_v53 = vadd.f32 %v808_v52, %v807_v50  ;;  %v872_v54 = vpop.f32.mrb[29].mxu1  ;;  %v810_v55 = vpop.f32.mrb[30].mxu0 }
 0x131   :  { %v873_v56 = vadd.f32 %v872_v54, %v871_v51  ;;  %v874_v57 = vpop.f32.mrb[30].mxu1  ;;  %v811_v58 = vpop.f32.mrb[31].mxu0 }
 0x132   :  { %v561_v59 = vadd.f32 %v809_v53, %v1172_v2  ;;  %v812_v60 = vadd.f32 %v811_v58, %v810_v55  ;;  %v875_v61 = vpop.f32.mrb[31].mxu1 }
 0x133   :  { %v876_v62 = vadd.f32 %v875_v61, %v874_v57 }
 0x134   :  { %v658_v63 = vadd.f32 %v873_v56, %v561_v59  ;;  %v564_v0 = vadd.f32 %v812_v60, %v1172_v2 }
 0x136   :  { %678 = vst [vmem:[%s1241_s3 + $0x70] sm:$0xff] %v658_v63  ;;  %v661_v1 = vadd.f32 %v876_v62, %v564_v0 }
 0x138   :  { %679 = vst [vmem:[%s1241_s3 + $0x78] sm:$0xff] %v661_v1 }

// kernel: dispnet_bi_forward.87
= control target key start
LH: loop header
LB: loop body
LE: loop exit
PB: predicated region body
PF: predicated region fallthrough
CT: control target
= control target key end

     0   :  { %v2118_v0 = vmov 0   ;;  %s2918_s1 = inlined_call_operand.vmem [shape: bf16[384,128], index: 1, kind: input, shape index: {}]   ;;  %s2919_s0 = inlined_call_operand.vmem [shape: bf16[512,384], index: 0, kind: input, shape index: {}]   ;;  %s2920_s2 = inlined_call_operand.vmem [shape: f32[1,128], index: 2, kind: input, shape index: {}]   ;;  %s2921_s3 = inlined_call_operand.vmem [shape: f32[512,128], index: 3, kind: output, shape index: {}]  }
   0x1   :  { %854 = vmatprep.subr.bf16.mxu0 %v2118_v0  ;;  %1933 = vmatprep.subr.bf16.mxu1 %v2118_v0  ;;  %v1966_v1 = vld [vmem:[%s2918_s1] sm:$0xff]   ;;  %v1967_v2 = vld [vmem:[%s2918_s1 + $0x8] sm:$0xff]   ;;  %v1968_v3 = vld [vmem:[%s2918_s1 + $0x10] sm:$0xff]  }
   0x2   :  { %855 = vmatpush1.bf16.msra.mxu0 %v1966_v1  ;;  %1949 = vmatpush1.bf16.msra.mxu1 %v1966_v1  ;;  %v1969_v4 = vld [vmem:[%s2918_s1 + $0x18] sm:$0xff]   ;;  %v1970_v5 = vld [vmem:[%s2918_s1 + $0x20] sm:$0xff]   ;;  %v1971_v7 = vld [vmem:[%s2918_s1 + $0x28] sm:$0xff]  }
   0x3   :  { %856 = vmatprep.subr.bf16.mxu0 %v2118_v0  ;;  %1934 = vmatprep.subr.bf16.mxu1 %v2118_v0  ;;  %v1984_v6 = vld [vmem:[%s2919_s0 + $0x4] ss:$12 sps:$4 sm:$0xff]   ;;  %v1973_v10 = vld [vmem:[%s2918_s1 + $0x38] sm:$0xff]   ;;  %v1975_v12 = vld [vmem:[%s2918_s1 + $0x48] sm:$0xff]  }
   0x4   :  { %v1987_v8 = vld [vmem:[%s2919_s0 + $0x244] ss:$12 sps:$4 sm:$0xff]   ;;  %886 = vmatprep.mubr.bf16.mxu0 %v1984_v6  ;;  %v1977_v14 = vld [vmem:[%s2918_s1 + $0x58] sm:$0xff]   ;;  %v1979_v16 = vld [vmem:[%s2918_s1 + $0x68] sm:$0xff]  }
   0x5   :  { %1078 = vmatprep.mubr.bf16.mxu1 %v1987_v8  ;;  %v1972_v9 = vld [vmem:[%s2918_s1 + $0x30] sm:$0xff]   ;;  %v1974_v11 = vld [vmem:[%s2918_s1 + $0x40] sm:$0xff]   ;;  %v1981_v18 = vld [vmem:[%s2918_s1 + $0x78] sm:$0xff]  }
   0x6   :  { %857 = vmatpush1.bf16.msra.mxu0 %v1967_v2  ;;  %1950 = vmatpush1.bf16.msra.mxu1 %v1967_v2  ;;  %v1976_v13 = vld [vmem:[%s2918_s1 + $0x50] sm:$0xff]   ;;  %v1978_v15 = vld [vmem:[%s2918_s1 + $0x60] sm:$0xff]   ;;  %v1989_v22 = vld [vmem:[%s2919_s0 + $0x1c] ss:$12 sps:$4 sm:$0xff]  }
   0x7   :  { %858 = vmatprep.subr.bf16.mxu0 %v2118_v0  ;;  %1935 = vmatprep.subr.bf16.mxu1 %v2118_v0  ;;  %v1980_v17 = vld [vmem:[%s2918_s1 + $0x70] sm:$0xff]   ;;  %v1988_v19 = vld [vmem:[%s2918_s1 + $0x80] sm:$0xff]   ;;  %v1991_v23 = vld [vmem:[%s2919_s0 + $0x25c] ss:$12 sps:$4 sm:$0xff]  }
   0x8   :  { %v1982_v20 = vld [vmem:[%s2919_s0] ss:$12 sps:$4 sm:$0xff]   ;;  %v2002_v25 = vld [vmem:[%s2918_s1 + $0x90] sm:$0xff]   ;;  %v1993_v26 = vld [vmem:[%s2919_s0 + $0x18] ss:$12 sps:$4 sm:$0xff]  }
   0x9   :  { %v1985_v21 = vld [vmem:[%s2919_s0 + $0x240] ss:$12 sps:$4 sm:$0xff]   ;;  %v1994_v27 = vld [vmem:[%s2919_s0 + $0x258] ss:$12 sps:$4 sm:$0xff]   ;;  %v2000_v31 = vld [vmem:[%s2919_s0 + $0x30] ss:$12 sps:$4 sm:$0xff]  }
   0xa   :  { %859 = vmatpush1.bf16.msra.mxu0 %v1968_v3  ;;  %1951 = vmatpush1.bf16.msra.mxu1 %v1968_v3  ;;  %v1995_v24 = vld [vmem:[%s2918_s1 + $0x88] sm:$0xff]   ;;  %v1996_v28 = vld [vmem:[%s2919_s0 + $0x34] ss:$12 sps:$4 sm:$0xff]   ;;  %v2009_v30 = vld [vmem:[%s2918_s1 + $0x98] sm:$0xff]  }
   0xb   :  { %860 = vmatprep.subr.bf16.mxu0 %v2118_v0  ;;  %1936 = vmatprep.subr.bf16.mxu1 %v2118_v0  ;;  %v1998_v29 = vld [vmem:[%s2919_s0 + $0x274] ss:$12 sps:$4 sm:$0xff]   ;;  %v2001_v33 = vld [vmem:[%s2919_s0 + $0x270] ss:$12 sps:$4 sm:$0xff]   ;;  %v2003_v34 = vld [vmem:[%s2919_s0 + $0x4c] ss:$12 sps:$4 sm:$0xff]  }
   0xc   :  { %v2016_v32 = vld [vmem:[%s2918_s1 + $0xa0] sm:$0xff]   ;;  %v2005_v35 = vld [vmem:[%s2919_s0 + $0x28c] ss:$12 sps:$4 sm:$0xff]   ;;  %v2007_v37 = vld [vmem:[%s2919_s0 + $0x48] ss:$12 sps:$4 sm:$0xff]  }
   0xd   :  { %v2023_v36 = vld [vmem:[%s2918_s1 + $0xa8] sm:$0xff]   ;;  %v2010_v39 = vld [vmem:[%s2919_s0 + $0x64] ss:$12 sps:$4 sm:$0xff]   ;;  %v2037_v42 = vld [vmem:[%s2918_s1 + $0xb8] sm:$0xff]  }
   0xe   :  { %861 = vmatpush1.bf16.msra.mxu0 %v1969_v4  ;;  %1952 = vmatpush1.bf16.msra.mxu1 %v1969_v4  ;;  %v2008_v38 = vld [vmem:[%s2919_s0 + $0x288] ss:$12 sps:$4 sm:$0xff]   ;;  %v2012_v40 = vld [vmem:[%s2919_s0 + $0x2a4] ss:$12 sps:$4 sm:$0xff]   ;;  %v2014_v43 = vld [vmem:[%s2919_s0 + $0x60] ss:$12 sps:$4 sm:$0xff]  }
   0xf   :  { %862 = vmatprep.subr.bf16.mxu0 %v2118_v0  ;;  %1937 = vmatprep.subr.bf16.mxu1 %v2118_v0  ;;  %v2030_v41 = vld [vmem:[%s2918_s1 + $0xb0] sm:$0xff]   ;;  %v2015_v44 = vld [vmem:[%s2919_s0 + $0x2a0] ss:$12 sps:$4 sm:$0xff]   ;;  %v2017_v45 = vld [vmem:[%s2919_s0 + $0x7c] ss:$12 sps:$4 sm:$0xff]  }
  0x10   :  { %v2019_v46 = vld [vmem:[%s2919_s0 + $0x2bc] ss:$12 sps:$4 sm:$0xff]   ;;  %v2021_v47 = vld [vmem:[%s2919_s0 + $0x78] ss:$12 sps:$4 sm:$0xff]   ;;  %v2024_v49 = vld [vmem:[%s2919_s0 + $0x94] ss:$12 sps:$4 sm:$0xff]  }
  0x11   :  { %v2022_v48 = vld [vmem:[%s2919_s0 + $0x2b8] ss:$12 sps:$4 sm:$0xff]   ;;  %v2026_v50 = vld [vmem:[%s2919_s0 + $0x2d4] ss:$12 sps:$4 sm:$0xff]   ;;  %v2028_v51 = vld [vmem:[%s2919_s0 + $0x90] ss:$12 sps:$4 sm:$0xff]  }
  0x12   :  { %863 = vmatpush1.bf16.msra.mxu0 %v1970_v5  ;;  %1953 = vmatpush1.bf16.msra.mxu1 %v1970_v5  ;;  %v2029_v52 = vld [vmem:[%s2919_s0 + $0x2d0] ss:$12 sps:$4 sm:$0xff]   ;;  %v2031_v53 = vld [vmem:[%s2919_s0 + $0xac] ss:$12 sps:$4 sm:$0xff]   ;;  %v2035_v55 = vld [vmem:[%s2919_s0 + $0xa8] ss:$12 sps:$4 sm:$0xff]  }
  0x13   :  { %864 = vmatprep.subr.bf16.mxu0 %v2118_v0  ;;  %1938 = vmatprep.subr.bf16.mxu1 %v2118_v0  ;;  %v2033_v54 = vld [vmem:[%s2919_s0 + $0x2ec] ss:$12 sps:$4 sm:$0xff]   ;;  %v2036_v56 = vld [vmem:[%s2919_s0 + $0x2e8] ss:$12 sps:$4 sm:$0xff]   ;;  %v2038_v57 = vld [vmem:[%s2919_s0 + $0xc4] ss:$12 sps:$4 sm:$0xff]  }
  0x14   :  { %v2040_v58 = vld [vmem:[%s2919_s0 + $0x8] ss:$12 sps:$4 sm:$0xff]   ;;  %v2041_v59 = vld [vmem:[%s2919_s0 + $0xc0] ss:$12 sps:$4 sm:$0xff]   ;;  %v2045_v62 = vld [vmem:[%s2919_s0 + $0x38] ss:$12 sps:$4 sm:$0xff]  }
  0x15   :  { %v2042_v60 = vld [vmem:[%s2919_s0 + $0x20] ss:$12 sps:$4 sm:$0xff]   ;;  %v2043_v61 = vld [vmem:[%s2919_s0 + $0xdc] ss:$12 sps:$4 sm:$0xff]   ;;  %v2046_v63 = vld [vmem:[%s2919_s0 + $0xd8] ss:$12 sps:$4 sm:$0xff]  }
  0x16   :  { %865 = vmatpush1.bf16.msra.mxu0 %v1971_v7  ;;  %1954 = vmatpush1.bf16.msra.mxu1 %v1971_v7  ;;  %v2048_v1 = vld [vmem:[%s2919_s0 + $0xf4] ss:$12 sps:$4 sm:$0xff]   ;;  %v2051_v3 = vld [vmem:[%s2919_s0 + $0xf0] ss:$12 sps:$4 sm:$0xff]   ;;  %v2053_v5 = vld [vmem:[%s2919_s0 + $0x10c] ss:$12 sps:$4 sm:$0xff]  }
  0x17   :  { %866 = vmatprep.subr.bf16.mxu0 %v2118_v0  ;;  %1939 = vmatprep.subr.bf16.mxu1 %v2118_v0  ;;  %v2050_v2 = vld [vmem:[%s2919_s0 + $0x68] ss:$12 sps:$4 sm:$0xff]   ;;  %v2052_v4 = vld [vmem:[%s2919_s0 + $0x80] ss:$12 sps:$4 sm:$0xff]   ;;  %v2055_v6 = vld [vmem:[%s2919_s0 + $0x98] ss:$12 sps:$4 sm:$0xff]  }
  0x18   :  { %v2056_v7 = vld [vmem:[%s2919_s0 + $0x108] ss:$12 sps:$4 sm:$0xff]   ;;  %v2057_v8 = vld [vmem:[%s2919_s0 + $0xb0] ss:$12 sps:$4 sm:$0xff]  }
  0x1a   :  { %867 = vmatpush1.bf16.msra.mxu0 %v1972_v9  ;;  %1955 = vmatpush1.bf16.msra.mxu1 %v1972_v9  ;;  %v2058_v9 = vld [vmem:[%s2919_s0 + $0x124] ss:$12 sps:$4 sm:$0xff]  }
  0x1b   :  { %868 = vmatprep.subr.bf16.mxu0 %v2118_v0  ;;  %1940 = vmatprep.subr.bf16.mxu1 %v2118_v0 }
  0x1e   :  { %869 = vmatpush1.bf16.msra.mxu0 %v1973_v10  ;;  %1956 = vmatpush1.bf16.msra.mxu1 %v1973_v10  ;;  %v2060_v10 = vld [vmem:[%s2919_s0 + $0xc8] ss:$12 sps:$4 sm:$0xff]  }
  0x1f   :  { %870 = vmatprep.subr.bf16.mxu0 %v2118_v0  ;;  %1941 = vmatprep.subr.bf16.mxu1 %v2118_v0 }
  0x22   :  { %871 = vmatpush1.bf16.msra.mxu0 %v1974_v11  ;;  %1957 = vmatpush1.bf16.msra.mxu1 %v1974_v11  ;;  %v2061_v11 = vld [vmem:[%s2919_s0 + $0x120] ss:$12 sps:$4 sm:$0xff]  }
  0x23   :  { %872 = vmatprep.subr.bf16.mxu0 %v2118_v0  ;;  %1942 = vmatprep.subr.bf16.mxu1 %v2118_v0 }
  0x26   :  { %873 = vmatpush1.bf16.msra.mxu0 %v1975_v12  ;;  %1958 = vmatpush1.bf16.msra.mxu1 %v1975_v12  ;;  %v2062_v12 = vld [vmem:[%s2919_s0 + $0xe0] ss:$12 sps:$4 sm:$0xff]  }
  0x27   :  { %874 = vmatprep.subr.bf16.mxu0 %v2118_v0  ;;  %1943 = vmatprep.subr.bf16.mxu1 %v2118_v0 }
  0x2a   :  { %875 = vmatpush1.bf16.msra.mxu0 %v1976_v13  ;;  %1959 = vmatpush1.bf16.msra.mxu1 %v1976_v13  ;;  %v2063_v13 = vld [vmem:[%s2919_s0 + $0x13c] ss:$12 sps:$4 sm:$0xff]  }
  0x2b   :  { %876 = vmatprep.subr.bf16.mxu0 %v2118_v0  ;;  %1944 = vmatprep.subr.bf16.mxu1 %v2118_v0 }
  0x2e   :  { %877 = vmatpush1.bf16.msra.mxu0 %v1977_v14  ;;  %1960 = vmatpush1.bf16.msra.mxu1 %v1977_v14  ;;  %v2065_v14 = vld [vmem:[%s2919_s0 + $0xf8] ss:$12 sps:$4 sm:$0xff]  }
  0x2f   :  { %878 = vmatprep.subr.bf16.mxu0 %v2118_v0  ;;  %1945 = vmatprep.subr.bf16.mxu1 %v2118_v0 }
  0x32   :  { %879 = vmatpush1.bf16.msra.mxu0 %v1978_v15  ;;  %1961 = vmatpush1.bf16.msra.mxu1 %v1978_v15  ;;  %v2066_v15 = vld [vmem:[%s2919_s0 + $0x138] ss:$12 sps:$4 sm:$0xff]  }
  0x33   :  { %880 = vmatprep.subr.bf16.mxu0 %v2118_v0  ;;  %1946 = vmatprep.subr.bf16.mxu1 %v2118_v0 }
  0x36   :  { %881 = vmatpush1.bf16.msra.mxu0 %v1979_v16  ;;  %1962 = vmatpush1.bf16.msra.mxu1 %v1979_v16  ;;  %v2067_v16 = vld [vmem:[%s2919_s0 + $0x110] ss:$12 sps:$4 sm:$0xff]  }
  0x37   :  { %882 = vmatprep.subr.bf16.mxu0 %v2118_v0  ;;  %1947 = vmatprep.subr.bf16.mxu1 %v2118_v0 }
  0x3a   :  { %883 = vmatpush1.bf16.msra.mxu0 %v1980_v17  ;;  %1963 = vmatpush1.bf16.msra.mxu1 %v1980_v17  ;;  %v2068_v17 = vld [vmem:[%s2919_s0 + $0x154] ss:$12 sps:$4 sm:$0xff]  }
  0x3b   :  { %884 = vmatprep.subr.bf16.mxu0 %v2118_v0  ;;  %1948 = vmatprep.subr.bf16.mxu1 %v2118_v0  ;;  %v2047_v0 = vld [vmem:[%s2919_s0 + $0x50] ss:$12 sps:$4 sm:$0xff]  }
  0x3e   :  { %885 = vmatpush1.bf16.msra.mxu0 %v1981_v18  ;;  %1964 = vmatpush1.bf16.msra.mxu1 %v1981_v18  ;;  %v2070_v18 = vld [vmem:[%s2919_s0 + $0x128] ss:$12 sps:$4 sm:$0xff]  }
  0x3f   :  { %1853 = vmatprep.subr.bf16.mxu1 %v1988_v19 }
  0x41   :  { %887 = vmatmul.mubr.bf16.vlgmr.msra.gmra.mrb[0].mxu0 %v1982_v20  ;;  %1079 = vmatmul.mubr.bf16.vlgmr.msra.gmra.mrb[0].mxu1 %v1985_v21  ;;  %v2072_v20 = vld [vmem:[%s2919_s0 + $0x140] ss:$12 sps:$4 sm:$0xff]  }
  0x42   :  { %1854 = vmatpush3.bf16.msra.mxu1 %v1988_v19  ;;  %894 = vmatprep.mubr.bf16.mxu0 %v1989_v22  ;;  %v2071_v19 = vld [vmem:[%s2919_s0 + $0x150] ss:$12 sps:$4 sm:$0xff]   ;;  %v2073_v21 = vld [vmem:[%s2919_s0 + $0x16c] ss:$12 sps:$4 sm:$0xff]  }
  0x43   :  { %1086 = vmatprep.mubr.bf16.mxu1 %v1991_v23  ;;  %1855 = vmatprep.subr.bf16.mxu1 %v1995_v24  ;;  %v2075_v22 = vld [vmem:[%s2919_s0 + $0x158] ss:$12 sps:$4 sm:$0xff]   ;;  %v2076_v23 = vld [vmem:[%s2919_s0 + $0x168] ss:$12 sps:$4 sm:$0xff]  }
  0x46   :  { %1856 = vmatpush3.bf16.msra.mxu1 %v1995_v24  ;;  %v2077_v24 = vld [vmem:[%s2919_s0 + $0x170] ss:$12 sps:$4 sm:$0xff]  }
  0x47   :  { %1857 = vmatprep.subr.bf16.mxu1 %v2002_v25 }
  0x49   :  { %895 = vmatmul.mubr.bf16.gmra.mrb[4].mxu0 %v1993_v26  ;;  %1087 = vmatmul.mubr.bf16.gmra.mrb[4].mxu1 %v1994_v27  ;;  %v2080_v26 = vld [vmem:[%s2919_s0 + $0x188] ss:$12 sps:$4 sm:$0xff]   ;;  %v2081_v27 = vld [vmem:[%s2919_s0 + $0x180] ss:$12 sps:$4 sm:$0xff]  }
  0x4a   :  { %902 = vmatprep.mubr.bf16.mxu0 %v1996_v28  ;;  %1094 = vmatprep.mubr.bf16.mxu1 %v1998_v29  ;;  %v2082_v28 = vld [vmem:[%s2919_s0 + $0x1a0] ss:$12 sps:$4 sm:$0xff]   ;;  %v2083_v29 = vld [vmem:[%s2919_s0 + $0x19c] ss:$12 sps:$4 sm:$0xff]  }
  0x4b   :  { %1858 = vmatpush3.bf16.msra.mxu1 %v2002_v25  ;;  %v2078_v25 = vld [vmem:[%s2919_s0 + $0x184] ss:$12 sps:$4 sm:$0xff]  }
  0x4c   :  { %1859 = vmatprep.subr.bf16.mxu1 %v2009_v30 }
  0x4f   :  { %1860 = vmatpush3.bf16.msra.mxu1 %v2009_v30  ;;  %v2085_v30 = vld [vmem:[%s2919_s0 + $0x1b8] ss:$12 sps:$4 sm:$0xff]  }
  0x50   :  { %1861 = vmatprep.subr.bf16.mxu1 %v2016_v32 }
  0x51   :  { %903 = vmatmul.mubr.bf16.gmra.mrb[8].mxu0 %v2000_v31  ;;  %1095 = vmatmul.mubr.bf16.gmra.mrb[8].mxu1 %v2001_v33  ;;  %v2086_v31 = vld [vmem:[%s2919_s0 + $0x198] ss:$12 sps:$4 sm:$0xff]   ;;  %v2088_v33 = vld [vmem:[%s2919_s0 + $0x1b4] ss:$12 sps:$4 sm:$0xff]  }
  0x52   :  { %910 = vmatprep.mubr.bf16.mxu0 %v2003_v34  ;;  %1102 = vmatprep.mubr.bf16.mxu1 %v2005_v35  ;;  %v2090_v34 = vld [vmem:[%s2919_s0 + $0x1e8] ss:$12 sps:$4 sm:$0xff]   ;;  %v2091_v35 = vld [vmem:[%s2919_s0 + $0x1b0] ss:$12 sps:$4 sm:$0xff]  }
  0x53   :  { %1862 = vmatpush3.bf16.msra.mxu1 %v2016_v32  ;;  %v2087_v32 = vld [vmem:[%s2919_s0 + $0x1d0] ss:$12 sps:$4 sm:$0xff]  }
  0x54   :  { %1863 = vmatprep.subr.bf16.mxu1 %v2023_v36 }
  0x57   :  { %1864 = vmatpush3.bf16.msra.mxu1 %v2023_v36  ;;  %v2092_v36 = vld [vmem:[%s2919_s0 + $0x200] ss:$12 sps:$4 sm:$0xff]  }
  0x58   :  { %1865 = vmatprep.subr.bf16.mxu1 %v2030_v41 }
  0x59   :  { %911 = vmatmul.mubr.bf16.gmra.mrb[12].mxu0 %v2007_v37  ;;  %1103 = vmatmul.mubr.bf16.gmra.mrb[12].mxu1 %v2008_v38  ;;  %v2093_v37 = vld [vmem:[%s2919_s0 + $0x1cc] ss:$12 sps:$4 sm:$0xff]  }
  0x5a   :  { %918 = vmatprep.mubr.bf16.mxu0 %v2010_v39  ;;  %1110 = vmatprep.mubr.bf16.mxu1 %v2012_v40  ;;  %v2095_v38 = vld [vmem:[%s2919_s0 + $0x218] ss:$12 sps:$4 sm:$0xff]   ;;  %v2096_v39 = vld [vmem:[%s2919_s0 + $0x1c8] ss:$12 sps:$4 sm:$0xff]   ;;  %v2097_v40 = vld [vmem:[%s2919_s0 + $0x230] ss:$12 sps:$4 sm:$0xff]  }
  0x5b   :  { %1866 = vmatpush3.bf16.msra.mxu1 %v2030_v41  ;;  %v2098_v41 = vld [vmem:[%s2919_s0 + $0x1e4] ss:$12 sps:$4 sm:$0xff]  }
  0x5c   :  { %1867 = vmatprep.subr.bf16.mxu1 %v2037_v42 }
  0x5f   :  { %1868 = vmatpush3.bf16.msra.mxu1 %v2037_v42  ;;  %v2100_v42 = vld [vmem:[%s2919_s0 + $0x248] ss:$12 sps:$4 sm:$0xff]  }
  0x61   :  { %919 = vmatmul.mubr.bf16.gmra.mrb[16].mxu0 %v2014_v43  ;;  %1111 = vmatmul.mubr.bf16.gmra.mrb[16].mxu1 %v2015_v44  ;;  %v2101_v43 = vld [vmem:[%s2919_s0 + $0x1e0] ss:$12 sps:$4 sm:$0xff]  }
  0x62   :  { %926 = vmatprep.mubr.bf16.mxu0 %v2017_v45  ;;  %1118 = vmatprep.mubr.bf16.mxu1 %v2019_v46  ;;  %v2102_v44 = vld [vmem:[%s2919_s0 + $0x260] ss:$12 sps:$4 sm:$0xff]   ;;  %v2103_v45 = vld [vmem:[%s2919_s0 + $0x1fc] ss:$12 sps:$4 sm:$0xff]   ;;  %v2105_v46 = vld [vmem:[%s2919_s0 + $0x278] ss:$12 sps:$4 sm:$0xff]  }
  0x69   :  { %927 = vmatmul.mubr.bf16.gmra.mrb[20].mxu0 %v2021_v47  ;;  %1119 = vmatmul.mubr.bf16.gmra.mrb[20].mxu1 %v2022_v48  ;;  %v2106_v47 = vld [vmem:[%s2919_s0 + $0x1f8] ss:$12 sps:$4 sm:$0xff]   ;;  %v2107_v48 = vld [vmem:[%s2919_s0 + $0x290] ss:$12 sps:$4 sm:$0xff]  }
  0x6a   :  { %934 = vmatprep.mubr.bf16.mxu0 %v2024_v49  ;;  %1126 = vmatprep.mubr.bf16.mxu1 %v2026_v50  ;;  %v2108_v49 = vld [vmem:[%s2919_s0 + $0x214] ss:$12 sps:$4 sm:$0xff]  }
  0x6b   :  { %v2110_v50 = vld [vmem:[%s2919_s0 + $0x2a8] ss:$12 sps:$4 sm:$0xff]  }
  0x71   :  { %935 = vmatmul.mubr.bf16.gmra.mrb[24].mxu0 %v2028_v51  ;;  %1127 = vmatmul.mubr.bf16.gmra.mrb[24].mxu1 %v2029_v52  ;;  %v2111_v51 = vld [vmem:[%s2919_s0 + $0x210] ss:$12 sps:$4 sm:$0xff]   ;;  %v2112_v52 = vld [vmem:[%s2919_s0 + $0x2c0] ss:$12 sps:$4 sm:$0xff]  }
  0x72   :  { %942 = vmatprep.mubr.bf16.mxu0 %v2031_v53  ;;  %1134 = vmatprep.mubr.bf16.mxu1 %v2033_v54  ;;  %v2113_v53 = vld [vmem:[%s2919_s0 + $0x22c] ss:$12 sps:$4 sm:$0xff]  }
  0x73   :  { %v2115_v54 = vld [vmem:[%s2919_s0 + $0x2d8] ss:$12 sps:$4 sm:$0xff]  }
  0x79   :  { %943 = vmatmul.mubr.bf16.gmra.mrb[28].mxu0 %v2035_v55  ;;  %1135 = vmatmul.mubr.bf16.gmra.mrb[28].mxu1 %v2036_v56  ;;  %v2116_v55 = vld [vmem:[%s2919_s0 + $0x228] ss:$12 sps:$4 sm:$0xff]   ;;  %v2117_v56 = vld [vmem:[%s2919_s0 + $0x2f0] ss:$12 sps:$4 sm:$0xff]  }
  0x7a   :  { %950 = vmatprep.mubr.bf16.mxu0 %v2038_v57  ;;  %1869 = vmatprep.mubr.bf16.mxu1 %v2040_v58 }
  0x81   :  { %951 = vmatmul.mubr.bf16.gmra.mrb[32].mxu0 %v2041_v59  ;;  %1870 = vmatmul.mubr.bf16.vlgmr.msra.gmra.mrb[32].mxu1 %v2042_v60 }
  0x82   :  { %958 = vmatprep.mubr.bf16.mxu0 %v2043_v61  ;;  %1873 = vmatprep.mubr.bf16.mxu1 %v2045_v62 }
  0x89   :  { %959 = vmatmul.mubr.bf16.gmra.mrb[36].mxu0 %v2046_v63  ;;  %1874 = vmatmul.mubr.bf16.gmra.mrb[36].mxu1 %v2047_v0 }
  0x8a   :  { %966 = vmatprep.mubr.bf16.mxu0 %v2048_v1  ;;  %1877 = vmatprep.mubr.bf16.mxu1 %v2050_v2 }
  0x91   :  { %967 = vmatmul.mubr.bf16.gmra.mrb[40].mxu0 %v2051_v3  ;;  %1878 = vmatmul.mubr.bf16.gmra.mrb[40].mxu1 %v2052_v4 }
  0x92   :  { %974 = vmatprep.mubr.bf16.mxu0 %v2053_v5  ;;  %1881 = vmatprep.mubr.bf16.mxu1 %v2055_v6 }
  0x99   :  { %975 = vmatmul.mubr.bf16.gmra.mrb[44].mxu0 %v2056_v7  ;;  %1882 = vmatmul.mubr.bf16.gmra.mrb[44].mxu1 %v2057_v8 }
  0x9a   :  { %982 = vmatprep.mubr.bf16.mxu0 %v2058_v9  ;;  %1885 = vmatprep.mubr.bf16.mxu1 %v2060_v10 }
  0xa1   :  { %983 = vmatmul.mubr.bf16.gmra.mrb[48].mxu0 %v2061_v11  ;;  %1886 = vmatmul.mubr.bf16.gmra.mrb[48].mxu1 %v2062_v12 }
  0xa2   :  { %990 = vmatprep.mubr.bf16.mxu0 %v2063_v13  ;;  %1889 = vmatprep.mubr.bf16.mxu1 %v2065_v14 }
  0xa9   :  { %991 = vmatmul.mubr.bf16.gmra.mrb[52].mxu0 %v2066_v15  ;;  %1890 = vmatmul.mubr.bf16.gmra.mrb[52].mxu1 %v2067_v16 }
  0xaa   :  { %998 = vmatprep.mubr.bf16.mxu0 %v2068_v17  ;;  %1893 = vmatprep.mubr.bf16.mxu1 %v2070_v18 }
  0xb1   :  { %999 = vmatmul.mubr.bf16.gmra.mrb[56].mxu0 %v2071_v19  ;;  %1894 = vmatmul.mubr.bf16.gmra.mrb[56].mxu1 %v2072_v20 }
  0xb2   :  { %1006 = vmatprep.mubr.bf16.mxu0 %v2073_v21  ;;  %1897 = vmatprep.mubr.bf16.mxu1 %v2075_v22 }
  0xb9   :  { %1007 = vmatmul.mubr.bf16.gmra.mrb[60].mxu0 %v2076_v23  ;;  %1898 = vmatmul.mubr.bf16.gmra.mrb[60].mxu1 %v2077_v24 }
  0xba   :  { %1014 = vmatprep.mubr.bf16.mxu0 %v2078_v25  ;;  %1901 = vmatprep.mubr.bf16.mxu1 %v2080_v26 }
  0xc1   :  { %1015 = vmatmul.mubr.bf16.gmra.mrb[64].mxu0 %v2081_v27  ;;  %1902 = vmatmul.mubr.bf16.gmra.mrb[64].mxu1 %v2082_v28 }
  0xc2   :  { %1022 = vmatprep.mubr.bf16.mxu0 %v2083_v29  ;;  %1905 = vmatprep.mubr.bf16.mxu1 %v2085_v30 }
  0xc9   :  { %1023 = vmatmul.mubr.bf16.gmra.mrb[68].mxu0 %v2086_v31  ;;  %1906 = vmatmul.mubr.bf16.gmra.mrb[68].mxu1 %v2087_v32 }
  0xca   :  { %1030 = vmatprep.mubr.bf16.mxu0 %v2088_v33  ;;  %1909 = vmatprep.mubr.bf16.mxu1 %v2090_v34 }
  0xd1   :  { %1031 = vmatmul.mubr.bf16.gmra.mrb[72].mxu0 %v2091_v35  ;;  %1910 = vmatmul.mubr.bf16.gmra.mrb[72].mxu1 %v2092_v36 }
  0xd2   :  { %1038 = vmatprep.mubr.bf16.mxu0 %v2093_v37  ;;  %1913 = vmatprep.mubr.bf16.mxu1 %v2095_v38 }
  0xd9   :  { %1039 = vmatmul.mubr.bf16.gmra.mrb[76].mxu0 %v2096_v39  ;;  %1914 = vmatmul.mubr.bf16.gmra.mrb[76].mxu1 %v2097_v40 }
  0xda   :  { %1046 = vmatprep.mubr.bf16.mxu0 %v2098_v41  ;;  %1917 = vmatprep.mubr.bf16.mxu1 %v2100_v42 }
  0xe1   :  { %1047 = vmatmul.mubr.bf16.gmra.mrb[80].mxu0 %v2101_v43  ;;  %1918 = vmatmul.mubr.bf16.gmra.mrb[80].mxu1 %v2102_v44 }
  0xe2   :  { %1054 = vmatprep.mubr.bf16.mxu0 %v2103_v45  ;;  %1921 = vmatprep.mubr.bf16.mxu1 %v2105_v46 }
  0xe9   :  { %1055 = vmatmul.mubr.bf16.gmra.mrb[84].mxu0 %v2106_v47  ;;  %1922 = vmatmul.mubr.bf16.gmra.mrb[84].mxu1 %v2107_v48 }
  0xea   :  { %1062 = vmatprep.mubr.bf16.mxu0 %v2108_v49  ;;  %1925 = vmatprep.mubr.bf16.mxu1 %v2110_v50 }
  0xf1   :  { %1063 = vmatmul.mubr.bf16.gmra.mrb[88].mxu0 %v2111_v51  ;;  %1926 = vmatmul.mubr.bf16.gmra.mrb[88].mxu1 %v2112_v52 }
  0xf2   :  { %1070 = vmatprep.mubr.bf16.mxu0 %v2113_v53  ;;  %1929 = vmatprep.mubr.bf16.mxu1 %v2115_v54 }
  0xf9   :  { %1071 = vmatmul.mubr.bf16.gmra.mrb[92].mxu0 %v2116_v55  ;;  %1930 = vmatmul.mubr.bf16.gmra.mrb[92].mxu1 %v2117_v56 }
 0x114   :  { %v2531_v57 = vpop.f32.mrb[0].mxu0  ;;  %v2533_v58 = vpop.f32.mrb[0].mxu1 }
 0x115   :  { %v890_v59 = vpop.f32.mrb[1].mxu0  ;;  %v1082_v60 = vpop.f32.mrb[1].mxu1 }
 0x116   :  { %v2535_v61 = vpop.f32.mrb[2].mxu0  ;;  %v2537_v62 = vpop.f32.mrb[2].mxu1  ;;  %v2594_v59 = vld [vmem:[%s2920_s2] ss:$0 sm:$0xff] }
 0x117   :  { %v893_v63 = vpop.f32.mrb[3].mxu0  ;;  %v1085_v0 = vpop.f32.mrb[3].mxu1 }
 0x118   :  { %v889_v63 = vadd.f32 %v2594_v59, %v2531_v57 }
 0x11c   :  { %v896_v1 = vpop.f32.mrb[4].mxu0  ;;  %v2539_v2 = vpop.f32.mrb[4].mxu1 }
 0x11d   :  { %v898_v3 = vpop.f32.mrb[5].mxu0  ;;  %v1090_v4 = vpop.f32.mrb[5].mxu1  ;;  %v897_v60 = vadd.f32 %v2594_v59, %v896_v1 }
 0x11e   :  { %v899_v5 = vpop.f32.mrb[6].mxu0  ;;  %v2541_v6 = vpop.f32.mrb[6].mxu1 }
 0x11f   :  { %v901_v7 = vpop.f32.mrb[7].mxu0  ;;  %v1093_v8 = vpop.f32.mrb[7].mxu1  ;;  %v900_v4 = vadd.f32 %v2594_v59, %v899_v5 }
 0x124   :  { %v2543_v9 = vpop.f32.mrb[8].mxu0  ;;  %v2545_v10 = vpop.f32.mrb[8].mxu1 }
 0x125   :  { %v906_v11 = vpop.f32.mrb[9].mxu0  ;;  %v1098_v12 = vpop.f32.mrb[9].mxu1 }
 0x126   :  { %v2547_v13 = vpop.f32.mrb[10].mxu0  ;;  %v2549_v14 = vpop.f32.mrb[10].mxu1  ;;  %v892_v12 = vadd.f32 %v2594_v59, %v2535_v61 }
 0x127   :  { %v909_v15 = vpop.f32.mrb[11].mxu0  ;;  %v1101_v16 = vpop.f32.mrb[11].mxu1 }
 0x12c   :  { %v2551_v17 = vpop.f32.mrb[12].mxu0  ;;  %v2553_v18 = vpop.f32.mrb[12].mxu1 }
 0x12d   :  { %v914_v19 = vpop.f32.mrb[13].mxu0  ;;  %v1106_v20 = vpop.f32.mrb[13].mxu1 }
 0x12e   :  { %v2555_v21 = vpop.f32.mrb[14].mxu0  ;;  %v2557_v22 = vpop.f32.mrb[14].mxu1 }
 0x12f   :  { %v917_v23 = vpop.f32.mrb[15].mxu0  ;;  %v1109_v24 = vpop.f32.mrb[15].mxu1 }
 0x134   :  { %v2559_v25 = vpop.f32.mrb[16].mxu0  ;;  %v2561_v26 = vpop.f32.mrb[16].mxu1 }
 0x135   :  { %v922_v27 = vpop.f32.mrb[17].mxu0  ;;  %v1114_v28 = vpop.f32.mrb[17].mxu1 }
 0x136   :  { %v2563_v29 = vpop.f32.mrb[18].mxu0  ;;  %v2565_v30 = vpop.f32.mrb[18].mxu1 }
 0x137   :  { %v925_v31 = vpop.f32.mrb[19].mxu0  ;;  %v1117_v32 = vpop.f32.mrb[19].mxu1 }
 0x138   :  { %v913_v32 = vadd.f32 %v2594_v59, %v2551_v17 }
 0x13c   :  { %v2567_v33 = vpop.f32.mrb[20].mxu0  ;;  %v2569_v34 = vpop.f32.mrb[20].mxu1 }
 0x13d   :  { %v930_v35 = vpop.f32.mrb[21].mxu0  ;;  %v1122_v36 = vpop.f32.mrb[21].mxu1 }
 0x13e   :  { %v2571_v37 = vpop.f32.mrb[22].mxu0  ;;  %v2573_v38 = vpop.f32.mrb[22].mxu1  ;;  %v905_v36 = vadd.f32 %v2594_v59, %v2543_v9  ;;  %v908_v9 = vadd.f32 %v2594_v59, %v2547_v13 }
 0x13f   :  { %v933_v39 = vpop.f32.mrb[23].mxu0  ;;  %v1125_v40 = vpop.f32.mrb[23].mxu1 }
 0x144   :  { %v2575_v41 = vpop.f32.mrb[24].mxu0  ;;  %v2577_v42 = vpop.f32.mrb[24].mxu1 }
 0x145   :  { %v938_v43 = vpop.f32.mrb[25].mxu0  ;;  %v1130_v44 = vpop.f32.mrb[25].mxu1 }
 0x146   :  { %v2579_v45 = vpop.f32.mrb[26].mxu0  ;;  %v2581_v46 = vpop.f32.mrb[26].mxu1  ;;  %v916_v44 = vadd.f32 %v2594_v59, %v2555_v21 }
 0x147   :  { %v941_v47 = vpop.f32.mrb[27].mxu0  ;;  %v1133_v48 = vpop.f32.mrb[27].mxu1 }
 0x14c   :  { %v2583_v49 = vpop.f32.mrb[28].mxu0  ;;  %v2585_v50 = vpop.f32.mrb[28].mxu1 }
 0x14d   :  { %v946_v51 = vpop.f32.mrb[29].mxu0  ;;  %v1138_v52 = vpop.f32.mrb[29].mxu1 }
 0x14e   :  { %v2587_v53 = vpop.f32.mrb[30].mxu0  ;;  %v2589_v54 = vpop.f32.mrb[30].mxu1 }
 0x14f   :  { %v949_v55 = vpop.f32.mrb[31].mxu0  ;;  %v1141_v56 = vpop.f32.mrb[31].mxu1 }
 0x154   :  { %v2599_v0 = vpop.f32.mrb[32].mxu0  ;;  %v1871_v3 = vpop.f32.mrb[32].mxu1 }
 0x155   :  { %v1186_v7 = vadd.f32 %v1871_v3, %v897_v60  ;;  %v954_v8 = vpop.f32.mrb[33].mxu0  ;;  %v1177_v11 = vpop.f32.mrb[33].mxu1 }
 0x156   :  { %v1178_v15 = vadd.f32 %v1177_v11, %v889_v63  ;;  %v2604_v16 = vpop.f32.mrb[34].mxu0  ;;  %v1872_v19 = vpop.f32.mrb[34].mxu1 }
 0x157   :  { %vm1434_vm0 = vcmp.ge.f32.partialorder %v1186_v7, 0.0  ;;  %v1498_v1 = vmul.f32 0.1, %v1186_v7  ;;  %v1189_v20 = vadd.f32 %v1872_v19, %v900_v4  ;;  %v957_v23 = vpop.f32.mrb[35].mxu0  ;;  %v1180_v57 = vpop.f32.mrb[35].mxu1  ;;  %v921_v19 = vadd.f32 %v2594_v59, %v2559_v25 }
 0x158   :  { %vm1432_vm1 = vcmp.ge.f32.partialorder %v1178_v15, 0.0  ;;  %v1496_v24 = vmul.f32 0.1, %v1178_v15  ;;  %v1181_v27 = vadd.f32 %v1180_v57, %v892_v12  ;;  %v929_v12 = vadd.f32 %v2594_v59, %v2567_v33 }
 0x159   :  { %v1562_v28 = vsel %vm1434_vm0, %v1186_v7, %v1498_v1  ;;  %vm1435_vm2 = vcmp.ge.f32.partialorder %v1189_v20, 0.0  ;;  %v1499_v5 = vmul.f32 0.1, %v1189_v20  ;;  %v932_v57 = vadd.f32 %v2594_v59, %v2571_v37 }
 0x15a   :  { %1626 = vst [vmem:[%s2921_s3 + $0x10] sm:$0xff] %v1562_v28  ;;  %v1560_v61 = vsel %vm1432_vm1, %v1178_v15, %v1496_v24  ;;  %vm1433_vm3 = vcmp.ge.f32.partialorder %v1181_v27, 0.0  ;;  %v1497_v31 = vmul.f32 0.1, %v1181_v27  ;;  %v924_v25 = vadd.f32 %v2594_v59, %v2563_v29 }
 0x15b   :  { %1624 = vst [vmem:[%s2921_s3] sm:$0xff] %v1560_v61  ;;  %v1563_v35 = vsel %vm1435_vm2, %v1189_v20, %v1499_v5 }
 0x15c   :  { %1627 = vst [vmem:[%s2921_s3 + $0x18] sm:$0xff] %v1563_v35  ;;  %v1561_v39 = vsel %vm1433_vm3, %v1181_v27, %v1497_v31  ;;  %v2619_v40 = vpop.f32.mrb[36].mxu0  ;;  %v1875_v43 = vpop.f32.mrb[36].mxu1 }
 0x15d   :  { %1625 = vst [vmem:[%s2921_s3 + $0x8] sm:$0xff] %v1561_v39  ;;  %v1202_v17 = vadd.f32 %v1875_v43, %v913_v32  ;;  %v962_v47 = vpop.f32.mrb[37].mxu0  ;;  %v1193_v48 = vpop.f32.mrb[37].mxu1 }
 0x15e   :  { %v1194_v51 = vadd.f32 %v1193_v48, %v905_v36  ;;  %v2628_v52 = vpop.f32.mrb[38].mxu0  ;;  %v1876_v55 = vpop.f32.mrb[38].mxu1  ;;  %v945_v47 = vadd.f32 %v2594_v59, %v2583_v49 }
 0x15f   :  { %vm1438_vm4 = vcmp.ge.f32.partialorder %v1202_v17, 0.0  ;;  %v1502_v56 = vmul.f32 0.1, %v1202_v17  ;;  %v1205_v60 = vadd.f32 %v1876_v55, %v916_v44  ;;  %v965_v63 = vpop.f32.mrb[39].mxu0  ;;  %v1196_v3 = vpop.f32.mrb[39].mxu1 }
 0x160   :  { %vm1436_vm5 = vcmp.ge.f32.partialorder %v1194_v51, 0.0  ;;  %v1500_v21 = vmul.f32 0.1, %v1194_v51  ;;  %v1197_v4 = vadd.f32 %v1196_v3, %v908_v9  ;;  %v937_v9 = vadd.f32 %v2594_v59, %v2575_v41 }
 0x161   :  { %v1566_v7 = vsel %vm1438_vm4, %v1202_v17, %v1502_v56  ;;  %vm1439_vm6 = vcmp.ge.f32.partialorder %v1205_v60, 0.0  ;;  %v1503_v8 = vmul.f32 0.1, %v1205_v60  ;;  %v940_v41 = vadd.f32 %v2594_v59, %v2579_v45 }
 0x162   :  { %1630 = vst [vmem:[%s2921_s3 + $0x30] sm:$0xff] %v1566_v7  ;;  %v1564_v13 = vsel %vm1436_vm5, %v1194_v51, %v1500_v21  ;;  %vm1437_vm7 = vcmp.ge.f32.partialorder %v1197_v4, 0.0  ;;  %v1501_v11 = vmul.f32 0.1, %v1197_v4 }
 0x163   :  { %1628 = vst [vmem:[%s2921_s3 + $0x20] sm:$0xff] %v1564_v13  ;;  %v1567_v15 = vsel %vm1439_vm6, %v1205_v60, %v1503_v8  ;;  %v948_v60 = vadd.f32 %v2594_v59, %v2587_v53 }
 0x164   :  { %1631 = vst [vmem:[%s2921_s3 + $0x38] sm:$0xff] %v1567_v15  ;;  %v1565_v1 = vsel %vm1437_vm7, %v1197_v4, %v1501_v11  ;;  %v2643_v20 = vpop.f32.mrb[40].mxu0  ;;  %v1879_v23 = vpop.f32.mrb[40].mxu1 }
 0x165   :  { %1629 = vst [vmem:[%s2921_s3 + $0x28] sm:$0xff] %v1565_v1  ;;  %v1218_v33 = vadd.f32 %v1879_v23, %v929_v12  ;;  %v970_v24 = vpop.f32.mrb[41].mxu0  ;;  %v1209_v27 = vpop.f32.mrb[41].mxu1 }
 0x166   :  { %v1210_v28 = vadd.f32 %v1209_v27, %v921_v19  ;;  %v2652_v5 = vpop.f32.mrb[42].mxu0  ;;  %v1880_v61 = vpop.f32.mrb[42].mxu1  ;;  %v953_v24 = vadd.f32 %v2594_v59, %v2599_v0  ;;  %v956_v0 = vadd.f32 %v2594_v59, %v2604_v16 }
 0x167   :  { %vm1442_vm8 = vcmp.ge.f32.partialorder %v1218_v33, 0.0  ;;  %v1506_v31 = vmul.f32 0.1, %v1218_v33  ;;  %v1221_v32 = vadd.f32 %v1880_v61, %v932_v57  ;;  %v973_v35 = vpop.f32.mrb[43].mxu0  ;;  %v1212_v36 = vpop.f32.mrb[43].mxu1  ;;  %v961_v57 = vadd.f32 %v2594_v59, %v2619_v40 }
 0x168   :  { %vm1440_vm9 = vcmp.ge.f32.partialorder %v1210_v28, 0.0  ;;  %v1504_v37 = vmul.f32 0.1, %v1210_v28  ;;  %v1213_v39 = vadd.f32 %v1212_v36, %v924_v25  ;;  %v964_v61 = vadd.f32 %v2594_v59, %v2628_v52 }
 0x169   :  { %v1570_v43 = vsel %vm1442_vm8, %v1218_v33, %v1506_v31  ;;  %vm1443_vm10 = vcmp.ge.f32.partialorder %v1221_v32, 0.0  ;;  %v1507_v44 = vmul.f32 0.1, %v1221_v32 }
 0x16a   :  { %1634 = vst [vmem:[%s2921_s3 + $0x50] sm:$0xff] %v1570_v43  ;;  %v1568_v29 = vsel %vm1440_vm9, %v1210_v28, %v1504_v37  ;;  %vm1441_vm11 = vcmp.ge.f32.partialorder %v1213_v39, 0.0  ;;  %v1505_v17 = vmul.f32 0.1, %v1213_v39 }
 0x16b   :  { %1632 = vst [vmem:[%s2921_s3 + $0x40] sm:$0xff] %v1568_v29  ;;  %v1571_v48 = vsel %vm1443_vm10, %v1221_v32, %v1507_v44 }
 0x16c   :  { %1635 = vst [vmem:[%s2921_s3 + $0x58] sm:$0xff] %v1571_v48  ;;  %v1569_v51 = vsel %vm1441_vm11, %v1213_v39, %v1505_v17  ;;  %v976_v55 = vpop.f32.mrb[44].mxu0  ;;  %v1883_v56 = vpop.f32.mrb[44].mxu1 }
 0x16d   :  { %1633 = vst [vmem:[%s2921_s3 + $0x48] sm:$0xff] %v1569_v51  ;;  %v1234_v49 = vadd.f32 %v1883_v56, %v945_v47  ;;  %v978_v63 = vpop.f32.mrb[45].mxu0  ;;  %v1225_v3 = vpop.f32.mrb[45].mxu1  ;;  %v977_v51 = vadd.f32 %v2594_v59, %v976_v55 }
 0x16e   :  { %v1226_v21 = vadd.f32 %v1225_v3, %v937_v9  ;;  %v979_v4 = vpop.f32.mrb[46].mxu0  ;;  %v1884_v7 = vpop.f32.mrb[46].mxu1 }
 0x16f   :  { %vm1446_vm12 = vcmp.ge.f32.partialorder %v1234_v49, 0.0  ;;  %v1510_v8 = vmul.f32 0.1, %v1234_v49  ;;  %v1237_v13 = vadd.f32 %v1884_v7, %v948_v60  ;;  %v981_v11 = vpop.f32.mrb[47].mxu0  ;;  %v1228_v12 = vpop.f32.mrb[47].mxu1  ;;  %v969_v60 = vadd.f32 %v2594_v59, %v2643_v20 }
 0x170   :  { %vm1444_vm13 = vcmp.ge.f32.partialorder %v1226_v21, 0.0  ;;  %v1508_v53 = vmul.f32 0.1, %v1226_v21  ;;  %v1229_v15 = vadd.f32 %v1228_v12, %v940_v41  ;;  %v980_v41 = vadd.f32 %v2594_v59, %v979_v4 }
 0x171   :  { %v1574_v19 = vsel %vm1446_vm12, %v1234_v49, %v1510_v8  ;;  %vm1447_vm14 = vcmp.ge.f32.partialorder %v1237_v13, 0.0  ;;  %v1511_v1 = vmul.f32 0.1, %v1237_v13  ;;  %v972_v8 = vadd.f32 %v2594_v59, %v2652_v5 }
 0x172   :  { %1638 = vst [vmem:[%s2921_s3 + $0x70] sm:$0xff] %v1574_v19  ;;  %v1572_v23 = vsel %vm1444_vm13, %v1226_v21, %v1508_v53  ;;  %vm1445_vm15 = vcmp.ge.f32.partialorder %v1229_v15, 0.0  ;;  %v1509_v45 = vmul.f32 0.1, %v1229_v15 }
 0x173   :  { %1636 = vst [vmem:[%s2921_s3 + $0x60] sm:$0xff] %v1572_v23  ;;  %v1575_v33 = vsel %vm1447_vm14, %v1237_v13, %v1511_v1 }
 0x174   :  { %1639 = vst [vmem:[%s2921_s3 + $0x78] sm:$0xff] %v1575_v33  ;;  %v1573_v27 = vsel %vm1445_vm15, %v1229_v15, %v1509_v45  ;;  %v984_v25 = vpop.f32.mrb[48].mxu0  ;;  %v1887_v28 = vpop.f32.mrb[48].mxu1 }
 0x175   :  { %1637 = vst [vmem:[%s2921_s3 + $0x68] sm:$0xff] %v1573_v27  ;;  %v1250_v40 = vadd.f32 %v1887_v28, %v961_v57  ;;  %v986_v31 = vpop.f32.mrb[49].mxu0  ;;  %v1241_v32 = vpop.f32.mrb[49].mxu1  ;;  %v985_v27 = vadd.f32 %v2594_v59, %v984_v25 }
 0x176   :  { %v1242_v35 = vadd.f32 %v1241_v32, %v953_v24  ;;  %v987_v36 = vpop.f32.mrb[50].mxu0  ;;  %v1888_v37 = vpop.f32.mrb[50].mxu1 }
 0x177   :  { %vm1450_vm0 = vcmp.ge.f32.partialorder %v1250_v40, 0.0  ;;  %v1514_v39 = vmul.f32 0.1, %v1250_v40  ;;  %v1253_v43 = vadd.f32 %v1888_v37, %v964_v61  ;;  %v989_v44 = vpop.f32.mrb[51].mxu0  ;;  %v1244_v29 = vpop.f32.mrb[51].mxu1  ;;  %v988_v37 = vadd.f32 %v2594_v59, %v987_v36 }
 0x178   :  { %vm1448_vm1 = vcmp.ge.f32.partialorder %v1242_v35, 0.0  ;;  %v1512_v52 = vmul.f32 0.1, %v1242_v35  ;;  %v1245_v17 = vadd.f32 %v1244_v29, %v956_v0 }
 0x179   :  { %v1578_v47 = vsel %vm1450_vm0, %v1250_v40, %v1514_v39  ;;  %vm1451_vm2 = vcmp.ge.f32.partialorder %v1253_v43, 0.0  ;;  %v1515_v48 = vmul.f32 0.1, %v1253_v43 }
 0x17a   :  { %1642 = vst [vmem:[%s2921_s3 + $0x90] sm:$0xff] %v1578_v47  ;;  %v1576_v9 = vsel %vm1448_vm1, %v1242_v35, %v1512_v52  ;;  %vm1449_vm3 = vcmp.ge.f32.partialorder %v1245_v17, 0.0  ;;  %v1513_v16 = vmul.f32 0.1, %v1245_v17 }
 0x17b   :  { %1640 = vst [vmem:[%s2921_s3 + $0x80] sm:$0xff] %v1576_v9  ;;  %v1579_v56 = vsel %vm1451_vm2, %v1253_v43, %v1515_v48 }
 0x17c   :  { %1643 = vst [vmem:[%s2921_s3 + $0x98] sm:$0xff] %v1579_v56  ;;  %v1577_v49 = vsel %vm1449_vm3, %v1245_v17, %v1513_v16  ;;  %v992_v63 = vpop.f32.mrb[52].mxu0  ;;  %v1891_v3 = vpop.f32.mrb[52].mxu1 }
 0x17d   :  { %1641 = vst [vmem:[%s2921_s3 + $0x88] sm:$0xff] %v1577_v49  ;;  %v1266_v55 = vadd.f32 %v1891_v3, %v977_v51  ;;  %v994_v21 = vpop.f32.mrb[53].mxu0  ;;  %v1257_v7 = vpop.f32.mrb[53].mxu1  ;;  %v993_v33 = vadd.f32 %v2594_v59, %v992_v63 }
 0x17e   :  { %v1258_v20 = vadd.f32 %v1257_v7, %v969_v60  ;;  %v995_v13 = vpop.f32.mrb[54].mxu0  ;;  %v1892_v11 = vpop.f32.mrb[54].mxu1 }
 0x17f   :  { %vm1454_vm4 = vcmp.ge.f32.partialorder %v1266_v55, 0.0  ;;  %v1518_v12 = vmul.f32 0.1, %v1266_v55  ;;  %v1269_v53 = vadd.f32 %v1892_v11, %v980_v41  ;;  %v997_v15 = vpop.f32.mrb[55].mxu0  ;;  %v1260_v19 = vpop.f32.mrb[55].mxu1  ;;  %v996_v31 = vadd.f32 %v2594_v59, %v995_v13 }
 0x180   :  { %vm1452_vm5 = vcmp.ge.f32.partialorder %v1258_v20, 0.0  ;;  %v1516_v4 = vmul.f32 0.1, %v1258_v20  ;;  %v1261_v1 = vadd.f32 %v1260_v19, %v972_v8 }
 0x181   :  { %v1582_v23 = vsel %vm1454_vm4, %v1266_v55, %v1518_v12  ;;  %vm1455_vm6 = vcmp.ge.f32.partialorder %v1269_v53, 0.0  ;;  %v1519_v45 = vmul.f32 0.1, %v1269_v53 }
 0x182   :  { %1646 = vst [vmem:[%s2921_s3 + $0xb0] sm:$0xff] %v1582_v23  ;;  %v1580_v57 = vsel %vm1452_vm5, %v1258_v20, %v1516_v4  ;;  %vm1453_vm7 = vcmp.ge.f32.partialorder %v1261_v1, 0.0  ;;  %v1517_v5 = vmul.f32 0.1, %v1261_v1 }
 0x183   :  { %1644 = vst [vmem:[%s2921_s3 + $0xa0] sm:$0xff] %v1580_v57  ;;  %v1583_v24 = vsel %vm1455_vm6, %v1269_v53, %v1519_v45 }
 0x184   :  { %1647 = vst [vmem:[%s2921_s3 + $0xb8] sm:$0xff] %v1583_v24  ;;  %v1581_v28 = vsel %vm1453_vm7, %v1261_v1, %v1517_v5  ;;  %v1000_v61 = vpop.f32.mrb[56].mxu0  ;;  %v1895_v40 = vpop.f32.mrb[56].mxu1 }
 0x185   :  { %1645 = vst [vmem:[%s2921_s3 + $0xa8] sm:$0xff] %v1581_v28  ;;  %v1282_v32 = vadd.f32 %v1895_v40, %v993_v33  ;;  %v1002_v0 = vpop.f32.mrb[57].mxu0  ;;  %v1273_v35 = vpop.f32.mrb[57].mxu1  ;;  %v1001_v60 = vadd.f32 %v2594_v59, %v1000_v61 }
 0x186   :  { %v1274_v39 = vadd.f32 %v1273_v35, %v985_v27  ;;  %v1003_v25 = vpop.f32.mrb[58].mxu0  ;;  %v1896_v43 = vpop.f32.mrb[58].mxu1 }
 0x187   :  { %vm1458_vm8 = vcmp.ge.f32.partialorder %v1282_v32, 0.0  ;;  %v1522_v44 = vmul.f32 0.1, %v1282_v32  ;;  %v1285_v29 = vadd.f32 %v1896_v43, %v996_v31  ;;  %v1005_v52 = vpop.f32.mrb[59].mxu0  ;;  %v1276_v17 = vpop.f32.mrb[59].mxu1  ;;  %v1004_v7 = vadd.f32 %v2594_v59, %v1003_v25 }
 0x188   :  { %vm1456_vm9 = vcmp.ge.f32.partialorder %v1274_v39, 0.0  ;;  %v1520_v47 = vmul.f32 0.1, %v1274_v39  ;;  %v1277_v48 = vadd.f32 %v1276_v17, %v988_v37 }
 0x189   :  { %v1586_v9 = vsel %vm1458_vm8, %v1282_v32, %v1522_v44  ;;  %vm1459_vm10 = vcmp.ge.f32.partialorder %v1285_v29, 0.0  ;;  %v1523_v16 = vmul.f32 0.1, %v1285_v29 }
 0x18a   :  { %1650 = vst [vmem:[%s2921_s3 + $0xd0] sm:$0xff] %v1586_v9  ;;  %v1584_v51 = vsel %vm1456_vm9, %v1274_v39, %v1520_v47  ;;  %vm1457_vm11 = vcmp.ge.f32.partialorder %v1277_v48, 0.0  ;;  %v1521_v36 = vmul.f32 0.1, %v1277_v48 }
 0x18b   :  { %1648 = vst [vmem:[%s2921_s3 + $0xc0] sm:$0xff] %v1584_v51  ;;  %v1587_v56 = vsel %vm1459_vm10, %v1285_v29, %v1523_v16 }
 0x18c   :  { %1651 = vst [vmem:[%s2921_s3 + $0xd8] sm:$0xff] %v1587_v56  ;;  %v1585_v49 = vsel %vm1457_vm11, %v1277_v48, %v1521_v36  ;;  %v1008_v63 = vpop.f32.mrb[60].mxu0  ;;  %v1899_v3 = vpop.f32.mrb[60].mxu1 }
 0x18d   :  { %1649 = vst [vmem:[%s2921_s3 + $0xc8] sm:$0xff] %v1585_v49  ;;  %v1009_v41 = vadd.f32 %v2594_v59, %v1008_v63  ;;  %v1010_v55 = vpop.f32.mrb[61].mxu0  ;;  %v1289_v21 = vpop.f32.mrb[61].mxu1 }
 0x18e   :  { %v1290_v8 = vadd.f32 %v1289_v21, %v1001_v60  ;;  %v1011_v20 = vpop.f32.mrb[62].mxu0  ;;  %v1900_v13 = vpop.f32.mrb[62].mxu1 }
 0x18f   :  { %v1298_v11 = vadd.f32 %v1899_v3, %v1009_v41  ;;  %v1012_v12 = vadd.f32 %v2594_v59, %v1011_v20  ;;  %v1013_v53 = vpop.f32.mrb[63].mxu0  ;;  %v1292_v15 = vpop.f32.mrb[63].mxu1 }
 0x190   :  { %vm1460_vm12 = vcmp.ge.f32.partialorder %v1290_v8, 0.0  ;;  %v1524_v19 = vmul.f32 0.1, %v1290_v8  ;;  %v1293_v4 = vadd.f32 %v1292_v15, %v1004_v7 }
 0x191   :  { %vm1462_vm13 = vcmp.ge.f32.partialorder %v1298_v11, 0.0  ;;  %v1526_v1 = vmul.f32 0.1, %v1298_v11  ;;  %v1301_v23 = vadd.f32 %v1900_v13, %v1012_v12 }
 0x192   :  { %v1588_v45 = vsel %vm1460_vm12, %v1290_v8, %v1524_v19  ;;  %vm1461_vm14 = vcmp.ge.f32.partialorder %v1293_v4, 0.0  ;;  %v1525_v57 = vmul.f32 0.1, %v1293_v4 }
 0x193   :  { %v1590_v5 = vsel %vm1462_vm13, %v1298_v11, %v1526_v1  ;;  %1652 = vst [vmem:[%s2921_s3 + $0xe0] sm:$0xff] %v1588_v45  ;;  %vm1463_vm15 = vcmp.ge.f32.partialorder %v1301_v23, 0.0  ;;  %v1527_v33 = vmul.f32 0.1, %v1301_v23 }
 0x194   :  { %1654 = vst [vmem:[%s2921_s3 + $0xf0] sm:$0xff] %v1590_v5  ;;  %v1589_v24 = vsel %vm1461_vm14, %v1293_v4, %v1525_v57  ;;  %v1016_v27 = vpop.f32.mrb[64].mxu0  ;;  %v1903_v28 = vpop.f32.mrb[64].mxu1 }
 0x195   :  { %v1591_v61 = vsel %vm1463_vm15, %v1301_v23, %v1527_v33  ;;  %1653 = vst [vmem:[%s2921_s3 + $0xe8] sm:$0xff] %v1589_v24  ;;  %v1017_v40 = vadd.f32 %v2594_v59, %v1016_v27  ;;  %v1018_v31 = vpop.f32.mrb[65].mxu0  ;;  %v1305_v32 = vpop.f32.mrb[65].mxu1 }
 0x196   :  { %1655 = vst [vmem:[%s2921_s3 + $0xf8] sm:$0xff] %v1591_v61  ;;  %v1019_v0 = vpop.f32.mrb[66].mxu0  ;;  %v1904_v35 = vpop.f32.mrb[66].mxu1 }
 0x197   :  { %v1306_v37 = vadd.f32 %v1305_v32, %v1017_v40  ;;  %v1020_v39 = vadd.f32 %v2594_v59, %v1019_v0  ;;  %v1021_v25 = vpop.f32.mrb[67].mxu0  ;;  %v1308_v43 = vpop.f32.mrb[67].mxu1 }
 0x199   :  { %vm1464_vm0 = vcmp.ge.f32.partialorder %v1306_v37, 0.0  ;;  %v1528_v44 = vmul.f32 0.1, %v1306_v37  ;;  %v1309_v29 = vadd.f32 %v1308_v43, %v1020_v39 }
 0x19b   :  { %v1592_v52 = vsel %vm1464_vm0, %v1306_v37, %v1528_v44  ;;  %vm1465_vm1 = vcmp.ge.f32.partialorder %v1309_v29, 0.0  ;;  %v1529_v17 = vmul.f32 0.1, %v1309_v29 }
 0x19c   :  { %1656 = vst [vmem:[%s2921_s3 + $0x100] sm:$0xff] %v1592_v52  ;;  %v1024_v47 = vpop.f32.mrb[68].mxu0  ;;  %v1907_v48 = vpop.f32.mrb[68].mxu1 }
 0x19d   :  { %v1593_v9 = vsel %vm1465_vm1, %v1309_v29, %v1529_v17  ;;  %v1025_v16 = vadd.f32 %v2594_v59, %v1024_v47  ;;  %v1026_v51 = vpop.f32.mrb[69].mxu0  ;;  %v1321_v36 = vpop.f32.mrb[69].mxu1  ;;  %v1089_v17 = vadd.f32 %v2594_v59, %v2539_v2  ;;  %v1084_v2 = vadd.f32 %v2594_v59, %v2537_v62 }
 0x19e   :  { %1657 = vst [vmem:[%s2921_s3 + $0x108] sm:$0xff] %v1593_v9  ;;  %v1027_v56 = vpop.f32.mrb[70].mxu0  ;;  %v1908_v60 = vpop.f32.mrb[70].mxu1 }
 0x19f   :  { %v1314_v49 = vadd.f32 %v1903_v28, %v1025_v16  ;;  %v1028_v63 = vadd.f32 %v2594_v59, %v1027_v56  ;;  %v1029_v3 = vpop.f32.mrb[71].mxu0  ;;  %v1324_v41 = vpop.f32.mrb[71].mxu1  ;;  %v1081_v16 = vadd.f32 %v2594_v59, %v2533_v58  ;;  %v1105_v58 = vadd.f32 %v2594_v59, %v2553_v18 }
 0x1a0   :  { %v1092_v3 = vadd.f32 %v2594_v59, %v2541_v6 }
 0x1a1   :  { %vm1466_vm2 = vcmp.ge.f32.partialorder %v1314_v49, 0.0  ;;  %v1530_v55 = vmul.f32 0.1, %v1314_v49  ;;  %v1317_v21 = vadd.f32 %v1904_v35, %v1028_v63 }
 0x1a3   :  { %v1594_v7 = vsel %vm1466_vm2, %v1314_v49, %v1530_v55  ;;  %vm1467_vm3 = vcmp.ge.f32.partialorder %v1317_v21, 0.0  ;;  %v1531_v8 = vmul.f32 0.1, %v1317_v21 }
 0x1a4   :  { %1658 = vst [vmem:[%s2921_s3 + $0x110] sm:$0xff] %v1594_v7  ;;  %v1032_v20 = vpop.f32.mrb[72].mxu0  ;;  %v2769_v13 = vpop.f32.mrb[72].mxu1 }
 0x1a5   :  { %v1595_v11 = vsel %vm1467_vm3, %v1317_v21, %v1531_v8  ;;  %v1033_v12 = vadd.f32 %v2594_v59, %v1032_v20  ;;  %v1034_v53 = vpop.f32.mrb[73].mxu0  ;;  %v1337_v15 = vpop.f32.mrb[73].mxu1 }
 0x1a6   :  { %1659 = vst [vmem:[%s2921_s3 + $0x118] sm:$0xff] %v1595_v11  ;;  %v1035_v19 = vpop.f32.mrb[74].mxu0  ;;  %v2775_v4 = vpop.f32.mrb[74].mxu1 }
 0x1a7   :  { %v1322_v1 = vadd.f32 %v1321_v36, %v1033_v12  ;;  %v1036_v23 = vadd.f32 %v2594_v59, %v1035_v19  ;;  %v1037_v45 = vpop.f32.mrb[75].mxu0  ;;  %v1340_v57 = vpop.f32.mrb[75].mxu1 }
 0x1a9   :  { %vm1468_vm4 = vcmp.ge.f32.partialorder %v1322_v1, 0.0  ;;  %v1532_v5 = vmul.f32 0.1, %v1322_v1  ;;  %v1325_v33 = vadd.f32 %v1324_v41, %v1036_v23 }
 0x1ab   :  { %v1596_v24 = vsel %vm1468_vm4, %v1322_v1, %v1532_v5  ;;  %vm1469_vm5 = vcmp.ge.f32.partialorder %v1325_v33, 0.0  ;;  %v1533_v27 = vmul.f32 0.1, %v1325_v33 }
 0x1ac   :  { %1660 = vst [vmem:[%s2921_s3 + $0x120] sm:$0xff] %v1596_v24  ;;  %v1040_v28 = vpop.f32.mrb[76].mxu0  ;;  %v2781_v61 = vpop.f32.mrb[76].mxu1  ;;  %v1097_v24 = vadd.f32 %v2594_v59, %v2545_v10  ;;  %v1100_v10 = vadd.f32 %v2594_v59, %v2549_v14 }
 0x1ad   :  { %v1597_v40 = vsel %vm1469_vm5, %v1325_v33, %v1533_v27  ;;  %v1041_v31 = vadd.f32 %v2594_v59, %v1040_v28  ;;  %v1042_v32 = vpop.f32.mrb[77].mxu0  ;;  %v2784_v0 = vpop.f32.mrb[77].mxu1 }
 0x1ae   :  { %1661 = vst [vmem:[%s2921_s3 + $0x128] sm:$0xff] %v1597_v40  ;;  %v1043_v35 = vpop.f32.mrb[78].mxu0  ;;  %v2789_v37 = vpop.f32.mrb[78].mxu1 }
 0x1af   :  { %v1330_v39 = vadd.f32 %v1907_v48, %v1041_v31  ;;  %v1044_v25 = vadd.f32 %v2594_v59, %v1043_v35  ;;  %v1045_v43 = vpop.f32.mrb[79].mxu0  ;;  %v2792_v44 = vpop.f32.mrb[79].mxu1 }
 0x1b0   :  { %v1108_v43 = vadd.f32 %v2594_v59, %v2557_v22 }
 0x1b1   :  { %vm1470_vm6 = vcmp.ge.f32.partialorder %v1330_v39, 0.0  ;;  %v1534_v29 = vmul.f32 0.1, %v1330_v39  ;;  %v1333_v52 = vadd.f32 %v1908_v60, %v1044_v25 }
 0x1b3   :  { %v1598_v47 = vsel %vm1470_vm6, %v1330_v39, %v1534_v29  ;;  %vm1471_vm7 = vcmp.ge.f32.partialorder %v1333_v52, 0.0  ;;  %v1535_v9 = vmul.f32 0.1, %v1333_v52  ;;  %v1121_v29 = vadd.f32 %v2594_v59, %v2569_v34 }
 0x1b4   :  { %1662 = vst [vmem:[%s2921_s3 + $0x130] sm:$0xff] %v1598_v47  ;;  %v1048_v48 = vpop.f32.mrb[80].mxu0  ;;  %v1919_v51 = vpop.f32.mrb[80].mxu1 }
 0x1b5   :  { %v1599_v36 = vsel %vm1471_vm7, %v1333_v52, %v1535_v9  ;;  %v1049_v56 = vadd.f32 %v2594_v59, %v1048_v48  ;;  %v1378_v49 = vadd.f32 %v1919_v51, %v1089_v17  ;;  %v1050_v60 = vpop.f32.mrb[81].mxu0  ;;  %v1369_v63 = vpop.f32.mrb[81].mxu1 }
 0x1b6   :  { %1663 = vst [vmem:[%s2921_s3 + $0x138] sm:$0xff] %v1599_v36  ;;  %v1370_v41 = vadd.f32 %v1369_v63, %v1081_v16  ;;  %v1051_v55 = vpop.f32.mrb[82].mxu0  ;;  %v1920_v21 = vpop.f32.mrb[82].mxu1 }
 0x1b7   :  { %v1338_v7 = vadd.f32 %v1337_v15, %v1049_v56  ;;  %vm1482_vm8 = vcmp.ge.f32.partialorder %v1378_v49, 0.0  ;;  %v1546_v8 = vmul.f32 0.1, %v1378_v49  ;;  %v1052_v20 = vadd.f32 %v2594_v59, %v1051_v55  ;;  %v1053_v11 = vpop.f32.mrb[83].mxu0  ;;  %v1372_v62 = vpop.f32.mrb[83].mxu1 }
 0x1b8   :  { %vm1480_vm9 = vcmp.ge.f32.partialorder %v1370_v41, 0.0  ;;  %v1544_v12 = vmul.f32 0.1, %v1370_v41  ;;  %v1381_v6 = vadd.f32 %v1920_v21, %v1092_v3  ;;  %v1373_v53 = vadd.f32 %v1372_v62, %v1084_v2 }
 0x1b9   :  { %vm1472_vm10 = vcmp.ge.f32.partialorder %v1338_v7, 0.0  ;;  %v1536_v18 = vmul.f32 0.1, %v1338_v7  ;;  %v1610_v19 = vsel %vm1482_vm8, %v1378_v49, %v1546_v8  ;;  %v1341_v1 = vadd.f32 %v1340_v57, %v1052_v20 }
 0x1ba   :  { %1674 = vst [vmem:[%s2921_s3 + $0x190] sm:$0xff] %v1610_v19  ;;  %v1608_v23 = vsel %vm1480_vm9, %v1370_v41, %v1544_v12  ;;  %vm1483_vm11 = vcmp.ge.f32.partialorder %v1381_v6, 0.0  ;;  %v1547_v15 = vmul.f32 0.1, %v1381_v6  ;;  %vm1481_vm12 = vcmp.ge.f32.partialorder %v1373_v53, 0.0 }
 0x1bb   :  { %v1600_v45 = vsel %vm1472_vm10, %v1338_v7, %v1536_v18  ;;  %1672 = vst [vmem:[%s2921_s3 + $0x180] sm:$0xff] %v1608_v23  ;;  %vm1473_vm13 = vcmp.ge.f32.partialorder %v1341_v1, 0.0  ;;  %v1537_v5 = vmul.f32 0.1, %v1341_v1  ;;  %v1545_v33 = vmul.f32 0.1, %v1373_v53 }
 0x1bc   :  { %1664 = vst [vmem:[%s2921_s3 + $0x140] sm:$0xff] %v1600_v45  ;;  %v1611_v57 = vsel %vm1483_vm11, %v1381_v6, %v1547_v15  ;;  %v1056_v27 = vpop.f32.mrb[84].mxu0  ;;  %v1923_v28 = vpop.f32.mrb[84].mxu1  ;;  %v1113_v41 = vadd.f32 %v2594_v59, %v2561_v26  ;;  %v1116_v26 = vadd.f32 %v2594_v59, %v2565_v30  ;;  %v1124_v6 = vadd.f32 %v2594_v59, %v2573_v38 }
 0x1bd   :  { %v1601_v40 = vsel %vm1473_vm13, %v1341_v1, %v1537_v5  ;;  %1675 = vst [vmem:[%s2921_s3 + $0x198] sm:$0xff] %v1611_v57  ;;  %v1609_v31 = vsel %vm1481_vm12, %v1373_v53, %v1545_v33  ;;  %v1057_v32 = vadd.f32 %v2594_v59, %v1056_v27  ;;  %v1394_v35 = vadd.f32 %v1923_v28, %v1105_v58  ;;  %v1058_v39 = vpop.f32.mrb[85].mxu0  ;;  %v1385_v25 = vpop.f32.mrb[85].mxu1 }
 0x1be   :  { %1665 = vst [vmem:[%s2921_s3 + $0x148] sm:$0xff] %v1601_v40  ;;  %1673 = vst [vmem:[%s2921_s3 + $0x188] sm:$0xff] %v1609_v31  ;;  %v1386_v52 = vadd.f32 %v1385_v25, %v1097_v24  ;;  %v1059_v17 = vpop.f32.mrb[86].mxu0  ;;  %v1924_v47 = vpop.f32.mrb[86].mxu1  ;;  %v1137_v53 = vadd.f32 %v2594_v59, %v2585_v50 }
 0x1bf   :  { %v1346_v9 = vadd.f32 %v2769_v13, %v1057_v32  ;;  %vm1486_vm14 = vcmp.ge.f32.partialorder %v1394_v35, 0.0  ;;  %v1550_v14 = vmul.f32 0.1, %v1394_v35  ;;  %v1060_v22 = vadd.f32 %v2594_v59, %v1059_v17  ;;  %v1061_v16 = vpop.f32.mrb[87].mxu0  ;;  %v1388_v48 = vpop.f32.mrb[87].mxu1 }
 0x1c0   :  { %vm1484_vm15 = vcmp.ge.f32.partialorder %v1386_v52, 0.0  ;;  %v1548_v34 = vmul.f32 0.1, %v1386_v52  ;;  %v1397_v51 = vadd.f32 %v1924_v47, %v1108_v43  ;;  %v1389_v36 = vadd.f32 %v1388_v48, %v1100_v10 }
 0x1c1   :  { %vm1474_vm0 = vcmp.ge.f32.partialorder %v1346_v9, 0.0  ;;  %v1538_v56 = vmul.f32 0.1, %v1346_v9  ;;  %v1614_v49 = vsel %vm1486_vm14, %v1394_v35, %v1550_v14  ;;  %v1349_v60 = vadd.f32 %v2775_v4, %v1060_v22 }
 0x1c2   :  { %1678 = vst [vmem:[%s2921_s3 + $0x1b0] sm:$0xff] %v1614_v49  ;;  %v1612_v13 = vsel %vm1484_vm15, %v1386_v52, %v1548_v34  ;;  %vm1487_vm1 = vcmp.ge.f32.partialorder %v1397_v51, 0.0  ;;  %v1551_v63 = vmul.f32 0.1, %v1397_v51  ;;  %vm1485_vm2 = vcmp.ge.f32.partialorder %v1389_v36, 0.0 }
 0x1c3   :  { %v1602_v2 = vsel %vm1474_vm0, %v1346_v9, %v1538_v56  ;;  %1676 = vst [vmem:[%s2921_s3 + $0x1a0] sm:$0xff] %v1612_v13  ;;  %vm1475_vm3 = vcmp.ge.f32.partialorder %v1349_v60, 0.0  ;;  %v1539_v3 = vmul.f32 0.1, %v1349_v60  ;;  %v1549_v58 = vmul.f32 0.1, %v1389_v36 }
 0x1c4   :  { %1666 = vst [vmem:[%s2921_s3 + $0x150] sm:$0xff] %v1602_v2  ;;  %v1615_v4 = vsel %vm1487_vm1, %v1397_v51, %v1551_v63  ;;  %v1064_v55 = vpop.f32.mrb[88].mxu0  ;;  %v1927_v21 = vpop.f32.mrb[88].mxu1  ;;  %v1129_v35 = vadd.f32 %v2594_v59, %v2577_v42  ;;  %v1132_v42 = vadd.f32 %v2594_v59, %v2581_v46  ;;  %v1140_v9 = vadd.f32 %v2594_v59, %v2589_v54 }
 0x1c5   :  { %v1603_v7 = vsel %vm1475_vm3, %v1349_v60, %v1539_v3  ;;  %1679 = vst [vmem:[%s2921_s3 + $0x1b8] sm:$0xff] %v1615_v4  ;;  %v1613_v8 = vsel %vm1485_vm2, %v1389_v36, %v1549_v58  ;;  %v1065_v20 = vadd.f32 %v2594_v59, %v1064_v55  ;;  %v1410_v11 = vadd.f32 %v1927_v21, %v1121_v29  ;;  %v1066_v62 = vpop.f32.mrb[89].mxu0  ;;  %v1401_v12 = vpop.f32.mrb[89].mxu1 }
 0x1c6   :  { %1667 = vst [vmem:[%s2921_s3 + $0x158] sm:$0xff] %v1603_v7  ;;  %1677 = vst [vmem:[%s2921_s3 + $0x1a8] sm:$0xff] %v1613_v8  ;;  %v1402_v18 = vadd.f32 %v1401_v12, %v1113_v41  ;;  %v1067_v19 = vpop.f32.mrb[90].mxu0  ;;  %v1928_v1 = vpop.f32.mrb[90].mxu1 }
 0x1c7   :  { %v1354_v23 = vadd.f32 %v2784_v0, %v1065_v20  ;;  %vm1490_vm4 = vcmp.ge.f32.partialorder %v1410_v11, 0.0  ;;  %v1554_v30 = vmul.f32 0.1, %v1410_v11  ;;  %v1068_v38 = vadd.f32 %v2594_v59, %v1067_v19  ;;  %v1069_v15 = vpop.f32.mrb[91].mxu0  ;;  %v1404_v45 = vpop.f32.mrb[91].mxu1 }
 0x1c8   :  { %vm1488_vm5 = vcmp.ge.f32.partialorder %v1402_v18, 0.0  ;;  %v1552_v50 = vmul.f32 0.1, %v1402_v18  ;;  %v1413_v5 = vadd.f32 %v1928_v1, %v1124_v6  ;;  %v1405_v33 = vadd.f32 %v1404_v45, %v1116_v26 }
 0x1c9   :  { %vm1476_vm6 = vcmp.ge.f32.partialorder %v1354_v23, 0.0  ;;  %v1540_v24 = vmul.f32 0.1, %v1354_v23  ;;  %v1618_v57 = vsel %vm1490_vm4, %v1410_v11, %v1554_v30  ;;  %v1357_v27 = vadd.f32 %v2792_v44, %v1068_v38 }
 0x1ca   :  { %1682 = vst [vmem:[%s2921_s3 + $0x1d0] sm:$0xff] %v1618_v57  ;;  %v1616_v0 = vsel %vm1488_vm5, %v1402_v18, %v1552_v50  ;;  %vm1491_vm7 = vcmp.ge.f32.partialorder %v1413_v5, 0.0  ;;  %v1555_v28 = vmul.f32 0.1, %v1413_v5  ;;  %vm1489_vm8 = vcmp.ge.f32.partialorder %v1405_v33, 0.0 }
 0x1cb   :  { %v1604_v40 = vsel %vm1476_vm6, %v1354_v23, %v1540_v24  ;;  %1680 = vst [vmem:[%s2921_s3 + $0x1c0] sm:$0xff] %v1616_v0  ;;  %vm1477_vm9 = vcmp.ge.f32.partialorder %v1357_v27, 0.0  ;;  %v1541_v31 = vmul.f32 0.1, %v1357_v27  ;;  %v1553_v32 = vmul.f32 0.1, %v1405_v33 }
 0x1cc   :  { %1668 = vst [vmem:[%s2921_s3 + $0x160] sm:$0xff] %v1604_v40  ;;  %v1619_v44 = vsel %vm1491_vm7, %v1413_v5, %v1555_v28  ;;  %v1072_v39 = vpop.f32.mrb[92].mxu0  ;;  %v1931_v25 = vpop.f32.mrb[92].mxu1 }
 0x1cd   :  { %v1605_v10 = vsel %vm1477_vm9, %v1357_v27, %v1541_v31  ;;  %1683 = vst [vmem:[%s2921_s3 + $0x1d8] sm:$0xff] %v1619_v44  ;;  %v1617_v43 = vsel %vm1489_vm8, %v1405_v33, %v1553_v32  ;;  %v1073_v29 = vadd.f32 %v2594_v59, %v1072_v39  ;;  %v1426_v52 = vadd.f32 %v1931_v25, %v1137_v53  ;;  %v1074_v17 = vpop.f32.mrb[93].mxu0  ;;  %v1417_v47 = vpop.f32.mrb[93].mxu1 }
 0x1ce   :  { %1669 = vst [vmem:[%s2921_s3 + $0x168] sm:$0xff] %v1605_v10  ;;  %1681 = vst [vmem:[%s2921_s3 + $0x1c8] sm:$0xff] %v1617_v43  ;;  %v1418_v14 = vadd.f32 %v1417_v47, %v1129_v35  ;;  %v1075_v22 = vpop.f32.mrb[94].mxu0  ;;  %v1932_v16 = vpop.f32.mrb[94].mxu1 }
 0x1cf   :  { %v1362_v48 = vadd.f32 %v2781_v61, %v1073_v29  ;;  %vm1494_vm10 = vcmp.ge.f32.partialorder %v1426_v52, 0.0  ;;  %v1558_v34 = vmul.f32 0.1, %v1426_v52  ;;  %v1076_v46 = vadd.f32 %v2594_v59, %v1075_v22  ;;  %v1077_v51 = vpop.f32.mrb[95].mxu0  ;;  %v1420_v36 = vpop.f32.mrb[95].mxu1 }
 0x1d0   :  { %vm1492_vm11 = vcmp.ge.f32.partialorder %v1418_v14, 0.0  ;;  %v1556_v54 = vmul.f32 0.1, %v1418_v14  ;;  %v1429_v56 = vadd.f32 %v1932_v16, %v1140_v9  ;;  %v1421_v49 = vadd.f32 %v1420_v36, %v1132_v42 }
 0x1d1   :  { %vm1478_vm12 = vcmp.ge.f32.partialorder %v1362_v48, 0.0  ;;  %v1542_v60 = vmul.f32 0.1, %v1362_v48  ;;  %v1622_v13 = vsel %vm1494_vm10, %v1426_v52, %v1558_v34  ;;  %v1365_v63 = vadd.f32 %v2789_v37, %v1076_v46 }
 0x1d2   :  { %1686 = vst [vmem:[%s2921_s3 + $0x1f0] sm:$0xff] %v1622_v13  ;;  %v1620_v61 = vsel %vm1492_vm11, %v1418_v14, %v1556_v54  ;;  %vm1495_vm13 = vcmp.ge.f32.partialorder %v1429_v56, 0.0  ;;  %v1559_v2 = vmul.f32 0.1, %v1429_v56  ;;  %vm1493_vm14 = vcmp.ge.f32.partialorder %v1421_v49, 0.0 }
 0x1d3   :  { %v1606_v59 = vsel %vm1478_vm12, %v1362_v48, %v1542_v60  ;;  %1684 = vst [vmem:[%s2921_s3 + $0x1e0] sm:$0xff] %v1620_v61  ;;  %vm1479_vm15 = vcmp.ge.f32.partialorder %v1365_v63, 0.0  ;;  %v1543_v3 = vmul.f32 0.1, %v1365_v63  ;;  %v1557_v58 = vmul.f32 0.1, %v1421_v49 }
 0x1d4   :  { %1670 = vst [vmem:[%s2921_s3 + $0x170] sm:$0xff] %v1606_v59  ;;  %v1623_v37 = vsel %vm1495_vm13, %v1429_v56, %v1559_v2 }
 0x1d5   :  { %v1607_v41 = vsel %vm1479_vm15, %v1365_v63, %v1543_v3  ;;  %1687 = vst [vmem:[%s2921_s3 + $0x1f8] sm:$0xff] %v1623_v37  ;;  %v1621_v4 = vsel %vm1493_vm14, %v1421_v49, %v1557_v58 }
 0x1d6   :  { %1671 = vst [vmem:[%s2921_s3 + $0x178] sm:$0xff] %v1607_v41  ;;  %1685 = vst [vmem:[%s2921_s3 + $0x1e8] sm:$0xff] %v1621_v4 }

// kernel: dispnet_bi_forward.89
= control target key start
LH: loop header
LB: loop body
LE: loop exit
PB: predicated region body
PF: predicated region fallthrough
CT: control target
= control target key end

     0   :  { %v1926_v0 = vmov 0   ;;  %s2714_s1 = inlined_call_operand.vmem [shape: bf16[384,128], index: 1, kind: input, shape index: {}]   ;;  %s2715_s0 = inlined_call_operand.vmem [shape: bf16[512,384], index: 0, kind: input, shape index: {}]   ;;  %s2716_s2 = inlined_call_operand.vmem [shape: f32[1,128], index: 2, kind: input, shape index: {}]   ;;  %s2717_s3 = inlined_call_operand.vmem [shape: f32[512,128], index: 3, kind: output, shape index: {}]  }
   0x1   :  { %854 = vmatprep.subr.bf16.mxu0 %v1926_v0  ;;  %1741 = vmatprep.subr.bf16.mxu1 %v1926_v0  ;;  %v1774_v1 = vld [vmem:[%s2714_s1] sm:$0xff]   ;;  %v1775_v2 = vld [vmem:[%s2714_s1 + $0x8] sm:$0xff]   ;;  %v1776_v3 = vld [vmem:[%s2714_s1 + $0x10] sm:$0xff]  }
   0x2   :  { %855 = vmatpush1.bf16.msra.mxu0 %v1774_v1  ;;  %1757 = vmatpush1.bf16.msra.mxu1 %v1774_v1  ;;  %v1777_v4 = vld [vmem:[%s2714_s1 + $0x18] sm:$0xff]   ;;  %v1778_v5 = vld [vmem:[%s2714_s1 + $0x20] sm:$0xff]   ;;  %v1779_v7 = vld [vmem:[%s2714_s1 + $0x28] sm:$0xff]  }
   0x3   :  { %856 = vmatprep.subr.bf16.mxu0 %v1926_v0  ;;  %1742 = vmatprep.subr.bf16.mxu1 %v1926_v0  ;;  %v1792_v6 = vld [vmem:[%s2715_s0 + $0x4] ss:$12 sps:$4 sm:$0xff]   ;;  %v1781_v10 = vld [vmem:[%s2714_s1 + $0x38] sm:$0xff]   ;;  %v1783_v12 = vld [vmem:[%s2714_s1 + $0x48] sm:$0xff]  }
   0x4   :  { %v1795_v8 = vld [vmem:[%s2715_s0 + $0x244] ss:$12 sps:$4 sm:$0xff]   ;;  %886 = vmatprep.mubr.bf16.mxu0 %v1792_v6  ;;  %v1785_v14 = vld [vmem:[%s2714_s1 + $0x58] sm:$0xff]   ;;  %v1787_v16 = vld [vmem:[%s2714_s1 + $0x68] sm:$0xff]  }
   0x5   :  { %1078 = vmatprep.mubr.bf16.mxu1 %v1795_v8  ;;  %v1780_v9 = vld [vmem:[%s2714_s1 + $0x30] sm:$0xff]   ;;  %v1782_v11 = vld [vmem:[%s2714_s1 + $0x40] sm:$0xff]   ;;  %v1789_v18 = vld [vmem:[%s2714_s1 + $0x78] sm:$0xff]  }
   0x6   :  { %857 = vmatpush1.bf16.msra.mxu0 %v1775_v2  ;;  %1758 = vmatpush1.bf16.msra.mxu1 %v1775_v2  ;;  %v1784_v13 = vld [vmem:[%s2714_s1 + $0x50] sm:$0xff]   ;;  %v1786_v15 = vld [vmem:[%s2714_s1 + $0x60] sm:$0xff]   ;;  %v1797_v22 = vld [vmem:[%s2715_s0 + $0x1c] ss:$12 sps:$4 sm:$0xff]  }
   0x7   :  { %858 = vmatprep.subr.bf16.mxu0 %v1926_v0  ;;  %1743 = vmatprep.subr.bf16.mxu1 %v1926_v0  ;;  %v1788_v17 = vld [vmem:[%s2714_s1 + $0x70] sm:$0xff]   ;;  %v1796_v19 = vld [vmem:[%s2714_s1 + $0x80] sm:$0xff]   ;;  %v1799_v23 = vld [vmem:[%s2715_s0 + $0x25c] ss:$12 sps:$4 sm:$0xff]  }
   0x8   :  { %v1790_v20 = vld [vmem:[%s2715_s0] ss:$12 sps:$4 sm:$0xff]   ;;  %v1810_v25 = vld [vmem:[%s2714_s1 + $0x90] sm:$0xff]   ;;  %v1801_v26 = vld [vmem:[%s2715_s0 + $0x18] ss:$12 sps:$4 sm:$0xff]  }
   0x9   :  { %v1793_v21 = vld [vmem:[%s2715_s0 + $0x240] ss:$12 sps:$4 sm:$0xff]   ;;  %v1802_v27 = vld [vmem:[%s2715_s0 + $0x258] ss:$12 sps:$4 sm:$0xff]   ;;  %v1808_v31 = vld [vmem:[%s2715_s0 + $0x30] ss:$12 sps:$4 sm:$0xff]  }
   0xa   :  { %859 = vmatpush1.bf16.msra.mxu0 %v1776_v3  ;;  %1759 = vmatpush1.bf16.msra.mxu1 %v1776_v3  ;;  %v1803_v24 = vld [vmem:[%s2714_s1 + $0x88] sm:$0xff]   ;;  %v1804_v28 = vld [vmem:[%s2715_s0 + $0x34] ss:$12 sps:$4 sm:$0xff]   ;;  %v1817_v30 = vld [vmem:[%s2714_s1 + $0x98] sm:$0xff]  }
   0xb   :  { %860 = vmatprep.subr.bf16.mxu0 %v1926_v0  ;;  %1744 = vmatprep.subr.bf16.mxu1 %v1926_v0  ;;  %v1806_v29 = vld [vmem:[%s2715_s0 + $0x274] ss:$12 sps:$4 sm:$0xff]   ;;  %v1809_v33 = vld [vmem:[%s2715_s0 + $0x270] ss:$12 sps:$4 sm:$0xff]   ;;  %v1811_v34 = vld [vmem:[%s2715_s0 + $0x4c] ss:$12 sps:$4 sm:$0xff]  }
   0xc   :  { %v1824_v32 = vld [vmem:[%s2714_s1 + $0xa0] sm:$0xff]   ;;  %v1813_v35 = vld [vmem:[%s2715_s0 + $0x28c] ss:$12 sps:$4 sm:$0xff]   ;;  %v1815_v37 = vld [vmem:[%s2715_s0 + $0x48] ss:$12 sps:$4 sm:$0xff]  }
   0xd   :  { %v1831_v36 = vld [vmem:[%s2714_s1 + $0xa8] sm:$0xff]   ;;  %v1818_v39 = vld [vmem:[%s2715_s0 + $0x64] ss:$12 sps:$4 sm:$0xff]   ;;  %v1845_v42 = vld [vmem:[%s2714_s1 + $0xb8] sm:$0xff]  }
   0xe   :  { %861 = vmatpush1.bf16.msra.mxu0 %v1777_v4  ;;  %1760 = vmatpush1.bf16.msra.mxu1 %v1777_v4  ;;  %v1816_v38 = vld [vmem:[%s2715_s0 + $0x288] ss:$12 sps:$4 sm:$0xff]   ;;  %v1820_v40 = vld [vmem:[%s2715_s0 + $0x2a4] ss:$12 sps:$4 sm:$0xff]   ;;  %v1822_v43 = vld [vmem:[%s2715_s0 + $0x60] ss:$12 sps:$4 sm:$0xff]  }
   0xf   :  { %862 = vmatprep.subr.bf16.mxu0 %v1926_v0  ;;  %1745 = vmatprep.subr.bf16.mxu1 %v1926_v0  ;;  %v1838_v41 = vld [vmem:[%s2714_s1 + $0xb0] sm:$0xff]   ;;  %v1823_v44 = vld [vmem:[%s2715_s0 + $0x2a0] ss:$12 sps:$4 sm:$0xff]   ;;  %v1825_v45 = vld [vmem:[%s2715_s0 + $0x7c] ss:$12 sps:$4 sm:$0xff]  }
  0x10   :  { %v1827_v46 = vld [vmem:[%s2715_s0 + $0x2bc] ss:$12 sps:$4 sm:$0xff]   ;;  %v1829_v47 = vld [vmem:[%s2715_s0 + $0x78] ss:$12 sps:$4 sm:$0xff]   ;;  %v1832_v49 = vld [vmem:[%s2715_s0 + $0x94] ss:$12 sps:$4 sm:$0xff]  }
  0x11   :  { %v1830_v48 = vld [vmem:[%s2715_s0 + $0x2b8] ss:$12 sps:$4 sm:$0xff]   ;;  %v1834_v50 = vld [vmem:[%s2715_s0 + $0x2d4] ss:$12 sps:$4 sm:$0xff]   ;;  %v1836_v51 = vld [vmem:[%s2715_s0 + $0x90] ss:$12 sps:$4 sm:$0xff]  }
  0x12   :  { %863 = vmatpush1.bf16.msra.mxu0 %v1778_v5  ;;  %1761 = vmatpush1.bf16.msra.mxu1 %v1778_v5  ;;  %v1837_v52 = vld [vmem:[%s2715_s0 + $0x2d0] ss:$12 sps:$4 sm:$0xff]   ;;  %v1839_v53 = vld [vmem:[%s2715_s0 + $0xac] ss:$12 sps:$4 sm:$0xff]   ;;  %v1843_v55 = vld [vmem:[%s2715_s0 + $0xa8] ss:$12 sps:$4 sm:$0xff]  }
  0x13   :  { %864 = vmatprep.subr.bf16.mxu0 %v1926_v0  ;;  %1746 = vmatprep.subr.bf16.mxu1 %v1926_v0  ;;  %v1841_v54 = vld [vmem:[%s2715_s0 + $0x2ec] ss:$12 sps:$4 sm:$0xff]   ;;  %v1844_v56 = vld [vmem:[%s2715_s0 + $0x2e8] ss:$12 sps:$4 sm:$0xff]   ;;  %v1846_v57 = vld [vmem:[%s2715_s0 + $0xc4] ss:$12 sps:$4 sm:$0xff]  }
  0x14   :  { %v1848_v58 = vld [vmem:[%s2715_s0 + $0x8] ss:$12 sps:$4 sm:$0xff]   ;;  %v1849_v59 = vld [vmem:[%s2715_s0 + $0xc0] ss:$12 sps:$4 sm:$0xff]   ;;  %v1853_v62 = vld [vmem:[%s2715_s0 + $0x38] ss:$12 sps:$4 sm:$0xff]  }
  0x15   :  { %v1850_v60 = vld [vmem:[%s2715_s0 + $0x20] ss:$12 sps:$4 sm:$0xff]   ;;  %v1851_v61 = vld [vmem:[%s2715_s0 + $0xdc] ss:$12 sps:$4 sm:$0xff]   ;;  %v1854_v63 = vld [vmem:[%s2715_s0 + $0xd8] ss:$12 sps:$4 sm:$0xff]  }
  0x16   :  { %865 = vmatpush1.bf16.msra.mxu0 %v1779_v7  ;;  %1762 = vmatpush1.bf16.msra.mxu1 %v1779_v7  ;;  %v1856_v1 = vld [vmem:[%s2715_s0 + $0xf4] ss:$12 sps:$4 sm:$0xff]   ;;  %v1859_v3 = vld [vmem:[%s2715_s0 + $0xf0] ss:$12 sps:$4 sm:$0xff]   ;;  %v1861_v5 = vld [vmem:[%s2715_s0 + $0x10c] ss:$12 sps:$4 sm:$0xff]  }
  0x17   :  { %866 = vmatprep.subr.bf16.mxu0 %v1926_v0  ;;  %1747 = vmatprep.subr.bf16.mxu1 %v1926_v0  ;;  %v1858_v2 = vld [vmem:[%s2715_s0 + $0x68] ss:$12 sps:$4 sm:$0xff]   ;;  %v1860_v4 = vld [vmem:[%s2715_s0 + $0x80] ss:$12 sps:$4 sm:$0xff]   ;;  %v1863_v6 = vld [vmem:[%s2715_s0 + $0x98] ss:$12 sps:$4 sm:$0xff]  }
  0x18   :  { %v1864_v7 = vld [vmem:[%s2715_s0 + $0x108] ss:$12 sps:$4 sm:$0xff]   ;;  %v1865_v8 = vld [vmem:[%s2715_s0 + $0xb0] ss:$12 sps:$4 sm:$0xff]  }
  0x1a   :  { %867 = vmatpush1.bf16.msra.mxu0 %v1780_v9  ;;  %1763 = vmatpush1.bf16.msra.mxu1 %v1780_v9  ;;  %v1866_v9 = vld [vmem:[%s2715_s0 + $0x124] ss:$12 sps:$4 sm:$0xff]  }
  0x1b   :  { %868 = vmatprep.subr.bf16.mxu0 %v1926_v0  ;;  %1748 = vmatprep.subr.bf16.mxu1 %v1926_v0 }
  0x1e   :  { %869 = vmatpush1.bf16.msra.mxu0 %v1781_v10  ;;  %1764 = vmatpush1.bf16.msra.mxu1 %v1781_v10  ;;  %v1868_v10 = vld [vmem:[%s2715_s0 + $0xc8] ss:$12 sps:$4 sm:$0xff]  }
  0x1f   :  { %870 = vmatprep.subr.bf16.mxu0 %v1926_v0  ;;  %1749 = vmatprep.subr.bf16.mxu1 %v1926_v0 }
  0x22   :  { %871 = vmatpush1.bf16.msra.mxu0 %v1782_v11  ;;  %1765 = vmatpush1.bf16.msra.mxu1 %v1782_v11  ;;  %v1869_v11 = vld [vmem:[%s2715_s0 + $0x120] ss:$12 sps:$4 sm:$0xff]  }
  0x23   :  { %872 = vmatprep.subr.bf16.mxu0 %v1926_v0  ;;  %1750 = vmatprep.subr.bf16.mxu1 %v1926_v0 }
  0x26   :  { %873 = vmatpush1.bf16.msra.mxu0 %v1783_v12  ;;  %1766 = vmatpush1.bf16.msra.mxu1 %v1783_v12  ;;  %v1870_v12 = vld [vmem:[%s2715_s0 + $0xe0] ss:$12 sps:$4 sm:$0xff]  }
  0x27   :  { %874 = vmatprep.subr.bf16.mxu0 %v1926_v0  ;;  %1751 = vmatprep.subr.bf16.mxu1 %v1926_v0 }
  0x2a   :  { %875 = vmatpush1.bf16.msra.mxu0 %v1784_v13  ;;  %1767 = vmatpush1.bf16.msra.mxu1 %v1784_v13  ;;  %v1871_v13 = vld [vmem:[%s2715_s0 + $0x13c] ss:$12 sps:$4 sm:$0xff]  }
  0x2b   :  { %876 = vmatprep.subr.bf16.mxu0 %v1926_v0  ;;  %1752 = vmatprep.subr.bf16.mxu1 %v1926_v0 }
  0x2e   :  { %877 = vmatpush1.bf16.msra.mxu0 %v1785_v14  ;;  %1768 = vmatpush1.bf16.msra.mxu1 %v1785_v14  ;;  %v1873_v14 = vld [vmem:[%s2715_s0 + $0xf8] ss:$12 sps:$4 sm:$0xff]  }
  0x2f   :  { %878 = vmatprep.subr.bf16.mxu0 %v1926_v0  ;;  %1753 = vmatprep.subr.bf16.mxu1 %v1926_v0 }
  0x32   :  { %879 = vmatpush1.bf16.msra.mxu0 %v1786_v15  ;;  %1769 = vmatpush1.bf16.msra.mxu1 %v1786_v15  ;;  %v1874_v15 = vld [vmem:[%s2715_s0 + $0x138] ss:$12 sps:$4 sm:$0xff]  }
  0x33   :  { %880 = vmatprep.subr.bf16.mxu0 %v1926_v0  ;;  %1754 = vmatprep.subr.bf16.mxu1 %v1926_v0 }
  0x36   :  { %881 = vmatpush1.bf16.msra.mxu0 %v1787_v16  ;;  %1770 = vmatpush1.bf16.msra.mxu1 %v1787_v16  ;;  %v1875_v16 = vld [vmem:[%s2715_s0 + $0x110] ss:$12 sps:$4 sm:$0xff]  }
  0x37   :  { %882 = vmatprep.subr.bf16.mxu0 %v1926_v0  ;;  %1755 = vmatprep.subr.bf16.mxu1 %v1926_v0 }
  0x3a   :  { %883 = vmatpush1.bf16.msra.mxu0 %v1788_v17  ;;  %1771 = vmatpush1.bf16.msra.mxu1 %v1788_v17  ;;  %v1876_v17 = vld [vmem:[%s2715_s0 + $0x154] ss:$12 sps:$4 sm:$0xff]  }
  0x3b   :  { %884 = vmatprep.subr.bf16.mxu0 %v1926_v0  ;;  %1756 = vmatprep.subr.bf16.mxu1 %v1926_v0  ;;  %v1855_v0 = vld [vmem:[%s2715_s0 + $0x50] ss:$12 sps:$4 sm:$0xff]  }
  0x3e   :  { %885 = vmatpush1.bf16.msra.mxu0 %v1789_v18  ;;  %1772 = vmatpush1.bf16.msra.mxu1 %v1789_v18  ;;  %v1878_v18 = vld [vmem:[%s2715_s0 + $0x128] ss:$12 sps:$4 sm:$0xff]  }
  0x3f   :  { %1661 = vmatprep.subr.bf16.mxu1 %v1796_v19 }
  0x41   :  { %887 = vmatmul.mubr.bf16.vlgmr.msra.gmra.mrb[0].mxu0 %v1790_v20  ;;  %1079 = vmatmul.mubr.bf16.vlgmr.msra.gmra.mrb[0].mxu1 %v1793_v21  ;;  %v1880_v20 = vld [vmem:[%s2715_s0 + $0x140] ss:$12 sps:$4 sm:$0xff]  }
  0x42   :  { %1662 = vmatpush3.bf16.msra.mxu1 %v1796_v19  ;;  %894 = vmatprep.mubr.bf16.mxu0 %v1797_v22  ;;  %v1879_v19 = vld [vmem:[%s2715_s0 + $0x150] ss:$12 sps:$4 sm:$0xff]   ;;  %v1881_v21 = vld [vmem:[%s2715_s0 + $0x16c] ss:$12 sps:$4 sm:$0xff]  }
  0x43   :  { %1086 = vmatprep.mubr.bf16.mxu1 %v1799_v23  ;;  %1663 = vmatprep.subr.bf16.mxu1 %v1803_v24  ;;  %v1883_v22 = vld [vmem:[%s2715_s0 + $0x158] ss:$12 sps:$4 sm:$0xff]   ;;  %v1884_v23 = vld [vmem:[%s2715_s0 + $0x168] ss:$12 sps:$4 sm:$0xff]  }
  0x46   :  { %1664 = vmatpush3.bf16.msra.mxu1 %v1803_v24  ;;  %v1885_v24 = vld [vmem:[%s2715_s0 + $0x170] ss:$12 sps:$4 sm:$0xff]  }
  0x47   :  { %1665 = vmatprep.subr.bf16.mxu1 %v1810_v25 }
  0x49   :  { %895 = vmatmul.mubr.bf16.gmra.mrb[4].mxu0 %v1801_v26  ;;  %1087 = vmatmul.mubr.bf16.gmra.mrb[4].mxu1 %v1802_v27  ;;  %v1888_v26 = vld [vmem:[%s2715_s0 + $0x188] ss:$12 sps:$4 sm:$0xff]   ;;  %v1889_v27 = vld [vmem:[%s2715_s0 + $0x180] ss:$12 sps:$4 sm:$0xff]  }
  0x4a   :  { %902 = vmatprep.mubr.bf16.mxu0 %v1804_v28  ;;  %1094 = vmatprep.mubr.bf16.mxu1 %v1806_v29  ;;  %v1890_v28 = vld [vmem:[%s2715_s0 + $0x1a0] ss:$12 sps:$4 sm:$0xff]   ;;  %v1891_v29 = vld [vmem:[%s2715_s0 + $0x19c] ss:$12 sps:$4 sm:$0xff]  }
  0x4b   :  { %1666 = vmatpush3.bf16.msra.mxu1 %v1810_v25  ;;  %v1886_v25 = vld [vmem:[%s2715_s0 + $0x184] ss:$12 sps:$4 sm:$0xff]  }
  0x4c   :  { %1667 = vmatprep.subr.bf16.mxu1 %v1817_v30 }
  0x4f   :  { %1668 = vmatpush3.bf16.msra.mxu1 %v1817_v30  ;;  %v1893_v30 = vld [vmem:[%s2715_s0 + $0x1b8] ss:$12 sps:$4 sm:$0xff]  }
  0x50   :  { %1669 = vmatprep.subr.bf16.mxu1 %v1824_v32 }
  0x51   :  { %903 = vmatmul.mubr.bf16.gmra.mrb[8].mxu0 %v1808_v31  ;;  %1095 = vmatmul.mubr.bf16.gmra.mrb[8].mxu1 %v1809_v33  ;;  %v1894_v31 = vld [vmem:[%s2715_s0 + $0x198] ss:$12 sps:$4 sm:$0xff]   ;;  %v1896_v33 = vld [vmem:[%s2715_s0 + $0x1b4] ss:$12 sps:$4 sm:$0xff]  }
  0x52   :  { %910 = vmatprep.mubr.bf16.mxu0 %v1811_v34  ;;  %1102 = vmatprep.mubr.bf16.mxu1 %v1813_v35  ;;  %v1898_v34 = vld [vmem:[%s2715_s0 + $0x1e8] ss:$12 sps:$4 sm:$0xff]   ;;  %v1899_v35 = vld [vmem:[%s2715_s0 + $0x1b0] ss:$12 sps:$4 sm:$0xff]  }
  0x53   :  { %1670 = vmatpush3.bf16.msra.mxu1 %v1824_v32  ;;  %v1895_v32 = vld [vmem:[%s2715_s0 + $0x1d0] ss:$12 sps:$4 sm:$0xff]  }
  0x54   :  { %1671 = vmatprep.subr.bf16.mxu1 %v1831_v36 }
  0x57   :  { %1672 = vmatpush3.bf16.msra.mxu1 %v1831_v36  ;;  %v1900_v36 = vld [vmem:[%s2715_s0 + $0x200] ss:$12 sps:$4 sm:$0xff]  }
  0x58   :  { %1673 = vmatprep.subr.bf16.mxu1 %v1838_v41 }
  0x59   :  { %911 = vmatmul.mubr.bf16.gmra.mrb[12].mxu0 %v1815_v37  ;;  %1103 = vmatmul.mubr.bf16.gmra.mrb[12].mxu1 %v1816_v38  ;;  %v1901_v37 = vld [vmem:[%s2715_s0 + $0x1cc] ss:$12 sps:$4 sm:$0xff]  }
  0x5a   :  { %918 = vmatprep.mubr.bf16.mxu0 %v1818_v39  ;;  %1110 = vmatprep.mubr.bf16.mxu1 %v1820_v40  ;;  %v1903_v38 = vld [vmem:[%s2715_s0 + $0x218] ss:$12 sps:$4 sm:$0xff]   ;;  %v1904_v39 = vld [vmem:[%s2715_s0 + $0x1c8] ss:$12 sps:$4 sm:$0xff]   ;;  %v1905_v40 = vld [vmem:[%s2715_s0 + $0x230] ss:$12 sps:$4 sm:$0xff]  }
  0x5b   :  { %1674 = vmatpush3.bf16.msra.mxu1 %v1838_v41  ;;  %v1906_v41 = vld [vmem:[%s2715_s0 + $0x1e4] ss:$12 sps:$4 sm:$0xff]  }
  0x5c   :  { %1675 = vmatprep.subr.bf16.mxu1 %v1845_v42 }
  0x5f   :  { %1676 = vmatpush3.bf16.msra.mxu1 %v1845_v42  ;;  %v1908_v42 = vld [vmem:[%s2715_s0 + $0x248] ss:$12 sps:$4 sm:$0xff]  }
  0x61   :  { %919 = vmatmul.mubr.bf16.gmra.mrb[16].mxu0 %v1822_v43  ;;  %1111 = vmatmul.mubr.bf16.gmra.mrb[16].mxu1 %v1823_v44  ;;  %v1909_v43 = vld [vmem:[%s2715_s0 + $0x1e0] ss:$12 sps:$4 sm:$0xff]  }
  0x62   :  { %926 = vmatprep.mubr.bf16.mxu0 %v1825_v45  ;;  %1118 = vmatprep.mubr.bf16.mxu1 %v1827_v46  ;;  %v1910_v44 = vld [vmem:[%s2715_s0 + $0x260] ss:$12 sps:$4 sm:$0xff]   ;;  %v1911_v45 = vld [vmem:[%s2715_s0 + $0x1fc] ss:$12 sps:$4 sm:$0xff]   ;;  %v1913_v46 = vld [vmem:[%s2715_s0 + $0x278] ss:$12 sps:$4 sm:$0xff]  }
  0x69   :  { %927 = vmatmul.mubr.bf16.gmra.mrb[20].mxu0 %v1829_v47  ;;  %1119 = vmatmul.mubr.bf16.gmra.mrb[20].mxu1 %v1830_v48  ;;  %v1914_v47 = vld [vmem:[%s2715_s0 + $0x1f8] ss:$12 sps:$4 sm:$0xff]   ;;  %v1915_v48 = vld [vmem:[%s2715_s0 + $0x290] ss:$12 sps:$4 sm:$0xff]  }
  0x6a   :  { %934 = vmatprep.mubr.bf16.mxu0 %v1832_v49  ;;  %1126 = vmatprep.mubr.bf16.mxu1 %v1834_v50  ;;  %v1916_v49 = vld [vmem:[%s2715_s0 + $0x214] ss:$12 sps:$4 sm:$0xff]  }
  0x6b   :  { %v1918_v50 = vld [vmem:[%s2715_s0 + $0x2a8] ss:$12 sps:$4 sm:$0xff]  }
  0x71   :  { %935 = vmatmul.mubr.bf16.gmra.mrb[24].mxu0 %v1836_v51  ;;  %1127 = vmatmul.mubr.bf16.gmra.mrb[24].mxu1 %v1837_v52  ;;  %v1919_v51 = vld [vmem:[%s2715_s0 + $0x210] ss:$12 sps:$4 sm:$0xff]   ;;  %v1920_v52 = vld [vmem:[%s2715_s0 + $0x2c0] ss:$12 sps:$4 sm:$0xff]  }
  0x72   :  { %942 = vmatprep.mubr.bf16.mxu0 %v1839_v53  ;;  %1134 = vmatprep.mubr.bf16.mxu1 %v1841_v54  ;;  %v1921_v53 = vld [vmem:[%s2715_s0 + $0x22c] ss:$12 sps:$4 sm:$0xff]  }
  0x73   :  { %v1923_v54 = vld [vmem:[%s2715_s0 + $0x2d8] ss:$12 sps:$4 sm:$0xff]  }
  0x79   :  { %943 = vmatmul.mubr.bf16.gmra.mrb[28].mxu0 %v1843_v55  ;;  %1135 = vmatmul.mubr.bf16.gmra.mrb[28].mxu1 %v1844_v56  ;;  %v1924_v55 = vld [vmem:[%s2715_s0 + $0x228] ss:$12 sps:$4 sm:$0xff]   ;;  %v1925_v56 = vld [vmem:[%s2715_s0 + $0x2f0] ss:$12 sps:$4 sm:$0xff]  }
  0x7a   :  { %950 = vmatprep.mubr.bf16.mxu0 %v1846_v57  ;;  %1677 = vmatprep.mubr.bf16.mxu1 %v1848_v58 }
  0x81   :  { %951 = vmatmul.mubr.bf16.gmra.mrb[32].mxu0 %v1849_v59  ;;  %1678 = vmatmul.mubr.bf16.vlgmr.msra.gmra.mrb[32].mxu1 %v1850_v60 }
  0x82   :  { %958 = vmatprep.mubr.bf16.mxu0 %v1851_v61  ;;  %1681 = vmatprep.mubr.bf16.mxu1 %v1853_v62 }
  0x89   :  { %959 = vmatmul.mubr.bf16.gmra.mrb[36].mxu0 %v1854_v63  ;;  %1682 = vmatmul.mubr.bf16.gmra.mrb[36].mxu1 %v1855_v0 }
  0x8a   :  { %966 = vmatprep.mubr.bf16.mxu0 %v1856_v1  ;;  %1685 = vmatprep.mubr.bf16.mxu1 %v1858_v2 }
  0x91   :  { %967 = vmatmul.mubr.bf16.gmra.mrb[40].mxu0 %v1859_v3  ;;  %1686 = vmatmul.mubr.bf16.gmra.mrb[40].mxu1 %v1860_v4 }
  0x92   :  { %974 = vmatprep.mubr.bf16.mxu0 %v1861_v5  ;;  %1689 = vmatprep.mubr.bf16.mxu1 %v1863_v6 }
  0x99   :  { %975 = vmatmul.mubr.bf16.gmra.mrb[44].mxu0 %v1864_v7  ;;  %1690 = vmatmul.mubr.bf16.gmra.mrb[44].mxu1 %v1865_v8 }
  0x9a   :  { %982 = vmatprep.mubr.bf16.mxu0 %v1866_v9  ;;  %1693 = vmatprep.mubr.bf16.mxu1 %v1868_v10 }
  0xa1   :  { %983 = vmatmul.mubr.bf16.gmra.mrb[48].mxu0 %v1869_v11  ;;  %1694 = vmatmul.mubr.bf16.gmra.mrb[48].mxu1 %v1870_v12 }
  0xa2   :  { %990 = vmatprep.mubr.bf16.mxu0 %v1871_v13  ;;  %1697 = vmatprep.mubr.bf16.mxu1 %v1873_v14 }
  0xa9   :  { %991 = vmatmul.mubr.bf16.gmra.mrb[52].mxu0 %v1874_v15  ;;  %1698 = vmatmul.mubr.bf16.gmra.mrb[52].mxu1 %v1875_v16 }
  0xaa   :  { %998 = vmatprep.mubr.bf16.mxu0 %v1876_v17  ;;  %1701 = vmatprep.mubr.bf16.mxu1 %v1878_v18 }
  0xb1   :  { %999 = vmatmul.mubr.bf16.gmra.mrb[56].mxu0 %v1879_v19  ;;  %1702 = vmatmul.mubr.bf16.gmra.mrb[56].mxu1 %v1880_v20 }
  0xb2   :  { %1006 = vmatprep.mubr.bf16.mxu0 %v1881_v21  ;;  %1705 = vmatprep.mubr.bf16.mxu1 %v1883_v22 }
  0xb9   :  { %1007 = vmatmul.mubr.bf16.gmra.mrb[60].mxu0 %v1884_v23  ;;  %1706 = vmatmul.mubr.bf16.gmra.mrb[60].mxu1 %v1885_v24 }
  0xba   :  { %1014 = vmatprep.mubr.bf16.mxu0 %v1886_v25  ;;  %1709 = vmatprep.mubr.bf16.mxu1 %v1888_v26 }
  0xc1   :  { %1015 = vmatmul.mubr.bf16.gmra.mrb[64].mxu0 %v1889_v27  ;;  %1710 = vmatmul.mubr.bf16.gmra.mrb[64].mxu1 %v1890_v28 }
  0xc2   :  { %1022 = vmatprep.mubr.bf16.mxu0 %v1891_v29  ;;  %1713 = vmatprep.mubr.bf16.mxu1 %v1893_v30 }
  0xc9   :  { %1023 = vmatmul.mubr.bf16.gmra.mrb[68].mxu0 %v1894_v31  ;;  %1714 = vmatmul.mubr.bf16.gmra.mrb[68].mxu1 %v1895_v32 }
  0xca   :  { %1030 = vmatprep.mubr.bf16.mxu0 %v1896_v33  ;;  %1717 = vmatprep.mubr.bf16.mxu1 %v1898_v34 }
  0xd1   :  { %1031 = vmatmul.mubr.bf16.gmra.mrb[72].mxu0 %v1899_v35  ;;  %1718 = vmatmul.mubr.bf16.gmra.mrb[72].mxu1 %v1900_v36 }
  0xd2   :  { %1038 = vmatprep.mubr.bf16.mxu0 %v1901_v37  ;;  %1721 = vmatprep.mubr.bf16.mxu1 %v1903_v38 }
  0xd9   :  { %1039 = vmatmul.mubr.bf16.gmra.mrb[76].mxu0 %v1904_v39  ;;  %1722 = vmatmul.mubr.bf16.gmra.mrb[76].mxu1 %v1905_v40 }
  0xda   :  { %1046 = vmatprep.mubr.bf16.mxu0 %v1906_v41  ;;  %1725 = vmatprep.mubr.bf16.mxu1 %v1908_v42 }
  0xe1   :  { %1047 = vmatmul.mubr.bf16.gmra.mrb[80].mxu0 %v1909_v43  ;;  %1726 = vmatmul.mubr.bf16.gmra.mrb[80].mxu1 %v1910_v44 }
  0xe2   :  { %1054 = vmatprep.mubr.bf16.mxu0 %v1911_v45  ;;  %1729 = vmatprep.mubr.bf16.mxu1 %v1913_v46 }
  0xe9   :  { %1055 = vmatmul.mubr.bf16.gmra.mrb[84].mxu0 %v1914_v47  ;;  %1730 = vmatmul.mubr.bf16.gmra.mrb[84].mxu1 %v1915_v48 }
  0xea   :  { %1062 = vmatprep.mubr.bf16.mxu0 %v1916_v49  ;;  %1733 = vmatprep.mubr.bf16.mxu1 %v1918_v50 }
  0xf1   :  { %1063 = vmatmul.mubr.bf16.gmra.mrb[88].mxu0 %v1919_v51  ;;  %1734 = vmatmul.mubr.bf16.gmra.mrb[88].mxu1 %v1920_v52 }
  0xf2   :  { %1070 = vmatprep.mubr.bf16.mxu0 %v1921_v53  ;;  %1737 = vmatprep.mubr.bf16.mxu1 %v1923_v54 }
  0xf9   :  { %1071 = vmatmul.mubr.bf16.gmra.mrb[92].mxu0 %v1924_v55  ;;  %1738 = vmatmul.mubr.bf16.gmra.mrb[92].mxu1 %v1925_v56 }
 0x114   :  { %v2339_v57 = vpop.f32.mrb[0].mxu0  ;;  %v2341_v58 = vpop.f32.mrb[0].mxu1 }
 0x115   :  { %v890_v59 = vpop.f32.mrb[1].mxu0  ;;  %v1082_v60 = vpop.f32.mrb[1].mxu1 }
 0x116   :  { %v2343_v61 = vpop.f32.mrb[2].mxu0  ;;  %v2345_v62 = vpop.f32.mrb[2].mxu1  ;;  %v2402_v59 = vld [vmem:[%s2716_s2] ss:$0 sm:$0xff] }
 0x117   :  { %v893_v63 = vpop.f32.mrb[3].mxu0  ;;  %v1085_v0 = vpop.f32.mrb[3].mxu1 }
 0x118   :  { %v889_v63 = vadd.f32 %v2402_v59, %v2339_v57 }
 0x11c   :  { %v896_v1 = vpop.f32.mrb[4].mxu0  ;;  %v2347_v2 = vpop.f32.mrb[4].mxu1 }
 0x11d   :  { %v898_v3 = vpop.f32.mrb[5].mxu0  ;;  %v1090_v4 = vpop.f32.mrb[5].mxu1  ;;  %v897_v60 = vadd.f32 %v2402_v59, %v896_v1 }
 0x11e   :  { %v899_v5 = vpop.f32.mrb[6].mxu0  ;;  %v2349_v6 = vpop.f32.mrb[6].mxu1 }
 0x11f   :  { %v901_v7 = vpop.f32.mrb[7].mxu0  ;;  %v1093_v8 = vpop.f32.mrb[7].mxu1  ;;  %v900_v4 = vadd.f32 %v2402_v59, %v899_v5 }
 0x124   :  { %v2351_v9 = vpop.f32.mrb[8].mxu0  ;;  %v2353_v10 = vpop.f32.mrb[8].mxu1 }
 0x125   :  { %v906_v11 = vpop.f32.mrb[9].mxu0  ;;  %v1098_v12 = vpop.f32.mrb[9].mxu1 }
 0x126   :  { %v2355_v13 = vpop.f32.mrb[10].mxu0  ;;  %v2357_v14 = vpop.f32.mrb[10].mxu1  ;;  %v892_v12 = vadd.f32 %v2402_v59, %v2343_v61 }
 0x127   :  { %v909_v15 = vpop.f32.mrb[11].mxu0  ;;  %v1101_v16 = vpop.f32.mrb[11].mxu1 }
 0x12c   :  { %v2359_v17 = vpop.f32.mrb[12].mxu0  ;;  %v2361_v18 = vpop.f32.mrb[12].mxu1 }
 0x12d   :  { %v914_v19 = vpop.f32.mrb[13].mxu0  ;;  %v1106_v20 = vpop.f32.mrb[13].mxu1  ;;  %v913_v61 = vadd.f32 %v2402_v59, %v2359_v17 }
 0x12e   :  { %v2363_v21 = vpop.f32.mrb[14].mxu0  ;;  %v2365_v22 = vpop.f32.mrb[14].mxu1 }
 0x12f   :  { %v917_v23 = vpop.f32.mrb[15].mxu0  ;;  %v1109_v24 = vpop.f32.mrb[15].mxu1 }
 0x130   :  { %v905_v23 = vadd.f32 %v2402_v59, %v2351_v9 }
 0x134   :  { %v2367_v25 = vpop.f32.mrb[16].mxu0  ;;  %v2369_v26 = vpop.f32.mrb[16].mxu1 }
 0x135   :  { %v922_v27 = vpop.f32.mrb[17].mxu0  ;;  %v1114_v28 = vpop.f32.mrb[17].mxu1 }
 0x136   :  { %v2371_v29 = vpop.f32.mrb[18].mxu0  ;;  %v2373_v30 = vpop.f32.mrb[18].mxu1  ;;  %v916_v28 = vadd.f32 %v2402_v59, %v2363_v21 }
 0x137   :  { %v925_v31 = vpop.f32.mrb[19].mxu0  ;;  %v1117_v32 = vpop.f32.mrb[19].mxu1 }
 0x13c   :  { %v2375_v33 = vpop.f32.mrb[20].mxu0  ;;  %v2377_v34 = vpop.f32.mrb[20].mxu1 }
 0x13d   :  { %v930_v35 = vpop.f32.mrb[21].mxu0  ;;  %v1122_v36 = vpop.f32.mrb[21].mxu1 }
 0x13e   :  { %v2379_v37 = vpop.f32.mrb[22].mxu0  ;;  %v2381_v38 = vpop.f32.mrb[22].mxu1  ;;  %v908_v36 = vadd.f32 %v2402_v59, %v2355_v13  ;;  %v929_v13 = vadd.f32 %v2402_v59, %v2375_v33 }
 0x13f   :  { %v933_v39 = vpop.f32.mrb[23].mxu0  ;;  %v1125_v40 = vpop.f32.mrb[23].mxu1 }
 0x144   :  { %v2383_v41 = vpop.f32.mrb[24].mxu0  ;;  %v2385_v42 = vpop.f32.mrb[24].mxu1 }
 0x145   :  { %v938_v43 = vpop.f32.mrb[25].mxu0  ;;  %v1130_v44 = vpop.f32.mrb[25].mxu1 }
 0x146   :  { %v2387_v45 = vpop.f32.mrb[26].mxu0  ;;  %v2389_v46 = vpop.f32.mrb[26].mxu1 }
 0x147   :  { %v941_v47 = vpop.f32.mrb[27].mxu0  ;;  %v1133_v48 = vpop.f32.mrb[27].mxu1 }
 0x148   :  { %v921_v47 = vadd.f32 %v2402_v59, %v2367_v25 }
 0x14c   :  { %v2391_v49 = vpop.f32.mrb[28].mxu0  ;;  %v2393_v50 = vpop.f32.mrb[28].mxu1 }
 0x14d   :  { %v946_v51 = vpop.f32.mrb[29].mxu0  ;;  %v1138_v52 = vpop.f32.mrb[29].mxu1 }
 0x14e   :  { %v2395_v53 = vpop.f32.mrb[30].mxu0  ;;  %v2397_v54 = vpop.f32.mrb[30].mxu1  ;;  %v932_v52 = vadd.f32 %v2402_v59, %v2379_v37 }
 0x14f   :  { %v949_v55 = vpop.f32.mrb[31].mxu0  ;;  %v1141_v56 = vpop.f32.mrb[31].mxu1 }
 0x154   :  { %v2407_v0 = vpop.f32.mrb[32].mxu0  ;;  %v1679_v3 = vpop.f32.mrb[32].mxu1 }
 0x155   :  { %v1186_v7 = vadd.f32 %v1679_v3, %v897_v60  ;;  %v954_v8 = vpop.f32.mrb[33].mxu0  ;;  %v1177_v11 = vpop.f32.mrb[33].mxu1 }
 0x156   :  { %v1178_v15 = vadd.f32 %v1177_v11, %v889_v63  ;;  %v2412_v16 = vpop.f32.mrb[34].mxu0  ;;  %v1680_v19 = vpop.f32.mrb[34].mxu1  ;;  %v924_v63 = vadd.f32 %v2402_v59, %v2371_v29  ;;  %v945_v29 = vadd.f32 %v2402_v59, %v2391_v49  ;;  %v937_v11 = vadd.f32 %v2402_v59, %v2383_v41 }
 0x157   :  { %1434 = vst [vmem:[%s2717_s3 + $0x10] sm:$0xff] %v1186_v7  ;;  %v1189_v57 = vadd.f32 %v1680_v19, %v900_v4  ;;  %v957_v1 = vpop.f32.mrb[35].mxu0  ;;  %v1180_v20 = vpop.f32.mrb[35].mxu1  ;;  %v948_v19 = vadd.f32 %v2402_v59, %v2395_v53 }
 0x158   :  { %1432 = vst [vmem:[%s2717_s3] sm:$0xff] %v1178_v15  ;;  %v1181_v5 = vadd.f32 %v1180_v20, %v892_v12 }
 0x159   :  { %1435 = vst [vmem:[%s2717_s3 + $0x18] sm:$0xff] %v1189_v57 }
 0x15a   :  { %1433 = vst [vmem:[%s2717_s3 + $0x8] sm:$0xff] %v1181_v5  ;;  %v940_v5 = vadd.f32 %v2402_v59, %v2387_v45 }
 0x15c   :  { %v960_v24 = vpop.f32.mrb[36].mxu0  ;;  %v1683_v27 = vpop.f32.mrb[36].mxu1 }
 0x15d   :  { %v1202_v31 = vadd.f32 %v1683_v27, %v913_v61  ;;  %v962_v32 = vpop.f32.mrb[37].mxu0  ;;  %v1193_v35 = vpop.f32.mrb[37].mxu1  ;;  %v961_v45 = vadd.f32 %v2402_v59, %v960_v24 }
 0x15e   :  { %v1194_v39 = vadd.f32 %v1193_v35, %v905_v23  ;;  %v963_v40 = vpop.f32.mrb[38].mxu0  ;;  %v1684_v43 = vpop.f32.mrb[38].mxu1 }
 0x15f   :  { %1438 = vst [vmem:[%s2717_s3 + $0x30] sm:$0xff] %v1202_v31  ;;  %v1205_v17 = vadd.f32 %v1684_v43, %v916_v28  ;;  %v965_v9 = vpop.f32.mrb[39].mxu0  ;;  %v1196_v44 = vpop.f32.mrb[39].mxu1  ;;  %v953_v31 = vadd.f32 %v2402_v59, %v2407_v0 }
 0x160   :  { %1436 = vst [vmem:[%s2717_s3 + $0x20] sm:$0xff] %v1194_v39  ;;  %v1197_v21 = vadd.f32 %v1196_v44, %v908_v36  ;;  %v964_v36 = vadd.f32 %v2402_v59, %v963_v40  ;;  %v956_v9 = vadd.f32 %v2402_v59, %v2412_v16 }
 0x161   :  { %1439 = vst [vmem:[%s2717_s3 + $0x38] sm:$0xff] %v1205_v17 }
 0x162   :  { %1437 = vst [vmem:[%s2717_s3 + $0x28] sm:$0xff] %v1197_v21 }
 0x164   :  { %v968_v48 = vpop.f32.mrb[40].mxu0  ;;  %v1687_v51 = vpop.f32.mrb[40].mxu1 }
 0x165   :  { %v1218_v55 = vadd.f32 %v1687_v51, %v929_v13  ;;  %v970_v56 = vpop.f32.mrb[41].mxu0  ;;  %v1209_v60 = vpop.f32.mrb[41].mxu1  ;;  %v969_v51 = vadd.f32 %v2402_v59, %v968_v48 }
 0x166   :  { %v1210_v3 = vadd.f32 %v1209_v60, %v921_v47  ;;  %v971_v4 = vpop.f32.mrb[42].mxu0  ;;  %v1688_v7 = vpop.f32.mrb[42].mxu1 }
 0x167   :  { %1442 = vst [vmem:[%s2717_s3 + $0x50] sm:$0xff] %v1218_v55  ;;  %v1221_v33 = vadd.f32 %v1688_v7, %v932_v52  ;;  %v973_v25 = vpop.f32.mrb[43].mxu0  ;;  %v1212_v8 = vpop.f32.mrb[43].mxu1  ;;  %v972_v7 = vadd.f32 %v2402_v59, %v971_v4 }
 0x168   :  { %1440 = vst [vmem:[%s2717_s3 + $0x40] sm:$0xff] %v1210_v3  ;;  %v1213_v37 = vadd.f32 %v1212_v8, %v924_v63 }
 0x169   :  { %1443 = vst [vmem:[%s2717_s3 + $0x58] sm:$0xff] %v1221_v33 }
 0x16a   :  { %1441 = vst [vmem:[%s2717_s3 + $0x48] sm:$0xff] %v1213_v37 }
 0x16c   :  { %v976_v12 = vpop.f32.mrb[44].mxu0  ;;  %v1691_v15 = vpop.f32.mrb[44].mxu1 }
 0x16d   :  { %v1234_v57 = vadd.f32 %v1691_v15, %v945_v29  ;;  %v978_v1 = vpop.f32.mrb[45].mxu0  ;;  %v1225_v20 = vpop.f32.mrb[45].mxu1  ;;  %v977_v16 = vadd.f32 %v2402_v59, %v976_v12 }
 0x16e   :  { %v1226_v61 = vadd.f32 %v1225_v20, %v937_v11  ;;  %v979_v23 = vpop.f32.mrb[46].mxu0  ;;  %v1692_v27 = vpop.f32.mrb[46].mxu1 }
 0x16f   :  { %1446 = vst [vmem:[%s2717_s3 + $0x70] sm:$0xff] %v1234_v57  ;;  %v1237_v49 = vadd.f32 %v1692_v27, %v948_v19  ;;  %v981_v41 = vpop.f32.mrb[47].mxu0  ;;  %v1228_v28 = vpop.f32.mrb[47].mxu1  ;;  %v980_v56 = vadd.f32 %v2402_v59, %v979_v23 }
 0x170   :  { %1444 = vst [vmem:[%s2717_s3 + $0x60] sm:$0xff] %v1226_v61  ;;  %v1229_v53 = vadd.f32 %v1228_v28, %v940_v5 }
 0x171   :  { %1447 = vst [vmem:[%s2717_s3 + $0x78] sm:$0xff] %v1237_v49 }
 0x172   :  { %1445 = vst [vmem:[%s2717_s3 + $0x68] sm:$0xff] %v1229_v53 }
 0x174   :  { %v984_v32 = vpop.f32.mrb[48].mxu0  ;;  %v1695_v35 = vpop.f32.mrb[48].mxu1 }
 0x175   :  { %v1250_v39 = vadd.f32 %v1695_v35, %v961_v45  ;;  %v986_v43 = vpop.f32.mrb[49].mxu0  ;;  %v1241_v17 = vpop.f32.mrb[49].mxu1  ;;  %v985_v12 = vadd.f32 %v2402_v59, %v984_v32 }
 0x176   :  { %v1242_v44 = vadd.f32 %v1241_v17, %v953_v31  ;;  %v987_v21 = vpop.f32.mrb[50].mxu0  ;;  %v1696_v13 = vpop.f32.mrb[50].mxu1 }
 0x177   :  { %1450 = vst [vmem:[%s2717_s3 + $0x90] sm:$0xff] %v1250_v39  ;;  %v1253_v24 = vadd.f32 %v1696_v13, %v964_v36  ;;  %v989_v47 = vpop.f32.mrb[51].mxu0  ;;  %v1244_v0 = vpop.f32.mrb[51].mxu1  ;;  %v988_v61 = vadd.f32 %v2402_v59, %v987_v21 }
 0x178   :  { %1448 = vst [vmem:[%s2717_s3 + $0x80] sm:$0xff] %v1242_v44  ;;  %v1245_v40 = vadd.f32 %v1244_v0, %v956_v9 }
 0x179   :  { %1451 = vst [vmem:[%s2717_s3 + $0x98] sm:$0xff] %v1253_v24 }
 0x17a   :  { %1449 = vst [vmem:[%s2717_s3 + $0x88] sm:$0xff] %v1245_v40 }
 0x17c   :  { %v992_v52 = vpop.f32.mrb[52].mxu0  ;;  %v1699_v55 = vpop.f32.mrb[52].mxu1 }
 0x17d   :  { %v1266_v60 = vadd.f32 %v1699_v55, %v977_v16  ;;  %v994_v63 = vpop.f32.mrb[53].mxu0  ;;  %v1257_v3 = vpop.f32.mrb[53].mxu1  ;;  %v993_v4 = vadd.f32 %v2402_v59, %v992_v52 }
 0x17e   :  { %v1258_v33 = vadd.f32 %v1257_v3, %v969_v51  ;;  %v995_v25 = vpop.f32.mrb[54].mxu0  ;;  %v1700_v8 = vpop.f32.mrb[54].mxu1 }
 0x17f   :  { %1454 = vst [vmem:[%s2717_s3 + $0xb0] sm:$0xff] %v1266_v60  ;;  %v1269_v37 = vadd.f32 %v1700_v8, %v980_v56  ;;  %v997_v29 = vpop.f32.mrb[55].mxu0  ;;  %v1260_v11 = vpop.f32.mrb[55].mxu1  ;;  %v996_v57 = vadd.f32 %v2402_v59, %v995_v25 }
 0x180   :  { %1452 = vst [vmem:[%s2717_s3 + $0xa0] sm:$0xff] %v1258_v33  ;;  %v1261_v48 = vadd.f32 %v1260_v11, %v972_v7 }
 0x181   :  { %1455 = vst [vmem:[%s2717_s3 + $0xb8] sm:$0xff] %v1269_v37 }
 0x182   :  { %1453 = vst [vmem:[%s2717_s3 + $0xa8] sm:$0xff] %v1261_v48 }
 0x184   :  { %v1000_v15 = vpop.f32.mrb[56].mxu0  ;;  %v1703_v19 = vpop.f32.mrb[56].mxu1 }
 0x185   :  { %v1282_v1 = vadd.f32 %v1703_v19, %v993_v4  ;;  %v1002_v20 = vpop.f32.mrb[57].mxu0  ;;  %v1273_v5 = vpop.f32.mrb[57].mxu1  ;;  %v1001_v31 = vadd.f32 %v2402_v59, %v1000_v15 }
 0x186   :  { %v1274_v23 = vadd.f32 %v1273_v5, %v985_v12  ;;  %v1003_v27 = vpop.f32.mrb[58].mxu0  ;;  %v1704_v49 = vpop.f32.mrb[58].mxu1 }
 0x187   :  { %1458 = vst [vmem:[%s2717_s3 + $0xd0] sm:$0xff] %v1282_v1  ;;  %v1285_v41 = vadd.f32 %v1704_v49, %v996_v57  ;;  %v1005_v28 = vpop.f32.mrb[59].mxu0  ;;  %v1276_v53 = vpop.f32.mrb[59].mxu1  ;;  %v1004_v17 = vadd.f32 %v2402_v59, %v1003_v27 }
 0x188   :  { %1456 = vst [vmem:[%s2717_s3 + $0xc0] sm:$0xff] %v1274_v23  ;;  %v1277_v45 = vadd.f32 %v1276_v53, %v988_v61 }
 0x189   :  { %1459 = vst [vmem:[%s2717_s3 + $0xd8] sm:$0xff] %v1285_v41 }
 0x18a   :  { %1457 = vst [vmem:[%s2717_s3 + $0xc8] sm:$0xff] %v1277_v45 }
 0x18c   :  { %v1008_v32 = vpop.f32.mrb[60].mxu0  ;;  %v1707_v35 = vpop.f32.mrb[60].mxu1 }
 0x18d   :  { %v1009_v36 = vadd.f32 %v2402_v59, %v1008_v32  ;;  %v1010_v39 = vpop.f32.mrb[61].mxu0  ;;  %v1289_v43 = vpop.f32.mrb[61].mxu1 }
 0x18e   :  { %v1290_v9 = vadd.f32 %v1289_v43, %v1001_v31  ;;  %v1011_v44 = vpop.f32.mrb[62].mxu0  ;;  %v1708_v21 = vpop.f32.mrb[62].mxu1 }
 0x18f   :  { %v1298_v13 = vadd.f32 %v1707_v35, %v1009_v36  ;;  %v1012_v24 = vadd.f32 %v2402_v59, %v1011_v44  ;;  %v1013_v47 = vpop.f32.mrb[63].mxu0  ;;  %v1292_v0 = vpop.f32.mrb[63].mxu1 }
 0x190   :  { %1460 = vst [vmem:[%s2717_s3 + $0xe0] sm:$0xff] %v1290_v9  ;;  %v1293_v40 = vadd.f32 %v1292_v0, %v1004_v17 }
 0x191   :  { %1462 = vst [vmem:[%s2717_s3 + $0xf0] sm:$0xff] %v1298_v13  ;;  %v1301_v16 = vadd.f32 %v1708_v21, %v1012_v24 }
 0x192   :  { %1461 = vst [vmem:[%s2717_s3 + $0xe8] sm:$0xff] %v1293_v40 }
 0x193   :  { %1463 = vst [vmem:[%s2717_s3 + $0xf8] sm:$0xff] %v1301_v16 }
 0x194   :  { %v1016_v51 = vpop.f32.mrb[64].mxu0  ;;  %v1711_v52 = vpop.f32.mrb[64].mxu1 }
 0x195   :  { %v1017_v55 = vadd.f32 %v2402_v59, %v1016_v51  ;;  %v1018_v56 = vpop.f32.mrb[65].mxu0  ;;  %v1305_v60 = vpop.f32.mrb[65].mxu1 }
 0x196   :  { %v1019_v63 = vpop.f32.mrb[66].mxu0  ;;  %v1712_v3 = vpop.f32.mrb[66].mxu1 }
 0x197   :  { %v1306_v7 = vadd.f32 %v1305_v60, %v1017_v55  ;;  %v1020_v33 = vadd.f32 %v2402_v59, %v1019_v63  ;;  %v1021_v25 = vpop.f32.mrb[67].mxu0  ;;  %v1308_v8 = vpop.f32.mrb[67].mxu1  ;;  %v1081_v55 = vadd.f32 %v2402_v59, %v2341_v58  ;;  %v1092_v63 = vadd.f32 %v2402_v59, %v2349_v6 }
 0x199   :  { %1464 = vst [vmem:[%s2717_s3 + $0x100] sm:$0xff] %v1306_v7  ;;  %v1309_v37 = vadd.f32 %v1308_v8, %v1020_v33 }
 0x19b   :  { %1465 = vst [vmem:[%s2717_s3 + $0x108] sm:$0xff] %v1309_v37 }
 0x19c   :  { %v1024_v29 = vpop.f32.mrb[68].mxu0  ;;  %v1715_v11 = vpop.f32.mrb[68].mxu1 }
 0x19d   :  { %v1025_v48 = vadd.f32 %v2402_v59, %v1024_v29  ;;  %v1026_v4 = vpop.f32.mrb[69].mxu0  ;;  %v1321_v12 = vpop.f32.mrb[69].mxu1 }
 0x19e   :  { %v1027_v15 = vpop.f32.mrb[70].mxu0  ;;  %v1716_v19 = vpop.f32.mrb[70].mxu1 }
 0x19f   :  { %v1314_v57 = vadd.f32 %v1711_v52, %v1025_v48  ;;  %v1028_v1 = vadd.f32 %v2402_v59, %v1027_v15  ;;  %v1029_v20 = vpop.f32.mrb[71].mxu0  ;;  %v1324_v5 = vpop.f32.mrb[71].mxu1  ;;  %v1089_v52 = vadd.f32 %v2402_v59, %v2347_v2  ;;  %v1084_v2 = vadd.f32 %v2402_v59, %v2345_v62 }
 0x1a0   :  { %v1105_v15 = vadd.f32 %v2402_v59, %v2361_v18  ;;  %v1108_v20 = vadd.f32 %v2402_v59, %v2365_v22  ;;  %v1100_v18 = vadd.f32 %v2402_v59, %v2357_v14 }
 0x1a1   :  { %1466 = vst [vmem:[%s2717_s3 + $0x110] sm:$0xff] %v1314_v57  ;;  %v1317_v61 = vadd.f32 %v1712_v3, %v1028_v1 }
 0x1a3   :  { %1467 = vst [vmem:[%s2717_s3 + $0x118] sm:$0xff] %v1317_v61 }
 0x1a4   :  { %v1032_v23 = vpop.f32.mrb[72].mxu0  ;;  %v2568_v27 = vpop.f32.mrb[72].mxu1 }
 0x1a5   :  { %v1033_v49 = vadd.f32 %v2402_v59, %v1032_v23  ;;  %v1034_v41 = vpop.f32.mrb[73].mxu0  ;;  %v1337_v28 = vpop.f32.mrb[73].mxu1 }
 0x1a6   :  { %v1035_v53 = vpop.f32.mrb[74].mxu0  ;;  %v2571_v45 = vpop.f32.mrb[74].mxu1 }
 0x1a7   :  { %v1322_v31 = vadd.f32 %v1321_v12, %v1033_v49  ;;  %v1036_v32 = vadd.f32 %v2402_v59, %v1035_v53  ;;  %v1037_v35 = vpop.f32.mrb[75].mxu0  ;;  %v1340_v36 = vpop.f32.mrb[75].mxu1 }
 0x1a9   :  { %1468 = vst [vmem:[%s2717_s3 + $0x120] sm:$0xff] %v1322_v31  ;;  %v1325_v39 = vadd.f32 %v1324_v5, %v1036_v32 }
 0x1ab   :  { %1469 = vst [vmem:[%s2717_s3 + $0x128] sm:$0xff] %v1325_v39  ;;  %v1113_v39 = vadd.f32 %v2402_v59, %v2369_v26 }
 0x1ac   :  { %v1040_v43 = vpop.f32.mrb[76].mxu0  ;;  %v2580_v17 = vpop.f32.mrb[76].mxu1 }
 0x1ad   :  { %v1041_v9 = vadd.f32 %v2402_v59, %v1040_v43  ;;  %v1042_v44 = vpop.f32.mrb[77].mxu0  ;;  %v2583_v21 = vpop.f32.mrb[77].mxu1 }
 0x1ae   :  { %v1043_v13 = vpop.f32.mrb[78].mxu0  ;;  %v2585_v24 = vpop.f32.mrb[78].mxu1 }
 0x1af   :  { %v1330_v47 = vadd.f32 %v1715_v11, %v1041_v9  ;;  %v1044_v0 = vadd.f32 %v2402_v59, %v1043_v13  ;;  %v1045_v40 = vpop.f32.mrb[79].mxu0  ;;  %v2588_v16 = vpop.f32.mrb[79].mxu1  ;;  %v1124_v9 = vadd.f32 %v2402_v59, %v2381_v38 }
 0x1b1   :  { %1470 = vst [vmem:[%s2717_s3 + $0x130] sm:$0xff] %v1330_v47  ;;  %v1333_v51 = vadd.f32 %v1716_v19, %v1044_v0  ;;  %v1097_v19 = vadd.f32 %v2402_v59, %v2353_v10 }
 0x1b3   :  { %1471 = vst [vmem:[%s2717_s3 + $0x138] sm:$0xff] %v1333_v51 }
 0x1b4   :  { %v1048_v56 = vpop.f32.mrb[80].mxu0  ;;  %v1727_v60 = vpop.f32.mrb[80].mxu1 }
 0x1b5   :  { %v1049_v3 = vadd.f32 %v2402_v59, %v1048_v56  ;;  %v1378_v7 = vadd.f32 %v1727_v60, %v1089_v52  ;;  %v1050_v33 = vpop.f32.mrb[81].mxu0  ;;  %v1369_v25 = vpop.f32.mrb[81].mxu1 }
 0x1b6   :  { %v1370_v8 = vadd.f32 %v1369_v25, %v1081_v55  ;;  %v1051_v37 = vpop.f32.mrb[82].mxu0  ;;  %v1728_v29 = vpop.f32.mrb[82].mxu1  ;;  %v1140_v33 = vadd.f32 %v2402_v59, %v2397_v54 }
 0x1b7   :  { %v1338_v11 = vadd.f32 %v1337_v28, %v1049_v3  ;;  %1482 = vst [vmem:[%s2717_s3 + $0x190] sm:$0xff] %v1378_v7  ;;  %v1052_v58 = vadd.f32 %v2402_v59, %v1051_v37  ;;  %v1381_v48 = vadd.f32 %v1728_v29, %v1092_v63  ;;  %v1053_v6 = vpop.f32.mrb[83].mxu0  ;;  %v1372_v4 = vpop.f32.mrb[83].mxu1  ;;  %v1129_v3 = vadd.f32 %v2402_v59, %v2385_v42 }
 0x1b8   :  { %1480 = vst [vmem:[%s2717_s3 + $0x180] sm:$0xff] %v1370_v8  ;;  %v1373_v12 = vadd.f32 %v1372_v4, %v1084_v2 }
 0x1b9   :  { %1472 = vst [vmem:[%s2717_s3 + $0x140] sm:$0xff] %v1338_v11  ;;  %v1341_v62 = vadd.f32 %v1340_v36, %v1052_v58  ;;  %1483 = vst [vmem:[%s2717_s3 + $0x198] sm:$0xff] %v1381_v48 }
 0x1ba   :  { %1481 = vst [vmem:[%s2717_s3 + $0x188] sm:$0xff] %v1373_v12 }
 0x1bb   :  { %1473 = vst [vmem:[%s2717_s3 + $0x148] sm:$0xff] %v1341_v62 }
 0x1bc   :  { %v1056_v57 = vpop.f32.mrb[84].mxu0  ;;  %v1731_v1 = vpop.f32.mrb[84].mxu1 }
 0x1bd   :  { %v1057_v5 = vadd.f32 %v2402_v59, %v1056_v57  ;;  %v1394_v61 = vadd.f32 %v1731_v1, %v1105_v15  ;;  %v1058_v23 = vpop.f32.mrb[85].mxu0  ;;  %v1385_v49 = vpop.f32.mrb[85].mxu1 }
 0x1be   :  { %v1386_v41 = vadd.f32 %v1385_v49, %v1097_v19  ;;  %v1059_v28 = vpop.f32.mrb[86].mxu0  ;;  %v1732_v53 = vpop.f32.mrb[86].mxu1 }
 0x1bf   :  { %v1346_v31 = vadd.f32 %v2568_v27, %v1057_v5  ;;  %1486 = vst [vmem:[%s2717_s3 + $0x1b0] sm:$0xff] %v1394_v61  ;;  %v1060_v10 = vadd.f32 %v2402_v59, %v1059_v28  ;;  %v1397_v22 = vadd.f32 %v1732_v53, %v1108_v20  ;;  %v1061_v32 = vpop.f32.mrb[87].mxu0  ;;  %v1388_v35 = vpop.f32.mrb[87].mxu1  ;;  %v1121_v27 = vadd.f32 %v2402_v59, %v2377_v34 }
 0x1c0   :  { %1484 = vst [vmem:[%s2717_s3 + $0x1a0] sm:$0xff] %v1386_v41  ;;  %v1389_v36 = vadd.f32 %v1388_v35, %v1100_v18  ;;  %v1116_v34 = vadd.f32 %v2402_v59, %v2373_v30 }
 0x1c1   :  { %1474 = vst [vmem:[%s2717_s3 + $0x150] sm:$0xff] %v1346_v31  ;;  %v1349_v14 = vadd.f32 %v2571_v45, %v1060_v10  ;;  %1487 = vst [vmem:[%s2717_s3 + $0x1b8] sm:$0xff] %v1397_v22 }
 0x1c2   :  { %1485 = vst [vmem:[%s2717_s3 + $0x1a8] sm:$0xff] %v1389_v36 }
 0x1c3   :  { %1475 = vst [vmem:[%s2717_s3 + $0x158] sm:$0xff] %v1349_v14 }
 0x1c4   :  { %v1064_v43 = vpop.f32.mrb[88].mxu0  ;;  %v1735_v45 = vpop.f32.mrb[88].mxu1 }
 0x1c5   :  { %v1065_v44 = vadd.f32 %v2402_v59, %v1064_v43  ;;  %v1410_v13 = vadd.f32 %v1735_v45, %v1121_v27  ;;  %v1066_v47 = vpop.f32.mrb[89].mxu0  ;;  %v1401_v0 = vpop.f32.mrb[89].mxu1 }
 0x1c6   :  { %v1402_v40 = vadd.f32 %v1401_v0, %v1113_v39  ;;  %v1067_v51 = vpop.f32.mrb[90].mxu0  ;;  %v1736_v52 = vpop.f32.mrb[90].mxu1 }
 0x1c7   :  { %v1354_v55 = vadd.f32 %v2583_v21, %v1065_v44  ;;  %1490 = vst [vmem:[%s2717_s3 + $0x1d0] sm:$0xff] %v1410_v13  ;;  %v1068_v26 = vadd.f32 %v2402_v59, %v1067_v51  ;;  %v1413_v38 = vadd.f32 %v1736_v52, %v1124_v9  ;;  %v1069_v56 = vpop.f32.mrb[91].mxu0  ;;  %v1404_v60 = vpop.f32.mrb[91].mxu1  ;;  %v1137_v21 = vadd.f32 %v2402_v59, %v2393_v50 }
 0x1c8   :  { %1488 = vst [vmem:[%s2717_s3 + $0x1c0] sm:$0xff] %v1402_v40  ;;  %v1405_v63 = vadd.f32 %v1404_v60, %v1116_v34  ;;  %v1132_v50 = vadd.f32 %v2402_v59, %v2389_v46 }
 0x1c9   :  { %1476 = vst [vmem:[%s2717_s3 + $0x160] sm:$0xff] %v1354_v55  ;;  %v1357_v30 = vadd.f32 %v2588_v16, %v1068_v26  ;;  %1491 = vst [vmem:[%s2717_s3 + $0x1d8] sm:$0xff] %v1413_v38 }
 0x1ca   :  { %1489 = vst [vmem:[%s2717_s3 + $0x1c8] sm:$0xff] %v1405_v63 }
 0x1cb   :  { %1477 = vst [vmem:[%s2717_s3 + $0x168] sm:$0xff] %v1357_v30 }
 0x1cc   :  { %v1072_v7 = vpop.f32.mrb[92].mxu0  ;;  %v1739_v16 = vpop.f32.mrb[92].mxu1 }
 0x1cd   :  { %v1073_v25 = vadd.f32 %v2402_v59, %v1072_v7  ;;  %v1426_v2 = vadd.f32 %v1739_v16, %v1137_v21  ;;  %v1074_v8 = vpop.f32.mrb[93].mxu0  ;;  %v1417_v37 = vpop.f32.mrb[93].mxu1 }
 0x1ce   :  { %v1418_v29 = vadd.f32 %v1417_v37, %v1129_v3  ;;  %v1075_v11 = vpop.f32.mrb[94].mxu0  ;;  %v1740_v58 = vpop.f32.mrb[94].mxu1 }
 0x1cf   :  { %v1362_v48 = vadd.f32 %v2580_v17, %v1073_v25  ;;  %1494 = vst [vmem:[%s2717_s3 + $0x1f0] sm:$0xff] %v1426_v2  ;;  %v1076_v42 = vadd.f32 %v2402_v59, %v1075_v11  ;;  %v1429_v54 = vadd.f32 %v1740_v58, %v1140_v33  ;;  %v1077_v6 = vpop.f32.mrb[95].mxu0  ;;  %v1420_v4 = vpop.f32.mrb[95].mxu1 }
 0x1d0   :  { %1492 = vst [vmem:[%s2717_s3 + $0x1e0] sm:$0xff] %v1418_v29  ;;  %v1421_v12 = vadd.f32 %v1420_v4, %v1132_v50 }
 0x1d1   :  { %1478 = vst [vmem:[%s2717_s3 + $0x170] sm:$0xff] %v1362_v48  ;;  %v1365_v46 = vadd.f32 %v2585_v24, %v1076_v42  ;;  %1495 = vst [vmem:[%s2717_s3 + $0x1f8] sm:$0xff] %v1429_v54 }
 0x1d2   :  { %1493 = vst [vmem:[%s2717_s3 + $0x1e8] sm:$0xff] %v1421_v12 }
 0x1d3   :  { %1479 = vst [vmem:[%s2717_s3 + $0x178] sm:$0xff] %v1365_v46 }

</bundles_post_ra>
